<compile_context>
chip_gen: v5e
topology: v5e:2x2
jax: 0.10.0
libtpu: 0.0.40
codegen_flags: <defaults>
</compile_context>

<pallas_src>
import functools

import jax
import jax.numpy as jnp
from jax import lax
from jax.experimental import pallas as pl
from jax.experimental.pallas import tpu as pltpu


def _fused_conv_kernel(w_ref, b_ref, x_ref, o_ref, *, CI, CO, KH, KW, n_repeats):
    """n_repeats applications of the same valid, stride-1 Conv2d, fully fused.

    w_ref : SMEM, flat (CO*CI*KH*KW,) float32
    b_ref : SMEM, (CO,) float32
    x_ref : VMEM, (N, CI, H, W)
    o_ref : VMEM, (N, CO, Hf, Wf) with Hf = H - n*(KH-1), Wf = W - n*(KW-1)
    """
    N = x_ref.shape[0]

    # Hoist all scalar loads out of the repeat / channel loops (trace-time only;
    # not re-emitted per fused conv iteration).
    w_sc = [[[[w_ref[((co * CI + ci) * KH + kh) * KW + kw]
               for kw in range(KW)] for kh in range(KH)]
             for ci in range(CI)] for co in range(CO)]
    b_sc = [b_ref[co] for co in range(CO)]

    # Load the input slab once, then keep activations as a list of per-channel
    # (N, Hc, Wc) planes so no stack/unstack relayout happens inside the loop.
    x = x_ref[...].astype(jnp.float32)
    cur = [x[:, ci] for ci in range(CI)]          # each (N, Hc, Wc)
    C = CI

    for _ in range(n_repeats):
        _, Hc, Wc = cur[0].shape
        Ho, Wo = Hc - KH + 1, Wc - KW + 1

        # Hoist window slicing out of the output-channel loop:
        # CI*KH*KW slices total (reused by every co) instead of CO*CI*KH*KW.
        windows = {}
        for ci in range(C):
            plane = cur[ci]                       # (N, Hc, Wc), batch+H on sublanes
            for kh in range(KH):
                for kw in range(KW):
                    windows[(ci, kh, kw)] = lax.slice(
                        plane, (0, kh, kw), (N, kh + Ho, kw + Wo))

        outs = []
        for co in range(CO):
            acc = jnp.full((N, Ho, Wo), b_sc[co], dtype=jnp.float32)
            for ci in range(C):
                for kh in range(KH):
                    for kw in range(KW):
                        acc = acc + w_sc[co][ci][kh][kw] * windows[(ci, kh, kw)]
            outs.append(acc)

        cur = outs                                # stays un-stacked (list of planes)
        C = CO

    # Single stack + single slab store of the final activations.
    o_ref[...] = jnp.stack(cur, axis=1).astype(o_ref.dtype)


def repeated_conv2d_pallas(x, w, b, n_repeats):
    """Apply the same valid, stride-1 Conv2d (NCHW input, OIHW weight) n times."""
    if n_repeats == 0:
        return x

    N, CI, H, W = x.shape
    CO, CI2, KH, KW = w.shape
    assert CI == CI2
    if n_repeats > 1:
        assert CO == CI, "repeated application requires in_channels == out_channels"

    Hf = H - n_repeats * (KH - 1)
    Wf = W - n_repeats * (KW - 1)
    assert Hf > 0 and Wf > 0, "spatial dims exhausted by repeated valid convs"

    kernel = functools.partial(
        _fused_conv_kernel, CI=CI, CO=CO, KH=KH, KW=KW, n_repeats=n_repeats)
    w_flat = w.reshape(-1).astype(jnp.float32)
    b = b.astype(jnp.float32)

    return pl.pallas_call(
        kernel,
        out_shape=jax.ShapeDtypeStruct((N, CO, Hf, Wf), x.dtype),
        in_specs=[
            pl.BlockSpec(memory_space=pltpu.MemorySpace.SMEM),   # weights (flat)
            pl.BlockSpec(memory_space=pltpu.MemorySpace.SMEM),   # bias
            pl.BlockSpec(memory_space=pltpu.MemorySpace.VMEM),   # full batch block
        ],
        out_specs=pl.BlockSpec(memory_space=pltpu.MemorySpace.VMEM),
    )(w_flat, b, x)


def model_forward(x, w, b, n):
    # for i in range(n): x = conv(x)   -- same conv applied n times, fused in-kernel
    return repeated_conv2d_pallas(x, w, b, n)


def _reference_forward(x, w, b, n):
    for _ in range(n):
        x = lax.conv_general_dilated(
            x, w, window_strides=(1, 1), padding="VALID",
            dimension_numbers=("NCHW", "OIHW", "NCHW"),
        ) + b[None, :, None, None]
    return x


if __name__ == "__main__":
    key = jax.random.PRNGKey(0)
    k_x, k_w, k_b = jax.random.split(key, 3)

    n = 3                       # number of repeated conv applications
    N, C, H, W = 2, 3, 16, 16   # Conv2d(3, 3, 3) -> channels fixed at 3

    x = jax.random.normal(k_x, (N, C, H, W), dtype=jnp.float32)

    # Deterministic Conv2d(3, 3, 3) params (kaiming-uniform-style bounds).
    fan_in = C * 3 * 3
    bound = 1.0 / jnp.sqrt(float(fan_in))
    w = jax.random.uniform(k_w, (3, C, 3, 3), jnp.float32, -bound, bound)
    b = jax.random.uniform(k_b, (3,), jnp.float32, -bound, bound)

    out = model_forward(x, w, b, n)
    out = jax.block_until_ready(out)

    ref = _reference_forward(x, w, b, n)
    assert out.shape == (N, 3, H - 2 * n, W - 2 * n), out.shape
    assert jnp.allclose(out, ref, atol=1e-4, rtol=1e-4), "mismatch vs reference conv"

    print("KERNEL_OK")
</pallas_src>

<mosaic_0001>
module attributes {stable_mosaic.version = 11 : i64} {
  func.func @_fused_conv_kernel(%arg0: memref<81xf32, #tpu.memory_space<smem>>, %arg1: memref<3xf32, #tpu.memory_space<smem>>, %arg2: memref<2x3x16x16xf32, #tpu.memory_space<vmem>>, %arg3: memref<2x3x10x10xf32, #tpu.memory_space<vmem>>) attributes {dimension_semantics = [], scalar_prefetch = 0 : i64, scratch_operands = 0 : i64, tpu.core_type = #tpu.core_type<tc>} {
    %c0 = arith.constant 0 : index
    %0 = memref.load %arg0[%c0] : memref<81xf32, #tpu.memory_space<smem>>
    %c1 = arith.constant 1 : index
    %1 = memref.load %arg0[%c1] : memref<81xf32, #tpu.memory_space<smem>>
    %c2 = arith.constant 2 : index
    %2 = memref.load %arg0[%c2] : memref<81xf32, #tpu.memory_space<smem>>
    %c3 = arith.constant 3 : index
    %3 = memref.load %arg0[%c3] : memref<81xf32, #tpu.memory_space<smem>>
    %c4 = arith.constant 4 : index
    %4 = memref.load %arg0[%c4] : memref<81xf32, #tpu.memory_space<smem>>
    %c5 = arith.constant 5 : index
    %5 = memref.load %arg0[%c5] : memref<81xf32, #tpu.memory_space<smem>>
    %c6 = arith.constant 6 : index
    %6 = memref.load %arg0[%c6] : memref<81xf32, #tpu.memory_space<smem>>
    %c7 = arith.constant 7 : index
    %7 = memref.load %arg0[%c7] : memref<81xf32, #tpu.memory_space<smem>>
    %c8 = arith.constant 8 : index
    %8 = memref.load %arg0[%c8] : memref<81xf32, #tpu.memory_space<smem>>
    %c9 = arith.constant 9 : index
    %9 = memref.load %arg0[%c9] : memref<81xf32, #tpu.memory_space<smem>>
    %c10 = arith.constant 10 : index
    %10 = memref.load %arg0[%c10] : memref<81xf32, #tpu.memory_space<smem>>
    %c11 = arith.constant 11 : index
    %11 = memref.load %arg0[%c11] : memref<81xf32, #tpu.memory_space<smem>>
    %c12 = arith.constant 12 : index
    %12 = memref.load %arg0[%c12] : memref<81xf32, #tpu.memory_space<smem>>
    %c13 = arith.constant 13 : index
    %13 = memref.load %arg0[%c13] : memref<81xf32, #tpu.memory_space<smem>>
    %c14 = arith.constant 14 : index
    %14 = memref.load %arg0[%c14] : memref<81xf32, #tpu.memory_space<smem>>
    %c15 = arith.constant 15 : index
    %15 = memref.load %arg0[%c15] : memref<81xf32, #tpu.memory_space<smem>>
    %c16 = arith.constant 16 : index
    %16 = memref.load %arg0[%c16] : memref<81xf32, #tpu.memory_space<smem>>
    %c17 = arith.constant 17 : index
    %17 = memref.load %arg0[%c17] : memref<81xf32, #tpu.memory_space<smem>>
    %c18 = arith.constant 18 : index
    %18 = memref.load %arg0[%c18] : memref<81xf32, #tpu.memory_space<smem>>
    %c19 = arith.constant 19 : index
    %19 = memref.load %arg0[%c19] : memref<81xf32, #tpu.memory_space<smem>>
    %c20 = arith.constant 20 : index
    %20 = memref.load %arg0[%c20] : memref<81xf32, #tpu.memory_space<smem>>
    %c21 = arith.constant 21 : index
    %21 = memref.load %arg0[%c21] : memref<81xf32, #tpu.memory_space<smem>>
    %c22 = arith.constant 22 : index
    %22 = memref.load %arg0[%c22] : memref<81xf32, #tpu.memory_space<smem>>
    %c23 = arith.constant 23 : index
    %23 = memref.load %arg0[%c23] : memref<81xf32, #tpu.memory_space<smem>>
    %c24 = arith.constant 24 : index
    %24 = memref.load %arg0[%c24] : memref<81xf32, #tpu.memory_space<smem>>
    %c25 = arith.constant 25 : index
    %25 = memref.load %arg0[%c25] : memref<81xf32, #tpu.memory_space<smem>>
    %c26 = arith.constant 26 : index
    %26 = memref.load %arg0[%c26] : memref<81xf32, #tpu.memory_space<smem>>
    %c27 = arith.constant 27 : index
    %27 = memref.load %arg0[%c27] : memref<81xf32, #tpu.memory_space<smem>>
    %c28 = arith.constant 28 : index
    %28 = memref.load %arg0[%c28] : memref<81xf32, #tpu.memory_space<smem>>
    %c29 = arith.constant 29 : index
    %29 = memref.load %arg0[%c29] : memref<81xf32, #tpu.memory_space<smem>>
    %c30 = arith.constant 30 : index
    %30 = memref.load %arg0[%c30] : memref<81xf32, #tpu.memory_space<smem>>
    %c31 = arith.constant 31 : index
    %31 = memref.load %arg0[%c31] : memref<81xf32, #tpu.memory_space<smem>>
    %c32 = arith.constant 32 : index
    %32 = memref.load %arg0[%c32] : memref<81xf32, #tpu.memory_space<smem>>
    %c33 = arith.constant 33 : index
    %33 = memref.load %arg0[%c33] : memref<81xf32, #tpu.memory_space<smem>>
    %c34 = arith.constant 34 : index
    %34 = memref.load %arg0[%c34] : memref<81xf32, #tpu.memory_space<smem>>
    %c35 = arith.constant 35 : index
    %35 = memref.load %arg0[%c35] : memref<81xf32, #tpu.memory_space<smem>>
    %c36 = arith.constant 36 : index
    %36 = memref.load %arg0[%c36] : memref<81xf32, #tpu.memory_space<smem>>
    %c37 = arith.constant 37 : index
    %37 = memref.load %arg0[%c37] : memref<81xf32, #tpu.memory_space<smem>>
    %c38 = arith.constant 38 : index
    %38 = memref.load %arg0[%c38] : memref<81xf32, #tpu.memory_space<smem>>
    %c39 = arith.constant 39 : index
    %39 = memref.load %arg0[%c39] : memref<81xf32, #tpu.memory_space<smem>>
    %c40 = arith.constant 40 : index
    %40 = memref.load %arg0[%c40] : memref<81xf32, #tpu.memory_space<smem>>
    %c41 = arith.constant 41 : index
    %41 = memref.load %arg0[%c41] : memref<81xf32, #tpu.memory_space<smem>>
    %c42 = arith.constant 42 : index
    %42 = memref.load %arg0[%c42] : memref<81xf32, #tpu.memory_space<smem>>
    %c43 = arith.constant 43 : index
    %43 = memref.load %arg0[%c43] : memref<81xf32, #tpu.memory_space<smem>>
    %c44 = arith.constant 44 : index
    %44 = memref.load %arg0[%c44] : memref<81xf32, #tpu.memory_space<smem>>
    %c45 = arith.constant 45 : index
    %45 = memref.load %arg0[%c45] : memref<81xf32, #tpu.memory_space<smem>>
    %c46 = arith.constant 46 : index
    %46 = memref.load %arg0[%c46] : memref<81xf32, #tpu.memory_space<smem>>
    %c47 = arith.constant 47 : index
    %47 = memref.load %arg0[%c47] : memref<81xf32, #tpu.memory_space<smem>>
    %c48 = arith.constant 48 : index
    %48 = memref.load %arg0[%c48] : memref<81xf32, #tpu.memory_space<smem>>
    %c49 = arith.constant 49 : index
    %49 = memref.load %arg0[%c49] : memref<81xf32, #tpu.memory_space<smem>>
    %c50 = arith.constant 50 : index
    %50 = memref.load %arg0[%c50] : memref<81xf32, #tpu.memory_space<smem>>
    %c51 = arith.constant 51 : index
    %51 = memref.load %arg0[%c51] : memref<81xf32, #tpu.memory_space<smem>>
    %c52 = arith.constant 52 : index
    %52 = memref.load %arg0[%c52] : memref<81xf32, #tpu.memory_space<smem>>
    %c53 = arith.constant 53 : index
    %53 = memref.load %arg0[%c53] : memref<81xf32, #tpu.memory_space<smem>>
    %c54 = arith.constant 54 : index
    %54 = memref.load %arg0[%c54] : memref<81xf32, #tpu.memory_space<smem>>
    %c55 = arith.constant 55 : index
    %55 = memref.load %arg0[%c55] : memref<81xf32, #tpu.memory_space<smem>>
    %c56 = arith.constant 56 : index
    %56 = memref.load %arg0[%c56] : memref<81xf32, #tpu.memory_space<smem>>
    %c57 = arith.constant 57 : index
    %57 = memref.load %arg0[%c57] : memref<81xf32, #tpu.memory_space<smem>>
    %c58 = arith.constant 58 : index
    %58 = memref.load %arg0[%c58] : memref<81xf32, #tpu.memory_space<smem>>
    %c59 = arith.constant 59 : index
    %59 = memref.load %arg0[%c59] : memref<81xf32, #tpu.memory_space<smem>>
    %c60 = arith.constant 60 : index
    %60 = memref.load %arg0[%c60] : memref<81xf32, #tpu.memory_space<smem>>
    %c61 = arith.constant 61 : index
    %61 = memref.load %arg0[%c61] : memref<81xf32, #tpu.memory_space<smem>>
    %c62 = arith.constant 62 : index
    %62 = memref.load %arg0[%c62] : memref<81xf32, #tpu.memory_space<smem>>
    %c63 = arith.constant 63 : index
    %63 = memref.load %arg0[%c63] : memref<81xf32, #tpu.memory_space<smem>>
    %c64 = arith.constant 64 : index
    %64 = memref.load %arg0[%c64] : memref<81xf32, #tpu.memory_space<smem>>
    %c65 = arith.constant 65 : index
    %65 = memref.load %arg0[%c65] : memref<81xf32, #tpu.memory_space<smem>>
    %c66 = arith.constant 66 : index
    %66 = memref.load %arg0[%c66] : memref<81xf32, #tpu.memory_space<smem>>
    %c67 = arith.constant 67 : index
    %67 = memref.load %arg0[%c67] : memref<81xf32, #tpu.memory_space<smem>>
    %c68 = arith.constant 68 : index
    %68 = memref.load %arg0[%c68] : memref<81xf32, #tpu.memory_space<smem>>
    %c69 = arith.constant 69 : index
    %69 = memref.load %arg0[%c69] : memref<81xf32, #tpu.memory_space<smem>>
    %c70 = arith.constant 70 : index
    %70 = memref.load %arg0[%c70] : memref<81xf32, #tpu.memory_space<smem>>
    %c71 = arith.constant 71 : index
    %71 = memref.load %arg0[%c71] : memref<81xf32, #tpu.memory_space<smem>>
    %c72 = arith.constant 72 : index
    %72 = memref.load %arg0[%c72] : memref<81xf32, #tpu.memory_space<smem>>
    %c73 = arith.constant 73 : index
    %73 = memref.load %arg0[%c73] : memref<81xf32, #tpu.memory_space<smem>>
    %c74 = arith.constant 74 : index
    %74 = memref.load %arg0[%c74] : memref<81xf32, #tpu.memory_space<smem>>
    %c75 = arith.constant 75 : index
    %75 = memref.load %arg0[%c75] : memref<81xf32, #tpu.memory_space<smem>>
    %c76 = arith.constant 76 : index
    %76 = memref.load %arg0[%c76] : memref<81xf32, #tpu.memory_space<smem>>
    %c77 = arith.constant 77 : index
    %77 = memref.load %arg0[%c77] : memref<81xf32, #tpu.memory_space<smem>>
    %c78 = arith.constant 78 : index
    %78 = memref.load %arg0[%c78] : memref<81xf32, #tpu.memory_space<smem>>
    %c79 = arith.constant 79 : index
    %79 = memref.load %arg0[%c79] : memref<81xf32, #tpu.memory_space<smem>>
    %c80 = arith.constant 80 : index
    %80 = memref.load %arg0[%c80] : memref<81xf32, #tpu.memory_space<smem>>
    %c0_0 = arith.constant 0 : index
    %81 = memref.load %arg1[%c0_0] : memref<3xf32, #tpu.memory_space<smem>>
    %c1_1 = arith.constant 1 : index
    %82 = memref.load %arg1[%c1_1] : memref<3xf32, #tpu.memory_space<smem>>
    %c2_2 = arith.constant 2 : index
    %83 = memref.load %arg1[%c2_2] : memref<3xf32, #tpu.memory_space<smem>>
    %c0_3 = arith.constant 0 : index
    %c0_4 = arith.constant 0 : index
    %c0_5 = arith.constant 0 : index
    %c0_6 = arith.constant 0 : index
    %84 = vector.load %arg2[%c0_3, %c0_4, %c0_5, %c0_6] : memref<2x3x16x16xf32, #tpu.memory_space<vmem>>, vector<2x3x16x16xf32>
    %85 = vector.extract_strided_slice %84 {offsets = [0, 0, 0, 0], sizes = [2, 1, 16, 16], strides = [1, 1, 1, 1]} : vector<2x3x16x16xf32> to vector<2x1x16x16xf32>
    %86 = vector.shape_cast %85 : vector<2x1x16x16xf32> to vector<2x16x16xf32>
    %87 = vector.extract_strided_slice %84 {offsets = [0, 1, 0, 0], sizes = [2, 1, 16, 16], strides = [1, 1, 1, 1]} : vector<2x3x16x16xf32> to vector<2x1x16x16xf32>
    %88 = vector.shape_cast %87 : vector<2x1x16x16xf32> to vector<2x16x16xf32>
    %89 = vector.extract_strided_slice %84 {offsets = [0, 2, 0, 0], sizes = [2, 1, 16, 16], strides = [1, 1, 1, 1]} : vector<2x3x16x16xf32> to vector<2x1x16x16xf32>
    %90 = vector.shape_cast %89 : vector<2x1x16x16xf32> to vector<2x16x16xf32>
    %91 = vector.extract_strided_slice %86 {offsets = [0, 0, 0], sizes = [2, 14, 14], strides = [1, 1, 1]} : vector<2x16x16xf32> to vector<2x14x14xf32>
    %92 = vector.extract_strided_slice %86 {offsets = [0, 0, 1], sizes = [2, 14, 14], strides = [1, 1, 1]} : vector<2x16x16xf32> to vector<2x14x14xf32>
    %93 = vector.extract_strided_slice %86 {offsets = [0, 0, 2], sizes = [2, 14, 14], strides = [1, 1, 1]} : vector<2x16x16xf32> to vector<2x14x14xf32>
    %94 = vector.extract_strided_slice %86 {offsets = [0, 1, 0], sizes = [2, 14, 14], strides = [1, 1, 1]} : vector<2x16x16xf32> to vector<2x14x14xf32>
    %95 = vector.extract_strided_slice %86 {offsets = [0, 1, 1], sizes = [2, 14, 14], strides = [1, 1, 1]} : vector<2x16x16xf32> to vector<2x14x14xf32>
    %96 = vector.extract_strided_slice %86 {offsets = [0, 1, 2], sizes = [2, 14, 14], strides = [1, 1, 1]} : vector<2x16x16xf32> to vector<2x14x14xf32>
    %97 = vector.extract_strided_slice %86 {offsets = [0, 2, 0], sizes = [2, 14, 14], strides = [1, 1, 1]} : vector<2x16x16xf32> to vector<2x14x14xf32>
    %98 = vector.extract_strided_slice %86 {offsets = [0, 2, 1], sizes = [2, 14, 14], strides = [1, 1, 1]} : vector<2x16x16xf32> to vector<2x14x14xf32>
    %99 = vector.extract_strided_slice %86 {offsets = [0, 2, 2], sizes = [2, 14, 14], strides = [1, 1, 1]} : vector<2x16x16xf32> to vector<2x14x14xf32>
    %100 = vector.extract_strided_slice %88 {offsets = [0, 0, 0], sizes = [2, 14, 14], strides = [1, 1, 1]} : vector<2x16x16xf32> to vector<2x14x14xf32>
    %101 = vector.extract_strided_slice %88 {offsets = [0, 0, 1], sizes = [2, 14, 14], strides = [1, 1, 1]} : vector<2x16x16xf32> to vector<2x14x14xf32>
    %102 = vector.extract_strided_slice %88 {offsets = [0, 0, 2], sizes = [2, 14, 14], strides = [1, 1, 1]} : vector<2x16x16xf32> to vector<2x14x14xf32>
    %103 = vector.extract_strided_slice %88 {offsets = [0, 1, 0], sizes = [2, 14, 14], strides = [1, 1, 1]} : vector<2x16x16xf32> to vector<2x14x14xf32>
    %104 = vector.extract_strided_slice %88 {offsets = [0, 1, 1], sizes = [2, 14, 14], strides = [1, 1, 1]} : vector<2x16x16xf32> to vector<2x14x14xf32>
    %105 = vector.extract_strided_slice %88 {offsets = [0, 1, 2], sizes = [2, 14, 14], strides = [1, 1, 1]} : vector<2x16x16xf32> to vector<2x14x14xf32>
    %106 = vector.extract_strided_slice %88 {offsets = [0, 2, 0], sizes = [2, 14, 14], strides = [1, 1, 1]} : vector<2x16x16xf32> to vector<2x14x14xf32>
    %107 = vector.extract_strided_slice %88 {offsets = [0, 2, 1], sizes = [2, 14, 14], strides = [1, 1, 1]} : vector<2x16x16xf32> to vector<2x14x14xf32>
    %108 = vector.extract_strided_slice %88 {offsets = [0, 2, 2], sizes = [2, 14, 14], strides = [1, 1, 1]} : vector<2x16x16xf32> to vector<2x14x14xf32>
    %109 = vector.extract_strided_slice %90 {offsets = [0, 0, 0], sizes = [2, 14, 14], strides = [1, 1, 1]} : vector<2x16x16xf32> to vector<2x14x14xf32>
    %110 = vector.extract_strided_slice %90 {offsets = [0, 0, 1], sizes = [2, 14, 14], strides = [1, 1, 1]} : vector<2x16x16xf32> to vector<2x14x14xf32>
    %111 = vector.extract_strided_slice %90 {offsets = [0, 0, 2], sizes = [2, 14, 14], strides = [1, 1, 1]} : vector<2x16x16xf32> to vector<2x14x14xf32>
    %112 = vector.extract_strided_slice %90 {offsets = [0, 1, 0], sizes = [2, 14, 14], strides = [1, 1, 1]} : vector<2x16x16xf32> to vector<2x14x14xf32>
    %113 = vector.extract_strided_slice %90 {offsets = [0, 1, 1], sizes = [2, 14, 14], strides = [1, 1, 1]} : vector<2x16x16xf32> to vector<2x14x14xf32>
    %114 = vector.extract_strided_slice %90 {offsets = [0, 1, 2], sizes = [2, 14, 14], strides = [1, 1, 1]} : vector<2x16x16xf32> to vector<2x14x14xf32>
    %115 = vector.extract_strided_slice %90 {offsets = [0, 2, 0], sizes = [2, 14, 14], strides = [1, 1, 1]} : vector<2x16x16xf32> to vector<2x14x14xf32>
    %116 = vector.extract_strided_slice %90 {offsets = [0, 2, 1], sizes = [2, 14, 14], strides = [1, 1, 1]} : vector<2x16x16xf32> to vector<2x14x14xf32>
    %117 = vector.extract_strided_slice %90 {offsets = [0, 2, 2], sizes = [2, 14, 14], strides = [1, 1, 1]} : vector<2x16x16xf32> to vector<2x14x14xf32>
    %118 = vector.broadcast %81 : f32 to vector<2x14x14xf32>
    %119 = vector.broadcast %0 : f32 to vector<2x14x14xf32>
    %120 = arith.mulf %119, %91 : vector<2x14x14xf32>
    %121 = arith.addf %118, %120 : vector<2x14x14xf32>
    %122 = vector.broadcast %1 : f32 to vector<2x14x14xf32>
    %123 = arith.mulf %122, %92 : vector<2x14x14xf32>
    %124 = arith.addf %121, %123 : vector<2x14x14xf32>
    %125 = vector.broadcast %2 : f32 to vector<2x14x14xf32>
    %126 = arith.mulf %125, %93 : vector<2x14x14xf32>
    %127 = arith.addf %124, %126 : vector<2x14x14xf32>
    %128 = vector.broadcast %3 : f32 to vector<2x14x14xf32>
    %129 = arith.mulf %128, %94 : vector<2x14x14xf32>
    %130 = arith.addf %127, %129 : vector<2x14x14xf32>
    %131 = vector.broadcast %4 : f32 to vector<2x14x14xf32>
    %132 = arith.mulf %131, %95 : vector<2x14x14xf32>
    %133 = arith.addf %130, %132 : vector<2x14x14xf32>
    %134 = vector.broadcast %5 : f32 to vector<2x14x14xf32>
    %135 = arith.mulf %134, %96 : vector<2x14x14xf32>
    %136 = arith.addf %133, %135 : vector<2x14x14xf32>
    %137 = vector.broadcast %6 : f32 to vector<2x14x14xf32>
    %138 = arith.mulf %137, %97 : vector<2x14x14xf32>
    %139 = arith.addf %136, %138 : vector<2x14x14xf32>
    %140 = vector.broadcast %7 : f32 to vector<2x14x14xf32>
    %141 = arith.mulf %140, %98 : vector<2x14x14xf32>
    %142 = arith.addf %139, %141 : vector<2x14x14xf32>
    %143 = vector.broadcast %8 : f32 to vector<2x14x14xf32>
    %144 = arith.mulf %143, %99 : vector<2x14x14xf32>
    %145 = arith.addf %142, %144 : vector<2x14x14xf32>
    %146 = vector.broadcast %9 : f32 to vector<2x14x14xf32>
    %147 = arith.mulf %146, %100 : vector<2x14x14xf32>
    %148 = arith.addf %145, %147 : vector<2x14x14xf32>
    %149 = vector.broadcast %10 : f32 to vector<2x14x14xf32>
    %150 = arith.mulf %149, %101 : vector<2x14x14xf32>
    %151 = arith.addf %148, %150 : vector<2x14x14xf32>
    %152 = vector.broadcast %11 : f32 to vector<2x14x14xf32>
    %153 = arith.mulf %152, %102 : vector<2x14x14xf32>
    %154 = arith.addf %151, %153 : vector<2x14x14xf32>
    %155 = vector.broadcast %12 : f32 to vector<2x14x14xf32>
    %156 = arith.mulf %155, %103 : vector<2x14x14xf32>
    %157 = arith.addf %154, %156 : vector<2x14x14xf32>
    %158 = vector.broadcast %13 : f32 to vector<2x14x14xf32>
    %159 = arith.mulf %158, %104 : vector<2x14x14xf32>
    %160 = arith.addf %157, %159 : vector<2x14x14xf32>
    %161 = vector.broadcast %14 : f32 to vector<2x14x14xf32>
    %162 = arith.mulf %161, %105 : vector<2x14x14xf32>
    %163 = arith.addf %160, %162 : vector<2x14x14xf32>
    %164 = vector.broadcast %15 : f32 to vector<2x14x14xf32>
    %165 = arith.mulf %164, %106 : vector<2x14x14xf32>
    %166 = arith.addf %163, %165 : vector<2x14x14xf32>
    %167 = vector.broadcast %16 : f32 to vector<2x14x14xf32>
    %168 = arith.mulf %167, %107 : vector<2x14x14xf32>
    %169 = arith.addf %166, %168 : vector<2x14x14xf32>
    %170 = vector.broadcast %17 : f32 to vector<2x14x14xf32>
    %171 = arith.mulf %170, %108 : vector<2x14x14xf32>
    %172 = arith.addf %169, %171 : vector<2x14x14xf32>
    %173 = vector.broadcast %18 : f32 to vector<2x14x14xf32>
    %174 = arith.mulf %173, %109 : vector<2x14x14xf32>
    %175 = arith.addf %172, %174 : vector<2x14x14xf32>
    %176 = vector.broadcast %19 : f32 to vector<2x14x14xf32>
    %177 = arith.mulf %176, %110 : vector<2x14x14xf32>
    %178 = arith.addf %175, %177 : vector<2x14x14xf32>
    %179 = vector.broadcast %20 : f32 to vector<2x14x14xf32>
    %180 = arith.mulf %179, %111 : vector<2x14x14xf32>
    %181 = arith.addf %178, %180 : vector<2x14x14xf32>
    %182 = vector.broadcast %21 : f32 to vector<2x14x14xf32>
    %183 = arith.mulf %182, %112 : vector<2x14x14xf32>
    %184 = arith.addf %181, %183 : vector<2x14x14xf32>
    %185 = vector.broadcast %22 : f32 to vector<2x14x14xf32>
    %186 = arith.mulf %185, %113 : vector<2x14x14xf32>
    %187 = arith.addf %184, %186 : vector<2x14x14xf32>
    %188 = vector.broadcast %23 : f32 to vector<2x14x14xf32>
    %189 = arith.mulf %188, %114 : vector<2x14x14xf32>
    %190 = arith.addf %187, %189 : vector<2x14x14xf32>
    %191 = vector.broadcast %24 : f32 to vector<2x14x14xf32>
    %192 = arith.mulf %191, %115 : vector<2x14x14xf32>
    %193 = arith.addf %190, %192 : vector<2x14x14xf32>
    %194 = vector.broadcast %25 : f32 to vector<2x14x14xf32>
    %195 = arith.mulf %194, %116 : vector<2x14x14xf32>
    %196 = arith.addf %193, %195 : vector<2x14x14xf32>
    %197 = vector.broadcast %26 : f32 to vector<2x14x14xf32>
    %198 = arith.mulf %197, %117 : vector<2x14x14xf32>
    %199 = arith.addf %196, %198 : vector<2x14x14xf32>
    %200 = vector.broadcast %82 : f32 to vector<2x14x14xf32>
    %201 = vector.broadcast %27 : f32 to vector<2x14x14xf32>
    %202 = arith.mulf %201, %91 : vector<2x14x14xf32>
    %203 = arith.addf %200, %202 : vector<2x14x14xf32>
    %204 = vector.broadcast %28 : f32 to vector<2x14x14xf32>
    %205 = arith.mulf %204, %92 : vector<2x14x14xf32>
    %206 = arith.addf %203, %205 : vector<2x14x14xf32>
    %207 = vector.broadcast %29 : f32 to vector<2x14x14xf32>
    %208 = arith.mulf %207, %93 : vector<2x14x14xf32>
    %209 = arith.addf %206, %208 : vector<2x14x14xf32>
    %210 = vector.broadcast %30 : f32 to vector<2x14x14xf32>
    %211 = arith.mulf %210, %94 : vector<2x14x14xf32>
    %212 = arith.addf %209, %211 : vector<2x14x14xf32>
    %213 = vector.broadcast %31 : f32 to vector<2x14x14xf32>
    %214 = arith.mulf %213, %95 : vector<2x14x14xf32>
    %215 = arith.addf %212, %214 : vector<2x14x14xf32>
    %216 = vector.broadcast %32 : f32 to vector<2x14x14xf32>
    %217 = arith.mulf %216, %96 : vector<2x14x14xf32>
    %218 = arith.addf %215, %217 : vector<2x14x14xf32>
    %219 = vector.broadcast %33 : f32 to vector<2x14x14xf32>
    %220 = arith.mulf %219, %97 : vector<2x14x14xf32>
    %221 = arith.addf %218, %220 : vector<2x14x14xf32>
    %222 = vector.broadcast %34 : f32 to vector<2x14x14xf32>
    %223 = arith.mulf %222, %98 : vector<2x14x14xf32>
    %224 = arith.addf %221, %223 : vector<2x14x14xf32>
    %225 = vector.broadcast %35 : f32 to vector<2x14x14xf32>
    %226 = arith.mulf %225, %99 : vector<2x14x14xf32>
    %227 = arith.addf %224, %226 : vector<2x14x14xf32>
    %228 = vector.broadcast %36 : f32 to vector<2x14x14xf32>
    %229 = arith.mulf %228, %100 : vector<2x14x14xf32>
    %230 = arith.addf %227, %229 : vector<2x14x14xf32>
    %231 = vector.broadcast %37 : f32 to vector<2x14x14xf32>
    %232 = arith.mulf %231, %101 : vector<2x14x14xf32>
    %233 = arith.addf %230, %232 : vector<2x14x14xf32>
    %234 = vector.broadcast %38 : f32 to vector<2x14x14xf32>
    %235 = arith.mulf %234, %102 : vector<2x14x14xf32>
    %236 = arith.addf %233, %235 : vector<2x14x14xf32>
    %237 = vector.broadcast %39 : f32 to vector<2x14x14xf32>
    %238 = arith.mulf %237, %103 : vector<2x14x14xf32>
    %239 = arith.addf %236, %238 : vector<2x14x14xf32>
    %240 = vector.broadcast %40 : f32 to vector<2x14x14xf32>
    %241 = arith.mulf %240, %104 : vector<2x14x14xf32>
    %242 = arith.addf %239, %241 : vector<2x14x14xf32>
    %243 = vector.broadcast %41 : f32 to vector<2x14x14xf32>
    %244 = arith.mulf %243, %105 : vector<2x14x14xf32>
    %245 = arith.addf %242, %244 : vector<2x14x14xf32>
    %246 = vector.broadcast %42 : f32 to vector<2x14x14xf32>
    %247 = arith.mulf %246, %106 : vector<2x14x14xf32>
    %248 = arith.addf %245, %247 : vector<2x14x14xf32>
    %249 = vector.broadcast %43 : f32 to vector<2x14x14xf32>
    %250 = arith.mulf %249, %107 : vector<2x14x14xf32>
    %251 = arith.addf %248, %250 : vector<2x14x14xf32>
    %252 = vector.broadcast %44 : f32 to vector<2x14x14xf32>
    %253 = arith.mulf %252, %108 : vector<2x14x14xf32>
    %254 = arith.addf %251, %253 : vector<2x14x14xf32>
    %255 = vector.broadcast %45 : f32 to vector<2x14x14xf32>
    %256 = arith.mulf %255, %109 : vector<2x14x14xf32>
    %257 = arith.addf %254, %256 : vector<2x14x14xf32>
    %258 = vector.broadcast %46 : f32 to vector<2x14x14xf32>
    %259 = arith.mulf %258, %110 : vector<2x14x14xf32>
    %260 = arith.addf %257, %259 : vector<2x14x14xf32>
    %261 = vector.broadcast %47 : f32 to vector<2x14x14xf32>
    %262 = arith.mulf %261, %111 : vector<2x14x14xf32>
    %263 = arith.addf %260, %262 : vector<2x14x14xf32>
    %264 = vector.broadcast %48 : f32 to vector<2x14x14xf32>
    %265 = arith.mulf %264, %112 : vector<2x14x14xf32>
    %266 = arith.addf %263, %265 : vector<2x14x14xf32>
    %267 = vector.broadcast %49 : f32 to vector<2x14x14xf32>
    %268 = arith.mulf %267, %113 : vector<2x14x14xf32>
    %269 = arith.addf %266, %268 : vector<2x14x14xf32>
    %270 = vector.broadcast %50 : f32 to vector<2x14x14xf32>
    %271 = arith.mulf %270, %114 : vector<2x14x14xf32>
    %272 = arith.addf %269, %271 : vector<2x14x14xf32>
    %273 = vector.broadcast %51 : f32 to vector<2x14x14xf32>
    %274 = arith.mulf %273, %115 : vector<2x14x14xf32>
    %275 = arith.addf %272, %274 : vector<2x14x14xf32>
    %276 = vector.broadcast %52 : f32 to vector<2x14x14xf32>
    %277 = arith.mulf %276, %116 : vector<2x14x14xf32>
    %278 = arith.addf %275, %277 : vector<2x14x14xf32>
    %279 = vector.broadcast %53 : f32 to vector<2x14x14xf32>
    %280 = arith.mulf %279, %117 : vector<2x14x14xf32>
    %281 = arith.addf %278, %280 : vector<2x14x14xf32>
    %282 = vector.broadcast %83 : f32 to vector<2x14x14xf32>
    %283 = vector.broadcast %54 : f32 to vector<2x14x14xf32>
    %284 = arith.mulf %283, %91 : vector<2x14x14xf32>
    %285 = arith.addf %282, %284 : vector<2x14x14xf32>
    %286 = vector.broadcast %55 : f32 to vector<2x14x14xf32>
    %287 = arith.mulf %286, %92 : vector<2x14x14xf32>
    %288 = arith.addf %285, %287 : vector<2x14x14xf32>
    %289 = vector.broadcast %56 : f32 to vector<2x14x14xf32>
    %290 = arith.mulf %289, %93 : vector<2x14x14xf32>
    %291 = arith.addf %288, %290 : vector<2x14x14xf32>
    %292 = vector.broadcast %57 : f32 to vector<2x14x14xf32>
    %293 = arith.mulf %292, %94 : vector<2x14x14xf32>
    %294 = arith.addf %291, %293 : vector<2x14x14xf32>
    %295 = vector.broadcast %58 : f32 to vector<2x14x14xf32>
    %296 = arith.mulf %295, %95 : vector<2x14x14xf32>
    %297 = arith.addf %294, %296 : vector<2x14x14xf32>
    %298 = vector.broadcast %59 : f32 to vector<2x14x14xf32>
    %299 = arith.mulf %298, %96 : vector<2x14x14xf32>
    %300 = arith.addf %297, %299 : vector<2x14x14xf32>
    %301 = vector.broadcast %60 : f32 to vector<2x14x14xf32>
    %302 = arith.mulf %301, %97 : vector<2x14x14xf32>
    %303 = arith.addf %300, %302 : vector<2x14x14xf32>
    %304 = vector.broadcast %61 : f32 to vector<2x14x14xf32>
    %305 = arith.mulf %304, %98 : vector<2x14x14xf32>
    %306 = arith.addf %303, %305 : vector<2x14x14xf32>
    %307 = vector.broadcast %62 : f32 to vector<2x14x14xf32>
    %308 = arith.mulf %307, %99 : vector<2x14x14xf32>
    %309 = arith.addf %306, %308 : vector<2x14x14xf32>
    %310 = vector.broadcast %63 : f32 to vector<2x14x14xf32>
    %311 = arith.mulf %310, %100 : vector<2x14x14xf32>
    %312 = arith.addf %309, %311 : vector<2x14x14xf32>
    %313 = vector.broadcast %64 : f32 to vector<2x14x14xf32>
    %314 = arith.mulf %313, %101 : vector<2x14x14xf32>
    %315 = arith.addf %312, %314 : vector<2x14x14xf32>
    %316 = vector.broadcast %65 : f32 to vector<2x14x14xf32>
    %317 = arith.mulf %316, %102 : vector<2x14x14xf32>
    %318 = arith.addf %315, %317 : vector<2x14x14xf32>
    %319 = vector.broadcast %66 : f32 to vector<2x14x14xf32>
    %320 = arith.mulf %319, %103 : vector<2x14x14xf32>
    %321 = arith.addf %318, %320 : vector<2x14x14xf32>
    %322 = vector.broadcast %67 : f32 to vector<2x14x14xf32>
    %323 = arith.mulf %322, %104 : vector<2x14x14xf32>
    %324 = arith.addf %321, %323 : vector<2x14x14xf32>
    %325 = vector.broadcast %68 : f32 to vector<2x14x14xf32>
    %326 = arith.mulf %325, %105 : vector<2x14x14xf32>
    %327 = arith.addf %324, %326 : vector<2x14x14xf32>
    %328 = vector.broadcast %69 : f32 to vector<2x14x14xf32>
    %329 = arith.mulf %328, %106 : vector<2x14x14xf32>
    %330 = arith.addf %327, %329 : vector<2x14x14xf32>
    %331 = vector.broadcast %70 : f32 to vector<2x14x14xf32>
    %332 = arith.mulf %331, %107 : vector<2x14x14xf32>
    %333 = arith.addf %330, %332 : vector<2x14x14xf32>
    %334 = vector.broadcast %71 : f32 to vector<2x14x14xf32>
    %335 = arith.mulf %334, %108 : vector<2x14x14xf32>
    %336 = arith.addf %333, %335 : vector<2x14x14xf32>
    %337 = vector.broadcast %72 : f32 to vector<2x14x14xf32>
    %338 = arith.mulf %337, %109 : vector<2x14x14xf32>
    %339 = arith.addf %336, %338 : vector<2x14x14xf32>
    %340 = vector.broadcast %73 : f32 to vector<2x14x14xf32>
    %341 = arith.mulf %340, %110 : vector<2x14x14xf32>
    %342 = arith.addf %339, %341 : vector<2x14x14xf32>
    %343 = vector.broadcast %74 : f32 to vector<2x14x14xf32>
    %344 = arith.mulf %343, %111 : vector<2x14x14xf32>
    %345 = arith.addf %342, %344 : vector<2x14x14xf32>
    %346 = vector.broadcast %75 : f32 to vector<2x14x14xf32>
    %347 = arith.mulf %346, %112 : vector<2x14x14xf32>
    %348 = arith.addf %345, %347 : vector<2x14x14xf32>
    %349 = vector.broadcast %76 : f32 to vector<2x14x14xf32>
    %350 = arith.mulf %349, %113 : vector<2x14x14xf32>
    %351 = arith.addf %348, %350 : vector<2x14x14xf32>
    %352 = vector.broadcast %77 : f32 to vector<2x14x14xf32>
    %353 = arith.mulf %352, %114 : vector<2x14x14xf32>
    %354 = arith.addf %351, %353 : vector<2x14x14xf32>
    %355 = vector.broadcast %78 : f32 to vector<2x14x14xf32>
    %356 = arith.mulf %355, %115 : vector<2x14x14xf32>
    %357 = arith.addf %354, %356 : vector<2x14x14xf32>
    %358 = vector.broadcast %79 : f32 to vector<2x14x14xf32>
    %359 = arith.mulf %358, %116 : vector<2x14x14xf32>
    %360 = arith.addf %357, %359 : vector<2x14x14xf32>
    %361 = vector.broadcast %80 : f32 to vector<2x14x14xf32>
    %362 = arith.mulf %361, %117 : vector<2x14x14xf32>
    %363 = arith.addf %360, %362 : vector<2x14x14xf32>
    %364 = vector.extract_strided_slice %199 {offsets = [0, 0, 0], sizes = [2, 12, 12], strides = [1, 1, 1]} : vector<2x14x14xf32> to vector<2x12x12xf32>
    %365 = vector.extract_strided_slice %199 {offsets = [0, 0, 1], sizes = [2, 12, 12], strides = [1, 1, 1]} : vector<2x14x14xf32> to vector<2x12x12xf32>
    %366 = vector.extract_strided_slice %199 {offsets = [0, 0, 2], sizes = [2, 12, 12], strides = [1, 1, 1]} : vector<2x14x14xf32> to vector<2x12x12xf32>
    %367 = vector.extract_strided_slice %199 {offsets = [0, 1, 0], sizes = [2, 12, 12], strides = [1, 1, 1]} : vector<2x14x14xf32> to vector<2x12x12xf32>
    %368 = vector.extract_strided_slice %199 {offsets = [0, 1, 1], sizes = [2, 12, 12], strides = [1, 1, 1]} : vector<2x14x14xf32> to vector<2x12x12xf32>
    %369 = vector.extract_strided_slice %199 {offsets = [0, 1, 2], sizes = [2, 12, 12], strides = [1, 1, 1]} : vector<2x14x14xf32> to vector<2x12x12xf32>
    %370 = vector.extract_strided_slice %199 {offsets = [0, 2, 0], sizes = [2, 12, 12], strides = [1, 1, 1]} : vector<2x14x14xf32> to vector<2x12x12xf32>
    %371 = vector.extract_strided_slice %199 {offsets = [0, 2, 1], sizes = [2, 12, 12], strides = [1, 1, 1]} : vector<2x14x14xf32> to vector<2x12x12xf32>
    %372 = vector.extract_strided_slice %199 {offsets = [0, 2, 2], sizes = [2, 12, 12], strides = [1, 1, 1]} : vector<2x14x14xf32> to vector<2x12x12xf32>
    %373 = vector.extract_strided_slice %281 {offsets = [0, 0, 0], sizes = [2, 12, 12], strides = [1, 1, 1]} : vector<2x14x14xf32> to vector<2x12x12xf32>
    %374 = vector.extract_strided_slice %281 {offsets = [0, 0, 1], sizes = [2, 12, 12], strides = [1, 1, 1]} : vector<2x14x14xf32> to vector<2x12x12xf32>
    %375 = vector.extract_strided_slice %281 {offsets = [0, 0, 2], sizes = [2, 12, 12], strides = [1, 1, 1]} : vector<2x14x14xf32> to vector<2x12x12xf32>
    %376 = vector.extract_strided_slice %281 {offsets = [0, 1, 0], sizes = [2, 12, 12], strides = [1, 1, 1]} : vector<2x14x14xf32> to vector<2x12x12xf32>
    %377 = vector.extract_strided_slice %281 {offsets = [0, 1, 1], sizes = [2, 12, 12], strides = [1, 1, 1]} : vector<2x14x14xf32> to vector<2x12x12xf32>
    %378 = vector.extract_strided_slice %281 {offsets = [0, 1, 2], sizes = [2, 12, 12], strides = [1, 1, 1]} : vector<2x14x14xf32> to vector<2x12x12xf32>
    %379 = vector.extract_strided_slice %281 {offsets = [0, 2, 0], sizes = [2, 12, 12], strides = [1, 1, 1]} : vector<2x14x14xf32> to vector<2x12x12xf32>
    %380 = vector.extract_strided_slice %281 {offsets = [0, 2, 1], sizes = [2, 12, 12], strides = [1, 1, 1]} : vector<2x14x14xf32> to vector<2x12x12xf32>
    %381 = vector.extract_strided_slice %281 {offsets = [0, 2, 2], sizes = [2, 12, 12], strides = [1, 1, 1]} : vector<2x14x14xf32> to vector<2x12x12xf32>
    %382 = vector.extract_strided_slice %363 {offsets = [0, 0, 0], sizes = [2, 12, 12], strides = [1, 1, 1]} : vector<2x14x14xf32> to vector<2x12x12xf32>
    %383 = vector.extract_strided_slice %363 {offsets = [0, 0, 1], sizes = [2, 12, 12], strides = [1, 1, 1]} : vector<2x14x14xf32> to vector<2x12x12xf32>
    %384 = vector.extract_strided_slice %363 {offsets = [0, 0, 2], sizes = [2, 12, 12], strides = [1, 1, 1]} : vector<2x14x14xf32> to vector<2x12x12xf32>
    %385 = vector.extract_strided_slice %363 {offsets = [0, 1, 0], sizes = [2, 12, 12], strides = [1, 1, 1]} : vector<2x14x14xf32> to vector<2x12x12xf32>
    %386 = vector.extract_strided_slice %363 {offsets = [0, 1, 1], sizes = [2, 12, 12], strides = [1, 1, 1]} : vector<2x14x14xf32> to vector<2x12x12xf32>
    %387 = vector.extract_strided_slice %363 {offsets = [0, 1, 2], sizes = [2, 12, 12], strides = [1, 1, 1]} : vector<2x14x14xf32> to vector<2x12x12xf32>
    %388 = vector.extract_strided_slice %363 {offsets = [0, 2, 0], sizes = [2, 12, 12], strides = [1, 1, 1]} : vector<2x14x14xf32> to vector<2x12x12xf32>
    %389 = vector.extract_strided_slice %363 {offsets = [0, 2, 1], sizes = [2, 12, 12], strides = [1, 1, 1]} : vector<2x14x14xf32> to vector<2x12x12xf32>
    %390 = vector.extract_strided_slice %363 {offsets = [0, 2, 2], sizes = [2, 12, 12], strides = [1, 1, 1]} : vector<2x14x14xf32> to vector<2x12x12xf32>
    %391 = vector.broadcast %81 : f32 to vector<2x12x12xf32>
    %392 = vector.broadcast %0 : f32 to vector<2x12x12xf32>
    %393 = arith.mulf %392, %364 : vector<2x12x12xf32>
    %394 = arith.addf %391, %393 : vector<2x12x12xf32>
    %395 = vector.broadcast %1 : f32 to vector<2x12x12xf32>
    %396 = arith.mulf %395, %365 : vector<2x12x12xf32>
    %397 = arith.addf %394, %396 : vector<2x12x12xf32>
    %398 = vector.broadcast %2 : f32 to vector<2x12x12xf32>
    %399 = arith.mulf %398, %366 : vector<2x12x12xf32>
    %400 = arith.addf %397, %399 : vector<2x12x12xf32>
    %401 = vector.broadcast %3 : f32 to vector<2x12x12xf32>
    %402 = arith.mulf %401, %367 : vector<2x12x12xf32>
    %403 = arith.addf %400, %402 : vector<2x12x12xf32>
    %404 = vector.broadcast %4 : f32 to vector<2x12x12xf32>
    %405 = arith.mulf %404, %368 : vector<2x12x12xf32>
    %406 = arith.addf %403, %405 : vector<2x12x12xf32>
    %407 = vector.broadcast %5 : f32 to vector<2x12x12xf32>
    %408 = arith.mulf %407, %369 : vector<2x12x12xf32>
    %409 = arith.addf %406, %408 : vector<2x12x12xf32>
    %410 = vector.broadcast %6 : f32 to vector<2x12x12xf32>
    %411 = arith.mulf %410, %370 : vector<2x12x12xf32>
    %412 = arith.addf %409, %411 : vector<2x12x12xf32>
    %413 = vector.broadcast %7 : f32 to vector<2x12x12xf32>
    %414 = arith.mulf %413, %371 : vector<2x12x12xf32>
    %415 = arith.addf %412, %414 : vector<2x12x12xf32>
    %416 = vector.broadcast %8 : f32 to vector<2x12x12xf32>
    %417 = arith.mulf %416, %372 : vector<2x12x12xf32>
    %418 = arith.addf %415, %417 : vector<2x12x12xf32>
    %419 = vector.broadcast %9 : f32 to vector<2x12x12xf32>
    %420 = arith.mulf %419, %373 : vector<2x12x12xf32>
    %421 = arith.addf %418, %420 : vector<2x12x12xf32>
    %422 = vector.broadcast %10 : f32 to vector<2x12x12xf32>
    %423 = arith.mulf %422, %374 : vector<2x12x12xf32>
    %424 = arith.addf %421, %423 : vector<2x12x12xf32>
    %425 = vector.broadcast %11 : f32 to vector<2x12x12xf32>
    %426 = arith.mulf %425, %375 : vector<2x12x12xf32>
    %427 = arith.addf %424, %426 : vector<2x12x12xf32>
    %428 = vector.broadcast %12 : f32 to vector<2x12x12xf32>
    %429 = arith.mulf %428, %376 : vector<2x12x12xf32>
    %430 = arith.addf %427, %429 : vector<2x12x12xf32>
    %431 = vector.broadcast %13 : f32 to vector<2x12x12xf32>
    %432 = arith.mulf %431, %377 : vector<2x12x12xf32>
    %433 = arith.addf %430, %432 : vector<2x12x12xf32>
    %434 = vector.broadcast %14 : f32 to vector<2x12x12xf32>
    %435 = arith.mulf %434, %378 : vector<2x12x12xf32>
    %436 = arith.addf %433, %435 : vector<2x12x12xf32>
    %437 = vector.broadcast %15 : f32 to vector<2x12x12xf32>
    %438 = arith.mulf %437, %379 : vector<2x12x12xf32>
    %439 = arith.addf %436, %438 : vector<2x12x12xf32>
    %440 = vector.broadcast %16 : f32 to vector<2x12x12xf32>
    %441 = arith.mulf %440, %380 : vector<2x12x12xf32>
    %442 = arith.addf %439, %441 : vector<2x12x12xf32>
    %443 = vector.broadcast %17 : f32 to vector<2x12x12xf32>
    %444 = arith.mulf %443, %381 : vector<2x12x12xf32>
    %445 = arith.addf %442, %444 : vector<2x12x12xf32>
    %446 = vector.broadcast %18 : f32 to vector<2x12x12xf32>
    %447 = arith.mulf %446, %382 : vector<2x12x12xf32>
    %448 = arith.addf %445, %447 : vector<2x12x12xf32>
    %449 = vector.broadcast %19 : f32 to vector<2x12x12xf32>
    %450 = arith.mulf %449, %383 : vector<2x12x12xf32>
    %451 = arith.addf %448, %450 : vector<2x12x12xf32>
    %452 = vector.broadcast %20 : f32 to vector<2x12x12xf32>
    %453 = arith.mulf %452, %384 : vector<2x12x12xf32>
    %454 = arith.addf %451, %453 : vector<2x12x12xf32>
    %455 = vector.broadcast %21 : f32 to vector<2x12x12xf32>
    %456 = arith.mulf %455, %385 : vector<2x12x12xf32>
    %457 = arith.addf %454, %456 : vector<2x12x12xf32>
    %458 = vector.broadcast %22 : f32 to vector<2x12x12xf32>
    %459 = arith.mulf %458, %386 : vector<2x12x12xf32>
    %460 = arith.addf %457, %459 : vector<2x12x12xf32>
    %461 = vector.broadcast %23 : f32 to vector<2x12x12xf32>
    %462 = arith.mulf %461, %387 : vector<2x12x12xf32>
    %463 = arith.addf %460, %462 : vector<2x12x12xf32>
    %464 = vector.broadcast %24 : f32 to vector<2x12x12xf32>
    %465 = arith.mulf %464, %388 : vector<2x12x12xf32>
    %466 = arith.addf %463, %465 : vector<2x12x12xf32>
    %467 = vector.broadcast %25 : f32 to vector<2x12x12xf32>
    %468 = arith.mulf %467, %389 : vector<2x12x12xf32>
    %469 = arith.addf %466, %468 : vector<2x12x12xf32>
    %470 = vector.broadcast %26 : f32 to vector<2x12x12xf32>
    %471 = arith.mulf %470, %390 : vector<2x12x12xf32>
    %472 = arith.addf %469, %471 : vector<2x12x12xf32>
    %473 = vector.broadcast %82 : f32 to vector<2x12x12xf32>
    %474 = vector.broadcast %27 : f32 to vector<2x12x12xf32>
    %475 = arith.mulf %474, %364 : vector<2x12x12xf32>
    %476 = arith.addf %473, %475 : vector<2x12x12xf32>
    %477 = vector.broadcast %28 : f32 to vector<2x12x12xf32>
    %478 = arith.mulf %477, %365 : vector<2x12x12xf32>
    %479 = arith.addf %476, %478 : vector<2x12x12xf32>
    %480 = vector.broadcast %29 : f32 to vector<2x12x12xf32>
    %481 = arith.mulf %480, %366 : vector<2x12x12xf32>
    %482 = arith.addf %479, %481 : vector<2x12x12xf32>
    %483 = vector.broadcast %30 : f32 to vector<2x12x12xf32>
    %484 = arith.mulf %483, %367 : vector<2x12x12xf32>
    %485 = arith.addf %482, %484 : vector<2x12x12xf32>
    %486 = vector.broadcast %31 : f32 to vector<2x12x12xf32>
    %487 = arith.mulf %486, %368 : vector<2x12x12xf32>
    %488 = arith.addf %485, %487 : vector<2x12x12xf32>
    %489 = vector.broadcast %32 : f32 to vector<2x12x12xf32>
    %490 = arith.mulf %489, %369 : vector<2x12x12xf32>
    %491 = arith.addf %488, %490 : vector<2x12x12xf32>
    %492 = vector.broadcast %33 : f32 to vector<2x12x12xf32>
    %493 = arith.mulf %492, %370 : vector<2x12x12xf32>
    %494 = arith.addf %491, %493 : vector<2x12x12xf32>
    %495 = vector.broadcast %34 : f32 to vector<2x12x12xf32>
    %496 = arith.mulf %495, %371 : vector<2x12x12xf32>
    %497 = arith.addf %494, %496 : vector<2x12x12xf32>
    %498 = vector.broadcast %35 : f32 to vector<2x12x12xf32>
    %499 = arith.mulf %498, %372 : vector<2x12x12xf32>
    %500 = arith.addf %497, %499 : vector<2x12x12xf32>
    %501 = vector.broadcast %36 : f32 to vector<2x12x12xf32>
    %502 = arith.mulf %501, %373 : vector<2x12x12xf32>
    %503 = arith.addf %500, %502 : vector<2x12x12xf32>
    %504 = vector.broadcast %37 : f32 to vector<2x12x12xf32>
    %505 = arith.mulf %504, %374 : vector<2x12x12xf32>
    %506 = arith.addf %503, %505 : vector<2x12x12xf32>
    %507 = vector.broadcast %38 : f32 to vector<2x12x12xf32>
    %508 = arith.mulf %507, %375 : vector<2x12x12xf32>
    %509 = arith.addf %506, %508 : vector<2x12x12xf32>
    %510 = vector.broadcast %39 : f32 to vector<2x12x12xf32>
    %511 = arith.mulf %510, %376 : vector<2x12x12xf32>
    %512 = arith.addf %509, %511 : vector<2x12x12xf32>
    %513 = vector.broadcast %40 : f32 to vector<2x12x12xf32>
    %514 = arith.mulf %513, %377 : vector<2x12x12xf32>
    %515 = arith.addf %512, %514 : vector<2x12x12xf32>
    %516 = vector.broadcast %41 : f32 to vector<2x12x12xf32>
    %517 = arith.mulf %516, %378 : vector<2x12x12xf32>
    %518 = arith.addf %515, %517 : vector<2x12x12xf32>
    %519 = vector.broadcast %42 : f32 to vector<2x12x12xf32>
    %520 = arith.mulf %519, %379 : vector<2x12x12xf32>
    %521 = arith.addf %518, %520 : vector<2x12x12xf32>
    %522 = vector.broadcast %43 : f32 to vector<2x12x12xf32>
    %523 = arith.mulf %522, %380 : vector<2x12x12xf32>
    %524 = arith.addf %521, %523 : vector<2x12x12xf32>
    %525 = vector.broadcast %44 : f32 to vector<2x12x12xf32>
    %526 = arith.mulf %525, %381 : vector<2x12x12xf32>
    %527 = arith.addf %524, %526 : vector<2x12x12xf32>
    %528 = vector.broadcast %45 : f32 to vector<2x12x12xf32>
    %529 = arith.mulf %528, %382 : vector<2x12x12xf32>
    %530 = arith.addf %527, %529 : vector<2x12x12xf32>
    %531 = vector.broadcast %46 : f32 to vector<2x12x12xf32>
    %532 = arith.mulf %531, %383 : vector<2x12x12xf32>
    %533 = arith.addf %530, %532 : vector<2x12x12xf32>
    %534 = vector.broadcast %47 : f32 to vector<2x12x12xf32>
    %535 = arith.mulf %534, %384 : vector<2x12x12xf32>
    %536 = arith.addf %533, %535 : vector<2x12x12xf32>
    %537 = vector.broadcast %48 : f32 to vector<2x12x12xf32>
    %538 = arith.mulf %537, %385 : vector<2x12x12xf32>
    %539 = arith.addf %536, %538 : vector<2x12x12xf32>
    %540 = vector.broadcast %49 : f32 to vector<2x12x12xf32>
    %541 = arith.mulf %540, %386 : vector<2x12x12xf32>
    %542 = arith.addf %539, %541 : vector<2x12x12xf32>
    %543 = vector.broadcast %50 : f32 to vector<2x12x12xf32>
    %544 = arith.mulf %543, %387 : vector<2x12x12xf32>
    %545 = arith.addf %542, %544 : vector<2x12x12xf32>
    %546 = vector.broadcast %51 : f32 to vector<2x12x12xf32>
    %547 = arith.mulf %546, %388 : vector<2x12x12xf32>
    %548 = arith.addf %545, %547 : vector<2x12x12xf32>
    %549 = vector.broadcast %52 : f32 to vector<2x12x12xf32>
    %550 = arith.mulf %549, %389 : vector<2x12x12xf32>
    %551 = arith.addf %548, %550 : vector<2x12x12xf32>
    %552 = vector.broadcast %53 : f32 to vector<2x12x12xf32>
    %553 = arith.mulf %552, %390 : vector<2x12x12xf32>
    %554 = arith.addf %551, %553 : vector<2x12x12xf32>
    %555 = vector.broadcast %83 : f32 to vector<2x12x12xf32>
    %556 = vector.broadcast %54 : f32 to vector<2x12x12xf32>
    %557 = arith.mulf %556, %364 : vector<2x12x12xf32>
    %558 = arith.addf %555, %557 : vector<2x12x12xf32>
    %559 = vector.broadcast %55 : f32 to vector<2x12x12xf32>
    %560 = arith.mulf %559, %365 : vector<2x12x12xf32>
    %561 = arith.addf %558, %560 : vector<2x12x12xf32>
    %562 = vector.broadcast %56 : f32 to vector<2x12x12xf32>
    %563 = arith.mulf %562, %366 : vector<2x12x12xf32>
    %564 = arith.addf %561, %563 : vector<2x12x12xf32>
    %565 = vector.broadcast %57 : f32 to vector<2x12x12xf32>
    %566 = arith.mulf %565, %367 : vector<2x12x12xf32>
    %567 = arith.addf %564, %566 : vector<2x12x12xf32>
    %568 = vector.broadcast %58 : f32 to vector<2x12x12xf32>
    %569 = arith.mulf %568, %368 : vector<2x12x12xf32>
    %570 = arith.addf %567, %569 : vector<2x12x12xf32>
    %571 = vector.broadcast %59 : f32 to vector<2x12x12xf32>
    %572 = arith.mulf %571, %369 : vector<2x12x12xf32>
    %573 = arith.addf %570, %572 : vector<2x12x12xf32>
    %574 = vector.broadcast %60 : f32 to vector<2x12x12xf32>
    %575 = arith.mulf %574, %370 : vector<2x12x12xf32>
    %576 = arith.addf %573, %575 : vector<2x12x12xf32>
    %577 = vector.broadcast %61 : f32 to vector<2x12x12xf32>
    %578 = arith.mulf %577, %371 : vector<2x12x12xf32>
    %579 = arith.addf %576, %578 : vector<2x12x12xf32>
    %580 = vector.broadcast %62 : f32 to vector<2x12x12xf32>
    %581 = arith.mulf %580, %372 : vector<2x12x12xf32>
    %582 = arith.addf %579, %581 : vector<2x12x12xf32>
    %583 = vector.broadcast %63 : f32 to vector<2x12x12xf32>
    %584 = arith.mulf %583, %373 : vector<2x12x12xf32>
    %585 = arith.addf %582, %584 : vector<2x12x12xf32>
    %586 = vector.broadcast %64 : f32 to vector<2x12x12xf32>
    %587 = arith.mulf %586, %374 : vector<2x12x12xf32>
    %588 = arith.addf %585, %587 : vector<2x12x12xf32>
    %589 = vector.broadcast %65 : f32 to vector<2x12x12xf32>
    %590 = arith.mulf %589, %375 : vector<2x12x12xf32>
    %591 = arith.addf %588, %590 : vector<2x12x12xf32>
    %592 = vector.broadcast %66 : f32 to vector<2x12x12xf32>
    %593 = arith.mulf %592, %376 : vector<2x12x12xf32>
    %594 = arith.addf %591, %593 : vector<2x12x12xf32>
    %595 = vector.broadcast %67 : f32 to vector<2x12x12xf32>
    %596 = arith.mulf %595, %377 : vector<2x12x12xf32>
    %597 = arith.addf %594, %596 : vector<2x12x12xf32>
    %598 = vector.broadcast %68 : f32 to vector<2x12x12xf32>
    %599 = arith.mulf %598, %378 : vector<2x12x12xf32>
    %600 = arith.addf %597, %599 : vector<2x12x12xf32>
    %601 = vector.broadcast %69 : f32 to vector<2x12x12xf32>
    %602 = arith.mulf %601, %379 : vector<2x12x12xf32>
    %603 = arith.addf %600, %602 : vector<2x12x12xf32>
    %604 = vector.broadcast %70 : f32 to vector<2x12x12xf32>
    %605 = arith.mulf %604, %380 : vector<2x12x12xf32>
    %606 = arith.addf %603, %605 : vector<2x12x12xf32>
    %607 = vector.broadcast %71 : f32 to vector<2x12x12xf32>
    %608 = arith.mulf %607, %381 : vector<2x12x12xf32>
    %609 = arith.addf %606, %608 : vector<2x12x12xf32>
    %610 = vector.broadcast %72 : f32 to vector<2x12x12xf32>
    %611 = arith.mulf %610, %382 : vector<2x12x12xf32>
    %612 = arith.addf %609, %611 : vector<2x12x12xf32>
    %613 = vector.broadcast %73 : f32 to vector<2x12x12xf32>
    %614 = arith.mulf %613, %383 : vector<2x12x12xf32>
    %615 = arith.addf %612, %614 : vector<2x12x12xf32>
    %616 = vector.broadcast %74 : f32 to vector<2x12x12xf32>
    %617 = arith.mulf %616, %384 : vector<2x12x12xf32>
    %618 = arith.addf %615, %617 : vector<2x12x12xf32>
    %619 = vector.broadcast %75 : f32 to vector<2x12x12xf32>
    %620 = arith.mulf %619, %385 : vector<2x12x12xf32>
    %621 = arith.addf %618, %620 : vector<2x12x12xf32>
    %622 = vector.broadcast %76 : f32 to vector<2x12x12xf32>
    %623 = arith.mulf %622, %386 : vector<2x12x12xf32>
    %624 = arith.addf %621, %623 : vector<2x12x12xf32>
    %625 = vector.broadcast %77 : f32 to vector<2x12x12xf32>
    %626 = arith.mulf %625, %387 : vector<2x12x12xf32>
    %627 = arith.addf %624, %626 : vector<2x12x12xf32>
    %628 = vector.broadcast %78 : f32 to vector<2x12x12xf32>
    %629 = arith.mulf %628, %388 : vector<2x12x12xf32>
    %630 = arith.addf %627, %629 : vector<2x12x12xf32>
    %631 = vector.broadcast %79 : f32 to vector<2x12x12xf32>
    %632 = arith.mulf %631, %389 : vector<2x12x12xf32>
    %633 = arith.addf %630, %632 : vector<2x12x12xf32>
    %634 = vector.broadcast %80 : f32 to vector<2x12x12xf32>
    %635 = arith.mulf %634, %390 : vector<2x12x12xf32>
    %636 = arith.addf %633, %635 : vector<2x12x12xf32>
    %637 = vector.extract_strided_slice %472 {offsets = [0, 0, 0], sizes = [2, 10, 10], strides = [1, 1, 1]} : vector<2x12x12xf32> to vector<2x10x10xf32>
    %638 = vector.extract_strided_slice %472 {offsets = [0, 0, 1], sizes = [2, 10, 10], strides = [1, 1, 1]} : vector<2x12x12xf32> to vector<2x10x10xf32>
    %639 = vector.extract_strided_slice %472 {offsets = [0, 0, 2], sizes = [2, 10, 10], strides = [1, 1, 1]} : vector<2x12x12xf32> to vector<2x10x10xf32>
    %640 = vector.extract_strided_slice %472 {offsets = [0, 1, 0], sizes = [2, 10, 10], strides = [1, 1, 1]} : vector<2x12x12xf32> to vector<2x10x10xf32>
    %641 = vector.extract_strided_slice %472 {offsets = [0, 1, 1], sizes = [2, 10, 10], strides = [1, 1, 1]} : vector<2x12x12xf32> to vector<2x10x10xf32>
    %642 = vector.extract_strided_slice %472 {offsets = [0, 1, 2], sizes = [2, 10, 10], strides = [1, 1, 1]} : vector<2x12x12xf32> to vector<2x10x10xf32>
    %643 = vector.extract_strided_slice %472 {offsets = [0, 2, 0], sizes = [2, 10, 10], strides = [1, 1, 1]} : vector<2x12x12xf32> to vector<2x10x10xf32>
    %644 = vector.extract_strided_slice %472 {offsets = [0, 2, 1], sizes = [2, 10, 10], strides = [1, 1, 1]} : vector<2x12x12xf32> to vector<2x10x10xf32>
    %645 = vector.extract_strided_slice %472 {offsets = [0, 2, 2], sizes = [2, 10, 10], strides = [1, 1, 1]} : vector<2x12x12xf32> to vector<2x10x10xf32>
    %646 = vector.extract_strided_slice %554 {offsets = [0, 0, 0], sizes = [2, 10, 10], strides = [1, 1, 1]} : vector<2x12x12xf32> to vector<2x10x10xf32>
    %647 = vector.extract_strided_slice %554 {offsets = [0, 0, 1], sizes = [2, 10, 10], strides = [1, 1, 1]} : vector<2x12x12xf32> to vector<2x10x10xf32>
    %648 = vector.extract_strided_slice %554 {offsets = [0, 0, 2], sizes = [2, 10, 10], strides = [1, 1, 1]} : vector<2x12x12xf32> to vector<2x10x10xf32>
    %649 = vector.extract_strided_slice %554 {offsets = [0, 1, 0], sizes = [2, 10, 10], strides = [1, 1, 1]} : vector<2x12x12xf32> to vector<2x10x10xf32>
    %650 = vector.extract_strided_slice %554 {offsets = [0, 1, 1], sizes = [2, 10, 10], strides = [1, 1, 1]} : vector<2x12x12xf32> to vector<2x10x10xf32>
    %651 = vector.extract_strided_slice %554 {offsets = [0, 1, 2], sizes = [2, 10, 10], strides = [1, 1, 1]} : vector<2x12x12xf32> to vector<2x10x10xf32>
    %652 = vector.extract_strided_slice %554 {offsets = [0, 2, 0], sizes = [2, 10, 10], strides = [1, 1, 1]} : vector<2x12x12xf32> to vector<2x10x10xf32>
    %653 = vector.extract_strided_slice %554 {offsets = [0, 2, 1], sizes = [2, 10, 10], strides = [1, 1, 1]} : vector<2x12x12xf32> to vector<2x10x10xf32>
    %654 = vector.extract_strided_slice %554 {offsets = [0, 2, 2], sizes = [2, 10, 10], strides = [1, 1, 1]} : vector<2x12x12xf32> to vector<2x10x10xf32>
    %655 = vector.extract_strided_slice %636 {offsets = [0, 0, 0], sizes = [2, 10, 10], strides = [1, 1, 1]} : vector<2x12x12xf32> to vector<2x10x10xf32>
    %656 = vector.extract_strided_slice %636 {offsets = [0, 0, 1], sizes = [2, 10, 10], strides = [1, 1, 1]} : vector<2x12x12xf32> to vector<2x10x10xf32>
    %657 = vector.extract_strided_slice %636 {offsets = [0, 0, 2], sizes = [2, 10, 10], strides = [1, 1, 1]} : vector<2x12x12xf32> to vector<2x10x10xf32>
    %658 = vector.extract_strided_slice %636 {offsets = [0, 1, 0], sizes = [2, 10, 10], strides = [1, 1, 1]} : vector<2x12x12xf32> to vector<2x10x10xf32>
    %659 = vector.extract_strided_slice %636 {offsets = [0, 1, 1], sizes = [2, 10, 10], strides = [1, 1, 1]} : vector<2x12x12xf32> to vector<2x10x10xf32>
    %660 = vector.extract_strided_slice %636 {offsets = [0, 1, 2], sizes = [2, 10, 10], strides = [1, 1, 1]} : vector<2x12x12xf32> to vector<2x10x10xf32>
    %661 = vector.extract_strided_slice %636 {offsets = [0, 2, 0], sizes = [2, 10, 10], strides = [1, 1, 1]} : vector<2x12x12xf32> to vector<2x10x10xf32>
    %662 = vector.extract_strided_slice %636 {offsets = [0, 2, 1], sizes = [2, 10, 10], strides = [1, 1, 1]} : vector<2x12x12xf32> to vector<2x10x10xf32>
    %663 = vector.extract_strided_slice %636 {offsets = [0, 2, 2], sizes = [2, 10, 10], strides = [1, 1, 1]} : vector<2x12x12xf32> to vector<2x10x10xf32>
    %664 = vector.broadcast %81 : f32 to vector<2x10x10xf32>
    %665 = vector.broadcast %0 : f32 to vector<2x10x10xf32>
    %666 = arith.mulf %665, %637 : vector<2x10x10xf32>
    %667 = arith.addf %664, %666 : vector<2x10x10xf32>
    %668 = vector.broadcast %1 : f32 to vector<2x10x10xf32>
    %669 = arith.mulf %668, %638 : vector<2x10x10xf32>
    %670 = arith.addf %667, %669 : vector<2x10x10xf32>
    %671 = vector.broadcast %2 : f32 to vector<2x10x10xf32>
    %672 = arith.mulf %671, %639 : vector<2x10x10xf32>
    %673 = arith.addf %670, %672 : vector<2x10x10xf32>
    %674 = vector.broadcast %3 : f32 to vector<2x10x10xf32>
    %675 = arith.mulf %674, %640 : vector<2x10x10xf32>
    %676 = arith.addf %673, %675 : vector<2x10x10xf32>
    %677 = vector.broadcast %4 : f32 to vector<2x10x10xf32>
    %678 = arith.mulf %677, %641 : vector<2x10x10xf32>
    %679 = arith.addf %676, %678 : vector<2x10x10xf32>
    %680 = vector.broadcast %5 : f32 to vector<2x10x10xf32>
    %681 = arith.mulf %680, %642 : vector<2x10x10xf32>
    %682 = arith.addf %679, %681 : vector<2x10x10xf32>
    %683 = vector.broadcast %6 : f32 to vector<2x10x10xf32>
    %684 = arith.mulf %683, %643 : vector<2x10x10xf32>
    %685 = arith.addf %682, %684 : vector<2x10x10xf32>
    %686 = vector.broadcast %7 : f32 to vector<2x10x10xf32>
    %687 = arith.mulf %686, %644 : vector<2x10x10xf32>
    %688 = arith.addf %685, %687 : vector<2x10x10xf32>
    %689 = vector.broadcast %8 : f32 to vector<2x10x10xf32>
    %690 = arith.mulf %689, %645 : vector<2x10x10xf32>
    %691 = arith.addf %688, %690 : vector<2x10x10xf32>
    %692 = vector.broadcast %9 : f32 to vector<2x10x10xf32>
    %693 = arith.mulf %692, %646 : vector<2x10x10xf32>
    %694 = arith.addf %691, %693 : vector<2x10x10xf32>
    %695 = vector.broadcast %10 : f32 to vector<2x10x10xf32>
    %696 = arith.mulf %695, %647 : vector<2x10x10xf32>
    %697 = arith.addf %694, %696 : vector<2x10x10xf32>
    %698 = vector.broadcast %11 : f32 to vector<2x10x10xf32>
    %699 = arith.mulf %698, %648 : vector<2x10x10xf32>
    %700 = arith.addf %697, %699 : vector<2x10x10xf32>
    %701 = vector.broadcast %12 : f32 to vector<2x10x10xf32>
    %702 = arith.mulf %701, %649 : vector<2x10x10xf32>
    %703 = arith.addf %700, %702 : vector<2x10x10xf32>
    %704 = vector.broadcast %13 : f32 to vector<2x10x10xf32>
    %705 = arith.mulf %704, %650 : vector<2x10x10xf32>
    %706 = arith.addf %703, %705 : vector<2x10x10xf32>
    %707 = vector.broadcast %14 : f32 to vector<2x10x10xf32>
    %708 = arith.mulf %707, %651 : vector<2x10x10xf32>
    %709 = arith.addf %706, %708 : vector<2x10x10xf32>
    %710 = vector.broadcast %15 : f32 to vector<2x10x10xf32>
    %711 = arith.mulf %710, %652 : vector<2x10x10xf32>
    %712 = arith.addf %709, %711 : vector<2x10x10xf32>
    %713 = vector.broadcast %16 : f32 to vector<2x10x10xf32>
    %714 = arith.mulf %713, %653 : vector<2x10x10xf32>
    %715 = arith.addf %712, %714 : vector<2x10x10xf32>
    %716 = vector.broadcast %17 : f32 to vector<2x10x10xf32>
    %717 = arith.mulf %716, %654 : vector<2x10x10xf32>
    %718 = arith.addf %715, %717 : vector<2x10x10xf32>
    %719 = vector.broadcast %18 : f32 to vector<2x10x10xf32>
    %720 = arith.mulf %719, %655 : vector<2x10x10xf32>
    %721 = arith.addf %718, %720 : vector<2x10x10xf32>
    %722 = vector.broadcast %19 : f32 to vector<2x10x10xf32>
    %723 = arith.mulf %722, %656 : vector<2x10x10xf32>
    %724 = arith.addf %721, %723 : vector<2x10x10xf32>
    %725 = vector.broadcast %20 : f32 to vector<2x10x10xf32>
    %726 = arith.mulf %725, %657 : vector<2x10x10xf32>
    %727 = arith.addf %724, %726 : vector<2x10x10xf32>
    %728 = vector.broadcast %21 : f32 to vector<2x10x10xf32>
    %729 = arith.mulf %728, %658 : vector<2x10x10xf32>
    %730 = arith.addf %727, %729 : vector<2x10x10xf32>
    %731 = vector.broadcast %22 : f32 to vector<2x10x10xf32>
    %732 = arith.mulf %731, %659 : vector<2x10x10xf32>
    %733 = arith.addf %730, %732 : vector<2x10x10xf32>
    %734 = vector.broadcast %23 : f32 to vector<2x10x10xf32>
    %735 = arith.mulf %734, %660 : vector<2x10x10xf32>
    %736 = arith.addf %733, %735 : vector<2x10x10xf32>
    %737 = vector.broadcast %24 : f32 to vector<2x10x10xf32>
    %738 = arith.mulf %737, %661 : vector<2x10x10xf32>
    %739 = arith.addf %736, %738 : vector<2x10x10xf32>
    %740 = vector.broadcast %25 : f32 to vector<2x10x10xf32>
    %741 = arith.mulf %740, %662 : vector<2x10x10xf32>
    %742 = arith.addf %739, %741 : vector<2x10x10xf32>
    %743 = vector.broadcast %26 : f32 to vector<2x10x10xf32>
    %744 = arith.mulf %743, %663 : vector<2x10x10xf32>
    %745 = arith.addf %742, %744 : vector<2x10x10xf32>
    %746 = vector.broadcast %82 : f32 to vector<2x10x10xf32>
    %747 = vector.broadcast %27 : f32 to vector<2x10x10xf32>
    %748 = arith.mulf %747, %637 : vector<2x10x10xf32>
    %749 = arith.addf %746, %748 : vector<2x10x10xf32>
    %750 = vector.broadcast %28 : f32 to vector<2x10x10xf32>
    %751 = arith.mulf %750, %638 : vector<2x10x10xf32>
    %752 = arith.addf %749, %751 : vector<2x10x10xf32>
    %753 = vector.broadcast %29 : f32 to vector<2x10x10xf32>
    %754 = arith.mulf %753, %639 : vector<2x10x10xf32>
    %755 = arith.addf %752, %754 : vector<2x10x10xf32>
    %756 = vector.broadcast %30 : f32 to vector<2x10x10xf32>
    %757 = arith.mulf %756, %640 : vector<2x10x10xf32>
    %758 = arith.addf %755, %757 : vector<2x10x10xf32>
    %759 = vector.broadcast %31 : f32 to vector<2x10x10xf32>
    %760 = arith.mulf %759, %641 : vector<2x10x10xf32>
    %761 = arith.addf %758, %760 : vector<2x10x10xf32>
    %762 = vector.broadcast %32 : f32 to vector<2x10x10xf32>
    %763 = arith.mulf %762, %642 : vector<2x10x10xf32>
    %764 = arith.addf %761, %763 : vector<2x10x10xf32>
    %765 = vector.broadcast %33 : f32 to vector<2x10x10xf32>
    %766 = arith.mulf %765, %643 : vector<2x10x10xf32>
    %767 = arith.addf %764, %766 : vector<2x10x10xf32>
    %768 = vector.broadcast %34 : f32 to vector<2x10x10xf32>
    %769 = arith.mulf %768, %644 : vector<2x10x10xf32>
    %770 = arith.addf %767, %769 : vector<2x10x10xf32>
    %771 = vector.broadcast %35 : f32 to vector<2x10x10xf32>
    %772 = arith.mulf %771, %645 : vector<2x10x10xf32>
    %773 = arith.addf %770, %772 : vector<2x10x10xf32>
    %774 = vector.broadcast %36 : f32 to vector<2x10x10xf32>
    %775 = arith.mulf %774, %646 : vector<2x10x10xf32>
    %776 = arith.addf %773, %775 : vector<2x10x10xf32>
    %777 = vector.broadcast %37 : f32 to vector<2x10x10xf32>
    %778 = arith.mulf %777, %647 : vector<2x10x10xf32>
    %779 = arith.addf %776, %778 : vector<2x10x10xf32>
    %780 = vector.broadcast %38 : f32 to vector<2x10x10xf32>
    %781 = arith.mulf %780, %648 : vector<2x10x10xf32>
    %782 = arith.addf %779, %781 : vector<2x10x10xf32>
    %783 = vector.broadcast %39 : f32 to vector<2x10x10xf32>
    %784 = arith.mulf %783, %649 : vector<2x10x10xf32>
    %785 = arith.addf %782, %784 : vector<2x10x10xf32>
    %786 = vector.broadcast %40 : f32 to vector<2x10x10xf32>
    %787 = arith.mulf %786, %650 : vector<2x10x10xf32>
    %788 = arith.addf %785, %787 : vector<2x10x10xf32>
    %789 = vector.broadcast %41 : f32 to vector<2x10x10xf32>
    %790 = arith.mulf %789, %651 : vector<2x10x10xf32>
    %791 = arith.addf %788, %790 : vector<2x10x10xf32>
    %792 = vector.broadcast %42 : f32 to vector<2x10x10xf32>
    %793 = arith.mulf %792, %652 : vector<2x10x10xf32>
    %794 = arith.addf %791, %793 : vector<2x10x10xf32>
    %795 = vector.broadcast %43 : f32 to vector<2x10x10xf32>
    %796 = arith.mulf %795, %653 : vector<2x10x10xf32>
    %797 = arith.addf %794, %796 : vector<2x10x10xf32>
    %798 = vector.broadcast %44 : f32 to vector<2x10x10xf32>
    %799 = arith.mulf %798, %654 : vector<2x10x10xf32>
    %800 = arith.addf %797, %799 : vector<2x10x10xf32>
    %801 = vector.broadcast %45 : f32 to vector<2x10x10xf32>
    %802 = arith.mulf %801, %655 : vector<2x10x10xf32>
    %803 = arith.addf %800, %802 : vector<2x10x10xf32>
    %804 = vector.broadcast %46 : f32 to vector<2x10x10xf32>
    %805 = arith.mulf %804, %656 : vector<2x10x10xf32>
    %806 = arith.addf %803, %805 : vector<2x10x10xf32>
    %807 = vector.broadcast %47 : f32 to vector<2x10x10xf32>
    %808 = arith.mulf %807, %657 : vector<2x10x10xf32>
    %809 = arith.addf %806, %808 : vector<2x10x10xf32>
    %810 = vector.broadcast %48 : f32 to vector<2x10x10xf32>
    %811 = arith.mulf %810, %658 : vector<2x10x10xf32>
    %812 = arith.addf %809, %811 : vector<2x10x10xf32>
    %813 = vector.broadcast %49 : f32 to vector<2x10x10xf32>
    %814 = arith.mulf %813, %659 : vector<2x10x10xf32>
    %815 = arith.addf %812, %814 : vector<2x10x10xf32>
    %816 = vector.broadcast %50 : f32 to vector<2x10x10xf32>
    %817 = arith.mulf %816, %660 : vector<2x10x10xf32>
    %818 = arith.addf %815, %817 : vector<2x10x10xf32>
    %819 = vector.broadcast %51 : f32 to vector<2x10x10xf32>
    %820 = arith.mulf %819, %661 : vector<2x10x10xf32>
    %821 = arith.addf %818, %820 : vector<2x10x10xf32>
    %822 = vector.broadcast %52 : f32 to vector<2x10x10xf32>
    %823 = arith.mulf %822, %662 : vector<2x10x10xf32>
    %824 = arith.addf %821, %823 : vector<2x10x10xf32>
    %825 = vector.broadcast %53 : f32 to vector<2x10x10xf32>
    %826 = arith.mulf %825, %663 : vector<2x10x10xf32>
    %827 = arith.addf %824, %826 : vector<2x10x10xf32>
    %828 = vector.broadcast %83 : f32 to vector<2x10x10xf32>
    %829 = vector.broadcast %54 : f32 to vector<2x10x10xf32>
    %830 = arith.mulf %829, %637 : vector<2x10x10xf32>
    %831 = arith.addf %828, %830 : vector<2x10x10xf32>
    %832 = vector.broadcast %55 : f32 to vector<2x10x10xf32>
    %833 = arith.mulf %832, %638 : vector<2x10x10xf32>
    %834 = arith.addf %831, %833 : vector<2x10x10xf32>
    %835 = vector.broadcast %56 : f32 to vector<2x10x10xf32>
    %836 = arith.mulf %835, %639 : vector<2x10x10xf32>
    %837 = arith.addf %834, %836 : vector<2x10x10xf32>
    %838 = vector.broadcast %57 : f32 to vector<2x10x10xf32>
    %839 = arith.mulf %838, %640 : vector<2x10x10xf32>
    %840 = arith.addf %837, %839 : vector<2x10x10xf32>
    %841 = vector.broadcast %58 : f32 to vector<2x10x10xf32>
    %842 = arith.mulf %841, %641 : vector<2x10x10xf32>
    %843 = arith.addf %840, %842 : vector<2x10x10xf32>
    %844 = vector.broadcast %59 : f32 to vector<2x10x10xf32>
    %845 = arith.mulf %844, %642 : vector<2x10x10xf32>
    %846 = arith.addf %843, %845 : vector<2x10x10xf32>
    %847 = vector.broadcast %60 : f32 to vector<2x10x10xf32>
    %848 = arith.mulf %847, %643 : vector<2x10x10xf32>
    %849 = arith.addf %846, %848 : vector<2x10x10xf32>
    %850 = vector.broadcast %61 : f32 to vector<2x10x10xf32>
    %851 = arith.mulf %850, %644 : vector<2x10x10xf32>
    %852 = arith.addf %849, %851 : vector<2x10x10xf32>
    %853 = vector.broadcast %62 : f32 to vector<2x10x10xf32>
    %854 = arith.mulf %853, %645 : vector<2x10x10xf32>
    %855 = arith.addf %852, %854 : vector<2x10x10xf32>
    %856 = vector.broadcast %63 : f32 to vector<2x10x10xf32>
    %857 = arith.mulf %856, %646 : vector<2x10x10xf32>
    %858 = arith.addf %855, %857 : vector<2x10x10xf32>
    %859 = vector.broadcast %64 : f32 to vector<2x10x10xf32>
    %860 = arith.mulf %859, %647 : vector<2x10x10xf32>
    %861 = arith.addf %858, %860 : vector<2x10x10xf32>
    %862 = vector.broadcast %65 : f32 to vector<2x10x10xf32>
    %863 = arith.mulf %862, %648 : vector<2x10x10xf32>
    %864 = arith.addf %861, %863 : vector<2x10x10xf32>
    %865 = vector.broadcast %66 : f32 to vector<2x10x10xf32>
    %866 = arith.mulf %865, %649 : vector<2x10x10xf32>
    %867 = arith.addf %864, %866 : vector<2x10x10xf32>
    %868 = vector.broadcast %67 : f32 to vector<2x10x10xf32>
    %869 = arith.mulf %868, %650 : vector<2x10x10xf32>
    %870 = arith.addf %867, %869 : vector<2x10x10xf32>
    %871 = vector.broadcast %68 : f32 to vector<2x10x10xf32>
    %872 = arith.mulf %871, %651 : vector<2x10x10xf32>
    %873 = arith.addf %870, %872 : vector<2x10x10xf32>
    %874 = vector.broadcast %69 : f32 to vector<2x10x10xf32>
    %875 = arith.mulf %874, %652 : vector<2x10x10xf32>
    %876 = arith.addf %873, %875 : vector<2x10x10xf32>
    %877 = vector.broadcast %70 : f32 to vector<2x10x10xf32>
    %878 = arith.mulf %877, %653 : vector<2x10x10xf32>
    %879 = arith.addf %876, %878 : vector<2x10x10xf32>
    %880 = vector.broadcast %71 : f32 to vector<2x10x10xf32>
    %881 = arith.mulf %880, %654 : vector<2x10x10xf32>
    %882 = arith.addf %879, %881 : vector<2x10x10xf32>
    %883 = vector.broadcast %72 : f32 to vector<2x10x10xf32>
    %884 = arith.mulf %883, %655 : vector<2x10x10xf32>
    %885 = arith.addf %882, %884 : vector<2x10x10xf32>
    %886 = vector.broadcast %73 : f32 to vector<2x10x10xf32>
    %887 = arith.mulf %886, %656 : vector<2x10x10xf32>
    %888 = arith.addf %885, %887 : vector<2x10x10xf32>
    %889 = vector.broadcast %74 : f32 to vector<2x10x10xf32>
    %890 = arith.mulf %889, %657 : vector<2x10x10xf32>
    %891 = arith.addf %888, %890 : vector<2x10x10xf32>
    %892 = vector.broadcast %75 : f32 to vector<2x10x10xf32>
    %893 = arith.mulf %892, %658 : vector<2x10x10xf32>
    %894 = arith.addf %891, %893 : vector<2x10x10xf32>
    %895 = vector.broadcast %76 : f32 to vector<2x10x10xf32>
    %896 = arith.mulf %895, %659 : vector<2x10x10xf32>
    %897 = arith.addf %894, %896 : vector<2x10x10xf32>
    %898 = vector.broadcast %77 : f32 to vector<2x10x10xf32>
    %899 = arith.mulf %898, %660 : vector<2x10x10xf32>
    %900 = arith.addf %897, %899 : vector<2x10x10xf32>
    %901 = vector.broadcast %78 : f32 to vector<2x10x10xf32>
    %902 = arith.mulf %901, %661 : vector<2x10x10xf32>
    %903 = arith.addf %900, %902 : vector<2x10x10xf32>
    %904 = vector.broadcast %79 : f32 to vector<2x10x10xf32>
    %905 = arith.mulf %904, %662 : vector<2x10x10xf32>
    %906 = arith.addf %903, %905 : vector<2x10x10xf32>
    %907 = vector.broadcast %80 : f32 to vector<2x10x10xf32>
    %908 = arith.mulf %907, %663 : vector<2x10x10xf32>
    %909 = arith.addf %906, %908 : vector<2x10x10xf32>
    %910 = vector.shape_cast %745 : vector<2x10x10xf32> to vector<2x1x10x10xf32>
    %911 = vector.shape_cast %827 : vector<2x10x10xf32> to vector<2x1x10x10xf32>
    %912 = vector.shape_cast %909 : vector<2x10x10xf32> to vector<2x1x10x10xf32>
    %913 = tpu.concatenate %910, %911, %912 in 1 : vector<2x1x10x10xf32>, vector<2x1x10x10xf32>, vector<2x1x10x10xf32> -> vector<2x3x10x10xf32>
    %c0_7 = arith.constant 0 : index
    %c0_8 = arith.constant 0 : index
    %c0_9 = arith.constant 0 : index
    %c0_10 = arith.constant 0 : index
    %914 = vector.load %arg3[%c0_7, %c0_8, %c0_9, %c0_10] : memref<2x3x10x10xf32, #tpu.memory_space<vmem>>, vector<2x3x10x10xf32>
    tpu.vector_store %arg3[%c0_7, %c0_8, %c0_9, %c0_10], %913 {strides = array<i32>} : memref<2x3x10x10xf32, #tpu.memory_space<vmem>>, vector<2x3x10x10xf32>,
    return
  }
}

</mosaic_0001>

<bundles_post_ra>
// kernel: tpu_custom_call.1
= control target key start
LH: loop header
LB: loop body
LE: loop exit
PB: predicated region body
PF: predicated region fallthrough
CT: control target
= control target key end

     0   :  { %8 = vsyncpa [#allocation4], 0  ;;  %s11919_s0 = inlined_call_operand.hbm [shape: f32[81], index: 0, kind: input, shape index: {}]   ;;  %s11920_s1 = inlined_call_operand.hbm [shape: f32[3], index: 1, kind: input, shape index: {}]   ;;  %s11921_s2 = inlined_call_operand.hbm [shape: f32[2,3,16,16], index: 2, kind: input, shape index: {}]   ;;  %s11922_s3 = inlined_call_operand.vmem [shape: f32[2,3,10,10], index: 3, kind: output, shape index: {}]  }
   0x1   :  { %9 = vsyncpa [#allocation6], 0  ;;  %s16_s14 = sshll.u32 %s11919_s0, 4  ;;  %s17_s14 = int_to_ptr.hbm [resolvable:$true] %s16_s14 }
   0x2   :  { %10 = vsyncpa [#allocation3], 0  ;;  %s25_s17 = sshll.u32 %s11920_s1, 4  ;;  %s6365_s18 = smov [#allocation2]   ;;  %s26_s17 = int_to_ptr.hbm [resolvable:$true] %s25_s17 }
   0x3   :  { %19 = dma.hbm_to_smem %s17_s14, 16, %s6365_s18, [#allocation4]  }
   0x4   :  { %s6366_s19 = smov [#allocation5]   ;;  %s33_s22 = sshll.u32 %s11921_s2, 4  ;;  %s34_s22 = int_to_ptr.hbm [resolvable:$true] %s33_s22 }
   0x5   :  { %28 = dma.hbm_to_smem %s26_s17, 16, %s6366_s19, [#allocation6]  }
   0x6   :  { %s6367_s23 = smov [#allocation7]   ;;  %s6368_s0 = smov 128  }
   0x7   :  { %s35_s24 = sshll.u32 %s6367_s23, 4  ;;  %s6369_s25 = smov 8   ;;  %s36_s24 = int_to_ptr.vmem [resolvable:$true] %s35_s24 }
   0x8   :  { %41 = dma.hbm_to_vmem [thread:$0]  %s34_s22, 1536, %s36_s24, [#allocation3], %s6368_s0, %s6368_s0, %s6369_s25  }
   0x9   :  { %6359 = dma.done.wait [#allocation4], 16  }
   0xa   :  { %6360 = vsyncadd [#allocation4], 4294967280 }
   0xb   :  { %6361 = dma.done.wait [#allocation6], 16  }
   0xc   :  { %6362 = vsyncadd [#allocation6], 4294967280 }
   0xd   :  { %6363 = dma.done.wait [#allocation3], 1536  }
   0xe   :  { %6364 = vsyncadd [#allocation3], 4294965760 }
   0xf   :  { %54 = sfence }
  0x10   :  { %s6199_s1 = sld [smem:[#allocation2 + $0x2]]  ;;  %v6401_v0 = vld [vmem:[#allocation7] sm:$0xff]  ;;  %v6403_v1 = vld [vmem:[#allocation7 + $0x30] sm:$0xff]  ;;  %s6370_s2 = smov 126   ;;  %v6418_v7 = vld [vmem:[#allocation7 + $0x8] sm:$0xff]  ;;  %vm220_vm0 = vcmask 1046528  }
  0x11   :  { %s6198_s26 = sld [smem:[#allocation2 + $0x1]]  ;;  %s6371_s28 = smov 127   ;;  %v6420_v8 = vld [vmem:[#allocation7 + $0x38] sm:$0xff]  ;;  %vm306_vm1 = vcmask 1045504   ;;  %v6501_v58 = vld [vmem:[#allocation7 + $0x40] sm:$0xff]  ;;  %v6507_v61 = vld [vmem:[#allocation7 + $0x10] sm:$0xff] }
  0x12   :  { %s6201_s27 = sld [smem:[#allocation2 + $0x4]]  ;;  %v6505_v60 = vld [vmem:[#allocation7 + $0x18] sm:$0xff]  ;;  %vm6177_vm2 = vcmask 80896   ;;  %vm6179_vm3 = vcmask 74752  }
  0x13   :  { %s6202_s29 = sld [smem:[#allocation2 + $0x5]] }
  0x14   :  { %s6204_s30 = sld [smem:[#allocation2 + $0x7]] }
  0x15   :  { %s6205_s4 = sld [smem:[#allocation2 + $0x8]] }
  0x16   :  { %v6405_v2 = vstv %s6199_s1  ;;  %s6207_s5 = sld [smem:[#allocation2 + $0xa]] }
  0x17   :  { %12291 = vst [vmem:[#allocation11_spill] sm:$0xff] %v6405_v2  ;;  %v187_v3 = vmul.f32 %v6405_v2, %v6401_v0  ;;  %v6409_v4 = vstv %s6198_s26  ;;  %v188_v10 = vmul.f32 %v6405_v2, %v6418_v7  ;;  %v190_v18 = vmul.f32 %v6405_v2, %v6420_v8  ;;  %s6208_s6 = sld [smem:[#allocation2 + $0xb]] }
  0x18   :  { %12292 = vst [vmem:[#allocation12_spill] sm:$0xff] %v6409_v4  ;;  %v164_v5 = vmul.f32 %v6409_v4, %v6403_v1  ;;  %v162_v6 = vmul.f32 %v6409_v4, %v6401_v0  ;;  %v6422_v9 = vstv %s6201_s27  ;;  %v165_v11 = vmul.f32 %v6409_v4, %v6420_v8  ;;  %s6210_s7 = sld [smem:[#allocation2 + $0xd]] }
  0x19   :  { %195 = vrot.lane.b32.xlu2 %v187_v3, %s6370_s2  ;;  %12293 = vst [vmem:[#allocation13_spill] sm:$0xff] %v6422_v9  ;;  %v163_v12 = vmul.f32 %v6409_v4, %v6418_v7  ;;  %v236_v13 = vmul.f32 %v6422_v9, %v6401_v0  ;;  %v237_v14 = vmul.f32 %v6422_v9, %v6418_v7  ;;  %v6449_v24 = vstv %s6202_s29  ;;  %s6211_s8 = sld [smem:[#allocation2 + $0xe]] }
  0x1a   :  { %174 = vrot.lane.b32.xlu1 %v164_v5, %s6371_s28  ;;  %170 = vrot.lane.b32.xlu0 %v162_v6, %s6371_s28  ;;  %v189_v19 = vmul.f32 %v6405_v2, %v6403_v1  ;;  %v239_v20 = vmul.f32 %v6422_v9, %v6420_v8  ;;  %v238_v21 = vmul.f32 %v6422_v9, %v6403_v1  ;;  %v6463_v34 = vstv %s6204_s30  ;;  %v6520_v6 = vld [vmem:[#allocation7 + $0x48] sm:$0xff]  ;;  %s6213_s9 = sld [smem:[#allocation2 + $0x10]] }
  0x1b   :  { %v244_v15 = vrot.slane %v236_v13, 1  ;;  %v245_v16 = vrot.slane %v237_v14, 1  ;;  %12294 = vst [vmem:[#allocation14_spill] sm:$0xff] %v6449_v24  ;;  %v269_v25 = vmul.f32 %v6449_v24, %v6403_v1  ;;  %v270_v26 = vmul.f32 %v6449_v24, %v6420_v8  ;;  %s6214_s10 = sld [smem:[#allocation2 + $0x11]] }
  0x1c   :  { %v248_v22 = vrot.slane %v239_v20, 1  ;;  %v247_v23 = vrot.slane %v238_v21, 1  ;;  %v268_v28 = vmul.f32 %v6449_v24, %v6418_v7  ;;  %v267_v29 = vmul.f32 %v6449_v24, %v6401_v0  ;;  %12295 = vst [vmem:[#allocation15_spill] sm:$0xff] %v6463_v34  ;;  %s6216_s11 = sld [smem:[#allocation2 + $0x13]] }
  0x1d   :  { %v246_v17 = vsel %vm220_vm0, %v244_v15, %v245_v16  ;;  %v278_v30 = vrot.slane %v269_v25, 1  ;;  %v279_v31 = vrot.slane %v270_v26, 1  ;;  %v323_v37 = vmul.f32 %v6463_v34, %v6418_v7  ;;  %s6217_s12 = sld [smem:[#allocation2 + $0x14]] }
  0x1e   :  { %v249_v27 = vsel %vm220_vm0, %v247_v23, %v248_v22  ;;  %v276_v32 = vrot.slane %v268_v28, 1  ;;  %v275_v33 = vrot.slane %v267_v29, 1  ;;  %v322_v38 = vmul.f32 %v6463_v34, %v6401_v0  ;;  %s6219_s13 = sld [smem:[#allocation2 + $0x16]] }
  0x1f   :  { %v280_v35 = vsel %vm220_vm0, %v278_v30, %v279_v31  ;;  %v331_v39 = vrot.slane %v323_v37, 2  ;;  %v6474_v41 = vstv %s6205_s4  ;;  %v325_v45 = vmul.f32 %v6463_v34, %v6420_v8  ;;  %s6220_s14 = sld [smem:[#allocation2 + $0x17]] }
  0x20   :  { %v277_v36 = vsel %vm220_vm0, %v275_v33, %v276_v32  ;;  %v330_v40 = vrot.slane %v322_v38, 2  ;;  %12296 = vst [vmem:[#allocation16_spill] sm:$0xff] %v6474_v41  ;;  %v353_v42 = vmul.f32 %v6474_v41, %v6401_v0  ;;  %v354_v43 = vmul.f32 %v6474_v41, %v6418_v7  ;;  %s6222_s15 = sld [smem:[#allocation2 + $0x19]] }
  0x21   :  { %197 = vrot.lane.b32.xlu2 %v188_v10, %s6370_s2  ;;  %v324_v46 = vmul.f32 %v6463_v34, %v6403_v1  ;;  %v334_v49 = vrot.slane %v325_v45, 2  ;;  %v356_v53 = vmul.f32 %v6474_v41, %v6420_v8  ;;  %v355_v54 = vmul.f32 %v6474_v41, %v6403_v1  ;;  %s6223_s16 = sld [smem:[#allocation2 + $0x1a]] }
  0x22   :  { %176 = vrot.lane.b32.xlu1 %v165_v11, %s6371_s28  ;;  %172 = vrot.lane.b32.xlu0 %v163_v12, %s6371_s28  ;;  %v332_v44 = vsel %vm306_vm1, %v330_v40, %v331_v39  ;;  %v361_v47 = vrot.slane %v353_v42, 2  ;;  %v362_v48 = vrot.slane %v354_v43, 2  ;;  %v6503_v59 = vstv %s6207_s5  ;;  %s6225_s17 = sld [smem:[#allocation2 + $0x1c]] }
  0x23   :  { %v333_v50 = vrot.slane %v324_v46, 2  ;;  %v365_v55 = vrot.slane %v356_v53, 2  ;;  %v364_v56 = vrot.slane %v355_v54, 2  ;;  %12297 = vst [vmem:[#allocation17_spill] sm:$0xff] %v6503_v59  ;;  %v395_v62 = vmul.f32 %v6503_v59, %v6501_v58  ;;  %s6226_s18 = sld [smem:[#allocation2 + $0x1d]] }
  0x24   :  { %v363_v51 = vsel %vm306_vm1, %v361_v47, %v362_v48  ;;  %v394_v63 = vmul.f32 %v6503_v59, %v6505_v60  ;;  %v393_v3 = vmul.f32 %v6503_v59, %v6507_v61  ;;  %v6518_v5 = vstv %s6208_s6  ;;  %s6228_s19 = sld [smem:[#allocation2 + $0x1f]] }
  0x25   :  { %v335_v52 = vsel %vm306_vm1, %v333_v50, %v334_v49  ;;  %v366_v57 = vsel %vm306_vm1, %v364_v56, %v365_v55  ;;  %12298 = vst [vmem:[#allocation18_spill] sm:$0xff] %v6518_v5  ;;  %v6522_v10 = vstv %s6210_s7  ;;  %v419_v11 = vmul.f32 %v6518_v5, %v6505_v60  ;;  %s6229_s20 = sld [smem:[#allocation2 + $0x20]] }
  0x26   :  { %12299 = vst [vmem:[#allocation19_spill] sm:$0xff] %v6522_v10  ;;  %v418_v12 = vmul.f32 %v6518_v5, %v6507_v61  ;;  %v396_v13 = vmul.f32 %v6503_v59, %v6520_v6  ;;  %v466_v14 = vmul.f32 %v6522_v10, %v6507_v61  ;;  %v467_v15 = vmul.f32 %v6522_v10, %v6505_v60  ;;  %s6231_s21 = sld [smem:[#allocation2 + $0x22]] }
  0x27   :  { %v420_v20 = vmul.f32 %v6518_v5, %v6501_v58  ;;  %v469_v21 = vmul.f32 %v6522_v10, %v6520_v6  ;;  %v6549_v26 = vstv %s6211_s8  ;;  %v6565_v38 = vstv %s6213_s9  ;;  %s6232_s22 = sld [smem:[#allocation2 + $0x23]] }
  0x28   :  { %12300 = vst [vmem:[#allocation20_spill] sm:$0xff] %v6549_v26  ;;  %v500_v28 = vmul.f32 %v6549_v26, %v6520_v6  ;;  %v498_v30 = vmul.f32 %v6549_v26, %v6505_v60  ;;  %v552_v42 = vmul.f32 %v6565_v38, %v6505_v60  ;;  %v551_v43 = vmul.f32 %v6565_v38, %v6507_v61  ;;  %s6234_s23 = sld [smem:[#allocation2 + $0x25]] }
  0x29   :  { %250 = vrot.lane.b32.xlu2 %v246_v17, %s6371_s28  ;;  %v475_v17 = vrot.slane %v467_v15, 1  ;;  %v478_v23 = vrot.slane %v469_v21, 1  ;;  %12301 = vst [vmem:[#allocation21_spill] sm:$0xff] %v6565_v38  ;;  %v6578_v47 = vstv %s6214_s10  ;;  %v6619_v21 = vld [vmem:[#allocation7 + $0x28] sm:$0xff]  ;;  %s6235_s24 = sld [smem:[#allocation2 + $0x26]] }
  0x2a   :  { %201 = vrot.lane.b32.xlu1 %v190_v18, %s6370_s2  ;;  %199 = vrot.lane.b32.xlu0 %v189_v19, %s6370_s2  ;;  %v421_v19 = vmul.f32 %v6518_v5, %v6520_v6  ;;  %v509_v33 = vrot.slane %v500_v28, 1  ;;  %v560_v45 = vrot.slane %v552_v42, 2  ;;  %v559_v46 = vrot.slane %v551_v43, 2  ;;  %12302 = vst [vmem:[#allocation22_spill] sm:$0xff] %v6578_v47  ;;  %s6237_s0 = sld [smem:[#allocation2 + $0x28]] }
  0x2b   :  { %v6821_v2 = vstv %s6229_s20  ;;  %s6238_s25 = sld [smem:[#allocation2 + $0x29]] }
  0x2c   :  { %v561_v50 = vsel %vm306_vm1, %v559_v46, %v560_v45  ;;  %12321 = vst [vmem:[#allocation41_spill] sm:$0xff] %v6821_v2  ;;  %s6240_s1 = sld [smem:[#allocation2 + $0x2b]] }
  0x2d   :  { %s6241_s26 = sld [smem:[#allocation2 + $0x2c]] }
  0x2e   :  { %s6243_s27 = sld [smem:[#allocation2 + $0x2e]] }
  0x2f   :  { %s6244_s29 = sld [smem:[#allocation2 + $0x2f]] }
  0x30   :  { %s6246_s30 = sld [smem:[#allocation2 + $0x31]] }
  0x31   :  { %256 = vrot.lane.b32.xlu2 %v248_v22, %s6371_s28  ;;  %v468_v22 = vmul.f32 %v6522_v10, %v6501_v58  ;;  %s6247_s4 = sld [smem:[#allocation2 + $0x32]] }
  0x32   :  { %254 = vrot.lane.b32.xlu1 %v249_v27, %s6371_s28  ;;  %252 = vrot.lane.b32.xlu0 %v245_v16, %s6371_s28  ;;  %v474_v16 = vrot.slane %v466_v14, 1  ;;  %v499_v27 = vmul.f32 %v6549_v26, %v6501_v58  ;;  %s6249_s5 = sld [smem:[#allocation2 + $0x34]] }
  0x33   :  { %v477_v25 = vrot.slane %v468_v22, 1  ;;  %v6621_v22 = vld [vmem:[#allocation7 + $0x20] sm:$0xff]  ;;  %s6250_s6 = sld [smem:[#allocation2 + $0x35]] }
  0x34   :  { %v476_v18 = vsel %vm220_vm0, %v474_v16, %v475_v17  ;;  %s6252_s7 = sld [smem:[#allocation2 + $0x37]] }
  0x35   :  { %v479_v29 = vsel %vm220_vm0, %v477_v25, %v478_v23  ;;  %s6253_s8 = sld [smem:[#allocation2 + $0x38]] }
  0x36   :  { %s6255_s9 = sld [smem:[#allocation2 + $0x3a]] }
  0x37   :  { %s6256_s10 = sld [smem:[#allocation2 + $0x3b]] }
  0x38   :  { %s6267_s20 = sld [smem:[#allocation2 + $0x46]] }
  0x39   :  { %285 = vrot.lane.b32.xlu2 %v280_v35, %s6370_s2 }
  0x3a   :  { %283 = vrot.lane.b32.xlu1 %v276_v32, %s6370_s2  ;;  %281 = vrot.lane.b32.xlu0 %v277_v36, %s6370_s2  ;;  %v508_v32 = vrot.slane %v499_v27, 1  ;;  %v506_v36 = vrot.slane %v498_v30, 1  ;;  %v6636_v30 = vstv %s6217_s12  ;;  %s6259_s12 = sld [smem:[#allocation2 + $0x3e]] }
  0x3b   :  { %12304 = vst [vmem:[#allocation24_spill] sm:$0xff] %v6636_v30 }
  0x41   :  { %338 = vrot.lane.b32.xlu2 %v331_v39, %s6371_s28  ;;  %v510_v39 = vsel %vm220_vm0, %v508_v32, %v509_v33  ;;  %v6640_v32 = vld [vmem:[#allocation7 + $0x58] sm:$0xff] }
  0x42   :  { %336 = vrot.lane.b32.xlu1 %v332_v44, %s6371_s28  ;;  %287 = vrot.lane.b32.xlu0 %v279_v31, %s6370_s2  ;;  %v497_v31 = vmul.f32 %v6549_v26, %v6507_v61 }
  0x44   :  { %v505_v37 = vrot.slane %v497_v31, 1 }
  0x46   :  { %v507_v40 = vsel %vm220_vm0, %v505_v37, %v506_v36 }
  0x49   :  { %367 = vrot.lane.b32.xlu2 %v363_v51, %s6370_s2  ;;  %v554_v51 = vmul.f32 %v6565_v38, %v6520_v6 }
  0x4a   :  { %342 = vrot.lane.b32.xlu1 %v334_v49, %s6371_s28  ;;  %340 = vrot.lane.b32.xlu0 %v335_v52, %s6371_s28  ;;  %v583_v49 = vmul.f32 %v6578_v47, %v6505_v60  ;;  %v553_v52 = vmul.f32 %v6565_v38, %v6501_v58 }
  0x4b   :  { %v563_v56 = vrot.slane %v554_v51, 2 }
  0x4c   :  { %v591_v54 = vrot.slane %v583_v49, 2 }
  0x51   :  { %373 = vrot.lane.b32.xlu2 %v365_v55, %s6370_s2 }
  0x52   :  { %371 = vrot.lane.b32.xlu1 %v366_v57, %s6370_s2  ;;  %369 = vrot.lane.b32.xlu0 %v362_v48, %s6370_s2  ;;  %v582_v48 = vmul.f32 %v6578_v47, %v6507_v61  ;;  %v562_v57 = vrot.slane %v553_v52, 2 }
  0x54   :  { %v590_v53 = vrot.slane %v582_v48, 2 }
  0x59   :  { %405 = vrot.lane.b32.xlu2 %v395_v62, %s6371_s28  ;;  %v592_v62 = vsel %vm306_vm1, %v590_v53, %v591_v54  ;;  %v650_v53 = vmul.f32 %v6636_v30, %v6640_v32 }
  0x5a   :  { %403 = vrot.lane.b32.xlu1 %v394_v63, %s6371_s28  ;;  %401 = vrot.lane.b32.xlu0 %v393_v3, %s6371_s28  ;;  %v564_v63 = vsel %vm306_vm1, %v562_v57, %v563_v56  ;;  %v585_v3 = vmul.f32 %v6578_v47, %v6520_v6 }
  0x61   :  { %428 = vrot.lane.b32.xlu2 %v419_v11, %s6370_s2  ;;  %v584_v11 = vmul.f32 %v6578_v47, %v6501_v58 }
  0x62   :  { %426 = vrot.lane.b32.xlu1 %v418_v12, %s6370_s2  ;;  %407 = vrot.lane.b32.xlu0 %v396_v13, %s6371_s28  ;;  %v594_v13 = vrot.slane %v585_v3, 2 }
  0x63   :  { %v593_v14 = vrot.slane %v584_v11, 2  ;;  %v6681_v11 = vstv %s6220_s14  ;;  %s6262_s14 = sld [smem:[#allocation2 + $0x41]] }
  0x64   :  { %12306 = vst [vmem:[#allocation26_spill] sm:$0xff] %v6681_v11 }
  0x69   :  { %480 = vrot.lane.b32.xlu2 %v476_v18, %s6371_s28  ;;  %v6613_v18 = vld [vmem:[#allocation7 + $0x50] sm:$0xff] }
  0x6a   :  { %432 = vrot.lane.b32.xlu1 %v421_v19, %s6370_s2  ;;  %430 = vrot.lane.b32.xlu0 %v420_v20, %s6370_s2  ;;  %v6615_v19 = vstv %s6216_s11  ;;  %s6258_s11 = sld [smem:[#allocation2 + $0x3d]] }
  0x6b   :  { %12303 = vst [vmem:[#allocation23_spill] sm:$0xff] %v6615_v19  ;;  %v624_v27 = vmul.f32 %v6615_v19, %v6613_v18  ;;  %v623_v28 = vmul.f32 %v6615_v19, %v6619_v21  ;;  %v625_v42 = vmul.f32 %v6615_v19, %v6640_v32 }
  0x71   :  { %486 = vrot.lane.b32.xlu2 %v478_v23, %s6371_s28 }
  0x72   :  { %484 = vrot.lane.b32.xlu1 %v479_v29, %s6371_s28  ;;  %482 = vrot.lane.b32.xlu0 %v475_v17, %s6371_s28  ;;  %v595_v17 = vsel %vm306_vm1, %v593_v14, %v594_v13  ;;  %v622_v29 = vmul.f32 %v6615_v19, %v6621_v22 }
  0x73   :  { %v6563_v35 = vpop.permute.xlu2 %195 }
  0x79   :  { %515 = vrot.lane.b32.xlu2 %v510_v39, %s6370_s2  ;;  %v648_v39 = vmul.f32 %v6636_v30, %v6619_v21 }
  0x7a   :  { %513 = vrot.lane.b32.xlu1 %v506_v36, %s6370_s2  ;;  %511 = vrot.lane.b32.xlu0 %v507_v40, %s6370_s2  ;;  %v647_v40 = vmul.f32 %v6636_v30, %v6621_v22 }
  0x7b   :  { %v6576_v44 = vpop.permute.xlu2 %197 }
  0x81   :  { %567 = vrot.lane.b32.xlu2 %v560_v45, %s6371_s28 }
  0x82   :  { %565 = vrot.lane.b32.xlu1 %v561_v50, %s6371_s28  ;;  %517 = vrot.lane.b32.xlu0 %v509_v33, %s6370_s2  ;;  %v6642_v33 = vstv %s6219_s13  ;;  %s6261_s13 = sld [smem:[#allocation2 + $0x40]] }
  0x83   :  { %v6592_v55 = vpop.permute.xlu2 %250  ;;  %12305 = vst [vmem:[#allocation25_spill] sm:$0xff] %v6642_v33  ;;  %v695_v43 = vmul.f32 %v6642_v33, %v6621_v22  ;;  %v696_v45 = vmul.f32 %v6642_v33, %v6619_v21  ;;  %v697_v57 = vmul.f32 %v6642_v33, %v6613_v18 }
  0x85   :  { %v703_v46 = vrot.slane %v695_v43, 1  ;;  %v704_v48 = vrot.slane %v696_v45, 1  ;;  %v706_v3 = vrot.slane %v697_v57, 1 }
  0x87   :  { %v705_v52 = vsel %vm220_vm0, %v703_v46, %v704_v48 }
  0x89   :  { %596 = vrot.lane.b32.xlu2 %v592_v62, %s6370_s2 }
  0x8a   :  { %571 = vrot.lane.b32.xlu1 %v563_v56, %s6371_s28  ;;  %569 = vrot.lane.b32.xlu0 %v564_v63, %s6371_s28  ;;  %v698_v56 = vmul.f32 %v6642_v33, %v6640_v32 }
  0x8b   :  { %v6603_v12 = vpop.permute.xlu2 %256 }
  0x8c   :  { %v6605_v15 = vpop.permute.xlu1 %174  ;;  %v6607_v16 = vpop.permute.xlu0 %170  ;;  %v707_v63 = vrot.slane %v698_v56, 1 }
  0x91   :  { %602 = vrot.lane.b32.xlu2 %v594_v13, %s6370_s2 }
  0x92   :  { %600 = vrot.lane.b32.xlu1 %v595_v17, %s6370_s2  ;;  %598 = vrot.lane.b32.xlu0 %v591_v54, %s6370_s2  ;;  %v649_v54 = vmul.f32 %v6636_v30, %v6613_v18  ;;  %v728_v17 = vmul.f32 %v6681_v11, %v6613_v18 }
  0x93   :  { %v6617_v20 = vpop.permute.xlu2 %285 }
  0x94   :  { %v6623_v23 = vpop.permute.xlu1 %176  ;;  %v6625_v25 = vpop.permute.xlu0 %172 }
  0x99   :  { %634 = vrot.lane.b32.xlu2 %v624_v27, %s6371_s28  ;;  %v729_v27 = vmul.f32 %v6681_v11, %v6640_v32 }
  0x9a   :  { %632 = vrot.lane.b32.xlu1 %v623_v28, %s6371_s28  ;;  %630 = vrot.lane.b32.xlu0 %v622_v29, %s6371_s28  ;;  %v708_v28 = vsel %vm220_vm0, %v706_v3, %v707_v63  ;;  %v727_v29 = vmul.f32 %v6681_v11, %v6619_v21 }
  0x9b   :  { %v6638_v31 = vpop.permute.xlu2 %338 }
  0x9c   :  { %v6644_v36 = vpop.permute.xlu1 %201  ;;  %v6646_v37 = vpop.permute.xlu0 %199  ;;  %v735_v45 = vrot.slane %v727_v29, 1 }
  0xa1   :  { %657 = vrot.lane.b32.xlu2 %v648_v39, %s6370_s2  ;;  %v726_v39 = vmul.f32 %v6681_v11, %v6621_v22 }
  0xa2   :  { %655 = vrot.lane.b32.xlu1 %v647_v40, %s6370_s2  ;;  %636 = vrot.lane.b32.xlu0 %v625_v42, %s6371_s28  ;;  %v737_v40 = vrot.slane %v728_v17, 1  ;;  %v738_v42 = vrot.slane %v729_v27, 1 }
  0xa3   :  { %v6661_v49 = vpop.permute.xlu2 %367  ;;  %v734_v46 = vrot.slane %v726_v39, 1 }
  0xa4   :  { %v6663_v50 = vpop.permute.xlu1 %254  ;;  %v6665_v51 = vpop.permute.xlu0 %252  ;;  %v739_v56 = vsel %vm220_vm0, %v737_v40, %v738_v42 }
  0xa5   :  { %v736_v57 = vsel %vm220_vm0, %v734_v46, %v735_v45 }
  0xa9   :  { %709 = vrot.lane.b32.xlu2 %v705_v52, %s6371_s28 }
  0xaa   :  { %661 = vrot.lane.b32.xlu1 %v650_v53, %s6370_s2  ;;  %659 = vrot.lane.b32.xlu0 %v649_v54, %s6370_s2  ;;  %v6705_v54 = vstv %s6222_s15  ;;  %s6264_s15 = sld [smem:[#allocation2 + $0x43]] }
  0xab   :  { %v6679_v62 = vpop.permute.xlu2 %373  ;;  %12307 = vst [vmem:[#allocation27_spill] sm:$0xff] %v6705_v54 }
  0xac   :  { %v6683_v13 = vpop.permute.xlu1 %283  ;;  %v6685_v14 = vpop.permute.xlu0 %281 }
  0xb1   :  { %715 = vrot.lane.b32.xlu2 %v707_v63, %s6371_s28  ;;  %v780_v63 = vmul.f32 %v6705_v54, %v6621_v22 }
  0xb2   :  { %713 = vrot.lane.b32.xlu1 %v708_v28, %s6371_s28  ;;  %711 = vrot.lane.b32.xlu0 %v704_v48, %s6371_s28  ;;  %v781_v48 = vmul.f32 %v6705_v54, %v6619_v21  ;;  %v6718_v28 = vstv %s6223_s16  ;;  %s6265_s16 = sld [smem:[#allocation2 + $0x44]] }
  0xb3   :  { %v6699_v43 = vpop.permute.xlu2 %405  ;;  %v788_v27 = vrot.slane %v780_v63, 2  ;;  %12308 = vst [vmem:[#allocation28_spill] sm:$0xff] %v6718_v28  ;;  %v811_v40 = vmul.f32 %v6718_v28, %v6621_v22  ;;  %v812_v46 = vmul.f32 %v6718_v28, %v6619_v21 }
  0xb4   :  { %v6701_v52 = vpop.permute.xlu1 %336  ;;  %v6703_v53 = vpop.permute.xlu0 %287  ;;  %v789_v17 = vrot.slane %v781_v48, 2 }
  0xb5   :  { %v819_v48 = vrot.slane %v811_v40, 2  ;;  %v820_v63 = vrot.slane %v812_v46, 2 }
  0xb7   :  { %v821_v47 = vsel %vm306_vm1, %v819_v48, %v820_v63 }
  0xb9   :  { %744 = vrot.lane.b32.xlu2 %v739_v56, %s6370_s2  ;;  %v783_v56 = vmul.f32 %v6705_v54, %v6640_v32 }
  0xba   :  { %742 = vrot.lane.b32.xlu1 %v735_v45, %s6370_s2  ;;  %740 = vrot.lane.b32.xlu0 %v736_v57, %s6370_s2  ;;  %v790_v45 = vsel %vm306_vm1, %v788_v27, %v789_v17  ;;  %v782_v57 = vmul.f32 %v6705_v54, %v6613_v18 }
  0xbb   :  { %v6716_v3 = vpop.permute.xlu2 %428  ;;  %v792_v33 = vrot.slane %v783_v56, 2 }
  0xbc   :  { %v6720_v29 = vpop.permute.xlu1 %342  ;;  %v6722_v39 = vpop.permute.xlu0 %340  ;;  %v791_v30 = vrot.slane %v782_v57, 2 }
  0xbe   :  { %v793_v54 = vsel %vm306_vm1, %v791_v30, %v792_v33 }
  0xc1   :  { %796 = vrot.lane.b32.xlu2 %v789_v17, %s6371_s28  ;;  %v814_v17 = vmul.f32 %v6718_v28, %v6640_v32 }
  0xc2   :  { %794 = vrot.lane.b32.xlu1 %v790_v45, %s6371_s28  ;;  %746 = vrot.lane.b32.xlu0 %v738_v42, %s6370_s2  ;;  %v813_v42 = vmul.f32 %v6718_v28, %v6613_v18 }
  0xc3   :  { %v6736_v11 = vpop.permute.xlu2 %480  ;;  %v823_v46 = vrot.slane %v814_v17, 2 }
  0xc4   :  { %12309 = vst [vmem:[#allocation29_spill] sm:$0xff] %v6736_v11  ;;  %v6738_v19 = vpop.permute.xlu1 %371  ;;  %v6740_v27 = vpop.permute.xlu0 %369  ;;  %v822_v45 = vrot.slane %v813_v42, 2 }
  0xc6   :  { %v824_v57 = vsel %vm306_vm1, %v822_v45, %v823_v46 }
  0xc9   :  { %825 = vrot.lane.b32.xlu2 %v821_v47, %s6370_s2  ;;  %v6761_v47 = vstv %s6225_s17  ;;  %s55_s17 = sld [smem:[#allocation2]] }
  0xca   :  { %800 = vrot.lane.b32.xlu1 %v792_v33, %s6371_s28  ;;  %798 = vrot.lane.b32.xlu0 %v793_v54, %s6371_s28  ;;  %12311 = vst [vmem:[#allocation31_spill] sm:$0xff] %v6761_v47  ;;  %v854_v17 = vmul.f32 %v6761_v47, %v6403_v1  ;;  %v853_v42 = vmul.f32 %v6761_v47, %v6418_v7 }
  0xcb   :  { %v6751_v40 = vpop.permute.xlu2 %486 }
  0xcc   :  { %12310 = vst [vmem:[#allocation30_spill] sm:$0xff] %v6751_v40  ;;  %v6753_v56 = vpop.permute.xlu1 %403  ;;  %v6755_v30 = vpop.permute.xlu0 %401 }
  0xd1   :  { %831 = vrot.lane.b32.xlu2 %v823_v46, %s6370_s2  ;;  %v852_v46 = vmul.f32 %v6761_v47, %v6401_v0 }
  0xd2   :  { %829 = vrot.lane.b32.xlu1 %v824_v57, %s6370_s2  ;;  %827 = vrot.lane.b32.xlu0 %v820_v63, %s6370_s2  ;;  %v6778_v63 = vstv %s6226_s18  ;;  %v6782_v57 = vstv %s6228_s19  ;;  %s136_s18 = sld [smem:[#allocation5]] }
  0xd3   :  { %v6763_v33 = vpop.permute.xlu2 %515  ;;  %12313 = vst [vmem:[#allocation33_spill] sm:$0xff] %v6778_v63  ;;  %v878_v26 = vmul.f32 %v6778_v63, %v6418_v7  ;;  %v926_v10 = vmul.f32 %v6782_v57, %v6418_v7  ;;  %v880_v9 = vmul.f32 %v6778_v63, %v6420_v8  ;;  %s6200_s19 = sld [smem:[#allocation2 + $0x3]] }
  0xd4   :  { %12312 = vst [vmem:[#allocation32_spill] sm:$0xff] %v6763_v33  ;;  %v6765_v54 = vpop.permute.xlu1 %426  ;;  %v6767_v48 = vpop.permute.xlu0 %407 }
  0xd5   :  { %12315 = vst [vmem:[#allocation35_spill] sm:$0xff] %v6782_v57  ;;  %v934_v59 = vrot.slane %v926_v10, 1  ;;  %v927_v10 = vmul.f32 %v6782_v57, %v6403_v1 }
  0xd9   :  { %864 = vrot.lane.b32.xlu2 %v854_v17, %s6371_s28  ;;  %v877_v17 = vmul.f32 %v6778_v63, %v6401_v0 }
  0xda   :  { %862 = vrot.lane.b32.xlu1 %v853_v42, %s6371_s28  ;;  %860 = vrot.lane.b32.xlu0 %v852_v46, %s6371_s28  ;;  %v855_v42 = vmul.f32 %v6761_v47, %v6420_v8  ;;  %v925_v46 = vmul.f32 %v6782_v57, %v6401_v0 }
  0xdb   :  { %v6780_v45 = vpop.permute.xlu2 %567 }
  0xdc   :  { %12314 = vst [vmem:[#allocation34_spill] sm:$0xff] %v6780_v45  ;;  %v6784_v28 = vpop.permute.xlu1 %432  ;;  %v6786_v38 = vpop.permute.xlu0 %430  ;;  %v933_v5 = vrot.slane %v925_v46, 1  ;;  %v936_v46 = vrot.slane %v927_v10, 1 }
  0xdd   :  { %12316 = vst [vmem:[#allocation36_spill] sm:$0xff] %v6786_v38 }
  0xde   :  { %v935_v24 = vsel %vm220_vm0, %v933_v5, %v934_v59 }
  0xe1   :  { %887 = vrot.lane.b32.xlu2 %v878_v26, %s6370_s2  ;;  %v879_v26 = vmul.f32 %v6778_v63, %v6403_v1 }
  0xe2   :  { %885 = vrot.lane.b32.xlu1 %v877_v17, %s6370_s2  ;;  %866 = vrot.lane.b32.xlu0 %v855_v42, %s6371_s28  ;;  %v928_v17 = vmul.f32 %v6782_v57, %v6420_v8  ;;  %v958_v57 = vmul.f32 %v6821_v2, %v6403_v1 }
  0xe3   :  { %v6801_v41 = vpop.permute.xlu2 %596 }
  0xe4   :  { %12317 = vst [vmem:[#allocation37_spill] sm:$0xff] %v6801_v41  ;;  %v6803_v34 = vpop.permute.xlu1 %484  ;;  %v6805_v47 = vpop.permute.xlu0 %482  ;;  %v937_v5 = vrot.slane %v928_v17, 1  ;;  %v956_v17 = vmul.f32 %v6821_v2, %v6401_v0  ;;  %v967_v10 = vrot.slane %v958_v57, 1 }
  0xe5   :  { %12318 = vst [vmem:[#allocation38_spill] sm:$0xff] %v6803_v34 }
  0xe6   :  { %12319 = vst [vmem:[#allocation39_spill] sm:$0xff] %v6805_v47  ;;  %v964_v33 = vrot.slane %v956_v17, 1  ;;  %v6858_v17 = vstv %s6232_s22  ;;  %s7446_s22 = sld [smem:[#allocation2 + $0x6]] }
  0xe7   :  { %12329 = vst [vmem:[#allocation49_spill] sm:$0xff] %v6858_v17 }
  0xe9   :  { %939 = vrot.lane.b32.xlu2 %v935_v24, %s6371_s28  ;;  %v959_v24 = vmul.f32 %v6821_v2, %v6420_v8 }
  0xea   :  { %891 = vrot.lane.b32.xlu1 %v880_v9, %s6370_s2  ;;  %889 = vrot.lane.b32.xlu0 %v879_v26, %s6370_s2  ;;  %v938_v9 = vsel %vm220_vm0, %v936_v46, %v937_v5  ;;  %v957_v26 = vmul.f32 %v6821_v2, %v6418_v7 }
  0xeb   :  { %v6819_v42 = vpop.permute.xlu2 %602 }
  0xec   :  { %12320 = vst [vmem:[#allocation40_spill] sm:$0xff] %v6819_v42  ;;  %v6823_v4 = vpop.permute.xlu1 %513  ;;  %v6825_v63 = vpop.permute.xlu0 %511  ;;  %v968_v42 = vrot.slane %v959_v24, 1  ;;  %v965_v45 = vrot.slane %v957_v26, 1 }
  0xed   :  { %12322 = vst [vmem:[#allocation42_spill] sm:$0xff] %v6823_v4 }
  0xee   :  { %12323 = vst [vmem:[#allocation43_spill] sm:$0xff] %v6825_v63  ;;  %v6845_v63 = vstv %s6231_s21  ;;  %v969_v2 = vsel %vm220_vm0, %v967_v10, %v968_v42  ;;  %s6268_s21 = sld [smem:[#allocation2 + $0x47]] }
  0xef   :  { %12327 = vst [vmem:[#allocation47_spill] sm:$0xff] %v6845_v63  ;;  %v1010_v57 = vmul.f32 %v6845_v63, %v6401_v0 }
  0xf1   :  { %945 = vrot.lane.b32.xlu2 %v937_v5, %s6371_s28  ;;  %v966_v5 = vsel %vm220_vm0, %v964_v33, %v965_v45  ;;  %v1018_v26 = vrot.slane %v1010_v57, 2 }
  0xf2   :  { %943 = vrot.lane.b32.xlu1 %v938_v9, %s6371_s28  ;;  %941 = vrot.lane.b32.xlu0 %v934_v59, %s6371_s28  ;;  %v1011_v59 = vmul.f32 %v6845_v63, %v6418_v7 }
  0xf3   :  { %v6839_v41 = vpop.permute.xlu2 %634 }
  0xf4   :  { %12324 = vst [vmem:[#allocation44_spill] sm:$0xff] %v6839_v41  ;;  %v6841_v46 = vpop.permute.xlu1 %565  ;;  %v6843_v40 = vpop.permute.xlu0 %517  ;;  %v1019_v9 = vrot.slane %v1011_v59, 2  ;;  %v1041_v41 = vmul.f32 %v6858_v17, %v6401_v0  ;;  %v1012_v59 = vmul.f32 %v6845_v63, %v6403_v1 }
  0xf5   :  { %12325 = vst [vmem:[#allocation45_spill] sm:$0xff] %v6841_v46 }
  0xf6   :  { %12326 = vst [vmem:[#allocation46_spill] sm:$0xff] %v6843_v40  ;;  %v1049_v57 = vrot.slane %v1041_v41, 2 }
  0xf9   :  { %974 = vrot.lane.b32.xlu2 %v969_v2, %s6370_s2  ;;  %v1042_v2 = vmul.f32 %v6858_v17, %v6418_v7  ;;  %v1021_v7 = vrot.slane %v1012_v59, 2 }
  0xfa   :  { %972 = vrot.lane.b32.xlu1 %v965_v45, %s6370_s2  ;;  %970 = vrot.lane.b32.xlu0 %v966_v5, %s6370_s2  ;;  %v1020_v45 = vsel %vm306_vm1, %v1018_v26, %v1019_v9  ;;  %v1013_v5 = vmul.f32 %v6845_v63, %v6420_v8 }
  0xfb   :  { %v6856_v24 = vpop.permute.xlu2 %657 }
  0xfc   :  { %12328 = vst [vmem:[#allocation48_spill] sm:$0xff] %v6856_v24  ;;  %v6860_v10 = vpop.permute.xlu1 %571  ;;  %v6862_v33 = vpop.permute.xlu0 %569  ;;  %v1050_v24 = vrot.slane %v1042_v2, 2 }
  0xfd   :  { %12330 = vst [vmem:[#allocation50_spill] sm:$0xff] %v6860_v10 }
  0xfe   :  { %12331 = vst [vmem:[#allocation51_spill] sm:$0xff] %v6862_v33  ;;  %v1022_v33 = vrot.slane %v1013_v5, 2  ;;  %v1051_v46 = vsel %vm306_vm1, %v1049_v57, %v1050_v24 }
 0x100   :  { %v1023_v63 = vsel %vm306_vm1, %v1021_v7, %v1022_v33 }
 0x101   :  { %1026 = vrot.lane.b32.xlu2 %v1019_v9, %s6371_s28  ;;  %v1044_v9 = vmul.f32 %v6858_v17, %v6420_v8 }
 0x102   :  { %1024 = vrot.lane.b32.xlu1 %v1020_v45, %s6371_s28  ;;  %976 = vrot.lane.b32.xlu0 %v968_v42, %s6370_s2  ;;  %v1043_v42 = vmul.f32 %v6858_v17, %v6403_v1  ;;  %v6901_v1 = vstv %s6234_s23  ;;  %s6206_s23 = sld [smem:[#allocation2 + $0x9]] }
 0x103   :  { %v6876_v0 = vpop.permute.xlu2 %709  ;;  %v1053_v2 = vrot.slane %v1044_v9, 2  ;;  %12338 = vst [vmem:[#allocation58_spill] sm:$0xff] %v6901_v1  ;;  %v1083_v57 = vmul.f32 %v6901_v1, %v6501_v58  ;;  %v1082_v7 = vmul.f32 %v6901_v1, %v6505_v60  ;;  %v1081_v9 = vmul.f32 %v6901_v1, %v6507_v61 }
 0x104   :  { %12332 = vst [vmem:[#allocation52_spill] sm:$0xff] %v6876_v0  ;;  %v6878_v10 = vpop.permute.xlu1 %600  ;;  %v6880_v26 = vpop.permute.xlu0 %598  ;;  %v1052_v45 = vrot.slane %v1043_v42, 2 }
 0x105   :  { %12333 = vst [vmem:[#allocation53_spill] sm:$0xff] %v6878_v10 }
 0x106   :  { %12334 = vst [vmem:[#allocation54_spill] sm:$0xff] %v6880_v26  ;;  %v1054_v8 = vsel %vm306_vm1, %v1052_v45, %v1053_v2 }
 0x109   :  { %1055 = vrot.lane.b32.xlu2 %v1051_v46, %s6370_s2 }
 0x10a   :  { %1030 = vrot.lane.b32.xlu1 %v1022_v33, %s6371_s28  ;;  %1028 = vrot.lane.b32.xlu0 %v1023_v63, %s6371_s28 }
 0x10b   :  { %v6891_v41 = vpop.permute.xlu2 %715 }
 0x10c   :  { %12335 = vst [vmem:[#allocation55_spill] sm:$0xff] %v6891_v41  ;;  %v6893_v5 = vpop.permute.xlu1 %632  ;;  %v6895_v59 = vpop.permute.xlu0 %630 }
 0x10d   :  { %12336 = vst [vmem:[#allocation56_spill] sm:$0xff] %v6893_v5 }
 0x10e   :  { %12337 = vst [vmem:[#allocation57_spill] sm:$0xff] %v6895_v59  ;;  %v6985_v59 = vstv %s6240_s1  ;;  %s7561_s1 = sld [smem:[#allocation2 + $0x4c]] }
 0x10f   :  { %12357 = vst [vmem:[#allocation77_spill] sm:$0xff] %v6985_v59 }
 0x111   :  { %1061 = vrot.lane.b32.xlu2 %v1053_v2, %s6370_s2  ;;  %v6922_v2 = vstv %s6237_s0  ;;  %s6270_s0 = sld [smem:[#allocation2 + $0x49]] }
 0x112   :  { %1059 = vrot.lane.b32.xlu1 %v1054_v8, %s6370_s2  ;;  %1057 = vrot.lane.b32.xlu0 %v1050_v24, %s6370_s2  ;;  %v6918_v24 = vstv %s6235_s24  ;;  %12344 = vst [vmem:[#allocation64_spill] sm:$0xff] %v6922_v2  ;;  %s6209_s24 = sld [smem:[#allocation2 + $0xc]] }
 0x113   :  { %v6903_v63 = vpop.permute.xlu2 %744  ;;  %12342 = vst [vmem:[#allocation62_spill] sm:$0xff] %v6918_v24  ;;  %v1107_v17 = vmul.f32 %v6918_v24, %v6505_v60 }
 0x114   :  { %12339 = vst [vmem:[#allocation59_spill] sm:$0xff] %v6903_v63  ;;  %v6905_v46 = vpop.permute.xlu1 %655  ;;  %v6907_v33 = vpop.permute.xlu0 %636 }
 0x115   :  { %12340 = vst [vmem:[#allocation60_spill] sm:$0xff] %v6905_v46 }
 0x116   :  { %12341 = vst [vmem:[#allocation61_spill] sm:$0xff] %v6907_v33  ;;  %v1109_v33 = vmul.f32 %v6918_v24, %v6520_v6 }
 0x119   :  { %1093 = vrot.lane.b32.xlu2 %v1083_v57, %s6371_s28  ;;  %v1106_v57 = vmul.f32 %v6918_v24, %v6507_v61 }
 0x11a   :  { %1091 = vrot.lane.b32.xlu1 %v1082_v7, %s6371_s28  ;;  %1089 = vrot.lane.b32.xlu0 %v1081_v9, %s6371_s28  ;;  %v1084_v7 = vmul.f32 %v6901_v1, %v6520_v6  ;;  %v1154_v9 = vmul.f32 %v6922_v2, %v6507_v61 }
 0x11b   :  { %v6920_v42 = vpop.permute.xlu2 %796 }
 0x11c   :  { %12343 = vst [vmem:[#allocation63_spill] sm:$0xff] %v6920_v42  ;;  %v6924_v45 = vpop.permute.xlu1 %661  ;;  %v6926_v8 = vpop.permute.xlu0 %659  ;;  %v1155_v42 = vmul.f32 %v6922_v2, %v6505_v60  ;;  %v1162_v63 = vrot.slane %v1154_v9, 1 }
 0x11d   :  { %12345 = vst [vmem:[#allocation65_spill] sm:$0xff] %v6924_v45 }
 0x11e   :  { %12346 = vst [vmem:[#allocation66_spill] sm:$0xff] %v6926_v8  ;;  %v1163_v41 = vrot.slane %v1155_v42, 1  ;;  %v1156_v42 = vmul.f32 %v6922_v2, %v6501_v58 }
 0x120   :  { %v1164_v45 = vsel %vm220_vm0, %v1162_v63, %v1163_v41  ;;  %v1165_v9 = vrot.slane %v1156_v42, 1 }
 0x121   :  { %1116 = vrot.lane.b32.xlu2 %v1107_v17, %s6370_s2  ;;  %v1108_v17 = vmul.f32 %v6918_v24, %v6501_v58 }
 0x122   :  { %1114 = vrot.lane.b32.xlu1 %v1106_v57, %s6370_s2  ;;  %1095 = vrot.lane.b32.xlu0 %v1084_v7, %s6371_s28  ;;  %v1157_v57 = vmul.f32 %v6922_v2, %v6520_v6 }
 0x123   :  { %v6941_v0 = vpop.permute.xlu2 %825 }
 0x124   :  { %12347 = vst [vmem:[#allocation67_spill] sm:$0xff] %v6941_v0  ;;  %v6943_v8 = vpop.permute.xlu1 %713  ;;  %v6945_v1 = vpop.permute.xlu0 %711  ;;  %v1166_v63 = vrot.slane %v1157_v57, 1  ;;  %v6961_v0 = vstv %s6238_s25  ;;  %s7553_s25 = sld [smem:[#allocation2 + $0x4a]] }
 0x125   :  { %12348 = vst [vmem:[#allocation68_spill] sm:$0xff] %v6943_v8  ;;  %v1187_v2 = vmul.f32 %v6961_v0, %v6501_v58  ;;  %v1185_v57 = vmul.f32 %v6961_v0, %v6507_v61 }
 0x126   :  { %12349 = vst [vmem:[#allocation69_spill] sm:$0xff] %v6945_v1 }
 0x127   :  { %12351 = vst [vmem:[#allocation71_spill] sm:$0xff] %v6961_v0  ;;  %v1196_v42 = vrot.slane %v1187_v2, 1  ;;  %v1193_v8 = vrot.slane %v1185_v57, 1  ;;  %v1239_v2 = vmul.f32 %v6985_v59, %v6507_v61  ;;  %v6998_v57 = vstv %s6241_s26  ;;  %s7575_s26 = sld [smem:[#allocation2 + $0xf]] }
 0x128   :  { %12359 = vst [vmem:[#allocation79_spill] sm:$0xff] %v6998_v57 }
 0x129   :  { %1168 = vrot.lane.b32.xlu2 %v1164_v45, %s6371_s28  ;;  %v1188_v45 = vmul.f32 %v6961_v0, %v6520_v6 }
 0x12a   :  { %1120 = vrot.lane.b32.xlu1 %v1109_v33, %s6370_s2  ;;  %1118 = vrot.lane.b32.xlu0 %v1108_v17, %s6370_s2  ;;  %v1167_v33 = vsel %vm220_vm0, %v1165_v9, %v1166_v63  ;;  %v1186_v17 = vmul.f32 %v6961_v0, %v6505_v60 }
 0x12b   :  { %v6959_v7 = vpop.permute.xlu2 %831 }
 0x12c   :  { %12350 = vst [vmem:[#allocation70_spill] sm:$0xff] %v6959_v7  ;;  %v6963_v1 = vpop.permute.xlu1 %742  ;;  %v6965_v24 = vpop.permute.xlu0 %740  ;;  %v1197_v7 = vrot.slane %v1188_v45, 1 }
 0x12d   :  { %12352 = vst [vmem:[#allocation72_spill] sm:$0xff] %v6963_v1 }
 0x12e   :  { %12353 = vst [vmem:[#allocation73_spill] sm:$0xff] %v6965_v24  ;;  %v1194_v24 = vrot.slane %v1186_v17, 1  ;;  %v1198_v0 = vsel %vm220_vm0, %v1196_v42, %v1197_v7  ;;  %v1247_v17 = vrot.slane %v1239_v2, 2 }
 0x131   :  { %1174 = vrot.lane.b32.xlu2 %v1166_v63, %s6371_s28  ;;  %v1195_v63 = vsel %vm220_vm0, %v1193_v8, %v1194_v24 }
 0x132   :  { %1172 = vrot.lane.b32.xlu1 %v1167_v33, %s6371_s28  ;;  %1170 = vrot.lane.b32.xlu0 %v1163_v41, %s6371_s28  ;;  %v1240_v41 = vmul.f32 %v6985_v59, %v6505_v60 }
 0x133   :  { %v6979_v1 = vpop.permute.xlu2 %864 }
 0x134   :  { %12354 = vst [vmem:[#allocation74_spill] sm:$0xff] %v6979_v1  ;;  %v6981_v9 = vpop.permute.xlu1 %794  ;;  %v6983_v46 = vpop.permute.xlu0 %746  ;;  %v1248_v33 = vrot.slane %v1240_v41, 2  ;;  %v1241_v41 = vmul.f32 %v6985_v59, %v6501_v58 }
 0x135   :  { %12355 = vst [vmem:[#allocation75_spill] sm:$0xff] %v6981_v9  ;;  %v1270_v9 = vmul.f32 %v6998_v57, %v6507_v61 }
 0x136   :  { %12356 = vst [vmem:[#allocation76_spill] sm:$0xff] %v6983_v46 }
 0x137   :  { %v1278_v2 = vrot.slane %v1270_v9, 2 }
 0x139   :  { %1203 = vrot.lane.b32.xlu2 %v1198_v0, %s6370_s2  ;;  %v1271_v0 = vmul.f32 %v6998_v57, %v6505_v60  ;;  %v1250_v60 = vrot.slane %v1241_v41, 2 }
 0x13a   :  { %1201 = vrot.lane.b32.xlu1 %v1194_v24, %s6370_s2  ;;  %1199 = vrot.lane.b32.xlu0 %v1195_v63, %s6370_s2  ;;  %v1249_v24 = vsel %vm306_vm1, %v1247_v17, %v1248_v33  ;;  %v1242_v63 = vmul.f32 %v6985_v59, %v6520_v6 }
 0x13b   :  { %v6996_v45 = vpop.permute.xlu2 %887 }
 0x13c   :  { %12358 = vst [vmem:[#allocation78_spill] sm:$0xff] %v6996_v45  ;;  %v7000_v42 = vpop.permute.xlu1 %800  ;;  %v7002_v8 = vpop.permute.xlu0 %798 }
 0x13d   :  { %12360 = vst [vmem:[#allocation80_spill] sm:$0xff] %v7000_v42  ;;  %v1279_v42 = vrot.slane %v1271_v0, 2 }
 0x13e   :  { %12361 = vst [vmem:[#allocation81_spill] sm:$0xff] %v7002_v8  ;;  %v1251_v8 = vrot.slane %v1242_v63, 2 }
 0x13f   :  { %v1280_v45 = vsel %vm306_vm1, %v1278_v2, %v1279_v42 }
 0x140   :  { %v1252_v59 = vsel %vm306_vm1, %v1250_v60, %v1251_v8 }
 0x141   :  { %1255 = vrot.lane.b32.xlu2 %v1248_v33, %s6371_s28  ;;  %v1273_v33 = vmul.f32 %v6998_v57, %v6520_v6 }
 0x142   :  { %1253 = vrot.lane.b32.xlu1 %v1249_v24, %s6371_s28  ;;  %1205 = vrot.lane.b32.xlu0 %v1197_v7, %s6370_s2  ;;  %v1272_v7 = vmul.f32 %v6998_v57, %v6501_v58  ;;  %v7041_v58 = vstv %s6243_s27  ;;  %s7646_s27 = sld [smem:[#allocation2 + $0x12]] }
 0x143   :  { %v7016_v61 = vpop.permute.xlu2 %939  ;;  %v1282_v0 = vrot.slane %v1273_v33, 2  ;;  %12368 = vst [vmem:[#allocation88_spill] sm:$0xff] %v7041_v58  ;;  %v1312_v2 = vmul.f32 %v7041_v58, %v6613_v18  ;;  %v1311_v60 = vmul.f32 %v7041_v58, %v6619_v21  ;;  %v1310_v33 = vmul.f32 %v7041_v58, %v6621_v22 }
 0x144   :  { %12362 = vst [vmem:[#allocation82_spill] sm:$0xff] %v7016_v61  ;;  %v7018_v46 = vpop.permute.xlu1 %829  ;;  %v7020_v17 = vpop.permute.xlu0 %827  ;;  %v1281_v24 = vrot.slane %v1272_v7, 2 }
 0x145   :  { %12363 = vst [vmem:[#allocation83_spill] sm:$0xff] %v7018_v46 }
 0x146   :  { %12364 = vst [vmem:[#allocation84_spill] sm:$0xff] %v7020_v17  ;;  %v1283_v6 = vsel %vm306_vm1, %v1281_v24, %v1282_v0 }
 0x149   :  { %1284 = vrot.lane.b32.xlu2 %v1280_v45, %s6370_s2 }
 0x14a   :  { %1259 = vrot.lane.b32.xlu1 %v1251_v8, %s6371_s28  ;;  %1257 = vrot.lane.b32.xlu0 %v1252_v59, %s6371_s28 }
 0x14b   :  { %v7031_v9 = vpop.permute.xlu2 %945 }
 0x14c   :  { %12365 = vst [vmem:[#allocation85_spill] sm:$0xff] %v7031_v9  ;;  %v7033_v63 = vpop.permute.xlu1 %862  ;;  %v7035_v41 = vpop.permute.xlu0 %860 }
 0x14d   :  { %12366 = vst [vmem:[#allocation86_spill] sm:$0xff] %v7033_v63 }
 0x14e   :  { %12367 = vst [vmem:[#allocation87_spill] sm:$0xff] %v7035_v41 }
 0x151   :  { %1290 = vrot.lane.b32.xlu2 %v1282_v0, %s6370_s2  ;;  %v7062_v0 = vstv %s6246_s30  ;;  %s6274_s30 = sld [smem:[#allocation2 + $0x4d]] }
 0x152   :  { %1288 = vrot.lane.b32.xlu1 %v1283_v6, %s6370_s2  ;;  %1286 = vrot.lane.b32.xlu0 %v1279_v42, %s6370_s2  ;;  %v7058_v42 = vstv %s6244_s29  ;;  %12374 = vst [vmem:[#allocation94_spill] sm:$0xff] %v7062_v0  ;;  %s7650_s29 = sld [smem:[#allocation2 + $0x15]] }
 0x153   :  { %v7043_v59 = vpop.permute.xlu2 %974  ;;  %12372 = vst [vmem:[#allocation92_spill] sm:$0xff] %v7058_v42  ;;  %v1336_v57 = vmul.f32 %v7058_v42, %v6619_v21 }
 0x154   :  { %12369 = vst [vmem:[#allocation89_spill] sm:$0xff] %v7043_v59  ;;  %v7045_v45 = vpop.permute.xlu1 %885  ;;  %v7047_v8 = vpop.permute.xlu0 %866 }
 0x155   :  { %12370 = vst [vmem:[#allocation90_spill] sm:$0xff] %v7045_v45 }
 0x156   :  { %12371 = vst [vmem:[#allocation91_spill] sm:$0xff] %v7047_v8 }
 0x159   :  { %1322 = vrot.lane.b32.xlu2 %v1312_v2, %s6371_s28  ;;  %v1335_v2 = vmul.f32 %v7058_v42, %v6621_v22 }
 0x15a   :  { %1320 = vrot.lane.b32.xlu1 %v1311_v60, %s6371_s28  ;;  %1318 = vrot.lane.b32.xlu0 %v1310_v33, %s6371_s28  ;;  %v1313_v60 = vmul.f32 %v7041_v58, %v6640_v32  ;;  %v1383_v33 = vmul.f32 %v7062_v0, %v6621_v22 }
 0x15b   :  { %v7060_v7 = vpop.permute.xlu2 %1026 }
 0x15c   :  { %12373 = vst [vmem:[#allocation93_spill] sm:$0xff] %v7060_v7  ;;  %v7064_v24 = vpop.permute.xlu1 %891  ;;  %v7066_v6 = vpop.permute.xlu0 %889  ;;  %v1384_v7 = vmul.f32 %v7062_v0, %v6619_v21  ;;  %v1391_v17 = vrot.slane %v1383_v33, 1 }
 0x15d   :  { %12375 = vst [vmem:[#allocation95_spill] sm:$0xff] %v7064_v24  ;;  %v1338_v24 = vmul.f32 %v7058_v42, %v6640_v32 }
 0x15e   :  { %12376 = vst [vmem:[#allocation96_spill] sm:$0xff] %v7066_v6  ;;  %v1392_v9 = vrot.slane %v1384_v7, 1  ;;  %v1385_v7 = vmul.f32 %v7062_v0, %v6613_v18  ;;  %v7125_v6 = vstv %s6249_s5  ;;  %s7706_s5 = sld [smem:[#allocation2 + $0x4f]] }
 0x15f   :  { %12387 = vst [vmem:[#allocation107_spill] sm:$0xff] %v7125_v6 }
 0x160   :  { %v1393_v61 = vsel %vm220_vm0, %v1391_v17, %v1392_v9  ;;  %v1394_v33 = vrot.slane %v1385_v7, 1 }
 0x161   :  { %1345 = vrot.lane.b32.xlu2 %v1336_v57, %s6370_s2  ;;  %v1337_v57 = vmul.f32 %v7058_v42, %v6613_v18 }
 0x162   :  { %1343 = vrot.lane.b32.xlu1 %v1335_v2, %s6370_s2  ;;  %1324 = vrot.lane.b32.xlu0 %v1313_v60, %s6371_s28  ;;  %v1386_v2 = vmul.f32 %v7062_v0, %v6640_v32 }
 0x163   :  { %v7081_v46 = vpop.permute.xlu2 %1055 }
 0x164   :  { %12377 = vst [vmem:[#allocation97_spill] sm:$0xff] %v7081_v46  ;;  %v7083_v59 = vpop.permute.xlu1 %943  ;;  %v7085_v58 = vpop.permute.xlu0 %941  ;;  %v1395_v17 = vrot.slane %v1386_v2, 1  ;;  %v7101_v46 = vstv %s6247_s4  ;;  %s7665_s4 = sld [smem:[#allocation2 + $0x18]] }
 0x165   :  { %12378 = vst [vmem:[#allocation98_spill] sm:$0xff] %v7083_v59  ;;  %v1416_v0 = vmul.f32 %v7101_v46, %v6613_v18  ;;  %v1414_v2 = vmul.f32 %v7101_v46, %v6621_v22 }
 0x166   :  { %12379 = vst [vmem:[#allocation99_spill] sm:$0xff] %v7085_v58 }
 0x167   :  { %12381 = vst [vmem:[#allocation101_spill] sm:$0xff] %v7101_v46  ;;  %v1425_v7 = vrot.slane %v1416_v0, 1  ;;  %v1422_v59 = vrot.slane %v1414_v2, 1  ;;  %v1468_v0 = vmul.f32 %v7125_v6, %v6621_v22  ;;  %v7138_v2 = vstv %s6250_s6  ;;  %s7750_s6 = sld [smem:[#allocation2 + $0x1b]] }
 0x168   :  { %12389 = vst [vmem:[#allocation109_spill] sm:$0xff] %v7138_v2 }
 0x169   :  { %1397 = vrot.lane.b32.xlu2 %v1393_v61, %s6371_s28  ;;  %v1417_v61 = vmul.f32 %v7101_v46, %v6640_v32 }
 0x16a   :  { %1349 = vrot.lane.b32.xlu1 %v1338_v24, %s6370_s2  ;;  %1347 = vrot.lane.b32.xlu0 %v1337_v57, %s6370_s2  ;;  %v1396_v24 = vsel %vm220_vm0, %v1394_v33, %v1395_v17  ;;  %v1415_v57 = vmul.f32 %v7101_v46, %v6619_v21 }
 0x16b   :  { %v7099_v60 = vpop.permute.xlu2 %1061 }
 0x16c   :  { %12380 = vst [vmem:[#allocation100_spill] sm:$0xff] %v7099_v60  ;;  %v7103_v58 = vpop.permute.xlu1 %972  ;;  %v7105_v42 = vpop.permute.xlu0 %970  ;;  %v1426_v60 = vrot.slane %v1417_v61, 1 }
 0x16d   :  { %12382 = vst [vmem:[#allocation102_spill] sm:$0xff] %v7103_v58 }
 0x16e   :  { %12383 = vst [vmem:[#allocation103_spill] sm:$0xff] %v7105_v42  ;;  %v1423_v42 = vrot.slane %v1415_v57, 1  ;;  %v1427_v46 = vsel %vm220_vm0, %v1425_v7, %v1426_v60  ;;  %v1476_v57 = vrot.slane %v1468_v0, 2 }
 0x171   :  { %1403 = vrot.lane.b32.xlu2 %v1395_v17, %s6371_s28  ;;  %v1424_v17 = vsel %vm220_vm0, %v1422_v59, %v1423_v42 }
 0x172   :  { %1401 = vrot.lane.b32.xlu1 %v1396_v24, %s6371_s28  ;;  %1399 = vrot.lane.b32.xlu0 %v1392_v9, %s6371_s28  ;;  %v1469_v9 = vmul.f32 %v7125_v6, %v6619_v21 }
 0x173   :  { %v7119_v58 = vpop.permute.xlu2 %1093 }
 0x174   :  { %12384 = vst [vmem:[#allocation104_spill] sm:$0xff] %v7119_v58  ;;  %v7121_v33 = vpop.permute.xlu1 %1024  ;;  %v7123_v8 = vpop.permute.xlu0 %976  ;;  %v1477_v24 = vrot.slane %v1469_v9, 2  ;;  %v1499_v58 = vmul.f32 %v7138_v2, %v6621_v22  ;;  %v1470_v9 = vmul.f32 %v7125_v6, %v6613_v18 }
 0x175   :  { %12385 = vst [vmem:[#allocation105_spill] sm:$0xff] %v7121_v33 }
 0x176   :  { %12386 = vst [vmem:[#allocation106_spill] sm:$0xff] %v7123_v8  ;;  %v1507_v0 = vrot.slane %v1499_v58, 2 }
 0x179   :  { %1432 = vrot.lane.b32.xlu2 %v1427_v46, %s6370_s2  ;;  %v1500_v46 = vmul.f32 %v7138_v2, %v6619_v21  ;;  %v1479_v21 = vrot.slane %v1470_v9, 2 }
 0x17a   :  { %1430 = vrot.lane.b32.xlu1 %v1423_v42, %s6370_s2  ;;  %1428 = vrot.lane.b32.xlu0 %v1424_v17, %s6370_s2  ;;  %v1478_v42 = vsel %vm306_vm1, %v1476_v57, %v1477_v24  ;;  %v1471_v17 = vmul.f32 %v7125_v6, %v6640_v32 }
 0x17b   :  { %v7136_v61 = vpop.permute.xlu2 %1116 }
 0x17c   :  { %12388 = vst [vmem:[#allocation108_spill] sm:$0xff] %v7136_v61  ;;  %v7140_v7 = vpop.permute.xlu1 %1030  ;;  %v7142_v59 = vpop.permute.xlu0 %1028  ;;  %v1508_v61 = vrot.slane %v1500_v46, 2 }
 0x17d   :  { %12390 = vst [vmem:[#allocation110_spill] sm:$0xff] %v7140_v7  ;;  %v1480_v7 = vrot.slane %v1471_v17, 2 }
 0x17e   :  { %12391 = vst [vmem:[#allocation111_spill] sm:$0xff] %v7142_v59  ;;  %v1509_v8 = vsel %vm306_vm1, %v1507_v0, %v1508_v61  ;;  %v7189_v0 = vld [vmem:[#allocation7 + $0x30] sm:$0xff] }
 0x17f   :  { %v1481_v6 = vsel %vm306_vm1, %v1479_v21, %v1480_v7 }
 0x181   :  { %1484 = vrot.lane.b32.xlu2 %v1477_v24, %s6371_s28  ;;  %v1502_v24 = vmul.f32 %v7138_v2, %v6640_v32 }
 0x182   :  { %1482 = vrot.lane.b32.xlu1 %v1478_v42, %s6371_s28  ;;  %1434 = vrot.lane.b32.xlu0 %v1426_v60, %s6370_s2  ;;  %v1501_v60 = vmul.f32 %v7138_v2, %v6613_v18 }
 0x183   :  { %v7156_v22 = vpop.permute.xlu2 %1168  ;;  %v1511_v46 = vrot.slane %v1502_v24, 2  ;;  %v7193_v24 = vld [vmem:[#allocation7 + $0x8] sm:$0xff] }
 0x184   :  { %12392 = vst [vmem:[#allocation112_spill] sm:$0xff] %v7156_v22  ;;  %v7158_v59 = vpop.permute.xlu1 %1059  ;;  %v7160_v57 = vpop.permute.xlu0 %1057  ;;  %v1510_v42 = vrot.slane %v1501_v60, 2  ;;  %v7197_v60 = vld [vmem:[#allocation7] sm:$0xff]  ;;  %v7214_v22 = vstv %s6255_s9  ;;  %s7780_s9 = sld [smem:[#allocation2 + $0x1e]] }
 0x185   :  { %12393 = vst [vmem:[#allocation113_spill] sm:$0xff] %v7158_v59 }
 0x186   :  { %12394 = vst [vmem:[#allocation114_spill] sm:$0xff] %v7160_v57  ;;  %v1512_v32 = vsel %vm306_vm1, %v1510_v42, %v1511_v46 }
 0x187   :  { %12406 = vst [vmem:[#allocation126_spill] sm:$0xff] %v7214_v22 }
 0x189   :  { %1513 = vrot.lane.b32.xlu2 %v1509_v8, %s6370_s2 }
 0x18a   :  { %1488 = vrot.lane.b32.xlu1 %v1480_v7, %s6371_s28  ;;  %1486 = vrot.lane.b32.xlu0 %v1481_v6, %s6371_s28  ;;  %v7187_v7 = vstv %s6252_s7  ;;  %s7761_s7 = sld [smem:[#allocation2 + $0x50]] }
 0x18b   :  { %v7171_v58 = vpop.permute.xlu2 %1174  ;;  %12401 = vst [vmem:[#allocation121_spill] sm:$0xff] %v7187_v7  ;;  %v1542_v21 = vmul.f32 %v7189_v0, %v7187_v7 }
 0x18c   :  { %12395 = vst [vmem:[#allocation115_spill] sm:$0xff] %v7171_v58  ;;  %v7173_v17 = vpop.permute.xlu1 %1091  ;;  %v7175_v9 = vpop.permute.xlu0 %1089  ;;  %v7210_v58 = vstv %s6253_s8  ;;  %s7768_s8 = sld [smem:[#allocation5 + $0x1]] }
 0x18d   :  { %12396 = vst [vmem:[#allocation116_spill] sm:$0xff] %v7173_v17 }
 0x18e   :  { %12397 = vst [vmem:[#allocation117_spill] sm:$0xff] %v7175_v9 }
 0x18f   :  { %12405 = vst [vmem:[#allocation125_spill] sm:$0xff] %v7210_v58 }
 0x191   :  { %1519 = vrot.lane.b32.xlu2 %v1511_v46, %s6370_s2  ;;  %v1540_v46 = vmul.f32 %v7197_v60, %v7187_v7 }
 0x192   :  { %1517 = vrot.lane.b32.xlu1 %v1512_v32, %s6370_s2  ;;  %1515 = vrot.lane.b32.xlu0 %v1508_v61, %s6370_s2  ;;  %v1541_v61 = vmul.f32 %v7193_v24, %v7187_v7 }
 0x193   :  { %v7181_v18 = vpop.permute.xlu2 %1203 }
 0x194   :  { %12398 = vst [vmem:[#allocation118_spill] sm:$0xff] %v7181_v18  ;;  %v7183_v8 = vpop.permute.xlu1 %1114  ;;  %v7185_v6 = vpop.permute.xlu0 %1095  ;;  %v1566_v18 = vmul.f32 %v7193_v24, %v7210_v58 }
 0x195   :  { %12399 = vst [vmem:[#allocation119_spill] sm:$0xff] %v7183_v8 }
 0x196   :  { %12400 = vst [vmem:[#allocation120_spill] sm:$0xff] %v7185_v6  ;;  %v7218_v6 = vld [vmem:[#allocation7 + $0x38] sm:$0xff] }
 0x197   :  { %v1568_v57 = vmul.f32 %v7218_v6, %v7210_v58 }
 0x199   :  { %1552 = vrot.lane.b32.xlu2 %v1542_v21, %s6371_s28  ;;  %v1565_v21 = vmul.f32 %v7197_v60, %v7210_v58 }
 0x19a   :  { %1550 = vrot.lane.b32.xlu1 %v1541_v61, %s6371_s28  ;;  %1548 = vrot.lane.b32.xlu0 %v1540_v46, %s6371_s28  ;;  %v1543_v61 = vmul.f32 %v7218_v6, %v7187_v7  ;;  %v1613_v46 = vmul.f32 %v7197_v60, %v7214_v22 }
 0x19b   :  { %v7204_v42 = vpop.permute.xlu2 %1255 }
 0x19c   :  { %12402 = vst [vmem:[#allocation122_spill] sm:$0xff] %v7204_v42  ;;  %v7206_v32 = vpop.permute.xlu1 %1120  ;;  %v7208_v2 = vpop.permute.xlu0 %1118  ;;  %v1614_v42 = vmul.f32 %v7193_v24, %v7214_v22 }
 0x19d   :  { %12403 = vst [vmem:[#allocation123_spill] sm:$0xff] %v7206_v32  ;;  %v1621_v32 = vrot.slane %v1613_v46, 1 }
 0x19e   :  { %12404 = vst [vmem:[#allocation124_spill] sm:$0xff] %v7208_v2  ;;  %v1622_v2 = vrot.slane %v1614_v42, 1  ;;  %v1615_v42 = vmul.f32 %v7189_v0, %v7214_v22 }
 0x1a0   :  { %v1623_v7 = vsel %vm220_vm0, %v1621_v32, %v1622_v2  ;;  %v1624_v46 = vrot.slane %v1615_v42, 1 }
 0x1a1   :  { %1575 = vrot.lane.b32.xlu2 %v1566_v18, %s6370_s2  ;;  %v1567_v18 = vmul.f32 %v7189_v0, %v7210_v58  ;;  %v7253_v58 = vstv %s6256_s10  ;;  %s7797_s10 = sld [smem:[#allocation2 + $0x21]] }
 0x1a2   :  { %1573 = vrot.lane.b32.xlu1 %v1565_v21, %s6370_s2  ;;  %1554 = vrot.lane.b32.xlu0 %v1543_v61, %s6371_s28  ;;  %v1616_v21 = vmul.f32 %v7218_v6, %v7214_v22  ;;  %12413 = vst [vmem:[#allocation133_spill] sm:$0xff] %v7253_v58 }
 0x1a3   :  { %v7229_v8 = vpop.permute.xlu2 %1284 }
 0x1a4   :  { %12407 = vst [vmem:[#allocation127_spill] sm:$0xff] %v7229_v8  ;;  %v7231_v17 = vpop.permute.xlu1 %1172  ;;  %v7233_v9 = vpop.permute.xlu0 %1170  ;;  %v1625_v32 = vrot.slane %v1616_v21, 1  ;;  %v1644_v21 = vmul.f32 %v7197_v60, %v7253_v58 }
 0x1a5   :  { %12408 = vst [vmem:[#allocation128_spill] sm:$0xff] %v7231_v17  ;;  %v1646_v17 = vmul.f32 %v7189_v0, %v7253_v58 }
 0x1a6   :  { %12409 = vst [vmem:[#allocation129_spill] sm:$0xff] %v7233_v9 }
 0x1a7   :  { %v1655_v42 = vrot.slane %v1646_v17, 1 }
 0x1a9   :  { %1627 = vrot.lane.b32.xlu2 %v1623_v7, %s6371_s28  ;;  %v1647_v7 = vmul.f32 %v7218_v6, %v7253_v58 }
 0x1aa   :  { %1579 = vrot.lane.b32.xlu1 %v1568_v57, %s6370_s2  ;;  %1577 = vrot.lane.b32.xlu0 %v1567_v18, %s6370_s2  ;;  %v1626_v57 = vsel %vm220_vm0, %v1624_v46, %v1625_v32  ;;  %v1645_v18 = vmul.f32 %v7193_v24, %v7253_v58  ;;  %v7274_v58 = vstv %s6258_s11  ;;  %s7941_s11 = sld [smem:[#allocation2 + $0x24]] }
 0x1ab   :  { %v7247_v61 = vpop.permute.xlu2 %1290  ;;  %v1656_v22 = vrot.slane %v1647_v7, 1  ;;  %12417 = vst [vmem:[#allocation137_spill] sm:$0xff] %v7274_v58  ;;  %v1698_v17 = vmul.f32 %v7197_v60, %v7274_v58 }
 0x1ac   :  { %12410 = vst [vmem:[#allocation130_spill] sm:$0xff] %v7247_v61  ;;  %v7249_v8 = vpop.permute.xlu1 %1201  ;;  %v7251_v9 = vpop.permute.xlu0 %1199 }
 0x1ad   :  { %12411 = vst [vmem:[#allocation131_spill] sm:$0xff] %v7249_v8  ;;  %v1653_v8 = vrot.slane %v1645_v18, 1  ;;  %v1657_v33 = vsel %vm220_vm0, %v1655_v42, %v1656_v22  ;;  %v1706_v18 = vrot.slane %v1698_v17, 2 }
 0x1ae   :  { %12412 = vst [vmem:[#allocation132_spill] sm:$0xff] %v7251_v9  ;;  %v1652_v9 = vrot.slane %v1644_v21, 1 }
 0x1b1   :  { %1633 = vrot.lane.b32.xlu2 %v1625_v32, %s6371_s28  ;;  %v1654_v32 = vsel %vm220_vm0, %v1652_v9, %v1653_v8  ;;  %v7290_v9 = vstv %s6259_s12  ;;  %s7955_s12 = sld [smem:[#allocation2 + $0x27]] }
 0x1b2   :  { %1631 = vrot.lane.b32.xlu1 %v1626_v57, %s6371_s28  ;;  %1629 = vrot.lane.b32.xlu0 %v1622_v2, %s6371_s28  ;;  %v1699_v2 = vmul.f32 %v7193_v24, %v7274_v58  ;;  %12421 = vst [vmem:[#allocation141_spill] sm:$0xff] %v7290_v9 }
 0x1b3   :  { %v7267_v61 = vpop.permute.xlu2 %1322 }
 0x1b4   :  { %12414 = vst [vmem:[#allocation134_spill] sm:$0xff] %v7267_v61  ;;  %v7269_v59 = vpop.permute.xlu1 %1253  ;;  %v7271_v46 = vpop.permute.xlu0 %1205  ;;  %v1707_v57 = vrot.slane %v1699_v2, 2  ;;  %v1729_v61 = vmul.f32 %v7197_v60, %v7290_v9  ;;  %v1700_v2 = vmul.f32 %v7189_v0, %v7274_v58 }
 0x1b5   :  { %12415 = vst [vmem:[#allocation135_spill] sm:$0xff] %v7269_v59 }
 0x1b6   :  { %12416 = vst [vmem:[#allocation136_spill] sm:$0xff] %v7271_v46  ;;  %v1737_v17 = vrot.slane %v1729_v61, 2  ;;  %v1709_v46 = vrot.slane %v1700_v2, 2 }
 0x1b9   :  { %1662 = vrot.lane.b32.xlu2 %v1657_v33, %s6370_s2  ;;  %v1730_v33 = vmul.f32 %v7193_v24, %v7290_v9 }
 0x1ba   :  { %1660 = vrot.lane.b32.xlu1 %v1653_v8, %s6370_s2  ;;  %1658 = vrot.lane.b32.xlu0 %v1654_v32, %s6370_s2  ;;  %v1708_v8 = vsel %vm306_vm1, %v1706_v18, %v1707_v57  ;;  %v1701_v32 = vmul.f32 %v7218_v6, %v7274_v58 }
 0x1bb   :  { %v7284_v7 = vpop.permute.xlu2 %1345 }
 0x1bc   :  { %12418 = vst [vmem:[#allocation138_spill] sm:$0xff] %v7284_v7  ;;  %v7286_v21 = vpop.permute.xlu1 %1259  ;;  %v7288_v42 = vpop.permute.xlu0 %1257  ;;  %v1738_v7 = vrot.slane %v1730_v33, 2 }
 0x1bd   :  { %12419 = vst [vmem:[#allocation139_spill] sm:$0xff] %v7286_v21 }
 0x1be   :  { %12420 = vst [vmem:[#allocation140_spill] sm:$0xff] %v7288_v42  ;;  %v1710_v42 = vrot.slane %v1701_v32, 2  ;;  %v1739_v45 = vsel %vm306_vm1, %v1737_v17, %v1738_v7 }
 0x1c0   :  { %v1711_v58 = vsel %vm306_vm1, %v1709_v46, %v1710_v42 }
 0x1c1   :  { %1714 = vrot.lane.b32.xlu2 %v1707_v57, %s6371_s28  ;;  %v1732_v57 = vmul.f32 %v7218_v6, %v7290_v9 }
 0x1c2   :  { %1712 = vrot.lane.b32.xlu1 %v1708_v8, %s6371_s28  ;;  %1664 = vrot.lane.b32.xlu0 %v1656_v22, %s6370_s2  ;;  %v1731_v22 = vmul.f32 %v7189_v0, %v7290_v9  ;;  %v7352_v9 = vstv %s6262_s14  ;;  %s8059_s14 = sld [smem:[#allocation5 + $0x2]] }
 0x1c3   :  { %v7304_v21 = vpop.permute.xlu2 %1397  ;;  %v1741_v33 = vrot.slane %v1732_v57, 2  ;;  %v7337_v57 = vld [vmem:[#allocation7 + $0x40] sm:$0xff]  ;;  %12432 = vst [vmem:[#allocation152_spill] sm:$0xff] %v7352_v9 }
 0x1c4   :  { %12422 = vst [vmem:[#allocation142_spill] sm:$0xff] %v7304_v21  ;;  %v7306_v59 = vpop.permute.xlu1 %1288  ;;  %v7308_v18 = vpop.permute.xlu0 %1286  ;;  %v1740_v8 = vrot.slane %v1731_v22, 2 }
 0x1c5   :  { %12423 = vst [vmem:[#allocation143_spill] sm:$0xff] %v7306_v59 }
 0x1c6   :  { %12424 = vst [vmem:[#allocation144_spill] sm:$0xff] %v7308_v18  ;;  %v1742_v2 = vsel %vm306_vm1, %v1740_v8, %v1741_v33  ;;  %v7345_v8 = vld [vmem:[#allocation7 + $0x10] sm:$0xff] }
 0x1c9   :  { %1743 = vrot.lane.b32.xlu2 %v1739_v45, %s6370_s2  ;;  %v7329_v45 = vstv %s6261_s13  ;;  %s8015_s13 = sld [smem:[#allocation2 + $0x2a]] }
 0x1ca   :  { %1718 = vrot.lane.b32.xlu1 %v1710_v42, %s6371_s28  ;;  %1716 = vrot.lane.b32.xlu0 %v1711_v58, %s6371_s28  ;;  %12428 = vst [vmem:[#allocation148_spill] sm:$0xff] %v7329_v45  ;;  %v1771_v22 = vmul.f32 %v7337_v57, %v7329_v45 }
 0x1cb   :  { %v7319_v61 = vpop.permute.xlu2 %1403 }
 0x1cc   :  { %12425 = vst [vmem:[#allocation145_spill] sm:$0xff] %v7319_v61  ;;  %v7321_v32 = vpop.permute.xlu1 %1320  ;;  %v7323_v46 = vpop.permute.xlu0 %1318 }
 0x1cd   :  { %12426 = vst [vmem:[#allocation146_spill] sm:$0xff] %v7321_v32  ;;  %v7366_v32 = vld [vmem:[#allocation7 + $0x48] sm:$0xff] }
 0x1ce   :  { %12427 = vst [vmem:[#allocation147_spill] sm:$0xff] %v7323_v46  ;;  %v1797_v1 = vmul.f32 %v7366_v32, %v7352_v9 }
 0x1d1   :  { %1749 = vrot.lane.b32.xlu2 %v1741_v33, %s6370_s2  ;;  %v7341_v33 = vld [vmem:[#allocation7 + $0x18] sm:$0xff] }
 0x1d2   :  { %1747 = vrot.lane.b32.xlu1 %v1742_v2, %s6370_s2  ;;  %1745 = vrot.lane.b32.xlu0 %v1738_v7, %s6370_s2  ;;  %v1770_v7 = vmul.f32 %v7341_v33, %v7329_v45  ;;  %v1769_v2 = vmul.f32 %v7345_v8, %v7329_v45 }
 0x1d3   :  { %v7331_v58 = vpop.permute.xlu2 %1432 }
 0x1d4   :  { %12429 = vst [vmem:[#allocation149_spill] sm:$0xff] %v7331_v58  ;;  %v7333_v42 = vpop.permute.xlu1 %1343  ;;  %v7335_v17 = vpop.permute.xlu0 %1324  ;;  %v7356_v58 = vstv %s6264_s15  ;;  %s8074_s15 = sld [smem:[#allocation2 + $0x36]] }
 0x1d5   :  { %12430 = vst [vmem:[#allocation150_spill] sm:$0xff] %v7333_v42  ;;  %v1795_v42 = vmul.f32 %v7341_v33, %v7352_v9 }
 0x1d6   :  { %12431 = vst [vmem:[#allocation151_spill] sm:$0xff] %v7335_v17 }
 0x1d7   :  { %12434 = vst [vmem:[#allocation154_spill] sm:$0xff] %v7356_v58 }
 0x1d9   :  { %1781 = vrot.lane.b32.xlu2 %v1771_v22, %s6371_s28  ;;  %v1794_v22 = vmul.f32 %v7345_v8, %v7352_v9 }
 0x1da   :  { %1779 = vrot.lane.b32.xlu1 %v1770_v7, %s6371_s28  ;;  %1777 = vrot.lane.b32.xlu0 %v1769_v2, %s6371_s28  ;;  %v1772_v7 = vmul.f32 %v7366_v32, %v7329_v45  ;;  %v1842_v2 = vmul.f32 %v7345_v8, %v7356_v58 }
 0x1db   :  { %v7354_v61 = vpop.permute.xlu2 %1484 }
 0x1dc   :  { %12433 = vst [vmem:[#allocation153_spill] sm:$0xff] %v7354_v61  ;;  %v7358_v21 = vpop.permute.xlu1 %1349  ;;  %v7360_v17 = vpop.permute.xlu0 %1347  ;;  %v1843_v61 = vmul.f32 %v7341_v33, %v7356_v58 }
 0x1dd   :  { %12435 = vst [vmem:[#allocation155_spill] sm:$0xff] %v7358_v21  ;;  %v1850_v21 = vrot.slane %v1842_v2, 1 }
 0x1de   :  { %12436 = vst [vmem:[#allocation156_spill] sm:$0xff] %v7360_v17  ;;  %v1851_v17 = vrot.slane %v1843_v61, 1  ;;  %v1844_v61 = vmul.f32 %v7337_v57, %v7356_v58 }
 0x1e0   :  { %v1852_v59 = vsel %vm220_vm0, %v1850_v21, %v1851_v17  ;;  %v1853_v2 = vrot.slane %v1844_v61, 1  ;;  %v7414_v61 = vstv %s55_s17  ;;  %s8105_s17 = sld [smem:[#allocation2 + $0x2d]] }
 0x1e1   :  { %1804 = vrot.lane.b32.xlu2 %v1795_v42, %s6370_s2  ;;  %v1796_v42 = vmul.f32 %v7337_v57, %v7352_v9  ;;  %12444 = vst [vmem:[#allocation164_spill] sm:$0xff] %v7414_v61  ;;  %v153_v63 = vmul.f32 %v7197_v60, %v7414_v61 }
 0x1e2   :  { %1802 = vrot.lane.b32.xlu1 %v1794_v22, %s6370_s2  ;;  %1783 = vrot.lane.b32.xlu0 %v1772_v7, %s6371_s28  ;;  %v1845_v22 = vmul.f32 %v7366_v32, %v7356_v58 }
 0x1e3   :  { %v7377_v46 = vpop.permute.xlu2 %1513 }
 0x1e4   :  { %12437 = vst [vmem:[#allocation157_spill] sm:$0xff] %v7377_v46  ;;  %v7379_v18 = vpop.permute.xlu1 %1401  ;;  %v7381_v45 = vpop.permute.xlu0 %1399  ;;  %v1854_v7 = vrot.slane %v1845_v22, 1  ;;  %v7397_v46 = vstv %s6265_s16  ;;  %s8081_s16 = sld [smem:[#allocation2 + $0x39]] }
 0x1e5   :  { %12438 = vst [vmem:[#allocation158_spill] sm:$0xff] %v7379_v18  ;;  %v1875_v58 = vmul.f32 %v7337_v57, %v7397_v46  ;;  %v1873_v22 = vmul.f32 %v7345_v8, %v7397_v46 }
 0x1e6   :  { %12439 = vst [vmem:[#allocation159_spill] sm:$0xff] %v7381_v45 }
 0x1e7   :  { %12441 = vst [vmem:[#allocation161_spill] sm:$0xff] %v7397_v46  ;;  %v1881_v18 = vrot.slane %v1873_v22, 1 }
 0x1e9   :  { %1856 = vrot.lane.b32.xlu2 %v1852_v59, %s6371_s28  ;;  %v1855_v59 = vsel %vm220_vm0, %v1853_v2, %v1854_v7 }
 0x1ea   :  { %1808 = vrot.lane.b32.xlu1 %v1797_v1, %s6370_s2  ;;  %1806 = vrot.lane.b32.xlu0 %v1796_v42, %s6370_s2  ;;  %v7407_v1 = vmul.f32 %v7366_v32, %v7397_v46  ;;  %v1874_v42 = vmul.f32 %v7341_v33, %v7397_v46  ;;  %v154_v46 = vmul.f32 %v7193_v24, %v7414_v61 }
 0x1eb   :  { %v7395_v21 = vpop.permute.xlu2 %1519 }
 0x1ec   :  { %12440 = vst [vmem:[#allocation160_spill] sm:$0xff] %v7395_v21  ;;  %v7399_v9 = vpop.permute.xlu1 %1430  ;;  %v7401_v45 = vpop.permute.xlu0 %1428  ;;  %v1884_v21 = vrot.slane %v1875_v58, 1  ;;  %v1882_v2 = vrot.slane %v1874_v42, 1  ;;  %v7432_v58 = vstv %s6200_s19  ;;  %s8178_s19 = sld [smem:[#allocation2 + $0x33]] }
 0x1ed   :  { %12442 = vst [vmem:[#allocation162_spill] sm:$0xff] %v7399_v9  ;;  %v1885_v9 = vrot.slane %v7407_v1, 1  ;;  %v7435_v1 = vstv %s6267_s20  ;;  %v212_v10 = vmul.f32 %v7197_v60, %v7432_v58  ;;  %s8293_s20 = sld [smem:[#allocation2 + $0x3c]] }
 0x1ee   :  { %12443 = vst [vmem:[#allocation163_spill] sm:$0xff] %v7401_v45  ;;  %v1883_v42 = vsel %vm220_vm0, %v1881_v18, %v1882_v2  ;;  %v1928_v22 = vmul.f32 %v7341_v33, %v7435_v1  ;;  %v213_v18 = vmul.f32 %v7193_v24, %v7432_v58 }
 0x1ef   :  { %12449 = vst [vmem:[#allocation169_spill] sm:$0xff] %v7432_v58  ;;  %v221_v38 = vrot.slane %v212_v10, 1 }
 0x1f0   :  { %12450 = vst [vmem:[#allocation170_spill] sm:$0xff] %v7435_v1 }
 0x1f1   :  { %1862 = vrot.lane.b32.xlu2 %v1854_v7, %s6371_s28 }
 0x1f2   :  { %1860 = vrot.lane.b32.xlu1 %v1855_v59, %s6371_s28  ;;  %1858 = vrot.lane.b32.xlu0 %v1851_v17, %s6371_s28  ;;  %v7430_v59 = vstv %s136_s18  ;;  %v1886_v17 = vsel %vm220_vm0, %v1884_v21, %v1885_v9  ;;  %v155_v21 = vmul.f32 %v7189_v0, %v7414_v61  ;;  %s8129_s18 = sld [smem:[#allocation2 + $0x30]] }
 0x1f3   :  { %v7420_v45 = vpop.permute.xlu2 %1552  ;;  %12448 = vst [vmem:[#allocation168_spill] sm:$0xff] %v7430_v59  ;;  %v158_v5 = vadd.f32 %v154_v46, %v7430_v59  ;;  %v214_v46 = vmul.f32 %v7189_v0, %v7432_v58 }
 0x1f4   :  { %12445 = vst [vmem:[#allocation165_spill] sm:$0xff] %v7420_v45  ;;  %v7426_v41 = vpop.permute.xlu1 %1482  ;;  %v7428_v7 = vpop.permute.xlu0 %1434  ;;  %v1927_v45 = vmul.f32 %v7345_v8, %v7435_v1 }
 0x1f5   :  { %12446 = vst [vmem:[#allocation166_spill] sm:$0xff] %v7426_v41  ;;  %v157_v41 = vadd.f32 %v153_v63, %v7430_v59  ;;  %v215_v63 = vmul.f32 %v7218_v6, %v7432_v58  ;;  %v7471_v58 = vstv %s6268_s21  ;;  %s6260_s21 = sld [smem:[#allocation2 + $0x3f]] }
 0x1f6   :  { %12447 = vst [vmem:[#allocation167_spill] sm:$0xff] %v7428_v7  ;;  %v156_v7 = vmul.f32 %v7218_v6, %v7414_v61  ;;  %v1936_v61 = vrot.slane %v1928_v22, 2  ;;  %v1935_v40 = vrot.slane %v1927_v45, 2  ;;  %v1958_v45 = vmul.f32 %v7345_v8, %v7471_v58 }
 0x1f7   :  { %v182_v34 = vadd.f32 %v6607_v16, %v157_v41  ;;  %12453 = vst [vmem:[#allocation173_spill] sm:$0xff] %v7471_v58  ;;  %v7477_v16 = vmul.f32 %v7341_v33, %v7471_v58  ;;  %v1930_v41 = vmul.f32 %v7366_v32, %v7435_v1 }
 0x1f8   :  { %v160_v11 = vadd.f32 %v156_v7, %v7430_v59  ;;  %v1929_v7 = vmul.f32 %v7337_v57, %v7435_v1 }
 0x1f9   :  { %1891 = vrot.lane.b32.xlu2 %v1886_v17, %s6370_s2  ;;  %v183_v17 = vadd.f32 %v6625_v25, %v158_v5  ;;  %v224_v25 = vrot.slane %v214_v46, 1  ;;  %v1937_v5 = vsel %vm306_vm1, %v1935_v40, %v1936_v61  ;;  %v207_v10 = vadd.f32 %v6563_v35, %v182_v34 }
 0x1fa   :  { %1889 = vrot.lane.b32.xlu1 %v1882_v2, %s6370_s2  ;;  %1887 = vrot.lane.b32.xlu0 %v1883_v42, %s6370_s2  ;;  %v159_v2 = vadd.f32 %v155_v21, %v7430_v59  ;;  %v222_v42 = vrot.slane %v213_v18, 1  ;;  %v185_v22 = vadd.f32 %v6623_v23, %v160_v11  ;;  %v7488_v18 = vstv %s7446_s22  ;;  %s6263_s22 = sld [smem:[#allocation2 + $0x42]] }
 0x1fb   :  { %v7461_v26 = vpop.permute.xlu2 %1575  ;;  %v208_v21 = vadd.f32 %v6576_v44, %v183_v17  ;;  %12454 = vst [vmem:[#allocation174_spill] sm:$0xff] %v7488_v18  ;;  %v299_v46 = vmul.f32 %v7193_v24, %v7488_v18  ;;  %v298_v34 = vmul.f32 %v7197_v60, %v7488_v18  ;;  %v1966_v35 = vrot.slane %v1958_v45, 2 }
 0x1fc   :  { %12451 = vst [vmem:[#allocation171_spill] sm:$0xff] %v7461_v26  ;;  %v7466_v4 = vpop.permute.xlu1 %1488  ;;  %v7468_v47 = vpop.permute.xlu0 %1486  ;;  %v225_v26 = vrot.slane %v215_v63, 1  ;;  %v184_v63 = vadd.f32 %v6605_v15, %v159_v2  ;;  %v223_v40 = vsel %vm220_vm0, %v221_v38, %v222_v42  ;;  %v210_v59 = vadd.f32 %v6644_v36, %v185_v22 }
 0x1fd   :  { %12452 = vst [vmem:[#allocation172_spill] sm:$0xff] %v7466_v4  ;;  %v1967_v44 = vrot.slane %v7477_v16, 2  ;;  %v1939_v11 = vrot.slane %v1930_v41, 2  ;;  %v1938_v38 = vrot.slane %v1929_v7, 2  ;;  %v232_v17 = vadd.f32 %v222_v42, %v208_v21 }
 0x1fe   :  { %v209_v15 = vadd.f32 %v6646_v37, %v184_v63  ;;  %v231_v36 = vadd.f32 %v223_v40, %v207_v10  ;;  %v300_v45 = vmul.f32 %v7189_v0, %v7488_v18  ;;  %v234_v37 = vadd.f32 %v225_v26, %v210_v59 }
 0x1ff   :  { %v263_v16 = vadd.f32 %v6665_v51, %v232_v17  ;;  %v307_v41 = vrot.slane %v298_v34, 2  ;;  %v1968_v7 = vsel %vm306_vm1, %v1966_v35, %v1967_v44  ;;  %v1940_v42 = vsel %vm306_vm1, %v1938_v38, %v1939_v11 }
 0x200   :  { %v1961_v10 = vmul.f32 %v7366_v32, %v7471_v58  ;;  %v1960_v21 = vmul.f32 %v7337_v57, %v7471_v58  ;;  %v310_v40 = vrot.slane %v300_v45, 2 }
 0x201   :  { %1943 = vrot.lane.b32.xlu2 %v1936_v61, %s6371_s28  ;;  %v226_v61 = vsel %vm220_vm0, %v224_v25, %v225_v26  ;;  %v294_v63 = vadd.f32 %v6683_v13, %v263_v16  ;;  %v265_v13 = vadd.f32 %v6603_v12, %v234_v37 }
 0x202   :  { %1941 = vrot.lane.b32.xlu1 %v1937_v5, %s6371_s28  ;;  %1893 = vrot.lane.b32.xlu0 %v1885_v9, %s6370_s2  ;;  %v308_v5 = vrot.slane %v299_v46, 2  ;;  %v301_v9 = vmul.f32 %v7218_v6, %v7488_v18  ;;  %v233_v25 = vadd.f32 %v226_v61, %v209_v15  ;;  %v262_v46 = vadd.f32 %v6592_v55, %v231_v36 }
 0x203   :  { %v7502_v23 = vpop.permute.xlu2 %1627  ;;  %v1970_v35 = vrot.slane %v1961_v10, 2 }
 0x204   :  { %v7505_v2 = vpop.permute.xlu1 %1517  ;;  %v7507_v22 = vpop.permute.xlu0 %1515  ;;  %v264_v26 = vadd.f32 %v6663_v50, %v233_v25  ;;  %v293_v51 = vadd.f32 %v6685_v14, %v262_v46  ;;  %v311_v59 = vrot.slane %v301_v9, 2  ;;  %v309_v34 = vsel %vm306_vm1, %v307_v41, %v308_v5  ;;  %v7577_v46 = vld [vmem:[#allocation7 + $0x50] sm:$0xff] }
 0x205   :  { %12455 = vst [vmem:[#allocation175_spill] sm:$0xff] %v7507_v22  ;;  %v1969_v50 = vrot.slane %v1960_v21, 2  ;;  %v318_v15 = vadd.f32 %v308_v5, %v294_v63  ;;  %v7541_v5 = vstv %s6206_s23  ;;  %s8440_s23 = sld [smem:[#allocation2 + $0x45]] }
 0x206   :  { %v295_v14 = vadd.f32 %v6617_v20, %v264_v26  ;;  %v317_v17 = vadd.f32 %v309_v34, %v293_v51  ;;  %v312_v36 = vsel %vm306_vm1, %v310_v40, %v311_v59  ;;  %12457 = vst [vmem:[#allocation177_spill] sm:$0xff] %v7541_v5  ;;  %v385_v20 = vmul.f32 %v7341_v33, %v7541_v5  ;;  %v7581_v51 = vld [vmem:[#allocation7 + $0x28] sm:$0xff]  ;;  %v7585_v40 = vld [vmem:[#allocation7 + $0x20] sm:$0xff] }
 0x207   :  { %v1971_v9 = vsel %vm306_vm1, %v1969_v50, %v1970_v35  ;;  %v349_v45 = vadd.f32 %v6638_v31, %v318_v15 }
 0x208   :  { %v348_v12 = vadd.f32 %v6701_v52, %v317_v17  ;;  %v319_v16 = vadd.f32 %v312_v36, %v295_v14  ;;  %v7551_v52 = vstv %s6270_s0  ;;  %s8529_s0 = sld [smem:[#allocation2 + $0x4b]] }
 0x209   :  { %1972 = vrot.lane.b32.xlu2 %v1968_v7, %s6370_s2  ;;  %v380_v41 = vadd.f32 %v6740_v27, %v349_v45  ;;  %12459 = vst [vmem:[#allocation179_spill] sm:$0xff] %v7551_v52 }
 0x20a   :  { %1947 = vrot.lane.b32.xlu1 %v1939_v11, %s6371_s28  ;;  %1945 = vrot.lane.b32.xlu0 %v1940_v42, %s6371_s28  ;;  %v296_v11 = vadd.f32 %v6703_v53, %v265_v13  ;;  %v7547_v53 = vstv %s6209_s24  ;;  %v350_v7 = vadd.f32 %v6722_v39, %v319_v16  ;;  %v379_v42 = vadd.f32 %v6661_v49, %v348_v12  ;;  %s6269_s24 = sld [smem:[#allocation2 + $0x48]] }
 0x20b   :  { %v7529_v55 = vpop.permute.xlu2 %1633  ;;  %12458 = vst [vmem:[#allocation178_spill] sm:$0xff] %v7547_v53  ;;  %v443_v27 = vmul.f32 %v7345_v8, %v7547_v53  ;;  %v444_v63 = vmul.f32 %v7341_v33, %v7547_v53  ;;  %v2000_v49 = vmul.f32 %v7577_v46, %v7551_v52  ;;  %v389_v26 = vadd.f32 %v385_v20, %v380_v41 }
 0x20c   :  { %12456 = vst [vmem:[#allocation176_spill] sm:$0xff] %v7529_v55  ;;  %v7531_v38 = vpop.permute.xlu1 %1550  ;;  %v7533_v61 = vpop.permute.xlu0 %1548  ;;  %v320_v37 = vadd.f32 %v311_v59, %v296_v11  ;;  %v381_v39 = vadd.f32 %v6738_v19, %v350_v7  ;;  %v1999_v59 = vmul.f32 %v7581_v51, %v7551_v52  ;;  %v1998_v19 = vmul.f32 %v7585_v40, %v7551_v52 }
 0x20d   :  { %v451_v13 = vrot.slane %v443_v27, 1  ;;  %v414_v50 = vadd.f32 %v6753_v56, %v389_v26  ;;  %v446_v14 = vmul.f32 %v7366_v32, %v7547_v53  ;;  %v445_v11 = vmul.f32 %v7337_v57, %v7547_v53 }
 0x20e   :  { %v351_v31 = vadd.f32 %v6720_v29, %v320_v37  ;;  %v386_v29 = vmul.f32 %v7337_v57, %v7541_v5  ;;  %v452_v36 = vrot.slane %v444_v63, 1  ;;  %v7608_v37 = vstv %s7561_s1 }
 0x20f   :  { %12462 = vst [vmem:[#allocation182_spill] sm:$0xff] %v7608_v37  ;;  %v439_v16 = vadd.f32 %v6716_v3, %v414_v50  ;;  %v455_v20 = vrot.slane %v446_v14, 1  ;;  %v2071_v63 = vmul.f32 %v7585_v40, %v7608_v37 }
 0x210   :  { %v382_v34 = vadd.f32 %v6679_v62, %v351_v31  ;;  %v390_v17 = vadd.f32 %v386_v29, %v381_v39  ;;  %v453_v56 = vsel %vm220_vm0, %v451_v13, %v452_v36  ;;  %v7625_v39 = vld [vmem:[#allocation7 + $0x58] sm:$0xff] }
 0x211   :  { %1978 = vrot.lane.b32.xlu2 %v1970_v35, %s6370_s2  ;;  %v387_v35 = vmul.f32 %v7366_v32, %v7541_v5 }
 0x212   :  { %1976 = vrot.lane.b32.xlu1 %v1971_v9, %s6370_s2  ;;  %1974 = vrot.lane.b32.xlu0 %v1967_v44, %s6370_s2  ;;  %v384_v44 = vmul.f32 %v7345_v8, %v7541_v5  ;;  %v7602_v9 = vstv %s7553_s25  ;;  %s8570_s25 = sld [smem:[#allocation2 + $0x4e]] }
 0x213   :  { %v7559_v25 = vpop.permute.xlu2 %1662  ;;  %12460 = vst [vmem:[#allocation180_spill] sm:$0xff] %v7602_v9  ;;  %v391_v12 = vadd.f32 %v387_v35, %v382_v34  ;;  %v2024_v29 = vmul.f32 %v7581_v51, %v7602_v9  ;;  %v2023_v3 = vmul.f32 %v7585_v40, %v7602_v9  ;;  %v462_v35 = vadd.f32 %v452_v36, %v439_v16 }
 0x214   :  { %v7566_v10 = vpop.permute.xlu1 %1573  ;;  %v7568_v21 = vpop.permute.xlu0 %1554  ;;  %v388_v15 = vadd.f32 %v384_v44, %v379_v42  ;;  %v415_v42 = vadd.f32 %v6699_v43, %v390_v17  ;;  %v7619_v44 = vstv %s7575_s26 }
 0x215   :  { %v416_v27 = vadd.f32 %v6767_v48, %v391_v12  ;;  %12463 = vst [vmem:[#allocation183_spill] sm:$0xff] %v7619_v44  ;;  %v7633_v48 = vmul.f32 %v7581_v51, %v7608_v37  ;;  %v531_v50 = vmul.f32 %v7366_v32, %v7619_v44 }
 0x216   :  { %v413_v62 = vadd.f32 %v6755_v30, %v388_v15  ;;  %v454_v30 = vrot.slane %v445_v11, 1  ;;  %v530_v15 = vmul.f32 %v7337_v57, %v7619_v44  ;;  %v2079_v11 = vrot.slane %v2071_v63, 1 }
 0x217   :  { %v441_v43 = vadd.f32 %v6784_v28, %v416_v27  ;;  %v12465_v28 = vld [vmem:[#allocation39_spill] sm:$0xff]  ;;  %v12021_v17 = vrot.slane %v7633_v48, 1  ;;  %v12468_v27 = vld [vmem:[#allocation29_spill] sm:$0xff]  ;;  %v540_v63 = vrot.slane %v531_v50, 2 }
 0x218   :  { %v438_v41 = vadd.f32 %v6765_v54, %v413_v62  ;;  %v2001_v54 = vmul.f32 %v7625_v39, %v7551_v52  ;;  %v456_v13 = vsel %vm220_vm0, %v454_v30, %v455_v20  ;;  %v493_v14 = vadd.f32 %v12465_v28, %v462_v35 }
 0x219   :  { %2010 = vrot.lane.b32.xlu2 %v2000_v49, %s6371_s28  ;;  %v12464_v49 = vld [vmem:[#allocation36_spill] sm:$0xff]  ;;  %v464_v36 = vadd.f32 %v455_v20, %v441_v43  ;;  %v539_v35 = vrot.slane %v530_v15, 2  ;;  %v12470_v20 = vld [vmem:[#allocation43_spill] sm:$0xff]  ;;  %v2074_v15 = vmul.f32 %v7625_v39, %v7608_v37  ;;  %v2073_v28 = vmul.f32 %v7577_v46, %v7608_v37 }
 0x21a   :  { %2008 = vrot.lane.b32.xlu1 %v1999_v59, %s6371_s28  ;;  %2006 = vrot.lane.b32.xlu0 %v1998_v19, %s6371_s28  ;;  %v440_v26 = vadd.f32 %v12464_v49, %v415_v42  ;;  %v529_v59 = vmul.f32 %v7341_v33, %v7619_v44  ;;  %v528_v19 = vmul.f32 %v7345_v8, %v7619_v44  ;;  %v12487_v44 = vld [vmem:[#allocation40_spill] sm:$0xff] }
 0x21b   :  { %v7605_v45 = vpop.permute.xlu2 %1714  ;;  %v461_v34 = vadd.f32 %v453_v56, %v438_v41  ;;  %v12467_v41 = vld [vmem:[#allocation42_spill] sm:$0xff] }
 0x21c   :  { %12461 = vst [vmem:[#allocation181_spill] sm:$0xff] %v7605_v45  ;;  %v7612_v31 = vpop.permute.xlu1 %1579  ;;  %v7614_v7 = vpop.permute.xlu0 %1577  ;;  %v463_v62 = vadd.f32 %v456_v13, %v440_v26  ;;  %v537_v56 = vrot.slane %v529_v59, 2  ;;  %v536_v12 = vrot.slane %v528_v19, 2  ;;  %v524_v30 = vadd.f32 %v12467_v41, %v493_v14  ;;  %v12471_v13 = vld [vmem:[#allocation30_spill] sm:$0xff] }
 0x21d   :  { %v492_v42 = vadd.f32 %v12468_v27, %v461_v34  ;;  %v2081_v26 = vsel %vm220_vm0, %v2079_v11, %v12021_v17  ;;  %v2026_v59 = vmul.f32 %v7625_v39, %v7602_v9  ;;  %v2025_v19 = vmul.f32 %v7577_v46, %v7602_v9  ;;  %v12473_v11 = vld [vmem:[#allocation46_spill] sm:$0xff]  ;;  %v12484_v9 = vld [vmem:[#allocation51_spill] sm:$0xff] }
 0x21e   :  { %v538_v34 = vsel %vm306_vm1, %v536_v12, %v537_v56  ;;  %v495_v50 = vadd.f32 %v12471_v13, %v464_v36  ;;  %v547_v14 = vadd.f32 %v537_v56, %v524_v30  ;;  %v541_v12 = vsel %vm306_vm1, %v539_v35, %v540_v63  ;;  %v12478_v13 = vld [vmem:[#allocation45_spill] sm:$0xff] }
 0x21f   :  { %v523_v43 = vadd.f32 %v12470_v20, %v492_v42  ;;  %v7683_v42 = vstv %s7646_s27  ;;  %v7688_v20 = vstv %s7650_s29  ;;  %v2083_v56 = vrot.slane %v2074_v15, 1 }
 0x220   :  { %v526_v27 = vadd.f32 %v12473_v11, %v495_v50  ;;  %12474 = vst [vmem:[#allocation39_spill] sm:$0xff] %v7683_v42  ;;  %v2082_v30 = vrot.slane %v2073_v28, 1  ;;  %v613_v35 = vmul.f32 %v7585_v40, %v7683_v42  ;;  %v614_v28 = vmul.f32 %v7581_v51, %v7683_v42  ;;  %v12480_v11 = vld [vmem:[#allocation54_spill] sm:$0xff] }
 0x221   :  { %2033 = vrot.lane.b32.xlu2 %v2024_v29, %s6370_s2  ;;  %12475 = vst [vmem:[#allocation42_spill] sm:$0xff] %v7688_v20  ;;  %v615_v58 = vmul.f32 %v7577_v46, %v7683_v42  ;;  %v672_v1 = vmul.f32 %v7585_v40, %v7688_v20 }
 0x222   :  { %2031 = vrot.lane.b32.xlu1 %v2023_v3, %s6370_s2  ;;  %2012 = vrot.lane.b32.xlu0 %v2001_v54, %s6371_s28  ;;  %v12469_v3 = vld [vmem:[#allocation38_spill] sm:$0xff] }
 0x223   :  { %v7655_v16 = vpop.permute.xlu2 %1743  ;;  %v494_v54 = vadd.f32 %v12469_v3, %v463_v62  ;;  %v12472_v62 = vld [vmem:[#allocation32_spill] sm:$0xff]  ;;  %v546_v3 = vadd.f32 %v538_v34, %v523_v43  ;;  %v616_v43 = vmul.f32 %v7625_v39, %v7683_v42  ;;  %v549_v34 = vadd.f32 %v540_v63, %v526_v27  ;;  %v12482_v63 = vld [vmem:[#allocation50_spill] sm:$0xff] }
 0x224   :  { %12466 = vst [vmem:[#allocation36_spill] sm:$0xff] %v7655_v16  ;;  %v7659_v29 = vpop.permute.xlu1 %1631  ;;  %v7661_v49 = vpop.permute.xlu0 %1629  ;;  %v2084_v27 = vsel %vm220_vm0, %v2082_v30, %v2083_v56  ;;  %v674_v30 = vmul.f32 %v7577_v46, %v7688_v20 }
 0x225   :  { %v525_v41 = vadd.f32 %v12472_v62, %v494_v54  ;;  %v7694_v54 = vstv %s6274_s30  ;;  %v577_v50 = vadd.f32 %v12478_v13, %v546_v3  ;;  %v12479_v62 = vld [vmem:[#allocation34_spill] sm:$0xff]  ;;  %v7716_v13 = vstv %s7665_s4 }
 0x226   :  { %12477 = vst [vmem:[#allocation38_spill] sm:$0xff] %v7694_v54  ;;  %v7722_v17 = vmul.f32 %v7625_v39, %v7694_v54  ;;  %v2102_v37 = vmul.f32 %v7585_v40, %v7694_v54 }
 0x227   :  { %v548_v15 = vadd.f32 %v541_v12, %v525_v41  ;;  %12481 = vst [vmem:[#allocation43_spill] sm:$0xff] %v7716_v13  ;;  %v580_v41 = vadd.f32 %v12482_v63, %v549_v34  ;;  %v2103_v12 = vmul.f32 %v7581_v51, %v7694_v54  ;;  %v7738_v34 = vmul.f32 %v7625_v39, %v7688_v20 }
 0x228   :  { %v7744_v63 = vmul.f32 %v7625_v39, %v7716_v13  ;;  %v12493_v18 = vrot.slane %v7722_v17, 1 }
 0x229   :  { %2085 = vrot.lane.b32.xlu2 %v2081_v26, %s6371_s28  ;;  %v578_v26 = vadd.f32 %v12479_v62, %v547_v14  ;;  %v7712_v14 = vmul.f32 %v7581_v51, %v7688_v20  ;;  %v2104_v62 = vmul.f32 %v7577_v46, %v7694_v54  ;;  %v579_v52 = vadd.f32 %v12484_v9, %v548_v15 }
 0x22a   :  { %2037 = vrot.lane.b32.xlu1 %v2026_v59, %s6370_s2  ;;  %2035 = vrot.lane.b32.xlu0 %v2025_v19, %s6370_s2  ;;  %v759_v9 = vmul.f32 %v7577_v46, %v7716_v13  ;;  %v12486_v54 = vrot.slane %v7633_v48, 1  ;;  %v611_v53 = vadd.f32 %v12487_v44, %v580_v41  ;;  %v7766_v48 = vmul.f32 %v7581_v51, %v7716_v13 }
 0x22b   :  { %v7692_v36 = vpop.permute.xlu2 %1749  ;;  %v609_v3 = vadd.f32 %v12480_v11, %v578_v26  ;;  %v12483_v26 = vld [vmem:[#allocation37_spill] sm:$0xff]  ;;  %v2113_v20 = vrot.slane %v2104_v62, 1  ;;  %v681_v5 = vrot.slane %v7712_v14, 1  ;;  %v7777_v62 = vstv %s7706_s5 }
 0x22c   :  { %12476 = vst [vmem:[#allocation29_spill] sm:$0xff] %v7692_v36  ;;  %v7702_v59 = vpop.permute.xlu1 %1660  ;;  %v7704_v19 = vpop.permute.xlu0 %1658  ;;  %v608_v11 = vadd.f32 %v12483_v26, %v577_v50  ;;  %v12485_v50 = vld [vmem:[#allocation53_spill] sm:$0xff]  ;;  %v680_v41 = vrot.slane %v672_v1, 1  ;;  %v768_v42 = vrot.slane %v759_v9, 2  ;;  %v2157_v1 = vmul.f32 %v7581_v51, %v7777_v62 }
 0x22d   :  { %v610_v15 = vadd.f32 %v12485_v50, %v579_v52  ;;  %v618_v26 = vadd.f32 %v614_v28, %v609_v3  ;;  %v2111_v52 = vrot.slane %v2103_v12, 1  ;;  %v2110_v28 = vrot.slane %v2102_v37, 1  ;;  %v12489_v3 = vld [vmem:[#allocation56_spill] sm:$0xff]  ;;  %12492 = vst [vmem:[#allocation45_spill] sm:$0xff] %v7777_v62  ;;  %v12494_v36 = vld [vmem:[#allocation57_spill] sm:$0xff] }
 0x22e   :  { %v617_v37 = vadd.f32 %v613_v35, %v608_v11  ;;  %v684_v12 = vrot.slane %v7738_v34, 1  ;;  %v683_v50 = vrot.slane %v674_v30, 1  ;;  %v2156_v35 = vmul.f32 %v7585_v40, %v7777_v62  ;;  %v12495_v11 = vld [vmem:[#allocation48_spill] sm:$0xff] }
 0x22f   :  { %v2112_v16 = vsel %vm220_vm0, %v2110_v28, %v2111_v52  ;;  %v620_v34 = vadd.f32 %v616_v43, %v611_v53  ;;  %v12048_v30 = vrot.slane %v7766_v48, 2  ;;  %v12497_v28 = vld [vmem:[#allocation61_spill] sm:$0xff]  ;;  %v7803_v53 = vstv %s7750_s6 }
 0x230   :  { %12499 = vst [vmem:[#allocation34_spill] sm:$0xff] %v7803_v53  ;;  %v12500_v43 = vrot.slane %v7744_v63, 2 }
 0x231   :  { %2091 = vrot.lane.b32.xlu2 %v2083_v56, %s6371_s28 }
 0x232   :  { %2089 = vrot.lane.b32.xlu1 %v2084_v27, %s6371_s28  ;;  %2087 = vrot.lane.b32.xlu0 %v12486_v54, %s6371_s28  ;;  %v643_v27 = vadd.f32 %v12489_v3, %v618_v26  ;;  %v757_v54 = vmul.f32 %v7585_v40, %v7716_v13  ;;  %v619_v26 = vadd.f32 %v615_v58, %v610_v15  ;;  %v12498_v3 = vld [vmem:[#allocation44_spill] sm:$0xff] }
 0x233   :  { %v7759_v56 = vpop.permute.xlu2 %1781  ;;  %v2115_v13 = vsel %vm220_vm0, %v2113_v20, %v12493_v18  ;;  %v682_v18 = vsel %vm220_vm0, %v680_v41, %v681_v5  ;;  %v12496_v20 = vld [vmem:[#allocation60_spill] sm:$0xff]  ;;  %v2165_v41 = vrot.slane %v2157_v1, 2  ;;  %v12506_v1 = vld [vmem:[#allocation65_spill] sm:$0xff] }
 0x234   :  { %12488 = vst [vmem:[#allocation30_spill] sm:$0xff] %v7759_v56  ;;  %v7772_v44 = vpop.permute.xlu1 %1712  ;;  %v7774_v14 = vpop.permute.xlu0 %1664  ;;  %v642_v56 = vadd.f32 %v12494_v36, %v617_v37  ;;  %v668_v58 = vadd.f32 %v12495_v11, %v643_v27  ;;  %v765_v9 = vrot.slane %v757_v54, 2  ;;  %v685_v36 = vsel %vm220_vm0, %v683_v50, %v684_v12 }
 0x235   :  { %12490 = vst [vmem:[#allocation32_spill] sm:$0xff] %v7772_v44  ;;  %v645_v37 = vadd.f32 %v12497_v28, %v620_v34  ;;  %v644_v27 = vadd.f32 %v12498_v3, %v619_v26  ;;  %v7808_v54 = vsel %vm306_vm1, %v768_v42, %v12500_v43  ;;  %v2164_v50 = vrot.slane %v2156_v35, 2  ;;  %v12508_v28 = vld [vmem:[#allocation66_spill] sm:$0xff] }
 0x236   :  { %12491 = vst [vmem:[#allocation46_spill] sm:$0xff] %v7774_v14  ;;  %v667_v15 = vadd.f32 %v12496_v20, %v642_v56  ;;  %v843_v56 = vmul.f32 %v7197_v60, %v7803_v53  ;;  %v7817_v26 = vstv %s7761_s7  ;;  %v691_v3 = vadd.f32 %v681_v5, %v668_v58  ;;  %v12514_v44 = vld [vmem:[#allocation86_spill] sm:$0xff] }
 0x237   :  { %12502 = vst [vmem:[#allocation50_spill] sm:$0xff] %v7817_v26  ;;  %v7820_v11 = vstv %s7768_s8  ;;  %v7825_v42 = vsel %vm306_vm1, %v765_v9, %v12048_v30  ;;  %v670_v35 = vadd.f32 %v12506_v1, %v645_v37  ;;  %v845_v5 = vmul.f32 %v7189_v0, %v7803_v53 }
 0x238   :  { %12503 = vst [vmem:[#allocation37_spill] sm:$0xff] %v7820_v11  ;;  %v690_v20 = vadd.f32 %v682_v18, %v667_v15  ;;  %v7837_v58 = vstv %s7780_s9  ;;  %v669_v43 = vadd.f32 %v12508_v28, %v644_v27  ;;  %v2187_v30 = vmul.f32 %v7585_v40, %v7817_v26 }
 0x239   :  { %2120 = vrot.lane.b32.xlu2 %v2115_v13, %s6370_s2  ;;  %12507 = vst [vmem:[#allocation40_spill] sm:$0xff] %v7837_v58  ;;  %v902_v9 = vmul.f32 %v7197_v60, %v7837_v58  ;;  %v847_v18 = vadd.f32 %v843_v56, %v7820_v11  ;;  %v2166_v15 = vsel %vm306_vm1, %v2164_v50, %v2165_v41 }
 0x23a   :  { %2118 = vrot.lane.b32.xlu1 %v2111_v52, %s6370_s2  ;;  %2116 = vrot.lane.b32.xlu0 %v2112_v16, %s6370_s2  ;;  %v844_v16 = vmul.f32 %v7193_v24, %v7803_v53  ;;  %v2159_v37 = vmul.f32 %v7625_v39, %v7777_v62  ;;  %v2158_v27 = vmul.f32 %v7577_v46, %v7777_v62  ;;  %v7868_v62 = vstv %s7797_s10 }
 0x23b   :  { %v7814_v13 = vpop.permute.xlu2 %1804  ;;  %v903_v60 = vmul.f32 %v7193_v24, %v7837_v58  ;;  %v7859_v28 = vmul.f32 %v7218_v6, %v7837_v58  ;;  %v904_v56 = vmul.f32 %v7189_v0, %v7837_v58  ;;  %v849_v45 = vadd.f32 %v845_v5, %v7820_v11  ;;  %12510 = vst [vmem:[#allocation56_spill] sm:$0xff] %v7868_v62  ;;  %v12512_v5 = vld [vmem:[#allocation87_spill] sm:$0xff] }
 0x23c   :  { %12501 = vst [vmem:[#allocation54_spill] sm:$0xff] %v7814_v13  ;;  %v7829_v52 = vpop.permute.xlu1 %1718  ;;  %v7831_v34 = vpop.permute.xlu0 %1716  ;;  %v7846_v13 = vmul.f32 %v7581_v51, %v7817_v26  ;;  %v848_v1 = vadd.f32 %v844_v16, %v7820_v11  ;;  %v846_v14 = vmul.f32 %v7218_v6, %v7803_v53  ;;  %v693_v16 = vadd.f32 %v684_v12, %v670_v35 }
 0x23d   :  { %12504 = vst [vmem:[#allocation51_spill] sm:$0xff] %v7829_v52  ;;  %v12509_v52 = vld [vmem:[#allocation52_spill] sm:$0xff]  ;;  %v910_v24 = vrot.slane %v902_v9, 1  ;;  %v2195_v0 = vrot.slane %v2187_v30, 2  ;;  %v872_v58 = vadd.f32 %v12512_v5, %v847_v18  ;;  %v2168_v6 = vrot.slane %v2159_v37, 2  ;;  %v12520_v37 = vld [vmem:[#allocation69_spill] sm:$0xff] }
 0x23e   :  { %12505 = vst [vmem:[#allocation53_spill] sm:$0xff] %v7831_v34  ;;  %v721_v50 = vadd.f32 %v12509_v52, %v690_v20  ;;  %v12511_v34 = vrot.slane %v7722_v17, 1  ;;  %v692_v20 = vadd.f32 %v685_v36, %v669_v43  ;;  %v2167_v53 = vrot.slane %v2158_v27, 2  ;;  %v12517_v30 = vld [vmem:[#allocation68_spill] sm:$0xff]  ;;  %v12518_v52 = vld [vmem:[#allocation74_spill] sm:$0xff] }
 0x23f   :  { %v911_v12 = vrot.slane %v903_v60, 1  ;;  %v914_v35 = vrot.slane %v7859_v28, 1  ;;  %v913_v9 = vrot.slane %v904_v56, 1  ;;  %v874_v36 = vadd.f32 %v12518_v52, %v849_v45  ;;  %v12519_v43 = vld [vmem:[#allocation90_spill] sm:$0xff]  ;;  %v12523_v56 = vld [vmem:[#allocation96_spill] sm:$0xff] }
 0x240   :  { %v897_v18 = vadd.f32 %v12519_v43, %v872_v58  ;;  %v850_v5 = vadd.f32 %v846_v14, %v7820_v11  ;;  %v722_v27 = vadd.f32 %v12520_v37, %v691_v3  ;;  %v12522_v60 = vrot.slane %v7846_v13, 2  ;;  %v12524_v58 = vld [vmem:[#allocation78_spill] sm:$0xff]  ;;  %v12525_v52 = vld [vmem:[#allocation72_spill] sm:$0xff]  ;;  %v7922_v11 = vld [vmem:[#allocation7 + $0x30] sm:$0xff] }
 0x241   :  { %2172 = vrot.lane.b32.xlu2 %v2165_v41, %s6371_s28  ;;  %v873_v41 = vadd.f32 %v12514_v44, %v848_v1  ;;  %v912_v1 = vsel %vm220_vm0, %v910_v24, %v911_v12  ;;  %v2190_v45 = vmul.f32 %v7625_v39, %v7817_v26  ;;  %v2189_v14 = vmul.f32 %v7577_v46, %v7817_v26 }
 0x242   :  { %2170 = vrot.lane.b32.xlu1 %v2166_v15, %s6371_s28  ;;  %2122 = vrot.lane.b32.xlu0 %v12511_v34, %s6370_s2  ;;  %v723_v34 = vadd.f32 %v12517_v30, %v692_v20  ;;  %v2197_v28 = vsel %vm306_vm1, %v2195_v0, %v12522_v60  ;;  %v2169_v20 = vsel %vm306_vm1, %v2167_v53, %v2168_v6  ;;  %v7907_v0 = vld [vmem:[#allocation7] sm:$0xff] }
 0x243   :  { %v7877_v55 = vpop.permute.xlu2 %1856  ;;  %v898_v3 = vadd.f32 %v12524_v58, %v873_v41  ;;  %v987_v53 = vmul.f32 %v7907_v0, %v7868_v62  ;;  %v753_v30 = vadd.f32 %v12525_v52, %v722_v27  ;;  %v920_v37 = vadd.f32 %v912_v1, %v897_v18  ;;  %v12527_v60 = vld [vmem:[#allocation91_spill] sm:$0xff]  ;;  %v7916_v58 = vld [vmem:[#allocation7 + $0x38] sm:$0xff] }
 0x244   :  { %12513 = vst [vmem:[#allocation57_spill] sm:$0xff] %v7877_v55  ;;  %v7881_v15 = vpop.permute.xlu1 %1747  ;;  %v7883_v17 = vpop.permute.xlu0 %1745  ;;  %v12521_v55 = vld [vmem:[#allocation73_spill] sm:$0xff]  ;;  %v12528_v41 = vld [vmem:[#allocation59_spill] sm:$0xff]  ;;  %v7920_v26 = vmul.f32 %v7916_v58, %v7868_v62  ;;  %v989_v27 = vmul.f32 %v7922_v11, %v7868_v62 }
 0x245   :  { %12515 = vst [vmem:[#allocation48_spill] sm:$0xff] %v7881_v15  ;;  %v752_v44 = vadd.f32 %v12521_v55, %v721_v50  ;;  %v915_v55 = vsel %vm220_vm0, %v913_v9, %v914_v35  ;;  %v7903_v50 = vld [vmem:[#allocation7 + $0x8] sm:$0xff]  ;;  %v754_v9 = vadd.f32 %v12528_v41, %v723_v34  ;;  %v2199_v34 = vrot.slane %v2190_v45, 2  ;;  %v12536_v45 = vld [vmem:[#allocation75_spill] sm:$0xff] }
 0x246   :  { %12516 = vst [vmem:[#allocation60_spill] sm:$0xff] %v7883_v17  ;;  %v899_v17 = vadd.f32 %v12523_v56, %v874_v36  ;;  %v988_v24 = vmul.f32 %v7903_v50, %v7868_v62  ;;  %v12526_v36 = vld [vmem:[#allocation55_spill] sm:$0xff]  ;;  %v875_v56 = vadd.f32 %v12527_v60, %v850_v5  ;;  %v995_v41 = vrot.slane %v987_v53, 2 }
 0x247   :  { %v724_v43 = vadd.f32 %v12526_v36, %v693_v16  ;;  %v12529_v16 = vld [vmem:[#allocation95_spill] sm:$0xff]  ;;  %v775_v52 = vadd.f32 %v7825_v42, %v752_v44  ;;  %v921_v36 = vadd.f32 %v911_v12, %v898_v3  ;;  %v998_v3 = vrot.slane %v989_v27, 2 }
 0x248   :  { %v900_v18 = vadd.f32 %v12529_v16, %v875_v56  ;;  %v922_v5 = vadd.f32 %v915_v55, %v899_v17  ;;  %v996_v60 = vrot.slane %v988_v24, 2  ;;  %v12534_v56 = vld [vmem:[#allocation98_spill] sm:$0xff]  ;;  %v12537_v12 = vld [vmem:[#allocation99_spill] sm:$0xff]  ;;  %v777_v24 = vadd.f32 %v7808_v54, %v754_v9 }
 0x249   :  { %2201 = vrot.lane.b32.xlu2 %v2197_v28, %s6370_s2  ;;  %v2198_v28 = vrot.slane %v2189_v14, 2  ;;  %v12535_v55 = vld [vmem:[#allocation82_spill] sm:$0xff]  ;;  %v806_v42 = vadd.f32 %v12536_v45, %v775_v52  ;;  %v952_v44 = vadd.f32 %v12537_v12, %v921_v36  ;;  %v999_v14 = vrot.slane %v7920_v26, 2  ;;  %v12541_v52 = vld [vmem:[#allocation81_spill] sm:$0xff]  ;;  %v12543_v54 = vld [vmem:[#allocation63_spill] sm:$0xff] }
 0x24a   :  { %2176 = vrot.lane.b32.xlu1 %v2168_v6, %s6371_s28  ;;  %2174 = vrot.lane.b32.xlu0 %v2169_v20, %s6371_s28  ;;  %v12532_v6 = vrot.slane %v7766_v48, 2  ;;  %v12533_v20 = vld [vmem:[#allocation76_spill] sm:$0xff]  ;;  %v953_v17 = vadd.f32 %v12534_v56, %v922_v5  ;;  %v951_v16 = vadd.f32 %v12535_v55, %v920_v37  ;;  %v923_v53 = vadd.f32 %v914_v35, %v900_v18  ;;  %v12538_v48 = vld [vmem:[#allocation103_spill] sm:$0xff]  ;;  %v12542_v36 = vld [vmem:[#allocation89_spill] sm:$0xff] }
 0x24b   :  { %v7929_v1 = vpop.permute.xlu2 %1862  ;;  %v755_v22 = vadd.f32 %v12533_v20, %v724_v43  ;;  %v2200_v43 = vsel %vm306_vm1, %v2198_v28, %v2199_v34  ;;  %v997_v37 = vsel %vm306_vm1, %v995_v41, %v996_v60  ;;  %v12540_v20 = vrot.slane %v7744_v63, 2  ;;  %v12544_v35 = vld [vmem:[#allocation67_spill] sm:$0xff]  ;;  %v12547_v63 = vld [vmem:[#allocation80_spill] sm:$0xff] }
 0x24c   :  { %12530 = vst [vmem:[#allocation61_spill] sm:$0xff] %v7929_v1  ;;  %v7932_v15 = vpop.permute.xlu1 %1779  ;;  %v7934_v4 = vpop.permute.xlu0 %1777  ;;  %v776_v62 = vadd.f32 %v12532_v6, %v753_v30  ;;  %v982_v30 = vadd.f32 %v12538_v48, %v951_v16  ;;  %v12539_v6 = vld [vmem:[#allocation102_spill] sm:$0xff]  ;;  %v808_v55 = vadd.f32 %v12541_v52, %v777_v24  ;;  %v984_v45 = vadd.f32 %v12542_v36, %v953_v17  ;;  %v12548_v28 = vld [vmem:[#allocation83_spill] sm:$0xff]  ;;  %v12550_v17 = vld [vmem:[#allocation85_spill] sm:$0xff] }
 0x24d   :  { %12531 = vst [vmem:[#allocation44_spill] sm:$0xff] %v7934_v4  ;;  %v983_v5 = vadd.f32 %v12539_v6, %v952_v44  ;;  %v778_v56 = vadd.f32 %v12540_v20, %v755_v22  ;;  %v7960_v9 = vadd.f32 %v12544_v35, %v806_v42  ;;  %v1000_v27 = vsel %vm306_vm1, %v998_v3, %v999_v14  ;;  %v12552_v42 = vld [vmem:[#allocation84_spill] sm:$0xff] }
 0x24e   :  { %v807_v26 = vadd.f32 %v12543_v54, %v776_v62  ;;  %v12546_v22 = vrot.slane %v7846_v13, 2  ;;  %v7969_v41 = vadd.f32 %v12548_v28, %v808_v55  ;;  %v954_v62 = vadd.f32 %v12550_v17, %v923_v53  ;;  %v12556_v13 = vld [vmem:[#allocation105_spill] sm:$0xff]  ;;  %v12562_v55 = vld [vmem:[#allocation12_spill] sm:$0xff]  ;;  %v12567_v17 = vld [vmem:[#allocation114_spill] sm:$0xff] }
 0x24f   :  { %12545 = vst [vmem:[#allocation65_spill] sm:$0xff] %v7960_v9  ;;  %v809_v18 = vadd.f32 %v12547_v63, %v778_v56  ;;  %v1006_v44 = vadd.f32 %v996_v60, %v983_v5  ;;  %v1007_v20 = vadd.f32 %v1000_v27, %v984_v45  ;;  %v7984_v56 = vstv %s7941_s11  ;;  %v12563_v54 = vld [vmem:[#allocation93_spill] sm:$0xff] }
 0x250   :  { %12549 = vst [vmem:[#allocation66_spill] sm:$0xff] %v7969_v41  ;;  %v7975_v12 = vadd.f32 %v12552_v42, %v807_v26  ;;  %v2227_v60 = vmul.f32 %v7969_v41, %v12562_v55  ;;  %v2225_v5 = vmul.f32 %v7960_v9, %v12562_v55  ;;  %v1074_v36 = vmul.f32 %v7337_v57, %v7984_v56  ;;  %v12564_v27 = vld [vmem:[#allocation97_spill] sm:$0xff] }
 0x251   :  { %2207 = vrot.lane.b32.xlu2 %v2199_v34, %s6370_s2  ;;  %v1005_v34 = vadd.f32 %v997_v37, %v982_v30  ;;  %12558 = vst [vmem:[#allocation74_spill] sm:$0xff] %v7984_v56  ;;  %v12559_v30 = vld [vmem:[#allocation70_spill] sm:$0xff]  ;;  %v12561_v37 = vld [vmem:[#allocation111_spill] sm:$0xff]  ;;  %v1037_v26 = vadd.f32 %v12563_v54, %v1006_v44  ;;  %v1072_v45 = vmul.f32 %v7345_v8, %v7984_v56 }
 0x252   :  { %2205 = vrot.lane.b32.xlu1 %v2200_v43, %s6370_s2  ;;  %2203 = vrot.lane.b32.xlu0 %v12546_v22, %s6370_s2  ;;  %12553 = vst [vmem:[#allocation87_spill] sm:$0xff] %v7975_v12  ;;  %v12557_v43 = vld [vmem:[#allocation106_spill] sm:$0xff]  ;;  %v7987_v53 = vadd.f32 %v12559_v30, %v809_v18  ;;  %v1038_v52 = vadd.f32 %v12561_v37, %v1007_v20  ;;  %v12565_v18 = vld [vmem:[#allocation113_spill] sm:$0xff] }
 0x253   :  { %v7972_v16 = vpop.permute.xlu2 %1891  ;;  %v1036_v48 = vadd.f32 %v12556_v13, %v1005_v34  ;;  %v985_v6 = vadd.f32 %v12557_v43, %v954_v62  ;;  %v2226_v35 = vmul.f32 %v7975_v12, %v12562_v55  ;;  %v8004_v34 = vstv %s7955_s12  ;;  %v12568_v13 = vld [vmem:[#allocation110_spill] sm:$0xff] }
 0x254   :  { %12551 = vst [vmem:[#allocation52_spill] sm:$0xff] %v7972_v16  ;;  %v7977_v3 = vpop.permute.xlu1 %1802  ;;  %v7979_v24 = vpop.permute.xlu0 %1783  ;;  %v1069_v28 = vadd.f32 %v12565_v18, %v1038_v52  ;;  %v1068_v62 = vadd.f32 %v12567_v17, %v1037_v26  ;;  %v1073_v42 = vmul.f32 %v7341_v33, %v7984_v56  ;;  %v1131_v44 = vmul.f32 %v7345_v8, %v8004_v34 }
 0x255   :  { %12554 = vst [vmem:[#allocation86_spill] sm:$0xff] %v7977_v3  ;;  %v1067_v22 = vadd.f32 %v12564_v27, %v1036_v48  ;;  %v1008_v63 = vadd.f32 %v999_v14, %v985_v6  ;;  %v1132_v43 = vmul.f32 %v7341_v33, %v8004_v34  ;;  %v8023_v6 = vmul.f32 %v7366_v32, %v8004_v34  ;;  %v12573_v27 = vld [vmem:[#allocation100_spill] sm:$0xff] }
 0x256   :  { %12555 = vst [vmem:[#allocation68_spill] sm:$0xff] %v7979_v24  ;;  %v1133_v8 = vmul.f32 %v7337_v57, %v8004_v34  ;;  %v1078_v37 = vadd.f32 %v1074_v36, %v1069_v28  ;;  %v1077_v54 = vadd.f32 %v1073_v42, %v1068_v62  ;;  %v1139_v26 = vrot.slane %v1131_v44, 1  ;;  %v12574_v57 = vld [vmem:[#allocation117_spill] sm:$0xff]  ;;  %v12576_v28 = vld [vmem:[#allocation116_spill] sm:$0xff] }
 0x257   :  { %12560 = vst [vmem:[#allocation90_spill] sm:$0xff] %v7987_v53  ;;  %v1039_v14 = vadd.f32 %v12568_v13, %v1008_v63  ;;  %v1076_v52 = vadd.f32 %v1072_v45, %v1067_v22  ;;  %v1075_v36 = vmul.f32 %v7366_v32, %v7984_v56  ;;  %v12575_v45 = vld [vmem:[#allocation13_spill] sm:$0xff]  ;;  %v1140_v62 = vrot.slane %v1132_v43, 1  ;;  %v12577_v13 = vld [vmem:[#allocation119_spill] sm:$0xff]  ;;  %v12579_v43 = vld [vmem:[#allocation124_spill] sm:$0xff] }
 0x258   :  { %12566 = vst [vmem:[#allocation69_spill] sm:$0xff] %v8004_v34  ;;  %v8043_v22 = vmul.f32 %v7975_v12, %v12575_v45  ;;  %v1102_v17 = vadd.f32 %v12576_v28, %v1077_v54  ;;  %v1143_v42 = vrot.slane %v8023_v6, 1  ;;  %v1142_v44 = vrot.slane %v1133_v8, 1  ;;  %v12578_v34 = vld [vmem:[#allocation104_spill] sm:$0xff] }
 0x259   :  { %2237 = vrot.lane.b32.xlu2 %v2227_v60, %s6371_s28  ;;  %v12572_v60 = vld [vmem:[#allocation11_spill] sm:$0xff]  ;;  %v1070_v63 = vadd.f32 %v12573_v27, %v1039_v14  ;;  %v1101_v18 = vadd.f32 %v12574_v57, %v1076_v52  ;;  %v1103_v14 = vadd.f32 %v12578_v34, %v1078_v37  ;;  %v1141_v52 = vsel %vm220_vm0, %v1139_v26, %v1140_v62  ;;  %v12582_v37 = vld [vmem:[#allocation108_spill] sm:$0xff] }
 0x25a   :  { %2235 = vrot.lane.b32.xlu1 %v2226_v35, %s6371_s28  ;;  %2233 = vrot.lane.b32.xlu0 %v2225_v5, %s6371_s28  ;;  %v2249_v5 = vmul.f32 %v7960_v9, %v12572_v60  ;;  %v2250_v33 = vmul.f32 %v7975_v12, %v12572_v60  ;;  %v2228_v35 = vmul.f32 %v7987_v53, %v12562_v55  ;;  %v8057_v6 = vstv %s8015_s13  ;;  %v12605_v3 = vld [vmem:[#allocation136_spill] sm:$0xff] }
 0x25b   :  { %v8017_v48 = vpop.permute.xlu2 %1943  ;;  %v1126_v55 = vadd.f32 %v12577_v13, %v1101_v18  ;;  %v2295_v32 = vmul.f32 %v7960_v9, %v12575_v45  ;;  %v1079_v54 = vadd.f32 %v1075_v36, %v1070_v63  ;;  %v1128_v27 = vadd.f32 %v12579_v43, %v1103_v14  ;;  %12580 = vst [vmem:[#allocation72_spill] sm:$0xff] %v8057_v6  ;;  %v8070_v63 = vld [vmem:[#allocation7 + $0x10] sm:$0xff]  ;;  %v8089_v43 = vld [vmem:[#allocation7 + $0x40] sm:$0xff] }
 0x25c   :  { %12569 = vst [vmem:[#allocation73_spill] sm:$0xff] %v8017_v48  ;;  %v8027_v20 = vpop.permute.xlu1 %1808  ;;  %v8029_v30 = vpop.permute.xlu0 %1806  ;;  %v1127_v26 = vadd.f32 %v12582_v37, %v1102_v17  ;;  %v1216_v57 = vmul.f32 %v8070_v63, %v8057_v6  ;;  %v12585_v17 = vld [vmem:[#allocation120_spill] sm:$0xff]  ;;  %v1218_v37 = vmul.f32 %v8089_v43, %v8057_v6  ;;  %v2252_v56 = vmul.f32 %v7987_v53, %v12572_v60 }
 0x25d   :  { %12570 = vst [vmem:[#allocation96_spill] sm:$0xff] %v8027_v20  ;;  %v1149_v28 = vadd.f32 %v1141_v52, %v1126_v55  ;;  %v1104_v13 = vadd.f32 %v12585_v17, %v1079_v54  ;;  %v2303_v34 = vrot.slane %v2295_v32, 1  ;;  %v12586_v55 = vld [vmem:[#allocation123_spill] sm:$0xff]  ;;  %v2251_v17 = vmul.f32 %v7969_v41, %v12572_v60 }
 0x25e   :  { %12571 = vst [vmem:[#allocation78_spill] sm:$0xff] %v8029_v30  ;;  %v1150_v48 = vadd.f32 %v1140_v62, %v1127_v26  ;;  %v1224_v16 = vrot.slane %v1216_v57, 2  ;;  %v1227_v62 = vrot.slane %v1218_v37, 2  ;;  %v12591_v26 = vld [vmem:[#allocation132_spill] sm:$0xff]  ;;  %v8116_v57 = vstv %s8059_s14  ;;  %v12604_v30 = vld [vmem:[#allocation135_spill] sm:$0xff] }
 0x25f   :  { %v1129_v52 = vadd.f32 %v12586_v55, %v1104_v13  ;;  %12592 = vst [vmem:[#allocation95_spill] sm:$0xff] %v8116_v57  ;;  %v12597_v55 = vld [vmem:[#allocation14_spill] sm:$0xff] }
 0x260   :  { %v2327_v60 = vmul.f32 %v7969_v41, %v12597_v55 }
 0x261   :  { %2259 = vrot.lane.b32.xlu2 %v2250_v33, %s6370_s2  ;;  %v8066_v33 = vld [vmem:[#allocation7 + $0x18] sm:$0xff] }
 0x262   :  { %2257 = vrot.lane.b32.xlu1 %v2249_v5, %s6370_s2  ;;  %2239 = vrot.lane.b32.xlu0 %v2228_v35, %s6371_s28  ;;  %v1144_v5 = vsel %vm220_vm0, %v1142_v44, %v1143_v42  ;;  %v1217_v35 = vmul.f32 %v8066_v33, %v8057_v6  ;;  %v8083_v44 = vld [vmem:[#allocation7 + $0x48] sm:$0xff] }
 0x263   :  { %v8061_v8 = vpop.permute.xlu2 %1972  ;;  %v8087_v14 = vmul.f32 %v8083_v44, %v8057_v6  ;;  %v1151_v54 = vadd.f32 %v1144_v5, %v1128_v27  ;;  %v12588_v6 = vld [vmem:[#allocation128_spill] sm:$0xff]  ;;  %v12590_v27 = vld [vmem:[#allocation129_spill] sm:$0xff] }
 0x264   :  { %12581 = vst [vmem:[#allocation55_spill] sm:$0xff] %v8061_v8  ;;  %v8076_v18 = vpop.permute.xlu1 %1860  ;;  %v8078_v36 = vpop.permute.xlu0 %1858  ;;  %v2297_v8 = vmul.f32 %v7969_v41, %v12575_v45  ;;  %v1225_v1 = vrot.slane %v1217_v35, 2  ;;  %v1181_v5 = vadd.f32 %v12590_v27, %v1150_v48  ;;  %v12594_v48 = vld [vmem:[#allocation131_spill] sm:$0xff] }
 0x265   :  { %12583 = vst [vmem:[#allocation91_spill] sm:$0xff] %v8076_v18  ;;  %v1182_v20 = vadd.f32 %v12588_v6, %v1151_v54  ;;  %v12589_v18 = vld [vmem:[#allocation112_spill] sm:$0xff]  ;;  %v1228_v13 = vrot.slane %v8087_v14, 2  ;;  %v2298_v6 = vmul.f32 %v7987_v53, %v12575_v45  ;;  %v2325_v54 = vmul.f32 %v7960_v9, %v12597_v55 }
 0x266   :  { %12584 = vst [vmem:[#allocation59_spill] sm:$0xff] %v8078_v36  ;;  %v12587_v36 = vrot.slane %v8043_v22, 1  ;;  %v1180_v24 = vadd.f32 %v12589_v18, %v1149_v28  ;;  %v1226_v28 = vsel %vm306_vm1, %v1224_v16, %v1225_v1  ;;  %v2306_v37 = vrot.slane %v2297_v8, 1 }
 0x267   :  { %v1229_v16 = vsel %vm306_vm1, %v1227_v62, %v1228_v13  ;;  %v8144_v8 = vmul.f32 %v7987_v53, %v12597_v55 }
 0x268   :  { %v2305_v32 = vsel %vm220_vm0, %v2303_v34, %v12587_v36  ;;  %v1152_v34 = vadd.f32 %v1143_v42, %v1129_v52  ;;  %v1211_v35 = vadd.f32 %v12591_v26, %v1180_v24  ;;  %v1212_v36 = vadd.f32 %v12594_v48, %v1181_v5  ;;  %v12602_v26 = vld [vmem:[#allocation16_spill] sm:$0xff] }
 0x269   :  { %2309 = vrot.lane.b32.xlu2 %v2305_v32, %s6371_s28  ;;  %v8132_v24 = vstv %s8074_s15  ;;  %v8135_v52 = vstv %s8081_s16  ;;  %v12601_v32 = vld [vmem:[#allocation15_spill] sm:$0xff]  ;;  %v2307_v5 = vrot.slane %v2298_v6, 1  ;;  %v2333_v6 = vrot.slane %v2325_v54, 1 }
 0x26a   :  { %2263 = vrot.lane.b32.xlu1 %v2252_v56, %s6370_s2  ;;  %2261 = vrot.lane.b32.xlu0 %v2251_v17, %s6370_s2  ;;  %v12598_v17 = vld [vmem:[#allocation118_spill] sm:$0xff]  ;;  %12599 = vst [vmem:[#allocation75_spill] sm:$0xff] %v8132_v24  ;;  %v8139_v27 = vmul.f32 %v7960_v9, %v12601_v32  ;;  %v1234_v48 = vadd.f32 %v1226_v28, %v1211_v35 }
 0x26b   :  { %v8118_v18 = vpop.permute.xlu2 %1978  ;;  %v1213_v42 = vadd.f32 %v12598_v17, %v1182_v20  ;;  %12600 = vst [vmem:[#allocation99_spill] sm:$0xff] %v8135_v52  ;;  %v8148_v20 = vmul.f32 %v7960_v9, %v12602_v26  ;;  %v12603_v17 = vld [vmem:[#allocation115_spill] sm:$0xff]  ;;  %v2308_v62 = vsel %vm220_vm0, %v2306_v37, %v2307_v5 }
 0x26c   :  { %12593 = vst [vmem:[#allocation76_spill] sm:$0xff] %v8118_v18  ;;  %v8122_v14 = vpop.permute.xlu1 %1889  ;;  %v8124_v56 = vpop.permute.xlu0 %1887  ;;  %v1183_v45 = vadd.f32 %v12603_v17, %v1152_v34  ;;  %v2326_v18 = vmul.f32 %v7975_v12, %v12597_v55  ;;  %v1265_v9 = vadd.f32 %v12604_v30, %v1234_v48  ;;  %v8163_v34 = vstv %s8105_s17  ;;  %v12608_v30 = vld [vmem:[#allocation140_spill] sm:$0xff] }
 0x26d   :  { %12595 = vst [vmem:[#allocation98_spill] sm:$0xff] %v8122_v14  ;;  %v8158_v14 = vmul.f32 %v7975_v12, %v12601_v32  ;;  %v1236_v28 = vadd.f32 %v1229_v16, %v1213_v42  ;;  %v2385_v37 = vrot.slane %v8139_v27, 2  ;;  %v2415_v54 = vrot.slane %v8148_v20, 2  ;;  %v12610_v20 = vld [vmem:[#allocation122_spill] sm:$0xff] }
 0x26e   :  { %12596 = vst [vmem:[#allocation82_spill] sm:$0xff] %v8124_v56  ;;  %v1235_v56 = vadd.f32 %v1225_v1, %v1212_v36  ;;  %v1214_v35 = vadd.f32 %v12605_v3, %v1183_v45  ;;  %v12607_v1 = vrot.slane %v8043_v22, 1  ;;  %v8175_v3 = vmul.f32 %v7987_v53, %v12601_v32  ;;  %v12614_v36 = vld [vmem:[#allocation143_spill] sm:$0xff] }
 0x26f   :  { %12606 = vst [vmem:[#allocation103_spill] sm:$0xff] %v8163_v34  ;;  %v1267_v45 = vadd.f32 %v12608_v30, %v1236_v28  ;;  %v2336_v16 = vrot.slane %v2327_v60, 1  ;;  %v2334_v22 = vrot.slane %v2326_v18, 1  ;;  %v1303_v27 = vmul.f32 %v7577_v46, %v8163_v34  ;;  %v12613_v60 = vld [vmem:[#allocation127_spill] sm:$0xff] }
 0x270   :  { %v1266_v48 = vadd.f32 %v12610_v20, %v1235_v56  ;;  %v1301_v17 = vmul.f32 %v7585_v40, %v8163_v34  ;;  %v1296_v18 = vadd.f32 %v12613_v60, %v1265_v9  ;;  %v1237_v30 = vadd.f32 %v1228_v13, %v1214_v35 }
 0x271   :  { %2315 = vrot.lane.b32.xlu2 %v2307_v5, %s6371_s28  ;;  %v8184_v5 = vmul.f32 %v7975_v12, %v12602_v26  ;;  %v1298_v55 = vadd.f32 %v12614_v36, %v1267_v45  ;;  %v8199_v12 = vstv %s8129_s18  ;;  %v1302_v56 = vmul.f32 %v7581_v51, %v8163_v34 }
 0x272   :  { %2313 = vrot.lane.b32.xlu1 %v2308_v62, %s6371_s28  ;;  %2311 = vrot.lane.b32.xlu0 %v12607_v1, %s6371_s28  ;;  %v2386_v1 = vrot.slane %v8158_v14, 2  ;;  %12615 = vst [vmem:[#allocation63_spill] sm:$0xff] %v8199_v12  ;;  %v1360_v20 = vmul.f32 %v7585_v40, %v8199_v12  ;;  %v12618_v9 = vrot.slane %v8144_v8, 1  ;;  %v8215_v36 = vmul.f32 %v7987_v53, %v12602_v26 }
 0x273   :  { %v8180_v42 = vpop.permute.xlu2 %2010  ;;  %v1361_v45 = vmul.f32 %v7581_v51, %v8199_v12  ;;  %v1305_v60 = vadd.f32 %v1301_v17, %v1296_v18  ;;  %v8240_v18 = vstv %s8178_s19 }
 0x274   :  { %12609 = vst [vmem:[#allocation102_spill] sm:$0xff] %v8180_v42  ;;  %v8191_v62 = vpop.permute.xlu1 %1941  ;;  %v8193_v28 = vpop.permute.xlu0 %1893  ;;  %v12616_v42 = vld [vmem:[#allocation144_spill] sm:$0xff]  ;;  %v2338_v13 = vsel %vm220_vm0, %v2336_v16, %v12618_v9  ;;  %v1307_v16 = vadd.f32 %v1303_v27, %v1298_v55  ;;  %v8230_v9 = vmul.f32 %v7969_v41, %v12602_v26  ;;  %v12620_v27 = vld [vmem:[#allocation147_spill] sm:$0xff] }
 0x275   :  { %12611 = vst [vmem:[#allocation81_spill] sm:$0xff] %v8191_v62  ;;  %v1297_v4 = vadd.f32 %v12616_v42, %v1266_v48  ;;  %v12617_v62 = vld [vmem:[#allocation139_spill] sm:$0xff]  ;;  %v8221_v42 = vmul.f32 %v7625_v39, %v8199_v12  ;;  %v1362_v48 = vmul.f32 %v7577_v46, %v8199_v12  ;;  %v2387_v12 = vsel %vm306_vm1, %v2385_v37, %v2386_v1 }
 0x276   :  { %12612 = vst [vmem:[#allocation89_spill] sm:$0xff] %v8193_v28  ;;  %v2379_v28 = vmul.f32 %v7969_v41, %v12601_v32  ;;  %v1268_v14 = vadd.f32 %v12617_v62, %v1237_v30  ;;  %v2335_v30 = vsel %vm220_vm0, %v2333_v6, %v2334_v22  ;;  %v1368_v32 = vrot.slane %v1360_v20, 1  ;;  %v12619_v62 = vld [vmem:[#allocation130_spill] sm:$0xff] }
 0x277   :  { %v1306_v35 = vadd.f32 %v1302_v56, %v1297_v4  ;;  %v1330_v17 = vadd.f32 %v12620_v27, %v1305_v60  ;;  %v1304_v6 = vmul.f32 %v7625_v39, %v8163_v34  ;;  %12621 = vst [vmem:[#allocation67_spill] sm:$0xff] %v8240_v18  ;;  %v12623_v4 = vld [vmem:[#allocation146_spill] sm:$0xff]  ;;  %v1369_v20 = vrot.slane %v1361_v45, 1 }
 0x278   :  { %v2388_v53 = vrot.slane %v2379_v28, 2  ;;  %v1299_v55 = vadd.f32 %v12619_v62, %v1268_v14  ;;  %v12625_v28 = vld [vmem:[#allocation150_spill] sm:$0xff]  ;;  %v1532_v27 = vmul.f32 %v7903_v50, %v8132_v24  ;;  %v12627_v34 = vrot.slane %v8184_v5, 2 }
 0x279   :  { %2343 = vrot.lane.b32.xlu2 %v2338_v13, %s6370_s2  ;;  %v1331_v56 = vadd.f32 %v12623_v4, %v1306_v35  ;;  %v1355_v14 = vadd.f32 %v12625_v28, %v1330_v17  ;;  %v12626_v62 = vld [vmem:[#allocation134_spill] sm:$0xff]  ;;  %v1370_v35 = vsel %vm220_vm0, %v1368_v32, %v1369_v20  ;;  %v8260_v45 = vmul.f32 %v7625_v39, %v8240_v18  ;;  %v12629_v4 = vld [vmem:[#allocation156_spill] sm:$0xff] }
 0x27a   :  { %2341 = vrot.lane.b32.xlu1 %v2334_v22, %s6370_s2  ;;  %2339 = vrot.lane.b32.xlu0 %v2335_v30, %s6370_s2  ;;  %v1372_v22 = vrot.slane %v8221_v42, 1  ;;  %v1371_v30 = vrot.slane %v1362_v48, 1  ;;  %v1332_v60 = vadd.f32 %v12626_v62, %v1307_v16  ;;  %v2417_v41 = vsel %vm306_vm1, %v2415_v54, %v12627_v34  ;;  %v12630_v34 = vld [vmem:[#allocation138_spill] sm:$0xff] }
 0x27b   :  { %v8242_v13 = vpop.permute.xlu2 %2033  ;;  %v1531_v42 = vmul.f32 %v7907_v0, %v8132_v24  ;;  %v12628_v48 = vrot.slane %v8175_v3, 2  ;;  %v1308_v17 = vadd.f32 %v1304_v6, %v1299_v55  ;;  %v1533_v62 = vmul.f32 %v7922_v11, %v8132_v24  ;;  %v12631_v6 = vld [vmem:[#allocation151_spill] sm:$0xff] }
 0x27c   :  { %12622 = vst [vmem:[#allocation80_spill] sm:$0xff] %v8242_v13  ;;  %v8246_v26 = vpop.permute.xlu1 %1947  ;;  %v8248_v37 = vpop.permute.xlu0 %1945  ;;  %v1357_v28 = vadd.f32 %v12629_v4, %v1332_v60  ;;  %v1447_v32 = vmul.f32 %v7577_v46, %v8240_v18  ;;  %v1356_v54 = vadd.f32 %v12630_v34, %v1331_v56  ;;  %v1373_v39 = vsel %vm220_vm0, %v1371_v30, %v1372_v22 }
 0x27d   :  { %12624 = vst [vmem:[#allocation83_spill] sm:$0xff] %v8246_v26  ;;  %v2390_v16 = vsel %vm306_vm1, %v2388_v53, %v12628_v48  ;;  %v8276_v13 = vmul.f32 %v7581_v51, %v8240_v18  ;;  %v1445_v53 = vmul.f32 %v7585_v40, %v8240_v18  ;;  %v1378_v55 = vadd.f32 %v1370_v35, %v1355_v14 }
 0x27e   :  { %v1333_v60 = vadd.f32 %v12631_v6, %v1308_v17  ;;  %v1536_v48 = vadd.f32 %v1532_v27, %v8116_v57  ;;  %v1590_v4 = vmul.f32 %v7907_v0, %v8135_v52  ;;  %v1535_v56 = vadd.f32 %v1531_v42, %v8116_v57  ;;  %v12634_v17 = vld [vmem:[#allocation155_spill] sm:$0xff] }
 0x27f   :  { %v8289_v51 = vmul.f32 %v7916_v58, %v8135_v52  ;;  %v1592_v40 = vmul.f32 %v7922_v11, %v8135_v52  ;;  %v12632_v30 = vrot.slane %v8144_v8, 1  ;;  %v1537_v14 = vadd.f32 %v1533_v62, %v8116_v57  ;;  %v12635_v8 = vld [vmem:[#allocation158_spill] sm:$0xff] }
 0x280   :  { %v1456_v27 = vrot.slane %v1447_v32, 2  ;;  %v1591_v35 = vmul.f32 %v7903_v50, %v8135_v52  ;;  %v1358_v34 = vadd.f32 %v12634_v17, %v1333_v60  ;;  %v1379_v6 = vadd.f32 %v1369_v20, %v1356_v54  ;;  %v12637_v54 = vld [vmem:[#allocation159_spill] sm:$0xff]  ;;  %v12638_v17 = vld [vmem:[#allocation165_spill] sm:$0xff] }
 0x281   :  { %2393 = vrot.lane.b32.xlu2 %v2386_v1, %s6371_s28  ;;  %v1380_v1 = vadd.f32 %v1373_v39, %v1357_v28  ;;  %v1454_v46 = vrot.slane %v8276_v13, 2  ;;  %v1453_v18 = vrot.slane %v1445_v53, 2  ;;  %v12636_v39 = vld [vmem:[#allocation142_spill] sm:$0xff]  ;;  %v1598_v32 = vrot.slane %v1590_v4, 1 }
 0x282   :  { %2391 = vrot.lane.b32.xlu1 %v2387_v12, %s6371_s28  ;;  %2345 = vrot.lane.b32.xlu0 %v12632_v30, %s6370_s2  ;;  %v1409_v62 = vadd.f32 %v12636_v39, %v1378_v55  ;;  %v1534_v30 = vmul.f32 %v7916_v58, %v8132_v24  ;;  %v1561_v52 = vadd.f32 %v7531_v38, %v1536_v48  ;;  %v1601_v13 = vrot.slane %v1592_v40, 1  ;;  %v12640_v39 = vld [vmem:[#allocation163_spill] sm:$0xff]  ;;  %v12641_v48 = vld [vmem:[#allocation149_spill] sm:$0xff]  ;;  %v12642_v40 = vld [vmem:[#allocation162_spill] sm:$0xff] }
 0x283   :  { %v8302_v42 = vpop.permute.xlu2 %2085  ;;  %v1411_v28 = vadd.f32 %v12635_v8, %v1380_v1  ;;  %v1560_v60 = vadd.f32 %v7533_v61, %v1535_v56  ;;  %v1410_v53 = vadd.f32 %v12637_v54, %v1379_v6  ;;  %v12639_v1 = vrot.slane %v8260_v45, 2  ;;  %v12643_v54 = vld [vmem:[#allocation171_spill] sm:$0xff] }
 0x284   :  { %12633 = vst [vmem:[#allocation85_spill] sm:$0xff] %v8302_v42  ;;  %v8306_v12 = vpop.permute.xlu1 %1976  ;;  %v8308_v26 = vpop.permute.xlu0 %1974  ;;  %v1562_v42 = vadd.f32 %v12638_v17, %v1537_v14  ;;  %v1599_v4 = vrot.slane %v1591_v35, 1  ;;  %v1381_v8 = vadd.f32 %v1372_v22, %v1358_v34  ;;  %v1440_v24 = vadd.f32 %v12640_v39, %v1409_v62  ;;  %v12648_v17 = vld [vmem:[#allocation166_spill] sm:$0xff] }
 0x285   :  { %v1458_v55 = vsel %vm306_vm1, %v1456_v27, %v12639_v1  ;;  %v1455_v38 = vsel %vm306_vm1, %v1453_v18, %v1454_v46  ;;  %v1585_v61 = vadd.f32 %v7566_v10, %v1560_v60  ;;  %v1442_v56 = vadd.f32 %v12641_v48, %v1411_v28 }
 0x286   :  { %v1441_v20 = vadd.f32 %v12642_v40, %v1410_v53  ;;  %v1600_v6 = vsel %vm220_vm0, %v1598_v32, %v1599_v4  ;;  %v1587_v14 = vadd.f32 %v7614_v7, %v1562_v42  ;;  %v1586_v27 = vadd.f32 %v12643_v54, %v1561_v52 }
 0x287   :  { %v1538_v22 = vadd.f32 %v1534_v30, %v8116_v57  ;;  %v12644_v35 = vrot.slane %v8289_v51, 1  ;;  %v8336_v34 = vstv %s8293_s20  ;;  %v12646_v10 = vrot.slane %v8175_v3, 2  ;;  %v12647_v30 = vld [vmem:[#allocation145_spill] sm:$0xff] }
 0x288   :  { %12645 = vst [vmem:[#allocation84_spill] sm:$0xff] %v8336_v34  ;;  %v1676_v7 = vmul.f32 %v7903_v50, %v8336_v34  ;;  %v8348_v52 = vmul.f32 %v7916_v58, %v8336_v34  ;;  %v1463_v28 = vadd.f32 %v1455_v38, %v1440_v24  ;;  %v1608_v62 = vadd.f32 %v1600_v6, %v1585_v61 }
 0x289   :  { %2421 = vrot.lane.b32.xlu2 %v2417_v41, %s6370_s2  ;;  %v1603_v18 = vsel %vm220_vm0, %v1601_v13, %v12644_v35  ;;  %v1675_v41 = vmul.f32 %v7907_v0, %v8336_v34  ;;  %v1677_v3 = vmul.f32 %v7922_v11, %v8336_v34  ;;  %v2419_v50 = vrot.slane %v8215_v36, 2 }
 0x28a   :  { %2397 = vrot.lane.b32.xlu1 %v12646_v10, %s6371_s28  ;;  %2395 = vrot.lane.b32.xlu0 %v2390_v16, %s6371_s28  ;;  %v1412_v60 = vadd.f32 %v12647_v30, %v1381_v8  ;;  %v1465_v0 = vadd.f32 %v1458_v55, %v1442_v56  ;;  %v1610_v13 = vadd.f32 %v1603_v18, %v1587_v14  ;;  %v2418_v58 = vrot.slane %v8230_v9, 2  ;;  %v12649_v9 = vld [vmem:[#allocation167_spill] sm:$0xff]  ;;  %v12659_v30 = vld [vmem:[#allocation32_spill] sm:$0xff] }
 0x28b   :  { %v8350_v42 = vpop.permute.xlu2 %2091  ;;  %v1464_v53 = vadd.f32 %v1454_v46, %v1441_v20  ;;  %v1494_v1 = vadd.f32 %v12648_v17, %v1463_v28  ;;  %v1563_v24 = vadd.f32 %v7568_v21, %v1538_v22  ;;  %v1609_v39 = vadd.f32 %v1599_v4, %v1586_v27  ;;  %v12662_v17 = vld [vmem:[#allocation46_spill] sm:$0xff] }
 0x28c   :  { %v8354_v32 = vpop.permute.xlu1 %2008  ;;  %v8356_v16 = vpop.permute.xlu0 %2006  ;;  %v1641_v11 = vadd.f32 %v7659_v29, %v1610_v13  ;;  %v1684_v38 = vrot.slane %v1676_v7, 2  ;;  %v1683_v61 = vrot.slane %v1675_v41, 2  ;;  %v1687_v48 = vrot.slane %v8348_v52, 2  ;;  %v12650_v29 = vld [vmem:[#allocation153_spill] sm:$0xff]  ;;  %v12657_v52 = vld [vmem:[#allocation172_spill] sm:$0xff] }
 0x28d   :  { %v1588_v36 = vadd.f32 %v7612_v31, %v1563_v24  ;;  %v1640_v8 = vadd.f32 %v7661_v49, %v1609_v39  ;;  %v1639_v55 = vadd.f32 %v7502_v23, %v1608_v62  ;;  %v1686_v56 = vrot.slane %v1677_v3, 2  ;;  %v12658_v3 = vld [vmem:[#allocation17_spill] sm:$0xff] }
 0x28e   :  { %v1443_v46 = vadd.f32 %v12649_v9, %v1412_v60  ;;  %v1496_v20 = vadd.f32 %v7468_v47, %v1465_v0  ;;  %v2420_v21 = vsel %vm306_vm1, %v2418_v58, %v2419_v50  ;;  %v1495_v4 = vadd.f32 %v12650_v29, %v1464_v53  ;;  %v12660_v60 = vld [vmem:[#allocation176_spill] sm:$0xff]  ;;  %v12664_v39 = vld [vmem:[#allocation181_spill] sm:$0xff] }
 0x28f   :  { %v1671_v40 = vadd.f32 %v7702_v59, %v1640_v8  ;;  %v1670_v6 = vadd.f32 %v7704_v19, %v1639_v55  ;;  %v12651_v23 = vrot.slane %v8184_v5, 2  ;;  %v1672_v47 = vadd.f32 %v7559_v25, %v1641_v11  ;;  %v12652_v59 = vld [vmem:[#allocation157_spill] sm:$0xff]  ;;  %v12653_v19 = vld [vmem:[#allocation175_spill] sm:$0xff]  ;;  %v12667_v8 = vld [vmem:[#allocation48_spill] sm:$0xff] }
 0x290   :  { %v8380_v31 = vadd.f32 %v7505_v2, %v1496_v20  ;;  %v1685_v49 = vsel %vm306_vm1, %v1683_v61, %v1684_v38  ;;  %v8387_v54 = vadd.f32 %v12652_v59, %v1494_v1  ;;  %v8390_v27 = vadd.f32 %v12653_v19, %v1495_v4 }
 0x291   :  { %2427 = vrot.lane.b32.xlu2 %v2419_v50, %s6370_s2  ;;  %v12655_v22 = vmov %v12644_v35  ;;  %v1688_v35 = vsel %vm306_vm1, %v1686_v56, %v1687_v48  ;;  %v12656_v25 = vrot.slane %v8260_v45, 2  ;;  %v1694_v7 = vadd.f32 %v1684_v38, %v1671_v40  ;;  %v12661_v45 = vld [vmem:[#allocation53_spill] sm:$0xff]  ;;  %v12665_v38 = vld [vmem:[#allocation160_spill] sm:$0xff] }
 0x292   :  { %2425 = vrot.lane.b32.xlu1 %v2420_v21, %s6370_s2  ;;  %2423 = vrot.lane.b32.xlu0 %v12651_v23, %s6370_s2  ;;  %12654 = vst [vmem:[#allocation105_spill] sm:$0xff] %v8390_v27  ;;  %v1611_v5 = vadd.f32 %v12655_v22, %v1588_v36  ;;  %v1693_v41 = vadd.f32 %v1685_v49, %v1670_v6  ;;  %v8413_v24 = vstv %s6260_s21  ;;  %v8424_v56 = vstv %s6263_s22  ;;  %v12670_v21 = vld [vmem:[#allocation60_spill] sm:$0xff]  ;;  %v12671_v22 = vld [vmem:[#allocation18_spill] sm:$0xff] }
 0x293   :  { %v8384_v14 = vpop.permute.xlu2 %2120  ;;  %v1466_v10 = vadd.f32 %v12656_v25, %v1443_v46  ;;  %v1695_v62 = vadd.f32 %v1688_v35, %v1672_v47  ;;  %v2447_v50 = vmul.f32 %v8380_v31, %v12658_v3  ;;  %v2446_v13 = vmul.f32 %v8390_v27, %v12658_v3  ;;  %12663 = vst [vmem:[#allocation106_spill] sm:$0xff] %v8413_v24  ;;  %v12669_v46 = vld [vmem:[#allocation36_spill] sm:$0xff] }
 0x294   :  { %v8395_v2 = vpop.permute.xlu1 %2031  ;;  %v8397_v18 = vpop.permute.xlu0 %2012  ;;  %v1724_v51 = vadd.f32 %v12659_v30, %v1693_v41  ;;  %v1642_v0 = vadd.f32 %v12660_v60, %v1611_v5  ;;  %v2445_v58 = vmul.f32 %v8387_v54, %v12658_v3  ;;  %v1725_v11 = vadd.f32 %v12664_v39, %v1694_v7  ;;  %12668 = vst [vmem:[#allocation111_spill] sm:$0xff] %v8424_v56  ;;  %v12672_v7 = vld [vmem:[#allocation51_spill] sm:$0xff] }
 0x295   :  { %v1497_v28 = vadd.f32 %v12657_v52, %v1466_v10  ;;  %v1726_v53 = vadd.f32 %v12661_v45, %v1695_v62  ;;  %v1762_v36 = vmul.f32 %v8089_v43, %v8413_v24  ;;  %v1761_v4 = vmul.f32 %v8066_v33, %v8413_v24  ;;  %v12673_v62 = vld [vmem:[#allocation19_spill] sm:$0xff] }
 0x296   :  { %v1673_v1 = vadd.f32 %v12662_v17, %v1642_v0  ;;  %v1755_v20 = vadd.f32 %v12669_v46, %v1724_v51  ;;  %v1756_v29 = vadd.f32 %v12670_v21, %v1725_v11  ;;  %v1760_v40 = vmul.f32 %v8070_v63, %v8413_v24  ;;  %v12674_v0 = vld [vmem:[#allocation44_spill] sm:$0xff]  ;;  %v12675_v17 = vld [vmem:[#allocation30_spill] sm:$0xff]  ;;  %v12676_v11 = vld [vmem:[#allocation29_spill] sm:$0xff] }
 0x297   :  { %v8419_v61 = vadd.f32 %v12665_v38, %v1497_v28  ;;  %v1757_v55 = vadd.f32 %v12667_v8, %v1726_v53  ;;  %v1819_v47 = vmul.f32 %v8070_v63, %v8424_v56  ;;  %v8444_v59 = vmul.f32 %v8083_v44, %v8424_v56 }
 0x298   :  { %v1696_v49 = vadd.f32 %v1687_v48, %v1673_v1  ;;  %v1821_v19 = vmul.f32 %v8089_v43, %v8424_v56  ;;  %v2469_v5 = vmul.f32 %v8387_v54, %v12671_v22  ;;  %v1820_v25 = vmul.f32 %v8066_v33, %v8424_v56 }
 0x299   :  { %2457 = vrot.lane.b32.xlu2 %v2447_v50, %s6371_s28  ;;  %12666 = vst [vmem:[#allocation70_spill] sm:$0xff] %v8419_v61  ;;  %v1766_v35 = vadd.f32 %v1762_v36, %v1757_v55  ;;  %v2470_v10 = vmul.f32 %v8390_v27, %v12671_v22  ;;  %v2448_v48 = vmul.f32 %v8419_v61, %v12658_v3  ;;  %v1827_v30 = vrot.slane %v1819_v47, 1  ;;  %v12677_v36 = vld [vmem:[#allocation86_spill] sm:$0xff] }
 0x29a   :  { %2455 = vrot.lane.b32.xlu1 %v2446_v13, %s6371_s28  ;;  %2453 = vrot.lane.b32.xlu0 %v2445_v58, %s6371_s28  ;;  %v1727_v41 = vadd.f32 %v12672_v7, %v1696_v49  ;;  %v1765_v52 = vadd.f32 %v1761_v4, %v1756_v29  ;;  %v1764_v28 = vadd.f32 %v1760_v40, %v1755_v20  ;;  %v1831_v58 = vrot.slane %v8444_v59, 1  ;;  %v12678_v29 = vld [vmem:[#allocation78_spill] sm:$0xff] }
 0x29b   :  { %v8426_v9 = vpop.permute.xlu2 %2172  ;;  %v8459_v50 = vmul.f32 %v8390_v27, %v12673_v62  ;;  %v2515_v51 = vmul.f32 %v8387_v54, %v12673_v62  ;;  %v1830_v45 = vrot.slane %v1821_v19, 1  ;;  %v1828_v53 = vrot.slane %v1820_v25, 1  ;;  %v12680_v47 = vld [vmem:[#allocation54_spill] sm:$0xff] }
 0x29c   :  { %v8434_v6 = vpop.permute.xlu1 %2037  ;;  %v8436_v23 = vpop.permute.xlu0 %2035  ;;  %v1790_v60 = vadd.f32 %v7932_v15, %v1765_v52  ;;  %v1789_v13 = vadd.f32 %v12674_v0, %v1764_v28  ;;  %v1791_v1 = vadd.f32 %v12675_v17, %v1766_v35  ;;  %v1758_v38 = vadd.f32 %v12676_v11, %v1727_v41 }
 0x29d   :  { %v1763_v15 = vmul.f32 %v8083_v44, %v8413_v24  ;;  %v2524_v20 = vrot.slane %v8459_v50, 1  ;;  %v1829_v21 = vsel %vm220_vm0, %v1827_v30, %v1828_v53  ;;  %v8484_v40 = vstv %s8440_s23 }
 0x29e   :  { %v1814_v8 = vadd.f32 %v12677_v36, %v1789_v13  ;;  %v1816_v4 = vadd.f32 %v12678_v29, %v1791_v1  ;;  %12679 = vst [vmem:[#allocation93_spill] sm:$0xff] %v8484_v40  ;;  %v1815_v49 = vadd.f32 %v12680_v47, %v1790_v60  ;;  %v1832_v59 = vsel %vm220_vm0, %v1830_v45, %v1831_v58  ;;  %v12682_v60 = vld [vmem:[#allocation91_spill] sm:$0xff]  ;;  %v12683_v1 = vld [vmem:[#allocation96_spill] sm:$0xff]  ;;  %v12686_v47 = vld [vmem:[#allocation98_spill] sm:$0xff] }
 0x29f   :  { %v2523_v19 = vrot.slane %v2515_v51, 1  ;;  %v1905_v35 = vmul.f32 %v8066_v33, %v8484_v40  ;;  %v1904_v25 = vmul.f32 %v8070_v63, %v8484_v40  ;;  %v1767_v41 = vadd.f32 %v1763_v15, %v1758_v38  ;;  %v12681_v63 = vld [vmem:[#allocation68_spill] sm:$0xff]  ;;  %v12684_v38 = vld [vmem:[#allocation59_spill] sm:$0xff] }
 0x2a0   :  { %v1837_v7 = vadd.f32 %v1829_v21, %v1814_v8  ;;  %v1906_v52 = vmul.f32 %v8089_v43, %v8484_v40  ;;  %v1839_v50 = vadd.f32 %v1832_v59, %v1816_v4  ;;  %v2517_v33 = vmul.f32 %v8380_v31, %v12673_v62  ;;  %v12687_v59 = vld [vmem:[#allocation82_spill] sm:$0xff] }
 0x2a1   :  { %2479 = vrot.lane.b32.xlu2 %v2470_v10, %s6370_s2  ;;  %v8496_v10 = vmul.f32 %v8083_v44, %v8484_v40  ;;  %v2525_v28 = vsel %vm220_vm0, %v2523_v19, %v2524_v20  ;;  %v1792_v30 = vadd.f32 %v12681_v63, %v1767_v41  ;;  %v1838_v44 = vadd.f32 %v1828_v53, %v1815_v49  ;;  %v12685_v53 = vld [vmem:[#allocation57_spill] sm:$0xff] }
 0x2a2   :  { %2477 = vrot.lane.b32.xlu1 %v2469_v5, %s6370_s2  ;;  %2459 = vrot.lane.b32.xlu0 %v2448_v48, %s6371_s28  ;;  %v2472_v5 = vmul.f32 %v8419_v61, %v12671_v22  ;;  %v2471_v48 = vmul.f32 %v8380_v31, %v12671_v22  ;;  %v2518_v51 = vmul.f32 %v8419_v61, %v12673_v62  ;;  %v1913_v0 = vrot.slane %v1905_v35, 2 }
 0x2a3   :  { %v8470_v39 = vpop.permute.xlu2 %2201  ;;  %v1870_v43 = vadd.f32 %v12682_v60, %v1839_v50  ;;  %v1912_v13 = vrot.slane %v1904_v25, 2  ;;  %v1916_v45 = vrot.slane %v8496_v10, 2  ;;  %v1817_v11 = vadd.f32 %v12683_v1, %v1792_v30  ;;  %v12691_v1 = vld [vmem:[#allocation61_spill] sm:$0xff] }
 0x2a4   :  { %v8476_v55 = vpop.permute.xlu1 %2089  ;;  %v8478_v46 = vpop.permute.xlu0 %2087  ;;  %v1869_v36 = vadd.f32 %v12684_v38, %v1838_v44  ;;  %v1868_v8 = vadd.f32 %v12685_v53, %v1837_v7  ;;  %v1915_v15 = vrot.slane %v1906_v52, 2  ;;  %v2526_v4 = vrot.slane %v2517_v33, 1 }
 0x2a5   :  { %v1914_v25 = vsel %vm306_vm1, %v1912_v13, %v1913_v0  ;;  %v2527_v10 = vrot.slane %v2518_v51, 1  ;;  %v1840_v7 = vadd.f32 %v1831_v58, %v1817_v11  ;;  %v8547_v38 = vstv %s6269_s24 }
 0x2a6   :  { %v1900_v49 = vadd.f32 %v12686_v47, %v1869_v36  ;;  %v1899_v19 = vadd.f32 %v12687_v59, %v1868_v8  ;;  %v1917_v52 = vsel %vm306_vm1, %v1915_v15, %v1916_v45  ;;  %12692 = vst [vmem:[#allocation97_spill] sm:$0xff] %v8547_v38  ;;  %v12693_v15 = vld [vmem:[#allocation89_spill] sm:$0xff]  ;;  %v8608_v22 = vstv %s8570_s25 }
 0x2a7   :  { %v1871_v11 = vadd.f32 %v12691_v1, %v1840_v7  ;;  %v12694_v47 = vld [vmem:[#allocation73_spill] sm:$0xff]  ;;  %12702 = vst [vmem:[#allocation114_spill] sm:$0xff] %v8608_v22 }
 0x2a8   :  { %v1923_v63 = vadd.f32 %v1913_v0, %v1900_v49  ;;  %v1922_v30 = vadd.f32 %v1914_v25, %v1899_v19  ;;  %v8557_v19 = vld [vmem:[#allocation7 + $0x50] sm:$0xff]  ;;  %v6308_v25 = vld [vmem:[#allocation7 + $0x20] sm:$0xff] }
 0x2a9   :  { %2529 = vrot.lane.b32.xlu2 %v2525_v28, %s6371_s28  ;;  %v2528_v28 = vsel %vm220_vm0, %v2526_v4, %v2527_v10  ;;  %v1902_v4 = vadd.f32 %v12693_v15, %v1871_v11 }
 0x2aa   :  { %2483 = vrot.lane.b32.xlu1 %v2472_v5, %s6370_s2  ;;  %2481 = vrot.lane.b32.xlu0 %v2471_v48, %s6370_s2  ;;  %v12688_v5 = vld [vmem:[#allocation52_spill] sm:$0xff]  ;;  %v1954_v49 = vadd.f32 %v12694_v47, %v1923_v63 }
 0x2ab   :  { %v8513_v17 = vpop.permute.xlu2 %2207  ;;  %v1901_v35 = vadd.f32 %v12688_v5, %v1870_v43  ;;  %v12689_v48 = vld [vmem:[#allocation20_spill] sm:$0xff]  ;;  %v12690_v43 = vld [vmem:[#allocation81_spill] sm:$0xff]  ;;  %v1991_v5 = vmul.f32 %v8557_v19, %v8547_v38 }
 0x2ac   :  { %v8518_v21 = vpop.permute.xlu1 %2118  ;;  %v8520_v29 = vpop.permute.xlu0 %2116  ;;  %v2547_v41 = vmul.f32 %v8380_v31, %v12689_v48  ;;  %v8535_v50 = vmul.f32 %v8419_v61, %v12689_v48  ;;  %v2546_v33 = vmul.f32 %v8390_v27, %v12689_v48  ;;  %v2545_v58 = vmul.f32 %v8387_v54, %v12689_v48 }
 0x2ad   :  { %v1924_v44 = vadd.f32 %v1917_v52, %v1901_v35  ;;  %v1953_v13 = vadd.f32 %v12690_v43, %v1922_v30  ;;  %v1985_v52 = vadd.f32 %v8308_v26, %v1954_v49  ;;  %v12697_v30 = vld [vmem:[#allocation21_spill] sm:$0xff] }
 0x2ae   :  { %v2556_v60 = vrot.slane %v2547_v41, 1  ;;  %v2554_v8 = vrot.slane %v2546_v33, 1  ;;  %v2553_v59 = vrot.slane %v2545_v58, 1  ;;  %v12695_v41 = vld [vmem:[#allocation55_spill] sm:$0xff]  ;;  %v8568_v33 = vstv %s8529_s0 }
 0x2af   :  { %v1955_v53 = vadd.f32 %v8248_v37, %v1924_v44  ;;  %v1984_v7 = vadd.f32 %v12695_v41, %v1953_v13  ;;  %12696 = vst [vmem:[#allocation113_spill] sm:$0xff] %v8568_v33  ;;  %v2048_v63 = vmul.f32 %v6308_v25, %v8568_v33  ;;  %v2598_v58 = vmul.f32 %v8390_v27, %v12697_v30  ;;  %v12699_v41 = vld [vmem:[#allocation22_spill] sm:$0xff] }
 0x2b0   :  { %v1925_v44 = vadd.f32 %v1916_v45, %v1902_v4  ;;  %v2050_v43 = vmul.f32 %v8557_v19, %v8568_v33  ;;  %v12698_v45 = vld [vmem:[#allocation83_spill] sm:$0xff] }
 0x2b1   :  { %2535 = vrot.lane.b32.xlu2 %v2527_v10, %s6371_s28  ;;  %v1986_v35 = vadd.f32 %v8306_v12, %v1955_v53  ;;  %v1989_v10 = vmul.f32 %v6308_v25, %v8547_v38  ;;  %v2555_v12 = vsel %vm220_vm0, %v2553_v59, %v2554_v8  ;;  %v2597_v53 = vmul.f32 %v8387_v54, %v12697_v30 }
 0x2b2   :  { %2533 = vrot.lane.b32.xlu1 %v2528_v28, %s6371_s28  ;;  %2531 = vrot.lane.b32.xlu0 %v2524_v20, %s6371_s28  ;;  %v2557_v20 = vrot.slane %v8535_v50, 1  ;;  %v6309_v28 = vld [vmem:[#allocation7 + $0x28] sm:$0xff]  ;;  %v1956_v15 = vadd.f32 %v12698_v45, %v1925_v44  ;;  %v2059_v44 = vrot.slane %v2050_v43, 1  ;;  %v2627_v45 = vmul.f32 %v8387_v54, %v12699_v41 }
 0x2b3   :  { %v8543_v51 = vpop.permute.xlu2 %2237  ;;  %v1990_v50 = vmul.f32 %v6309_v28, %v8547_v38  ;;  %v1995_v13 = vadd.f32 %v1991_v5, %v1986_v35  ;;  %v2049_v1 = vmul.f32 %v6309_v28, %v8568_v33  ;;  %v1993_v47 = vadd.f32 %v1989_v10, %v1984_v7  ;;  %v12700_v10 = vld [vmem:[#allocation102_spill] sm:$0xff] }
 0x2b4   :  { %v8549_v36 = vpop.permute.xlu1 %2170  ;;  %v8551_v0 = vpop.permute.xlu0 %2122  ;;  %v2558_v37 = vsel %vm220_vm0, %v2556_v60, %v2557_v20  ;;  %v6310_v60 = vld [vmem:[#allocation7 + $0x58] sm:$0xff]  ;;  %v8596_v5 = vmul.f32 %v8390_v27, %v12699_v41  ;;  %v2599_v43 = vmul.f32 %v8380_v31, %v12697_v30 }
 0x2b5   :  { %v8578_v26 = vmul.f32 %v6310_v60, %v8568_v33  ;;  %v1994_v4 = vadd.f32 %v1990_v50, %v1985_v52  ;;  %v2057_v52 = vrot.slane %v2049_v1, 1  ;;  %v2020_v7 = vadd.f32 %v12700_v10, %v1995_v13  ;;  %v12703_v13 = vld [vmem:[#allocation80_spill] sm:$0xff] }
 0x2b6   :  { %v2605_v50 = vrot.slane %v2597_v53, 2  ;;  %v1992_v62 = vmul.f32 %v6310_v60, %v8547_v38  ;;  %v2635_v10 = vrot.slane %v2627_v45, 2 }
 0x2b7   :  { %v2019_v35 = vadd.f32 %v8354_v32, %v1994_v4  ;;  %v2060_v33 = vrot.slane %v8578_v26, 1  ;;  %v2133_v4 = vmul.f32 %v6308_v25, %v8608_v22 }
 0x2b9   :  { %2563 = vrot.lane.b32.xlu2 %v2558_v37, %s6370_s2  ;;  %v2606_v37 = vrot.slane %v2598_v58, 2  ;;  %v2044_v1 = vadd.f32 %v12703_v13, %v2019_v35  ;;  %v2061_v53 = vsel %vm220_vm0, %v2059_v44, %v2060_v33  ;;  %v2141_v13 = vrot.slane %v2133_v4, 2 }
 0x2ba   :  { %2561 = vrot.lane.b32.xlu1 %v2554_v8, %s6370_s2  ;;  %2559 = vrot.lane.b32.xlu0 %v2555_v12, %s6370_s2  ;;  %v2056_v8 = vrot.slane %v2048_v63, 1  ;;  %v2018_v12 = vadd.f32 %v8356_v16, %v1993_v47  ;;  %v12701_v63 = vld [vmem:[#allocation76_spill] sm:$0xff]  ;;  %v2045_v16 = vadd.f32 %v8436_v23, %v2020_v7  ;;  %v2600_v23 = vmul.f32 %v8419_v61, %v12697_v30 }
 0x2bb   :  { %v8585_v11 = vpop.permute.xlu2 %2259  ;;  %v1987_v58 = vadd.f32 %v12701_v63, %v1956_v15  ;;  %v2607_v26 = vsel %vm306_vm1, %v2605_v50, %v2606_v37  ;;  %v2134_v15 = vmul.f32 %v6309_v28, %v8608_v22  ;;  %v2136_v47 = vmul.f32 %v6310_v60, %v8608_v22 }
 0x2bc   :  { %v8590_v49 = vpop.permute.xlu1 %2176  ;;  %v8592_v59 = vpop.permute.xlu0 %2174  ;;  %v2043_v48 = vadd.f32 %v8395_v2, %v2018_v12  ;;  %v2058_v32 = vsel %vm220_vm0, %v2056_v8, %v2057_v52  ;;  %v2636_v2 = vrot.slane %v8596_v5, 2  ;;  %v2135_v12 = vmul.f32 %v8557_v19, %v8608_v22  ;;  %v12726_v22 = vld [vmem:[#allocation90_spill] sm:$0xff] }
 0x2bd   :  { %v1996_v35 = vadd.f32 %v1992_v62, %v1987_v58  ;;  %v2068_v5 = vadd.f32 %v2061_v53, %v2045_v16  ;;  %v2608_v7 = vrot.slane %v2599_v43, 2  ;;  %v2067_v63 = vadd.f32 %v2057_v52, %v2044_v1  ;;  %v12704_v58 = vld [vmem:[#allocation85_spill] sm:$0xff] }
 0x2be   :  { %v2637_v28 = vsel %vm306_vm1, %v2635_v10, %v2636_v2  ;;  %v2609_v25 = vrot.slane %v2600_v23, 2  ;;  %v2144_v45 = vrot.slane %v2135_v12, 2  ;;  %v2629_v52 = vmul.f32 %v8380_v31, %v12699_v41 }
 0x2bf   :  { %v2021_v50 = vadd.f32 %v8397_v18, %v1996_v35  ;;  %v2099_v60 = vadd.f32 %v8476_v55, %v2068_v5  ;;  %v2098_v19 = vadd.f32 %v8478_v46, %v2067_v63  ;;  %v2630_v1 = vmul.f32 %v8419_v61, %v12699_v41 }
 0x2c0   :  { %v2610_v18 = vsel %vm306_vm1, %v2608_v7, %v2609_v25 }
 0x2c1   :  { %2613 = vrot.lane.b32.xlu2 %v2606_v37, %s6371_s28  ;;  %v2066_v37 = vadd.f32 %v2058_v32, %v2043_v48  ;;  %v2145_v48 = vrot.slane %v2136_v47, 2  ;;  %v2046_v62 = vadd.f32 %v8434_v6, %v2021_v50  ;;  %v2129_v16 = vadd.f32 %v8518_v21, %v2098_v19 }
 0x2c2   :  { %2611 = vrot.lane.b32.xlu1 %v2607_v26, %s6371_s28  ;;  %2565 = vrot.lane.b32.xlu0 %v2557_v20, %s6370_s2  ;;  %v2142_v26 = vrot.slane %v2134_v15, 2  ;;  %v2130_v6 = vadd.f32 %v8384_v14, %v2099_v60  ;;  %v2639_v35 = vrot.slane %v2630_v1, 2 }
 0x2c3   :  { %v8626_v8 = vpop.permute.xlu2 %2309  ;;  %v2097_v32 = vadd.f32 %v12704_v58, %v2066_v37  ;;  %v2069_v53 = vadd.f32 %v2060_v33, %v2046_v62  ;;  %v2146_v23 = vsel %vm306_vm1, %v2144_v45, %v2145_v48  ;;  %v12711_v58 = vld [vmem:[#allocation25_spill] sm:$0xff] }
 0x2c4   :  { %v2206_v44 = vpop.permute.xlu1 %2205  ;;  %v2204_v20 = vpop.permute.xlu0 %2203  ;;  %v2143_v46 = vsel %vm306_vm1, %v2141_v13, %v2142_v26  ;;  %v2152_v4 = vadd.f32 %v2142_v26, %v2129_v16  ;;  %v2153_v37 = vadd.f32 %v2146_v23, %v2130_v6  ;;  %v12710_v13 = vld [vmem:[#allocation24_spill] sm:$0xff] }
 0x2c5   :  { %v2128_v55 = vadd.f32 %v8520_v29, %v2097_v32  ;;  %v2638_v29 = vrot.slane %v2629_v52, 2  ;;  %v2100_v12 = vadd.f32 %v8350_v42, %v2069_v53 }
 0x2c6   :  { %v2184_v10 = vadd.f32 %v8592_v59, %v2153_v37  ;;  %v2183_v5 = vadd.f32 %v8426_v9, %v2152_v4 }
 0x2c7   :  { %v2151_v47 = vadd.f32 %v2143_v46, %v2128_v55  ;;  %v2640_v33 = vsel %vm306_vm1, %v2638_v29, %v2639_v35  ;;  %v2131_v7 = vadd.f32 %v8551_v0, %v2100_v12 }
 0x2c8   :  { %v8664_v50 = vadd.f32 %v2206_v44, %v2184_v10 }
 0x2c9   :  { %2641 = vrot.lane.b32.xlu2 %v2637_v28, %s6370_s2  ;;  %v2182_v14 = vadd.f32 %v8549_v36, %v2151_v47  ;;  %v8671_v36 = vadd.f32 %v2204_v20, %v2183_v5  ;;  %v2154_v9 = vadd.f32 %v2145_v48, %v2131_v7 }
 0x2ca   :  { %2617 = vrot.lane.b32.xlu1 %v2609_v25, %s6371_s28  ;;  %2615 = vrot.lane.b32.xlu0 %v2610_v18, %s6371_s28  ;;  %12705 = vst [vmem:[#allocation110_spill] sm:$0xff] %v8664_v50  ;;  %v12708_v25 = vld [vmem:[#allocation23_spill] sm:$0xff]  ;;  %v2691_v1 = vmul.f32 %v8664_v50, %v12710_v13  ;;  %v2737_v53 = vmul.f32 %v8664_v50, %v12711_v58 }
 0x2cb   :  { %v8646_v43 = vpop.permute.xlu2 %2315  ;;  %v8669_v42 = vadd.f32 %v8470_v39, %v2182_v14  ;;  %12707 = vst [vmem:[#allocation117_spill] sm:$0xff] %v8671_v36  ;;  %v2667_v0 = vmul.f32 %v8664_v50, %v12708_v25  ;;  %v2185_v60 = vadd.f32 %v8590_v49, %v2154_v9  ;;  %v2690_v48 = vmul.f32 %v8671_v36, %v12710_v13  ;;  %v12712_v14 = vld [vmem:[#allocation26_spill] sm:$0xff] }
 0x2cc   :  { %v8651_v15 = vpop.permute.xlu1 %2235  ;;  %v8653_v21 = vpop.permute.xlu0 %2233  ;;  %v2736_v32 = vmul.f32 %v8671_v36, %v12711_v58  ;;  %v2746_v37 = vrot.slane %v2737_v53, 1  ;;  %v2767_v12 = vmul.f32 %v8664_v50, %v12712_v14 }
 0x2cd   :  { %12706 = vst [vmem:[#allocation100_spill] sm:$0xff] %v8669_v42  ;;  %v2665_v44 = vmul.f32 %v8669_v42, %v12708_v25  ;;  %v8690_v20 = vadd.f32 %v8513_v17, %v2185_v60  ;;  %v2689_v62 = vmul.f32 %v8669_v42, %v12710_v13  ;;  %v2735_v17 = vmul.f32 %v8669_v42, %v12711_v58 }
 0x2ce   :  { %v2744_v16 = vrot.slane %v2736_v32, 1  ;;  %v2765_v9 = vmul.f32 %v8669_v42, %v12712_v14 }
 0x2cf   :  { %12709 = vst [vmem:[#allocation116_spill] sm:$0xff] %v8690_v20  ;;  %v2668_v19 = vmul.f32 %v8690_v20, %v12708_v25  ;;  %v2743_v55 = vrot.slane %v2735_v17, 1  ;;  %v2692_v46 = vmul.f32 %v8690_v20, %v12710_v13  ;;  %v2738_v29 = vmul.f32 %v8690_v20, %v12711_v58  ;;  %v12713_v17 = vld [vmem:[#allocation27_spill] sm:$0xff] }
 0x2d0   :  { %v2768_v5 = vmul.f32 %v8690_v20, %v12712_v14 }
 0x2d1   :  { %2647 = vrot.lane.b32.xlu2 %v2639_v35, %s6370_s2  ;;  %v2745_v6 = vsel %vm220_vm0, %v2743_v55, %v2744_v16  ;;  %v2747_v35 = vrot.slane %v2738_v29, 1 }
 0x2d2   :  { %2645 = vrot.lane.b32.xlu1 %v2640_v33, %s6370_s2  ;;  %2643 = vrot.lane.b32.xlu0 %v2636_v2, %s6370_s2  ;;  %v2666_v2 = vmul.f32 %v8671_v36, %v12708_v25  ;;  %v2766_v33 = vmul.f32 %v8671_v36, %v12712_v14  ;;  %v12721_v14 = vld [vmem:[#allocation87_spill] sm:$0xff] }
 0x2d3   :  { %v8666_v63 = vpop.permute.xlu2 %2343  ;;  %v2748_v10 = vsel %vm220_vm0, %v2746_v37, %v2747_v35  ;;  %v12715_v37 = vld [vmem:[#allocation28_spill] sm:$0xff] }
 0x2d4   :  { %v8673_v59 = vpop.permute.xlu1 %2257  ;;  %v8675_v28 = vpop.permute.xlu0 %2239 }
 0x2d9   :  { %2677 = vrot.lane.b32.xlu2 %v2667_v0, %s6371_s28 }
 0x2da   :  { %2675 = vrot.lane.b32.xlu1 %v2666_v2, %s6371_s28  ;;  %2673 = vrot.lane.b32.xlu0 %v2665_v44, %s6371_s28  ;;  %v2776_v2 = vrot.slane %v2767_v12, 1  ;;  %v2774_v44 = vrot.slane %v2766_v33, 1  ;;  %v2847_v33 = vmul.f32 %v8669_v42, %v12715_v37 }
 0x2db   :  { %v8687_v39 = vpop.permute.xlu2 %2393 }
 0x2dc   :  { %v8692_v26 = vpop.permute.xlu1 %2263  ;;  %v8694_v49 = vpop.permute.xlu0 %2261 }
 0x2e1   :  { %2699 = vrot.lane.b32.xlu2 %v2690_v48, %s6370_s2  ;;  %v2777_v48 = vrot.slane %v2768_v5, 1 }
 0x2e2   :  { %2697 = vrot.lane.b32.xlu1 %v2689_v62, %s6370_s2  ;;  %2679 = vrot.lane.b32.xlu0 %v2668_v19, %s6371_s28  ;;  %v2773_v62 = vrot.slane %v2765_v9, 1  ;;  %v2820_v9 = vmul.f32 %v8690_v20, %v12713_v17 }
 0x2e3   :  { %v8709_v45 = vpop.permute.xlu2 %2421  ;;  %v2778_v19 = vsel %vm220_vm0, %v2776_v2, %v2777_v48 }
 0x2e4   :  { %v8711_v18 = vpop.permute.xlu1 %2313  ;;  %v8713_v52 = vpop.permute.xlu0 %2311  ;;  %v2775_v32 = vsel %vm220_vm0, %v2773_v62, %v2774_v44 }
 0x2e9   :  { %2749 = vrot.lane.b32.xlu2 %v2745_v6, %s6371_s28  ;;  %v2817_v6 = vmul.f32 %v8669_v42, %v12713_v17 }
 0x2ea   :  { %2703 = vrot.lane.b32.xlu1 %v2692_v46, %s6370_s2  ;;  %2701 = vrot.lane.b32.xlu0 %v2691_v1, %s6370_s2 }
 0x2eb   :  { %v8725_v23 = vpop.permute.xlu2 %2427  ;;  %v2825_v29 = vrot.slane %v2817_v6, 2 }
 0x2ec   :  { %v8729_v4 = vpop.permute.xlu1 %2341  ;;  %v8731_v47 = vpop.permute.xlu0 %2339 }
 0x2f1   :  { %2755 = vrot.lane.b32.xlu2 %v2747_v35, %s6371_s28  ;;  %v2848_v35 = vmul.f32 %v8671_v36, %v12715_v37 }
 0x2f2   :  { %2753 = vrot.lane.b32.xlu1 %v2748_v10, %s6371_s28  ;;  %2751 = vrot.lane.b32.xlu0 %v2744_v16, %s6371_s28  ;;  %v2818_v16 = vmul.f32 %v8671_v36, %v12713_v17  ;;  %v2819_v10 = vmul.f32 %v8664_v50, %v12713_v17 }
 0x2f3   :  { %v8743_v7 = vpop.permute.xlu2 %2457  ;;  %v2856_v62 = vrot.slane %v2848_v35, 2  ;;  %v2850_v35 = vmul.f32 %v8690_v20, %v12715_v37 }
 0x2f4   :  { %v8747_v0 = vpop.permute.xlu1 %2391  ;;  %v8749_v60 = vpop.permute.xlu0 %2345  ;;  %v2826_v53 = vrot.slane %v2818_v16, 2  ;;  %v2829_v16 = vrot.slane %v2820_v9, 2 }
 0x2f5   :  { %v2859_v9 = vrot.slane %v2850_v35, 2  ;;  %v12722_v35 = vld [vmem:[#allocation65_spill] sm:$0xff] }
 0x2f6   :  { %v2827_v12 = vsel %vm306_vm1, %v2825_v29, %v2826_v53 }
 0x2f9   :  { %2783 = vrot.lane.b32.xlu2 %v2778_v19, %s6370_s2  ;;  %v2828_v19 = vrot.slane %v2819_v10, 2 }
 0x2fa   :  { %2781 = vrot.lane.b32.xlu1 %v2774_v44, %s6370_s2  ;;  %2779 = vrot.lane.b32.xlu0 %v2775_v32, %s6370_s2  ;;  %v2855_v32 = vrot.slane %v2847_v33, 2 }
 0x2fb   :  { %v8758_v55 = vpop.permute.xlu2 %2479 }
 0x2fc   :  { %12714 = vst [vmem:[#allocation119_spill] sm:$0xff] %v8758_v55  ;;  %v8762_v46 = vpop.permute.xlu1 %2397  ;;  %v8764_v1 = vpop.permute.xlu0 %2395  ;;  %v2857_v6 = vsel %vm306_vm1, %v2855_v32, %v2856_v62 }
 0x301   :  { %2833 = vrot.lane.b32.xlu2 %v2826_v53, %s6371_s28  ;;  %v2849_v53 = vmul.f32 %v8664_v50, %v12715_v37  ;;  %v12720_v37 = vld [vmem:[#allocation31_spill] sm:$0xff] }
 0x302   :  { %2831 = vrot.lane.b32.xlu1 %v2827_v12, %s6371_s28  ;;  %2785 = vrot.lane.b32.xlu0 %v2777_v48, %s6370_s2  ;;  %v2830_v48 = vsel %vm306_vm1, %v2828_v19, %v2829_v16  ;;  %v2885_v58 = vmul.f32 %v12720_v37, %v12722_v35  ;;  %v2888_v41 = vmul.f32 %v12720_v37, %v12726_v22 }
 0x303   :  { %v8776_v5 = vpop.permute.xlu2 %2529  ;;  %v2858_v33 = vrot.slane %v2849_v53, 2  ;;  %v2886_v53 = vmul.f32 %v12720_v37, %v12721_v14 }
 0x304   :  { %12716 = vst [vmem:[#allocation104_spill] sm:$0xff] %v8776_v5  ;;  %v8780_v2 = vpop.permute.xlu1 %2425  ;;  %v8782_v44 = vpop.permute.xlu0 %2423 }
 0x305   :  { %v2860_v19 = vsel %vm306_vm1, %v2858_v33, %v2859_v9 }
 0x309   :  { %2861 = vrot.lane.b32.xlu2 %v2857_v6, %s6370_s2 }
 0x30a   :  { %2837 = vrot.lane.b32.xlu1 %v2829_v16, %s6371_s28  ;;  %2835 = vrot.lane.b32.xlu0 %v2830_v48, %s6371_s28  ;;  %v12719_v48 = vld [vmem:[#allocation66_spill] sm:$0xff] }
 0x30b   :  { %v8791_v29 = vpop.permute.xlu2 %2535  ;;  %v2887_v17 = vmul.f32 %v12720_v37, %v12719_v48 }
 0x30c   :  { %12717 = vst [vmem:[#allocation124_spill] sm:$0xff] %v8791_v29  ;;  %v8795_v12 = vpop.permute.xlu1 %2455  ;;  %v8797_v10 = vpop.permute.xlu0 %2453 }
 0x311   :  { %2867 = vrot.lane.b32.xlu2 %v2859_v9, %s6370_s2 }
 0x312   :  { %2865 = vrot.lane.b32.xlu1 %v2860_v19, %s6370_s2  ;;  %2863 = vrot.lane.b32.xlu0 %v2856_v62, %s6370_s2  ;;  %v12725_v19 = vld [vmem:[#allocation33_spill] sm:$0xff] }
 0x313   :  { %v8803_v32 = vpop.permute.xlu2 %2563  ;;  %v2910_v13 = vmul.f32 %v12725_v19, %v12721_v14  ;;  %v2909_v25 = vmul.f32 %v12725_v19, %v12722_v35 }
 0x314   :  { %12718 = vst [vmem:[#allocation108_spill] sm:$0xff] %v8803_v32  ;;  %v8805_v16 = vpop.permute.xlu1 %2477  ;;  %v8807_v6 = vpop.permute.xlu0 %2459 }
 0x319   :  { %2897 = vrot.lane.b32.xlu2 %v2887_v17, %s6371_s28  ;;  %v12727_v17 = vld [vmem:[#allocation35_spill] sm:$0xff] }
 0x31a   :  { %2895 = vrot.lane.b32.xlu1 %v2886_v53, %s6371_s28  ;;  %2893 = vrot.lane.b32.xlu0 %v2885_v58, %s6371_s28  ;;  %v2956_v53 = vmul.f32 %v12727_v17, %v12721_v14  ;;  %v2955_v58 = vmul.f32 %v12727_v17, %v12722_v35 }
 0x31b   :  { %v8818_v62 = vpop.permute.xlu2 %2613 }
 0x31c   :  { %12723 = vst [vmem:[#allocation120_spill] sm:$0xff] %v8818_v62  ;;  %v8820_v33 = vpop.permute.xlu1 %2483  ;;  %v8822_v9 = vpop.permute.xlu0 %2481  ;;  %v2964_v3 = vrot.slane %v2956_v53, 1  ;;  %v2963_v37 = vrot.slane %v2955_v58, 1 }
 0x31d   :  { %12724 = vst [vmem:[#allocation123_spill] sm:$0xff] %v8822_v9 }
 0x31e   :  { %v2965_v57 = vsel %vm220_vm0, %v2963_v37, %v2964_v3  ;;  %v2958_v37 = vmul.f32 %v12727_v17, %v12726_v22 }
 0x321   :  { %2919 = vrot.lane.b32.xlu2 %v2910_v13, %s6370_s2  ;;  %v2912_v13 = vmul.f32 %v12725_v19, %v12726_v22 }
 0x322   :  { %2917 = vrot.lane.b32.xlu1 %v2909_v25, %s6370_s2  ;;  %2899 = vrot.lane.b32.xlu0 %v2888_v41, %s6371_s28  ;;  %v2911_v25 = vmul.f32 %v12725_v19, %v12719_v48  ;;  %v2957_v41 = vmul.f32 %v12727_v17, %v12719_v48  ;;  %v2967_v19 = vrot.slane %v2958_v37, 1 }
 0x323   :  { %v8837_v30 = vpop.permute.xlu2 %2641 }
 0x324   :  { %12728 = vst [vmem:[#allocation128_spill] sm:$0xff] %v8837_v30  ;;  %v8839_v38 = vpop.permute.xlu1 %2533  ;;  %v8841_v24 = vpop.permute.xlu0 %2531  ;;  %v2966_v56 = vrot.slane %v2957_v41, 1 }
 0x325   :  { %12729 = vst [vmem:[#allocation112_spill] sm:$0xff] %v8839_v38 }
 0x326   :  { %12730 = vst [vmem:[#allocation129_spill] sm:$0xff] %v8841_v24 }
 0x329   :  { %2969 = vrot.lane.b32.xlu2 %v2965_v57, %s6371_s28  ;;  %v12734_v57 = vld [vmem:[#allocation41_spill] sm:$0xff] }
 0x32a   :  { %2923 = vrot.lane.b32.xlu1 %v2912_v13, %s6370_s2  ;;  %2921 = vrot.lane.b32.xlu0 %v2911_v25, %s6370_s2  ;;  %v2987_v34 = vmul.f32 %v12734_v57, %v12719_v48  ;;  %v2968_v13 = vsel %vm220_vm0, %v2966_v56, %v2967_v19  ;;  %v2986_v25 = vmul.f32 %v12734_v57, %v12721_v14 }
 0x32b   :  { %v8853_v40 = vpop.permute.xlu2 %2647  ;;  %v2988_v17 = vmul.f32 %v12734_v57, %v12726_v22  ;;  %v2985_v41 = vmul.f32 %v12734_v57, %v12722_v35 }
 0x32c   :  { %12731 = vst [vmem:[#allocation132_spill] sm:$0xff] %v8853_v40  ;;  %v8857_v53 = vpop.permute.xlu1 %2561  ;;  %v8859_v58 = vpop.permute.xlu0 %2559  ;;  %v2996_v56 = vrot.slane %v2987_v34, 1 }
 0x32d   :  { %12732 = vst [vmem:[#allocation131_spill] sm:$0xff] %v8857_v53  ;;  %v2997_v30 = vrot.slane %v2988_v17, 1  ;;  %v2993_v32 = vrot.slane %v2985_v41, 1  ;;  %v12738_v53 = vld [vmem:[#allocation47_spill] sm:$0xff] }
 0x32e   :  { %12733 = vst [vmem:[#allocation118_spill] sm:$0xff] %v8859_v58  ;;  %v3037_v34 = vmul.f32 %v12738_v53, %v12722_v35 }
 0x331   :  { %2975 = vrot.lane.b32.xlu2 %v2967_v19, %s6371_s28  ;;  %v2994_v19 = vrot.slane %v2986_v25, 1 }
 0x332   :  { %2973 = vrot.lane.b32.xlu1 %v2968_v13, %s6371_s28  ;;  %2971 = vrot.lane.b32.xlu0 %v2964_v3, %s6371_s28  ;;  %v2998_v13 = vsel %vm220_vm0, %v2996_v56, %v2997_v30  ;;  %v3045_v56 = vrot.slane %v3037_v34, 2 }
 0x333   :  { %v8871_v62 = vpop.permute.xlu2 %2677  ;;  %v2995_v3 = vsel %vm220_vm0, %v2993_v32, %v2994_v19  ;;  %v12742_v32 = vld [vmem:[#allocation49_spill] sm:$0xff] }
 0x334   :  { %12735 = vst [vmem:[#allocation115_spill] sm:$0xff] %v8871_v62  ;;  %v8875_v37 = vpop.permute.xlu1 %2611  ;;  %v8877_v40 = vpop.permute.xlu0 %2565  ;;  %v3038_v62 = vmul.f32 %v12738_v53, %v12721_v14 }
 0x335   :  { %12736 = vst [vmem:[#allocation135_spill] sm:$0xff] %v8875_v37 }
 0x336   :  { %12737 = vst [vmem:[#allocation136_spill] sm:$0xff] %v8877_v40  ;;  %v3046_v41 = vrot.slane %v3038_v62, 2  ;;  %v3040_v62 = vmul.f32 %v12738_v53, %v12726_v22 }
 0x338   :  { %v3049_v40 = vrot.slane %v3040_v62, 2 }
 0x339   :  { %3003 = vrot.lane.b32.xlu2 %v2998_v13, %s6370_s2  ;;  %v3068_v13 = vmul.f32 %v12742_v32, %v12721_v14 }
 0x33a   :  { %3001 = vrot.lane.b32.xlu1 %v2994_v19, %s6370_s2  ;;  %2999 = vrot.lane.b32.xlu0 %v2995_v3, %s6370_s2  ;;  %v3047_v19 = vsel %vm306_vm1, %v3045_v56, %v3046_v41  ;;  %v3039_v3 = vmul.f32 %v12738_v53, %v12719_v48 }
 0x33b   :  { %v8886_v57 = vpop.permute.xlu2 %2699 }
 0x33c   :  { %12739 = vst [vmem:[#allocation140_spill] sm:$0xff] %v8886_v57  ;;  %v8890_v17 = vpop.permute.xlu1 %2617  ;;  %v8892_v25 = vpop.permute.xlu0 %2615  ;;  %v3067_v57 = vmul.f32 %v12742_v32, %v12722_v35  ;;  %v3048_v56 = vrot.slane %v3039_v3, 2 }
 0x33d   :  { %12740 = vst [vmem:[#allocation122_spill] sm:$0xff] %v8890_v17 }
 0x33e   :  { %12741 = vst [vmem:[#allocation127_spill] sm:$0xff] %v8892_v25  ;;  %v3075_v37 = vrot.slane %v3067_v57, 2 }
 0x341   :  { %3053 = vrot.lane.b32.xlu2 %v3046_v41, %s6371_s28  ;;  %v3076_v41 = vrot.slane %v3068_v13, 2  ;;  %v3070_v13 = vmul.f32 %v12742_v32, %v12726_v22 }
 0x342   :  { %3051 = vrot.lane.b32.xlu1 %v3047_v19, %s6371_s28  ;;  %3005 = vrot.lane.b32.xlu0 %v2997_v30, %s6370_s2  ;;  %v3050_v30 = vsel %vm306_vm1, %v3048_v56, %v3049_v40 }
 0x343   :  { %v8904_v25 = vpop.permute.xlu2 %2749  ;;  %v3077_v19 = vsel %vm306_vm1, %v3075_v37, %v3076_v41  ;;  %v3079_v62 = vrot.slane %v3070_v13, 2 }
 0x344   :  { %12743 = vst [vmem:[#allocation143_spill] sm:$0xff] %v8904_v25  ;;  %v8908_v34 = vpop.permute.xlu1 %2645  ;;  %v8910_v17 = vpop.permute.xlu0 %2643  ;;  %v3069_v25 = vmul.f32 %v12742_v32, %v12719_v48  ;;  %v12752_v32 = vld [vmem:[#allocation58_spill] sm:$0xff] }
 0x345   :  { %12744 = vst [vmem:[#allocation144_spill] sm:$0xff] %v8908_v34  ;;  %v3105_v13 = vmul.f32 %v8387_v54, %v12752_v32 }
 0x346   :  { %12745 = vst [vmem:[#allocation139_spill] sm:$0xff] %v8910_v17  ;;  %v3078_v37 = vrot.slane %v3069_v25, 2  ;;  %v3106_v25 = vmul.f32 %v8390_v27, %v12752_v32  ;;  %v12768_v17 = vld [vmem:[#allocation164_spill] sm:$0xff] }
 0x347   :  { %v2219_v38 = vmul.f32 %v12719_v48, %v12768_v17 }
 0x348   :  { %v3080_v56 = vsel %vm306_vm1, %v3078_v37, %v3079_v62 }
 0x349   :  { %3081 = vrot.lane.b32.xlu2 %v3077_v19, %s6370_s2 }
 0x34a   :  { %3057 = vrot.lane.b32.xlu1 %v3049_v40, %s6371_s28  ;;  %3055 = vrot.lane.b32.xlu0 %v3050_v30, %s6371_s28 }
 0x34b   :  { %v8919_v53 = vpop.permute.xlu2 %2755 }
 0x34c   :  { %12746 = vst [vmem:[#allocation130_spill] sm:$0xff] %v8919_v53  ;;  %v8923_v57 = vpop.permute.xlu1 %2675  ;;  %v8925_v3 = vpop.permute.xlu0 %2673  ;;  %v3107_v53 = vmul.f32 %v8380_v31, %v12752_v32 }
 0x34d   :  { %12747 = vst [vmem:[#allocation147_spill] sm:$0xff] %v8923_v57 }
 0x34e   :  { %12748 = vst [vmem:[#allocation146_spill] sm:$0xff] %v8925_v3 }
 0x351   :  { %3087 = vrot.lane.b32.xlu2 %v3079_v62, %s6370_s2 }
 0x352   :  { %3085 = vrot.lane.b32.xlu1 %v3080_v56, %s6370_s2  ;;  %3083 = vrot.lane.b32.xlu0 %v3076_v41, %s6370_s2  ;;  %v12756_v56 = vld [vmem:[#allocation62_spill] sm:$0xff] }
 0x353   :  { %v8931_v40 = vpop.permute.xlu2 %2783  ;;  %v3129_v57 = vmul.f32 %v8387_v54, %v12756_v56 }
 0x354   :  { %12749 = vst [vmem:[#allocation150_spill] sm:$0xff] %v8931_v40  ;;  %v8933_v19 = vpop.permute.xlu1 %2697  ;;  %v8935_v30 = vpop.permute.xlu0 %2679  ;;  %v3130_v40 = vmul.f32 %v8390_v27, %v12756_v56 }
 0x355   :  { %12750 = vst [vmem:[#allocation134_spill] sm:$0xff] %v8933_v19  ;;  %v3108_v19 = vmul.f32 %v8419_v61, %v12752_v32 }
 0x356   :  { %12751 = vst [vmem:[#allocation156_spill] sm:$0xff] %v8935_v30 }
 0x359   :  { %3117 = vrot.lane.b32.xlu2 %v3107_v53, %s6371_s28  ;;  %v12757_v53 = vld [vmem:[#allocation64_spill] sm:$0xff] }
 0x35a   :  { %3115 = vrot.lane.b32.xlu1 %v3106_v25, %s6371_s28  ;;  %3113 = vrot.lane.b32.xlu0 %v3105_v13, %s6371_s28  ;;  %v3176_v25 = vmul.f32 %v8390_v27, %v12757_v53  ;;  %v3175_v13 = vmul.f32 %v8387_v54, %v12757_v53 }
 0x35b   :  { %v8946_v41 = vpop.permute.xlu2 %2833 }
 0x35c   :  { %12753 = vst [vmem:[#allocation138_spill] sm:$0xff] %v8946_v41  ;;  %v8948_v37 = vpop.permute.xlu1 %2703  ;;  %v8950_v62 = vpop.permute.xlu0 %2701  ;;  %v3184_v30 = vrot.slane %v3176_v25, 1  ;;  %v3183_v32 = vrot.slane %v3175_v13, 1 }
 0x35d   :  { %12754 = vst [vmem:[#allocation151_spill] sm:$0xff] %v8948_v37 }
 0x35e   :  { %12755 = vst [vmem:[#allocation155_spill] sm:$0xff] %v8950_v62  ;;  %v3185_v3 = vsel %vm220_vm0, %v3183_v32, %v3184_v30  ;;  %v3178_v32 = vmul.f32 %v8419_v61, %v12757_v53 }
 0x361   :  { %3139 = vrot.lane.b32.xlu2 %v3130_v40, %s6370_s2  ;;  %v3132_v40 = vmul.f32 %v8419_v61, %v12756_v56 }
 0x362   :  { %3137 = vrot.lane.b32.xlu1 %v3129_v57, %s6370_s2  ;;  %3119 = vrot.lane.b32.xlu0 %v3108_v19, %s6371_s28  ;;  %v3131_v57 = vmul.f32 %v8380_v31, %v12756_v56  ;;  %v3177_v19 = vmul.f32 %v8380_v31, %v12757_v53  ;;  %v3187_v56 = vrot.slane %v3178_v32, 1 }
 0x363   :  { %v8965_v41 = vpop.permute.xlu2 %2861 }
 0x364   :  { %12758 = vst [vmem:[#allocation158_spill] sm:$0xff] %v8965_v41  ;;  %v8967_v62 = vpop.permute.xlu1 %2753  ;;  %v8969_v37 = vpop.permute.xlu0 %2751 }
 0x365   :  { %12759 = vst [vmem:[#allocation142_spill] sm:$0xff] %v8967_v62  ;;  %v12764_v62 = vld [vmem:[#allocation71_spill] sm:$0xff] }
 0x366   :  { %12760 = vst [vmem:[#allocation159_spill] sm:$0xff] %v8969_v37  ;;  %v3186_v37 = vrot.slane %v3177_v19, 1  ;;  %v3208_v53 = vmul.f32 %v8419_v61, %v12764_v62  ;;  %v3205_v19 = vmul.f32 %v8387_v54, %v12764_v62 }
 0x368   :  { %v3213_v34 = vrot.slane %v3205_v19, 1  ;;  %v12771_v19 = vld [vmem:[#allocation168_spill] sm:$0xff] }
 0x369   :  { %3189 = vrot.lane.b32.xlu2 %v3185_v3, %s6371_s28  ;;  %v3207_v3 = vmul.f32 %v8380_v31, %v12764_v62 }
 0x36a   :  { %3143 = vrot.lane.b32.xlu1 %v3132_v40, %s6370_s2  ;;  %3141 = vrot.lane.b32.xlu0 %v3131_v57, %s6370_s2  ;;  %v3188_v40 = vsel %vm220_vm0, %v3186_v37, %v3187_v56  ;;  %v3206_v57 = vmul.f32 %v8390_v27, %v12764_v62 }
 0x36b   :  { %v8981_v41 = vpop.permute.xlu2 %2867  ;;  %v3216_v37 = vrot.slane %v3207_v3, 1  ;;  %v2218_v3 = vmul.f32 %v12721_v14, %v12768_v17 }
 0x36c   :  { %12761 = vst [vmem:[#allocation165_spill] sm:$0xff] %v8981_v41  ;;  %v8985_v25 = vpop.permute.xlu1 %2781  ;;  %v8987_v13 = vpop.permute.xlu0 %2779 }
 0x36d   :  { %12762 = vst [vmem:[#allocation163_spill] sm:$0xff] %v8985_v25  ;;  %v2222_v5 = vadd.f32 %v2218_v3, %v12771_v19 }
 0x36e   :  { %12763 = vst [vmem:[#allocation149_spill] sm:$0xff] %v8987_v13  ;;  %v3217_v13 = vrot.slane %v3208_v53, 1  ;;  %v12770_v53 = vld [vmem:[#allocation169_spill] sm:$0xff] }
 0x36f   :  { %v2276_v55 = vmul.f32 %v12726_v22, %v12770_v53 }
 0x370   :  { %v3218_v24 = vsel %vm220_vm0, %v3216_v37, %v3217_v13 }
 0x371   :  { %3195 = vrot.lane.b32.xlu2 %v3187_v56, %s6371_s28  ;;  %v3214_v56 = vrot.slane %v3206_v57, 1  ;;  %v2274_v57 = vmul.f32 %v12721_v14, %v12770_v53 }
 0x372   :  { %3193 = vrot.lane.b32.xlu1 %v3188_v40, %s6371_s28  ;;  %3191 = vrot.lane.b32.xlu0 %v3184_v30, %s6371_s28  ;;  %v2217_v40 = vmul.f32 %v12722_v35, %v12768_v17  ;;  %v2220_v30 = vmul.f32 %v12726_v22, %v12768_v17 }
 0x373   :  { %v8999_v41 = vpop.permute.xlu2 %2897  ;;  %v3215_v62 = vsel %vm220_vm0, %v3213_v34, %v3214_v56  ;;  %v2282_v9 = vrot.slane %v2274_v57, 1 }
 0x374   :  { %12765 = vst [vmem:[#allocation162_spill] sm:$0xff] %v8999_v41  ;;  %v9003_v32 = vpop.permute.xlu1 %2831  ;;  %v9005_v25 = vpop.permute.xlu0 %2785  ;;  %v12769_v41 = vld [vmem:[#allocation77_spill] sm:$0xff]  ;;  %v2224_v58 = vadd.f32 %v2220_v30, %v12771_v19  ;;  %v2275_v30 = vmul.f32 %v12719_v48, %v12770_v53 }
 0x375   :  { %12766 = vst [vmem:[#allocation171_spill] sm:$0xff] %v9003_v32  ;;  %v3258_v32 = vmul.f32 %v8390_v27, %v12769_v41  ;;  %v3257_v34 = vmul.f32 %v8387_v54, %v12769_v41 }
 0x376   :  { %12767 = vst [vmem:[#allocation145_spill] sm:$0xff] %v9005_v25  ;;  %v2221_v25 = vadd.f32 %v2217_v40, %v12771_v19 }
 0x377   :  { %v3266_v40 = vrot.slane %v3258_v32, 2  ;;  %v12775_v32 = vld [vmem:[#allocation79_spill] sm:$0xff] }
 0x378   :  { %v9049_v3 = vmul.f32 %v8390_v27, %v12775_v32 }
 0x379   :  { %3223 = vrot.lane.b32.xlu2 %v3218_v24, %s6370_s2  ;;  %v2273_v24 = vmul.f32 %v12722_v35, %v12770_v53 }
 0x37a   :  { %3221 = vrot.lane.b32.xlu1 %v3214_v56, %s6370_s2  ;;  %3219 = vrot.lane.b32.xlu0 %v3215_v62, %s6370_s2  ;;  %v2245_v62 = vadd.f32 %v8653_v21, %v2221_v25  ;;  %v2246_v21 = vadd.f32 %v8651_v15, %v2222_v5  ;;  %v3287_v15 = vmul.f32 %v8387_v54, %v12775_v32  ;;  %v2284_v5 = vrot.slane %v2275_v30, 1 }
 0x37b   :  { %v9025_v37 = vpop.permute.xlu2 %2919  ;;  %v2281_v20 = vrot.slane %v2273_v24, 1  ;;  %v12776_v24 = vld [vmem:[#allocation174_spill] sm:$0xff] }
 0x37c   :  { %12772 = vst [vmem:[#allocation166_spill] sm:$0xff] %v9025_v37  ;;  %v9032_v29 = vpop.permute.xlu1 %2837  ;;  %v9034_v56 = vpop.permute.xlu0 %2835  ;;  %v2248_v37 = vadd.f32 %v8675_v28, %v2224_v58  ;;  %v2269_v17 = vadd.f32 %v8673_v59, %v2245_v62  ;;  %v3259_v59 = vmul.f32 %v8380_v31, %v12769_v41  ;;  %v2358_v30 = vmul.f32 %v12726_v22, %v12776_v24 }
 0x37d   :  { %12773 = vst [vmem:[#allocation167_spill] sm:$0xff] %v9032_v29  ;;  %v3265_v29 = vrot.slane %v3257_v34, 2  ;;  %v2283_v57 = vsel %vm220_vm0, %v2281_v20, %v2282_v9  ;;  %v2270_v20 = vadd.f32 %v8585_v11, %v2246_v21 }
 0x37e   :  { %12774 = vst [vmem:[#allocation153_spill] sm:$0xff] %v9034_v56  ;;  %v2223_v56 = vadd.f32 %v2219_v38, %v12771_v19  ;;  %v2272_v25 = vadd.f32 %v8692_v26, %v2248_v37  ;;  %v2285_v38 = vrot.slane %v2276_v55, 1  ;;  %v2291_v26 = vadd.f32 %v2283_v57, %v2269_v17 }
 0x37f   :  { %v3267_v28 = vsel %vm306_vm1, %v3265_v29, %v3266_v40  ;;  %v2356_v29 = vmul.f32 %v12721_v14, %v12776_v24  ;;  %v3296_v17 = vrot.slane %v9049_v3, 2  ;;  %v3268_v62 = vrot.slane %v3259_v59, 2 }
 0x380   :  { %v2247_v58 = vadd.f32 %v8543_v51, %v2223_v56  ;;  %v3260_v51 = vmul.f32 %v8419_v61, %v12769_v41  ;;  %v2294_v55 = vadd.f32 %v2285_v38, %v2272_v25  ;;  %v2286_v57 = vsel %vm220_vm0, %v2284_v5, %v2285_v38 }
 0x381   :  { %3273 = vrot.lane.b32.xlu2 %v3266_v40, %s6371_s28  ;;  %v2355_v40 = vmul.f32 %v12722_v35, %v12776_v24  ;;  %v2364_v11 = vrot.slane %v2356_v29, 2  ;;  %v2321_v21 = vadd.f32 %v8626_v8, %v2291_v26  ;;  %v2357_v41 = vmul.f32 %v12719_v48, %v12776_v24 }
 0x382   :  { %3271 = vrot.lane.b32.xlu1 %v3267_v28, %s6371_s28  ;;  %3225 = vrot.lane.b32.xlu0 %v3217_v13, %s6370_s2  ;;  %v2271_v34 = vadd.f32 %v8694_v49, %v2247_v58  ;;  %v3295_v28 = vrot.slane %v3287_v15, 2  ;;  %v3269_v49 = vrot.slane %v3260_v51, 2  ;;  %v2292_v58 = vadd.f32 %v2282_v9, %v2270_v20 }
 0x383   :  { %v9063_v37 = vpop.permute.xlu2 %2969  ;;  %v2324_v19 = vadd.f32 %v8646_v43, %v2294_v55  ;;  %v2351_v59 = vadd.f32 %v8731_v47, %v2321_v21  ;;  %v3289_v38 = vmul.f32 %v8380_v31, %v12775_v32  ;;  %v2363_v26 = vrot.slane %v2355_v40, 2 }
 0x384   :  { %v9069_v56 = vpop.permute.xlu1 %2865  ;;  %v9071_v13 = vpop.permute.xlu0 %2863  ;;  %v2293_v25 = vadd.f32 %v2286_v57, %v2271_v34  ;;  %v3297_v3 = vsel %vm306_vm1, %v3295_v28, %v3296_v17  ;;  %v3270_v15 = vsel %vm306_vm1, %v3268_v62, %v3269_v49  ;;  %v2322_v9 = vadd.f32 %v8713_v52, %v2292_v58 }
 0x385   :  { %v2354_v43 = vadd.f32 %v8749_v60, %v2324_v19  ;;  %v3290_v5 = vmul.f32 %v8419_v61, %v12775_v32  ;;  %v2365_v51 = vsel %vm306_vm1, %v2363_v26, %v2364_v11  ;;  %v2367_v20 = vrot.slane %v2358_v30, 2 }
 0x386   :  { %v2323_v8 = vadd.f32 %v8711_v18, %v2293_v25  ;;  %v2352_v29 = vadd.f32 %v8729_v4, %v2322_v9  ;;  %v2373_v55 = vadd.f32 %v2365_v51, %v2351_v59  ;;  %v2366_v60 = vrot.slane %v2357_v41, 2  ;;  %v12779_v9 = vld [vmem:[#allocation88_spill] sm:$0xff] }
 0x387   :  { %v3298_v19 = vrot.slane %v3289_v38, 2  ;;  %v2376_v62 = vadd.f32 %v2367_v20, %v2354_v43  ;;  %v3299_v28 = vrot.slane %v3290_v5, 2  ;;  %v3327_v26 = vmul.f32 %v8664_v50, %v12779_v9 }
 0x388   :  { %v2353_v34 = vadd.f32 %v8666_v63, %v2323_v8  ;;  %v2403_v40 = vadd.f32 %v8747_v0, %v2373_v55  ;;  %v2374_v57 = vadd.f32 %v2364_v11, %v2352_v29  ;;  %v2368_v4 = vsel %vm306_vm1, %v2366_v60, %v2367_v20 }
 0x389   :  { %3301 = vrot.lane.b32.xlu2 %v3297_v3, %s6370_s2  ;;  %v2406_v21 = vadd.f32 %v8762_v46, %v2376_v62  ;;  %v3300_v30 = vsel %vm306_vm1, %v3298_v19, %v3299_v28  ;;  %v12777_v3 = vld [vmem:[#allocation177_spill] sm:$0xff]  ;;  %v3326_v43 = vmul.f32 %v8671_v36, %v12779_v9  ;;  %v3325_v5 = vmul.f32 %v8669_v42, %v12779_v9 }
 0x38a   :  { %3277 = vrot.lane.b32.xlu1 %v3269_v49, %s6371_s28  ;;  %3275 = vrot.lane.b32.xlu0 %v3270_v15, %s6371_s28  ;;  %v2375_v49 = vadd.f32 %v2368_v4, %v2353_v34  ;;  %v2433_v63 = vadd.f32 %v8709_v45, %v2403_v40  ;;  %v2404_v46 = vadd.f32 %v8687_v39, %v2374_v57  ;;  %v12778_v45 = vld [vmem:[#allocation178_spill] sm:$0xff] }
 0x38b   :  { %v9094_v47 = vpop.permute.xlu2 %2975  ;;  %v2436_v0 = vadd.f32 %v8725_v23, %v2406_v21  ;;  %v2437_v59 = vmul.f32 %v8387_v54, %v12777_v3  ;;  %v2494_v38 = vmul.f32 %v8390_v27, %v12778_v45  ;;  %v2440_v23 = vmul.f32 %v8419_v61, %v12777_v3 }
 0x38c   :  { %v9100_v18 = vpop.permute.xlu1 %2895  ;;  %v9102_v52 = vpop.permute.xlu0 %2893  ;;  %v2405_v11 = vadd.f32 %v8764_v1, %v2375_v49  ;;  %v2439_v39 = vmul.f32 %v8380_v31, %v12777_v3  ;;  %v2493_v8 = vmul.f32 %v8387_v54, %v12778_v45  ;;  %v2496_v51 = vmul.f32 %v8419_v61, %v12778_v45 }
 0x38d   :  { %v2441_v1 = vadd.f32 %v2437_v59, %v2433_v63  ;;  %v2495_v20 = vmul.f32 %v8380_v31, %v12778_v45  ;;  %v2502_v19 = vrot.slane %v2494_v38, 1  ;;  %v12783_v59 = vld [vmem:[#allocation116_spill] sm:$0xff] }
 0x38e   :  { %v2435_v15 = vadd.f32 %v8780_v2, %v2405_v11  ;;  %v2438_v2 = vmul.f32 %v8390_v27, %v12777_v3 }
 0x38f   :  { %v2465_v29 = vadd.f32 %v8797_v10, %v2441_v1  ;;  %v2504_v63 = vrot.slane %v2495_v20, 1 }
 0x390   :  { %v2443_v55 = vadd.f32 %v2439_v39, %v2435_v15  ;;  %v3328_v15 = vmul.f32 %v12783_v59, %v12779_v9  ;;  %v12785_v39 = vld [vmem:[#allocation123_spill] sm:$0xff]  ;;  %v12808_v9 = vld [vmem:[#allocation156_spill] sm:$0xff] }
 0x391   :  { %3307 = vrot.lane.b32.xlu2 %v3299_v28, %s6370_s2  ;;  %v2489_v62 = vadd.f32 %v8805_v16, %v2465_v29  ;;  %v2501_v28 = vrot.slane %v2493_v8, 1 }
 0x392   :  { %3305 = vrot.lane.b32.xlu1 %v3300_v30, %s6370_s2  ;;  %3303 = vrot.lane.b32.xlu0 %v3296_v17, %s6370_s2  ;;  %v2434_v17 = vadd.f32 %v8782_v44, %v2404_v46  ;;  %v2444_v44 = vadd.f32 %v2440_v23, %v2436_v0  ;;  %v2505_v30 = vrot.slane %v2496_v51, 1  ;;  %v2467_v49 = vadd.f32 %v8743_v7, %v2443_v55  ;;  %v12781_v0 = vld [vmem:[#allocation183_spill] sm:$0xff]  ;;  %v12782_v46 = vld [vmem:[#allocation92_spill] sm:$0xff]  ;;  %v12786_v7 = vld [vmem:[#allocation94_spill] sm:$0xff] }
 0x393   :  { %v9113_v41 = vpop.permute.xlu2 %3003  ;;  %v2576_v16 = vmul.f32 %v8390_v27, %v12781_v0  ;;  %v9174_v8 = vmul.f32 %v8671_v36, %v12786_v7  ;;  %v2578_v51 = vmul.f32 %v8419_v61, %v12781_v0 }
 0x394   :  { %v9118_v25 = vpop.permute.xlu1 %2917  ;;  %v9120_v58 = vpop.permute.xlu0 %2899  ;;  %v2442_v60 = vadd.f32 %v2438_v2, %v2434_v17  ;;  %v2468_v34 = vadd.f32 %v8807_v6, %v2444_v44  ;;  %v2503_v6 = vsel %vm220_vm0, %v2501_v28, %v2502_v19  ;;  %v12784_v17 = vld [vmem:[#allocation119_spill] sm:$0xff]  ;;  %v2491_v1 = vadd.f32 %v12785_v39, %v2467_v49 }
 0x395   :  { %v2511_v11 = vadd.f32 %v2503_v6, %v2489_v62  ;;  %v3395_v2 = vmul.f32 %v8669_v42, %v12786_v7  ;;  %v2506_v44 = vsel %vm220_vm0, %v2504_v63, %v2505_v30  ;;  %v12789_v6 = vld [vmem:[#allocation118_spill] sm:$0xff]  ;;  %v2577_v63 = vmul.f32 %v8380_v31, %v12781_v0  ;;  %v12793_v39 = vld [vmem:[#allocation131_spill] sm:$0xff] }
 0x396   :  { %v2466_v40 = vadd.f32 %v8795_v12, %v2442_v60  ;;  %v2492_v57 = vadd.f32 %v8820_v33, %v2468_v34  ;;  %v3350_v12 = vmul.f32 %v8671_v36, %v12782_v46  ;;  %v3349_v33 = vmul.f32 %v8669_v42, %v12782_v46  ;;  %v12788_v34 = vld [vmem:[#allocation124_spill] sm:$0xff] }
 0x397   :  { %v2513_v55 = vadd.f32 %v2506_v44, %v2491_v1  ;;  %v3351_v44 = vmul.f32 %v8664_v50, %v12782_v46 }
 0x398   :  { %v2490_v38 = vadd.f32 %v12784_v17, %v2466_v40  ;;  %v2514_v23 = vadd.f32 %v2505_v30, %v2492_v57  ;;  %v3404_v57 = vrot.slane %v9174_v8, 1  ;;  %v3403_v17 = vrot.slane %v3395_v2, 1 }
 0x399   :  { %3337 = vrot.lane.b32.xlu2 %v3327_v26, %s6371_s28  ;;  %v2575_v26 = vmul.f32 %v8387_v54, %v12781_v0  ;;  %v3397_v2 = vmul.f32 %v8664_v50, %v12786_v7  ;;  %v12810_v0 = vld [vmem:[#allocation147_spill] sm:$0xff] }
 0x39a   :  { %3335 = vrot.lane.b32.xlu1 %v3326_v43, %s6371_s28  ;;  %3333 = vrot.lane.b32.xlu0 %v3325_v5, %s6371_s28  ;;  %v2584_v43 = vrot.slane %v2576_v16, 2  ;;  %v12787_v5 = vld [vmem:[#allocation104_spill] sm:$0xff]  ;;  %v2512_v60 = vadd.f32 %v2502_v19, %v2490_v38  ;;  %v2544_v62 = vadd.f32 %v12788_v34, %v2514_v23  ;;  %v2587_v23 = vrot.slane %v2578_v51, 2  ;;  %v12795_v34 = vld [vmem:[#allocation135_spill] sm:$0xff] }
 0x39b   :  { %v9152_v10 = vpop.permute.xlu2 %3053  ;;  %v2541_v29 = vadd.f32 %v12787_v5, %v2511_v11  ;;  %v2583_v49 = vrot.slane %v2575_v26, 2  ;;  %v12790_v16 = vld [vmem:[#allocation112_spill] sm:$0xff]  ;;  %v3405_v8 = vsel %vm220_vm0, %v3403_v17, %v3404_v57  ;;  %v3352_v26 = vmul.f32 %v12783_v59, %v12782_v46 }
 0x39c   :  { %12780 = vst [vmem:[#allocation157_spill] sm:$0xff] %v9152_v10  ;;  %v9156_v21 = vpop.permute.xlu1 %2923  ;;  %v9158_v4 = vpop.permute.xlu0 %2921  ;;  %v2543_v11 = vadd.f32 %v12790_v16, %v2513_v55  ;;  %v12794_v55 = vld [vmem:[#allocation108_spill] sm:$0xff] }
 0x39d   :  { %v2571_v30 = vadd.f32 %v12789_v6, %v2541_v29  ;;  %v2585_v38 = vsel %vm306_vm1, %v2583_v49, %v2584_v43  ;;  %v2586_v29 = vrot.slane %v2577_v63, 2  ;;  %v12796_v63 = vld [vmem:[#allocation122_spill] sm:$0xff]  ;;  %v12797_v17 = vld [vmem:[#allocation128_spill] sm:$0xff] }
 0x39f   :  { %v2593_v5 = vadd.f32 %v2585_v38, %v2571_v30  ;;  %v3398_v30 = vmul.f32 %v12783_v59, %v12786_v7  ;;  %v12803_v7 = vld [vmem:[#allocation42_spill] sm:$0xff] }
 0x3a0   :  { %v2715_v32 = vmul.f32 %v8664_v50, %v12803_v7 }
 0x3a1   :  { %3359 = vrot.lane.b32.xlu2 %v3350_v12, %s6370_s2  ;;  %v12791_v12 = vld [vmem:[#allocation129_spill] sm:$0xff] }
 0x3a2   :  { %3357 = vrot.lane.b32.xlu1 %v3349_v33, %s6370_s2  ;;  %3339 = vrot.lane.b32.xlu0 %v3328_v15, %s6371_s28  ;;  %v2542_v33 = vadd.f32 %v12791_v12, %v2512_v60  ;;  %v12792_v15 = vld [vmem:[#allocation136_spill] sm:$0xff]  ;;  %v2573_v60 = vadd.f32 %v12794_v55, %v2543_v11  ;;  %v2588_v11 = vsel %vm306_vm1, %v2586_v29, %v2587_v23  ;;  %v12800_v55 = vld [vmem:[#allocation127_spill] sm:$0xff] }
 0x3a3   :  { %v9187_v20 = vpop.permute.xlu2 %3081  ;;  %v2574_v19 = vadd.f32 %v12792_v15, %v2544_v62  ;;  %v2623_v62 = vadd.f32 %v12795_v34, %v2593_v5  ;;  %v3406_v15 = vrot.slane %v3397_v2, 1  ;;  %v12802_v34 = vld [vmem:[#allocation101_spill] sm:$0xff] }
 0x3a4   :  { %v9190_v40 = vpop.permute.xlu1 %2973  ;;  %v9192_v28 = vpop.permute.xlu0 %2971  ;;  %v2572_v1 = vadd.f32 %v12793_v39, %v2542_v33  ;;  %v12798_v39 = vld [vmem:[#allocation39_spill] sm:$0xff] }
 0x3a5   :  { %v2596_v51 = vadd.f32 %v2587_v23, %v2574_v19  ;;  %v2595_v19 = vadd.f32 %v2588_v11, %v2573_v60  ;;  %v2653_v38 = vadd.f32 %v12797_v17, %v2623_v62  ;;  %v9235_v23 = vmul.f32 %v8671_v36, %v12803_v7  ;;  %v12804_v62 = vld [vmem:[#allocation144_spill] sm:$0xff] }
 0x3a6   :  { %v2594_v49 = vadd.f32 %v2584_v43, %v2572_v1  ;;  %v12801_v1 = vld [vmem:[#allocation120_spill] sm:$0xff]  ;;  %v2660_v29 = vmul.f32 %v12783_v59, %v12798_v39  ;;  %v3426_v60 = vmul.f32 %v8671_v36, %v12802_v34  ;;  %v9249_v11 = vmul.f32 %v12783_v59, %v12802_v34 }
 0x3a7   :  { %v2626_v16 = vadd.f32 %v12796_v63, %v2596_v51  ;;  %v2625_v43 = vadd.f32 %v12800_v55, %v2595_v19  ;;  %v3427_v63 = vmul.f32 %v8664_v50, %v12802_v34  ;;  %v2713_v17 = vmul.f32 %v8669_v42, %v12803_v7 }
 0x3a8   :  { %v2624_v51 = vadd.f32 %v12801_v1, %v2594_v49  ;;  %v12805_v49 = vld [vmem:[#allocation139_spill] sm:$0xff]  ;;  %v2658_v55 = vmul.f32 %v8671_v36, %v12798_v39 }
 0x3a9   :  { %3409 = vrot.lane.b32.xlu2 %v3405_v8, %s6371_s28  ;;  %v2657_v8 = vmul.f32 %v8669_v42, %v12798_v39 }
 0x3aa   :  { %3363 = vrot.lane.b32.xlu1 %v3352_v26, %s6370_s2  ;;  %3361 = vrot.lane.b32.xlu0 %v3351_v44, %s6370_s2  ;;  %v3407_v26 = vrot.slane %v3398_v30, 1  ;;  %v12799_v44 = vld [vmem:[#allocation132_spill] sm:$0xff]  ;;  %v2655_v30 = vadd.f32 %v12804_v62, %v2625_v43  ;;  %v2716_v62 = vmul.f32 %v12783_v59, %v12803_v7 }
 0x3ab   :  { %v9215_v6 = vpop.permute.xlu2 %3087  ;;  %v2656_v5 = vadd.f32 %v12799_v44, %v2626_v16  ;;  %v2654_v16 = vadd.f32 %v12805_v49, %v2624_v51  ;;  %v2661_v19 = vadd.f32 %v2657_v8, %v2653_v38  ;;  %v2659_v44 = vmul.f32 %v8664_v50, %v12798_v39  ;;  %v12807_v8 = vld [vmem:[#allocation146_spill] sm:$0xff] }
 0x3ac   :  { %v9220_v12 = vpop.permute.xlu1 %3001  ;;  %v9222_v33 = vpop.permute.xlu0 %2999  ;;  %v3408_v2 = vsel %vm220_vm0, %v3406_v15, %v3407_v26  ;;  %v3436_v38 = vrot.slane %v3427_v63, 1  ;;  %v3434_v49 = vrot.slane %v3426_v60, 1  ;;  %v3437_v39 = vrot.slane %v9249_v11, 1 }
 0x3ad   :  { %v2685_v51 = vadd.f32 %v12807_v8, %v2661_v19  ;;  %v2662_v46 = vadd.f32 %v2658_v55, %v2654_v16  ;;  %v2721_v8 = vrot.slane %v2713_v17, 1  ;;  %v2725_v11 = vrot.slane %v2716_v62, 1  ;;  %v12817_v62 = vld [vmem:[#allocation155_spill] sm:$0xff] }
 0x3af   :  { %v2686_v19 = vadd.f32 %v12810_v0, %v2662_v46  ;;  %v12814_v46 = vld [vmem:[#allocation43_spill] sm:$0xff] }
 0x3b0   :  { %v2796_v17 = vmul.f32 %v8671_v36, %v12814_v46 }
 0x3b1   :  { %3415 = vrot.lane.b32.xlu2 %v3407_v26, %s6371_s28  ;;  %v3425_v26 = vmul.f32 %v8669_v42, %v12802_v34  ;;  %v2663_v34 = vadd.f32 %v2659_v44, %v2655_v30  ;;  %v12813_v44 = vld [vmem:[#allocation115_spill] sm:$0xff] }
 0x3b2   :  { %3413 = vrot.lane.b32.xlu1 %v3408_v2, %s6371_s28  ;;  %3411 = vrot.lane.b32.xlu0 %v3404_v57, %s6371_s28  ;;  %v2664_v57 = vadd.f32 %v2660_v29, %v2656_v5  ;;  %v2722_v2 = vrot.slane %v9235_v23, 1  ;;  %v12809_v5 = vld [vmem:[#allocation134_spill] sm:$0xff]  ;;  %v12811_v23 = vld [vmem:[#allocation151_spill] sm:$0xff] }
 0x3b3   :  { %v9253_v15 = vpop.permute.xlu2 %3117  ;;  %v2709_v29 = vadd.f32 %v12809_v5, %v2685_v51  ;;  %v3433_v63 = vrot.slane %v3425_v26, 1  ;;  %v2687_v55 = vadd.f32 %v12813_v44, %v2663_v34 }
 0x3b4   :  { %12806 = vst [vmem:[#allocation175_spill] sm:$0xff] %v9253_v15  ;;  %v9261_v43 = vpop.permute.xlu1 %3051  ;;  %v9263_v1 = vpop.permute.xlu0 %3005  ;;  %v2688_v3 = vadd.f32 %v12808_v9, %v2664_v57  ;;  %v3438_v15 = vsel %vm220_vm0, %v3436_v38, %v3437_v39  ;;  %v12812_v9 = vld [vmem:[#allocation107_spill] sm:$0xff]  ;;  %v2723_v16 = vsel %vm220_vm0, %v2721_v8, %v2722_v2  ;;  %v12816_v57 = vld [vmem:[#allocation140_spill] sm:$0xff]  ;;  %v2797_v8 = vmul.f32 %v8664_v50, %v12814_v46 }
 0x3b5   :  { %v3435_v60 = vsel %vm220_vm0, %v3433_v63, %v3434_v49  ;;  %v3478_v30 = vmul.f32 %v8671_v36, %v12812_v9  ;;  %v2731_v0 = vadd.f32 %v2723_v16, %v2709_v29  ;;  %v3477_v26 = vmul.f32 %v8669_v42, %v12812_v9 }
 0x3b6   :  { %v2712_v45 = vadd.f32 %v12811_v23, %v2688_v3  ;;  %v2724_v3 = vrot.slane %v2715_v32, 1  ;;  %v2710_v38 = vadd.f32 %v12816_v57, %v2686_v19  ;;  %v2711_v5 = vadd.f32 %v12817_v62, %v2687_v55  ;;  %v12820_v57 = vld [vmem:[#allocation130_spill] sm:$0xff] }
 0x3b7   :  { %v3486_v63 = vrot.slane %v3478_v30, 2  ;;  %v2795_v32 = vmul.f32 %v8669_v42, %v12814_v46  ;;  %v2798_v29 = vmul.f32 %v12783_v59, %v12814_v46  ;;  %v2804_v19 = vrot.slane %v2796_v17, 2  ;;  %v12821_v30 = vld [vmem:[#allocation109_spill] sm:$0xff]  ;;  %v12829_v46 = vld [vmem:[#allocation171_spill] sm:$0xff] }
 0x3b8   :  { %v2734_v51 = vadd.f32 %v2725_v11, %v2712_v45  ;;  %v2726_v23 = vsel %vm220_vm0, %v2724_v3, %v2725_v11  ;;  %v12819_v45 = vld [vmem:[#allocation143_spill] sm:$0xff]  ;;  %v3485_v16 = vrot.slane %v3477_v26, 2  ;;  %v2732_v55 = vadd.f32 %v2722_v2, %v2710_v38  ;;  %v12823_v3 = vld [vmem:[#allocation142_spill] sm:$0xff] }
 0x3b9   :  { %3443 = vrot.lane.b32.xlu2 %v3438_v15, %s6370_s2  ;;  %v2733_v44 = vadd.f32 %v2726_v23, %v2711_v5  ;;  %v3508_v7 = vmul.f32 %v8671_v36, %v12821_v30  ;;  %v3507_v11 = vmul.f32 %v8669_v42, %v12821_v30  ;;  %v12824_v2 = vld [vmem:[#allocation159_spill] sm:$0xff]  ;;  %v2803_v38 = vrot.slane %v2795_v32, 2 }
 0x3ba   :  { %3441 = vrot.lane.b32.xlu1 %v3434_v49, %s6370_s2  ;;  %3439 = vrot.lane.b32.xlu0 %v3435_v60, %s6370_s2  ;;  %v2761_v60 = vadd.f32 %v12819_v45, %v2731_v0  ;;  %v2764_v62 = vadd.f32 %v12820_v57, %v2734_v51  ;;  %v3479_v0 = vmul.f32 %v8664_v50, %v12812_v9  ;;  %v12825_v51 = vld [vmem:[#allocation145_spill] sm:$0xff]  ;;  %v12827_v23 = vld [vmem:[#allocation163_spill] sm:$0xff] }
 0x3bb   :  { %v9287_v15 = vpop.permute.xlu2 %3139  ;;  %v2763_v17 = vadd.f32 %v12823_v3, %v2733_v44  ;;  %v2762_v26 = vadd.f32 %v12824_v2, %v2732_v55  ;;  %v3516_v32 = vrot.slane %v3508_v7, 2  ;;  %v12828_v3 = vld [vmem:[#allocation150_spill] sm:$0xff]  ;;  %v3509_v7 = vmul.f32 %v8664_v50, %v12821_v30 }
 0x3bc   :  { %12815 = vst [vmem:[#allocation172_spill] sm:$0xff] %v9287_v15  ;;  %v9293_v34 = vpop.permute.xlu1 %3057  ;;  %v9295_v49 = vpop.permute.xlu0 %3055  ;;  %v12822_v15 = vld [vmem:[#allocation149_spill] sm:$0xff]  ;;  %v2794_v5 = vadd.f32 %v12825_v51, %v2764_v62  ;;  %v2806_v62 = vrot.slane %v2797_v8, 2  ;;  %v3515_v51 = vrot.slane %v3507_v11, 2 }
 0x3bd   :  { %12818 = vst [vmem:[#allocation32_spill] sm:$0xff] %v9295_v49  ;;  %v2791_v10 = vadd.f32 %v12822_v15, %v2761_v60  ;;  %v3487_v49 = vsel %vm306_vm1, %v3485_v16, %v3486_v63  ;;  %v2792_v45 = vadd.f32 %v12827_v23, %v2762_v26  ;;  %v2805_v60 = vsel %vm306_vm1, %v2803_v38, %v2804_v19  ;;  %v12830_v26 = vld [vmem:[#allocation167_spill] sm:$0xff] }
 0x3be   :  { %v2807_v16 = vrot.slane %v2798_v29, 2  ;;  %v3517_v29 = vsel %vm306_vm1, %v3515_v51, %v3516_v32 }
 0x3bf   :  { %v2813_v57 = vadd.f32 %v2805_v60, %v2791_v10  ;;  %v2814_v42 = vadd.f32 %v2804_v19, %v2792_v45  ;;  %v12837_v60 = vld [vmem:[#allocation153_spill] sm:$0xff] }
 0x3c0   :  { %v2816_v2 = vadd.f32 %v2807_v16, %v2794_v5  ;;  %v2808_v38 = vsel %vm306_vm1, %v2806_v62, %v2807_v16  ;;  %v3518_v62 = vrot.slane %v3509_v7, 2 }
 0x3c1   :  { %3493 = vrot.lane.b32.xlu2 %v3486_v63, %s6371_s28  ;;  %v3480_v63 = vmul.f32 %v12783_v59, %v12812_v9 }
 0x3c2   :  { %3491 = vrot.lane.b32.xlu1 %v3487_v49, %s6371_s28  ;;  %3445 = vrot.lane.b32.xlu0 %v3437_v39, %s6370_s2  ;;  %v3488_v49 = vrot.slane %v3479_v0, 2  ;;  %v2793_v39 = vadd.f32 %v12828_v3, %v2763_v17  ;;  %v2846_v23 = vadd.f32 %v12830_v26, %v2816_v2  ;;  %v3510_v0 = vmul.f32 %v12783_v59, %v12821_v30  ;;  %v12834_v17 = vld [vmem:[#allocation138_spill] sm:$0xff] }
 0x3c3   :  { %v9320_v15 = vpop.permute.xlu2 %3189  ;;  %v3489_v9 = vrot.slane %v3480_v63, 2  ;;  %v2844_v5 = vadd.f32 %v12834_v17, %v2814_v42  ;;  %v12835_v63 = vld [vmem:[#allocation165_spill] sm:$0xff] }
 0x3c4   :  { %12826 = vst [vmem:[#allocation176_spill] sm:$0xff] %v9320_v15  ;;  %v9326_v44 = vpop.permute.xlu1 %3085  ;;  %v9328_v55 = vpop.permute.xlu0 %3083  ;;  %v2843_v15 = vadd.f32 %v12829_v46, %v2813_v57  ;;  %v2815_v8 = vadd.f32 %v2808_v38, %v2793_v39  ;;  %v12831_v46 = vld [vmem:[#allocation158_spill] sm:$0xff]  ;;  %v9350_v45 = vadd.f32 %v12835_v63, %v2846_v23  ;;  %v3519_v3 = vrot.slane %v3510_v0, 2 }
 0x3c5   :  { %v3490_v10 = vsel %vm306_vm1, %v3488_v49, %v3489_v9  ;;  %v9361_v49 = vadd.f32 %v9071_v13, %v2844_v5 }
 0x3c6   :  { %v9342_v19 = vadd.f32 %v12831_v46, %v2843_v15  ;;  %12836 = vst [vmem:[#allocation181_spill] sm:$0xff] %v9350_v45  ;;  %v2845_v16 = vadd.f32 %v12837_v60, %v2815_v8  ;;  %v9369_v2 = vmul.f32 %v9350_v45, %v12770_v53  ;;  %v3520_v51 = vsel %vm306_vm1, %v3518_v62, %v3519_v3 }
 0x3c7   :  { %12840 = vst [vmem:[#allocation36_spill] sm:$0xff] %v9361_v49  ;;  %v9395_v46 = vmul.f32 %v9361_v49, %v12776_v24 }
 0x3c8   :  { %12832 = vst [vmem:[#allocation53_spill] sm:$0xff] %v9342_v19  ;;  %v9358_v15 = vadd.f32 %v9069_v56, %v2845_v16  ;;  %v4253_v42 = vmul.f32 %v9342_v19, %v12770_v53  ;;  %v4335_v39 = vmul.f32 %v9342_v19, %v12776_v24  ;;  %v12842_v56 = vld [vmem:[#allocation121_spill] sm:$0xff]  ;;  %v12153_v63 = vrot.slane %v9369_v2, 1  ;;  %v12847_v16 = vld [vmem:[#allocation35_spill] sm:$0xff] }
 0x3c9   :  { %3521 = vrot.lane.b32.xlu2 %v3517_v29, %s6370_s2  ;;  %12841 = vst [vmem:[#allocation60_spill] sm:$0xff] %v9369_v2  ;;  %v3547_v26 = vmul.f32 %v12842_v56, %v12719_v48  ;;  %v3546_v13 = vmul.f32 %v12842_v56, %v12721_v14  ;;  %v3545_v23 = vmul.f32 %v12842_v56, %v12722_v35 }
 0x3ca   :  { %3497 = vrot.lane.b32.xlu1 %v3489_v9, %s6371_s28  ;;  %3495 = vrot.lane.b32.xlu0 %v3490_v10, %s6371_s28  ;;  %12839 = vst [vmem:[#allocation48_spill] sm:$0xff] %v9358_v15  ;;  %v9383_v29 = vmul.f32 %v9361_v49, %v12770_v53  ;;  %v4255_v38 = vmul.f32 %v9358_v15, %v12770_v53  ;;  %v4261_v8 = vrot.slane %v4253_v42, 1  ;;  %v4343_v0 = vrot.slane %v4335_v39, 2  ;;  %v12849_v39 = vld [vmem:[#allocation41_spill] sm:$0xff] }
 0x3cb   :  { %v9344_v11 = vpop.permute.xlu2 %3195  ;;  %v9389_v10 = vmul.f32 %v9350_v45, %v12776_v24  ;;  %12846 = vst [vmem:[#allocation29_spill] sm:$0xff] %v9395_v46  ;;  %v4935_v62 = vmul.f32 %v9342_v19, %v12847_v16  ;;  %v9410_v42 = vmul.f32 %v9350_v45, %v12847_v16 }
 0x3cc   :  { %12833 = vst [vmem:[#allocation46_spill] sm:$0xff] %v9344_v11  ;;  %v9353_v57 = vpop.permute.xlu1 %3115  ;;  %v9355_v9 = vpop.permute.xlu0 %3113  ;;  %v12151_v53 = vrot.slane %v9383_v29, 1  ;;  %v4264_v60 = vrot.slane %v4255_v38, 1  ;;  %v12853_v11 = vrot.slane %v9395_v46, 2 }
 0x3cd   :  { %12838 = vst [vmem:[#allocation160_spill] sm:$0xff] %v9353_v57  ;;  %v12156_v30 = vrot.slane %v9389_v10, 2  ;;  %v9436_v57 = vmul.f32 %v9361_v49, %v12847_v16  ;;  %v12160_v46 = vrot.slane %v9410_v42, 1 }
 0x3ce   :  { %12843 = vst [vmem:[#allocation51_spill] sm:$0xff] %v9383_v29  ;;  %v9421_v38 = vsel %vm220_vm0, %v4261_v8, %v12151_v53  ;;  %v9432_v59 = vsel %vm306_vm1, %v4343_v0, %v12853_v11  ;;  %v12856_v29 = vld [vmem:[#allocation47_spill] sm:$0xff]  ;;  %v12857_v53 = vld [vmem:[#allocation49_spill] sm:$0xff]  ;;  %v4937_v11 = vmul.f32 %v9358_v15, %v12847_v16  ;;  %v4967_v0 = vmul.f32 %v9358_v15, %v12849_v39 }
 0x3cf   :  { %12844 = vst [vmem:[#allocation44_spill] sm:$0xff] %v9389_v10  ;;  %v5017_v8 = vmul.f32 %v9342_v19, %v12856_v29  ;;  %v5047_v2 = vmul.f32 %v9342_v19, %v12857_v53 }
 0x3d0   :  { %12848 = vst [vmem:[#allocation86_spill] sm:$0xff] %v9410_v42  ;;  %v4976_v16 = vrot.slane %v4967_v0, 1 }
 0x3d1   :  { %3527 = vrot.lane.b32.xlu2 %v3519_v3, %s6370_s2  ;;  %12851 = vst [vmem:[#allocation54_spill] sm:$0xff] %v9421_v38  ;;  %v9426_v3 = vsel %vm220_vm0, %v4264_v60, %v12153_v63  ;;  %v12158_v63 = vrot.slane %v9436_v57, 1  ;;  %v5055_v42 = vrot.slane %v5047_v2, 2 }
 0x3d2   :  { %3525 = vrot.lane.b32.xlu1 %v3520_v51, %s6370_s2  ;;  %3523 = vrot.lane.b32.xlu0 %v3516_v32, %s6370_s2  ;;  %v4337_v32 = vmul.f32 %v9358_v15, %v12776_v24  ;;  %v9414_v24 = vmul.f32 %v9350_v45, %v12849_v39  ;;  %v4965_v51 = vmul.f32 %v9342_v19, %v12849_v39 }
 0x3d3   :  { %v9391_v7 = vpop.permute.xlu2 %3223  ;;  %12852 = vst [vmem:[#allocation68_spill] sm:$0xff] %v9426_v3 }
 0x3d4   :  { %12845 = vst [vmem:[#allocation30_spill] sm:$0xff] %v9391_v7  ;;  %v9399_v17 = vpop.permute.xlu1 %3137  ;;  %v9401_v5 = vpop.permute.xlu0 %3119  ;;  %v4346_v7 = vrot.slane %v4337_v32, 2  ;;  %v4943_v32 = vrot.slane %v4935_v62, 1  ;;  %v4973_v10 = vrot.slane %v4965_v51, 1 }
 0x3d5   :  { %12850 = vst [vmem:[#allocation78_spill] sm:$0xff] %v9414_v24 }
 0x3d6   :  { %12854 = vst [vmem:[#allocation91_spill] sm:$0xff] %v9432_v59  ;;  %v9445_v60 = vsel %vm306_vm1, %v4346_v7, %v12156_v30  ;;  %v9456_v59 = vmul.f32 %v9361_v49, %v12849_v39  ;;  %v4946_v7 = vrot.slane %v4937_v11, 1  ;;  %v9470_v39 = vsel %vm220_vm0, %v4943_v32, %v12158_v63 }
 0x3d7   :  { %12855 = vst [vmem:[#allocation96_spill] sm:$0xff] %v9436_v57  ;;  %v12865_v57 = vrot.slane %v9414_v24, 1  ;;  %v9494_v63 = vmul.f32 %v9350_v45, %v12856_v29 }
 0x3d8   :  { %12858 = vst [vmem:[#allocation59_spill] sm:$0xff] %v9445_v60  ;;  %v12163_v51 = vrot.slane %v9456_v59, 1  ;;  %v9484_v62 = vsel %vm220_vm0, %v4946_v7, %v12160_v46  ;;  %v12869_v46 = vld [vmem:[#allocation125_spill] sm:$0xff] }
 0x3d9   :  { %3557 = vrot.lane.b32.xlu2 %v3547_v26, %s6371_s28  ;;  %12859 = vst [vmem:[#allocation57_spill] sm:$0xff] %v9456_v59  ;;  %v9463_v26 = vmul.f32 %v9361_v49, %v12856_v29  ;;  %v9489_v32 = vsel %vm220_vm0, %v4976_v16, %v12865_v57  ;;  %v3570_v24 = vmul.f32 %v12869_v46, %v12721_v14 }
 0x3da   :  { %3555 = vrot.lane.b32.xlu1 %v3546_v13, %s6371_s28  ;;  %3553 = vrot.lane.b32.xlu0 %v3545_v23, %s6371_s28  ;;  %12862 = vst [vmem:[#allocation52_spill] sm:$0xff] %v9470_v39  ;;  %v5025_v13 = vrot.slane %v5017_v8, 2  ;;  %v9475_v23 = vmul.f32 %v9361_v49, %v12857_v53  ;;  %v9499_v39 = vsel %vm220_vm0, %v4973_v10, %v12163_v51 }
 0x3db   :  { %12860 = vst [vmem:[#allocation98_spill] sm:$0xff] %v9463_v26  ;;  %v9465_v30 = vpop.permute.xlu2 %3273  ;;  %v12164_v8 = vrot.slane %v9463_v26, 2  ;;  %v5019_v16 = vmul.f32 %v9358_v15, %v12856_v29  ;;  %v9513_v59 = vmul.f32 %v9350_v45, %v12857_v53  ;;  %v3569_v2 = vmul.f32 %v12869_v46, %v12722_v35 }
 0x3dc   :  { %12861 = vst [vmem:[#allocation82_spill] sm:$0xff] %v9465_v30  ;;  %v9477_v11 = vpop.permute.xlu1 %3143  ;;  %v9479_v0 = vpop.permute.xlu0 %3141  ;;  %v12166_v7 = vrot.slane %v9475_v23, 2  ;;  %v5049_v51 = vmul.f32 %v9358_v15, %v12857_v53  ;;  %v3548_v29 = vmul.f32 %v12842_v56, %v12726_v22  ;;  %v3572_v38 = vmul.f32 %v12869_v46, %v12726_v22 }
 0x3dd   :  { %12863 = vst [vmem:[#allocation81_spill] sm:$0xff] %v9475_v23  ;;  %v9507_v57 = vsel %vm306_vm1, %v5025_v13, %v12164_v8  ;;  %v12873_v13 = vld [vmem:[#allocation40_spill] sm:$0xff]  ;;  %v12171_v53 = vrot.slane %v9513_v59, 2 }
 0x3de   :  { %12864 = vst [vmem:[#allocation61_spill] sm:$0xff] %v9484_v62  ;;  %v9520_v10 = vsel %vm306_vm1, %v5055_v42, %v12166_v7  ;;  %v4913_v8 = vmul.f32 %v9342_v19, %v12873_v13  ;;  %v5058_v7 = vrot.slane %v5049_v51, 2  ;;  %v9539_v23 = vmul.f32 %v9361_v49, %v12873_v13 }
 0x3df   :  { %12866 = vst [vmem:[#allocation89_spill] sm:$0xff] %v9489_v32  ;;  %v5028_v32 = vrot.slane %v5019_v16, 2 }
 0x3e0   :  { %12867 = vst [vmem:[#allocation73_spill] sm:$0xff] %v9494_v63  ;;  %v9555_v51 = vsel %vm306_vm1, %v5058_v7, %v12171_v53  ;;  %v4921_v62 = vrot.slane %v4913_v8, 1 }
 0x3e1   :  { %12868 = vst [vmem:[#allocation55_spill] sm:$0xff] %v9499_v39  ;;  %v12170_v39 = vrot.slane %v9494_v63, 2  ;;  %3579 = vrot.lane.b32.xlu2 %v3570_v24, %s6370_s2  ;;  %v12877_v24 = vld [vmem:[#allocation56_spill] sm:$0xff] }
 0x3e2   :  { %12870 = vst [vmem:[#allocation83_spill] sm:$0xff] %v9507_v57  ;;  %v12874_v57 = vld [vmem:[#allocation126_spill] sm:$0xff]  ;;  %3577 = vrot.lane.b32.xlu1 %v3569_v2, %s6370_s2  ;;  %3559 = vrot.lane.b32.xlu0 %v3548_v29, %s6371_s28  ;;  %v4995_v56 = vmul.f32 %v9342_v19, %v12877_v24  ;;  %v12173_v2 = vrot.slane %v9539_v23, 1  ;;  %v9560_v29 = vmul.f32 %v9350_v45, %v12873_v13 }
 0x3e3   :  { %12871 = vst [vmem:[#allocation102_spill] sm:$0xff] %v9513_v59  ;;  %v9530_v26 = vmul.f32 %v12874_v57, %v12721_v14  ;;  %v3615_v42 = vmul.f32 %v12874_v57, %v12722_v35  ;;  %v9546_v16 = vsel %vm306_vm1, %v5028_v32, %v12170_v39  ;;  %v9571_v7 = vmul.f32 %v9361_v49, %v12877_v24 }
 0x3e4   :  { %12872 = vst [vmem:[#allocation76_spill] sm:$0xff] %v9520_v10  ;;  %v9550_v10 = vpop.permute.xlu2 %3301  ;;  %v9562_v63 = vpop.permute.xlu1 %3193  ;;  %v9576_v53 = vsel %vm220_vm0, %v4921_v62, %v12173_v2  ;;  %v12178_v59 = vrot.slane %v9560_v29, 1  ;;  %v5003_v3 = vrot.slane %v4995_v56, 2  ;;  %v4997_v62 = vmul.f32 %v9358_v15, %v12877_v24 }
 0x3e5   :  { %12875 = vst [vmem:[#allocation80_spill] sm:$0xff] %v9539_v23  ;;  %v9564_v32 = vpop.permute.xlu0 %3191  ;;  %v3624_v39 = vrot.slane %v9530_v26, 1  ;;  %v3623_v8 = vrot.slane %v3615_v42, 1  ;;  %v12177_v60 = vrot.slane %v9571_v7, 2  ;;  %v3617_v42 = vmul.f32 %v12874_v57, %v12719_v48 }
 0x3e6   :  { %12876 = vst [vmem:[#allocation85_spill] sm:$0xff] %v9546_v16  ;;  %v4915_v16 = vmul.f32 %v9358_v15, %v12873_v13  ;;  %v3618_v23 = vmul.f32 %v12874_v57, %v12726_v22 }
 0x3e7   :  { %12878 = vst [vmem:[#allocation66_spill] sm:$0xff] %v9550_v10  ;;  %v3625_v2 = vsel %vm220_vm0, %v3623_v8, %v3624_v39  ;;  %v9601_v56 = vsel %vm306_vm1, %v5003_v3, %v12177_v60  ;;  %v12888_v8 = vld [vmem:[#allocation133_spill] sm:$0xff] }
 0x3e8   :  { %12879 = vst [vmem:[#allocation90_spill] sm:$0xff] %v9555_v51  ;;  %v9580_v51 = vmul.f32 %v9350_v45, %v12877_v24  ;;  %v4924_v26 = vrot.slane %v4915_v16, 1  ;;  %v9608_v30 = vmul.f32 %v12888_v8, %v12719_v48  ;;  %v9615_v3 = vmul.f32 %v12888_v8, %v12726_v22 }
 0x3e9   :  { %12880 = vst [vmem:[#allocation169_spill] sm:$0xff] %v9560_v29  ;;  %3629 = vrot.lane.b32.xlu2 %v3625_v2, %s6371_s28  ;;  %v5006_v29 = vrot.slane %v4997_v62, 2  ;;  %v5595_v2 = vmul.f32 %v9342_v19, %v12874_v57  ;;  %v5597_v62 = vmul.f32 %v9358_v15, %v12874_v57 }
 0x3ea   :  { %12881 = vst [vmem:[#allocation174_spill] sm:$0xff] %v9562_v63  ;;  %v9596_v16 = vsel %vm220_vm0, %v4924_v26, %v12178_v59  ;;  %3583 = vrot.lane.b32.xlu1 %v3572_v38, %s6370_s2  ;;  %v9621_v26 = vmul.f32 %v9361_v49, %v12874_v57  ;;  %v3626_v59 = vrot.slane %v3617_v42, 1  ;;  %v5627_v42 = vmul.f32 %v9358_v15, %v12888_v8 }
 0x3eb   :  { %12882 = vst [vmem:[#allocation119_spill] sm:$0xff] %v9564_v32  ;;  %v9658_v32 = vmul.f32 %v9361_v49, %v12888_v8  ;;  %v3656_v63 = vrot.slane %v9608_v30, 1 }
 0x3ec   :  { %12883 = vst [vmem:[#allocation123_spill] sm:$0xff] %v9571_v7  ;;  %v9623_v60 = vpop.permute.xlu2 %3307  ;;  %v5636_v10 = vrot.slane %v5627_v42, 1 }
 0x3ed   :  { %12884 = vst [vmem:[#allocation104_spill] sm:$0xff] %v9576_v53  ;;  %v3571_v53 = vmul.f32 %v12869_v46, %v12719_v48  ;;  %v12180_v46 = vrot.slane %v9580_v51, 2  ;;  %v9638_v7 = vpop.permute.xlu0 %3219 }
 0x3ee   :  { %12885 = vst [vmem:[#allocation124_spill] sm:$0xff] %v9580_v51  ;;  %v3646_v51 = vmul.f32 %v12888_v8, %v12721_v14 }
 0x3ef   :  { %12886 = vst [vmem:[#allocation118_spill] sm:$0xff] %v9596_v16  ;;  %3581 = vrot.lane.b32.xlu0 %v3571_v53, %s6370_s2  ;;  %v9628_v38 = vsel %vm306_vm1, %v5006_v29, %v12180_v46  ;;  %v9632_v53 = vmul.f32 %v9350_v45, %v12874_v57  ;;  %v5603_v16 = vrot.slane %v5595_v2, 1  ;;  %v9645_v29 = vmul.f32 %v9350_v45, %v12888_v8 }
 0x3f0   :  { %12887 = vst [vmem:[#allocation112_spill] sm:$0xff] %v9601_v56  ;;  %v9636_v56 = vpop.permute.xlu1 %3221  ;;  %v3627_v46 = vrot.slane %v3618_v23, 1 }
 0x3f1   :  { %12889 = vst [vmem:[#allocation129_spill] sm:$0xff] %v9621_v26  ;;  %v12184_v57 = vrot.slane %v9632_v53, 1 }
 0x3f2   :  { %12890 = vst [vmem:[#allocation136_spill] sm:$0xff] %v9623_v60  ;;  %v12182_v60 = vrot.slane %v9621_v26, 1  ;;  %v3628_v23 = vsel %vm220_vm0, %v3626_v59, %v3627_v46  ;;  %v12900_v26 = vld [vmem:[#allocation137_spill] sm:$0xff]  ;;  %3635 = vrot.lane.b32.xlu2 %v3627_v46, %s6371_s28 }
 0x3f3   :  { %12891 = vst [vmem:[#allocation131_spill] sm:$0xff] %v9628_v38  ;;  %v5606_v38 = vrot.slane %v5597_v62, 1  ;;  %v9677_v59 = vmul.f32 %v9361_v49, %v12900_v26  ;;  %v5677_v30 = vmul.f32 %v9342_v19, %v12900_v26  ;;  %3633 = vrot.lane.b32.xlu1 %v3628_v23, %s6371_s28  ;;  %v9695_v46 = vmul.f32 %v9350_v45, %v12900_v26 }
 0x3f4   :  { %12892 = vst [vmem:[#allocation108_spill] sm:$0xff] %v9632_v53  ;;  %v9653_v2 = vsel %vm220_vm0, %v5603_v16, %v12182_v60  ;;  %v5625_v16 = vmul.f32 %v9342_v19, %v12888_v8 }
 0x3f5   :  { %12893 = vst [vmem:[#allocation135_spill] sm:$0xff] %v9636_v56  ;;  %v12186_v56 = vrot.slane %v9645_v29, 1  ;;  %v9665_v62 = vsel %vm220_vm0, %v5606_v38, %v12184_v57  ;;  %v3645_v38 = vmul.f32 %v12888_v8, %v12722_v35  ;;  %v5685_v60 = vrot.slane %v5677_v30, 2 }
 0x3f6   :  { %12894 = vst [vmem:[#allocation122_spill] sm:$0xff] %v9638_v7  ;;  %v5633_v57 = vrot.slane %v5625_v16, 1  ;;  %v5679_v8 = vmul.f32 %v9358_v15, %v12900_v26  ;;  %v9699_v16 = vpop.permute.xlu2 %3337  ;;  %v12911_v7 = vrot.slane %v9677_v59, 2 }
 0x3f7   :  { %12895 = vst [vmem:[#allocation128_spill] sm:$0xff] %v9645_v29  ;;  %v9672_v42 = vsel %vm220_vm0, %v5636_v10, %v12186_v56  ;;  %3631 = vrot.lane.b32.xlu0 %v3624_v39, %s6371_s28 }
 0x3f8   :  { %12896 = vst [vmem:[#allocation132_spill] sm:$0xff] %v9653_v2  ;;  %v9711_v56 = vpop.permute.xlu1 %3271  ;;  %v9713_v2 = vpop.permute.xlu0 %3225 }
 0x3f9   :  { %12897 = vst [vmem:[#allocation127_spill] sm:$0xff] %v9658_v32 }
 0x3fa   :  { %12898 = vst [vmem:[#allocation120_spill] sm:$0xff] %v9665_v62  ;;  %v12902_v62 = vld [vmem:[#allocation141_spill] sm:$0xff] }
 0x3fb   :  { %12899 = vst [vmem:[#allocation144_spill] sm:$0xff] %v9672_v42  ;;  %v5707_v29 = vmul.f32 %v9342_v19, %v12902_v62  ;;  %v9688_v10 = vmul.f32 %v9361_v49, %v12902_v62  ;;  %v12906_v42 = vrot.slane %v9658_v32, 1  ;;  %v9709_v30 = vmul.f32 %v9350_v45, %v12902_v62 }
 0x3fc   :  { %12901 = vst [vmem:[#allocation139_spill] sm:$0xff] %v9677_v59  ;;  %v12192_v32 = vrot.slane %v9695_v46, 2 }
 0x3fd   :  { %12903 = vst [vmem:[#allocation146_spill] sm:$0xff] %v9688_v10  ;;  %v9704_v53 = vsel %vm220_vm0, %v5633_v57, %v12906_v42  ;;  %v5715_v23 = vrot.slane %v5707_v29, 2  ;;  %v12190_v39 = vrot.slane %v9688_v10, 2  ;;  %v5688_v57 = vrot.slane %v5679_v8, 2 }
 0x3fe   :  { %12904 = vst [vmem:[#allocation156_spill] sm:$0xff] %v9695_v46  ;;  %v5709_v29 = vmul.f32 %v9358_v15, %v12902_v62  ;;  %v3654_v42 = vrot.slane %v3646_v51, 1  ;;  %v3653_v8 = vrot.slane %v3645_v38, 1  ;;  %v3698_v38 = vmul.f32 %v12900_v26, %v12721_v14 }
 0x3ff   :  { %12905 = vst [vmem:[#allocation134_spill] sm:$0xff] %v9699_v16  ;;  %v9718_v16 = vsel %vm306_vm1, %v5685_v60, %v12911_v7  ;;  %v9732_v59 = vsel %vm306_vm1, %v5688_v57, %v12192_v32  ;;  %v12191_v60 = vrot.slane %v9709_v30, 2 }
 0x400   :  { %12907 = vst [vmem:[#allocation147_spill] sm:$0xff] %v9704_v53  ;;  %v9726_v53 = vsel %vm306_vm1, %v5715_v23, %v12190_v39  ;;  %v5718_v7 = vrot.slane %v5709_v29, 2  ;;  %v3655_v57 = vsel %vm220_vm0, %v3653_v8, %v3654_v42  ;;  %3661 = vrot.lane.b32.xlu1 %v3654_v42, %s6370_s2  ;;  %v9778_v10 = vpop.permute.xlu0 %3275 }
 0x401   :  { %12908 = vst [vmem:[#allocation151_spill] sm:$0xff] %v9709_v30  ;;  %3659 = vrot.lane.b32.xlu0 %v3655_v57, %s6370_s2 }
 0x402   :  { %12909 = vst [vmem:[#allocation115_spill] sm:$0xff] %v9711_v56  ;;  %v3657_v56 = vrot.slane %v9615_v3, 1  ;;  %v9741_v23 = vsel %vm306_vm1, %v5718_v7, %v12191_v60  ;;  %v9764_v60 = vpop.permute.xlu2 %3359 }
 0x403   :  { %12910 = vst [vmem:[#allocation140_spill] sm:$0xff] %v9713_v2 }
 0x404   :  { %12912 = vst [vmem:[#allocation155_spill] sm:$0xff] %v9718_v16  ;;  %v12915_v16 = vld [vmem:[#allocation99_spill] sm:$0xff]  ;;  %v3658_v51 = vsel %vm220_vm0, %v3656_v63, %v3657_v56  ;;  %v9776_v63 = vpop.permute.xlu1 %3277 }
 0x405   :  { %12913 = vst [vmem:[#allocation143_spill] sm:$0xff] %v9726_v53  ;;  %v5573_v2 = vmul.f32 %v9342_v19, %v12915_v16  ;;  %v9745_v3 = vmul.f32 %v9361_v49, %v12915_v16  ;;  %3663 = vrot.lane.b32.xlu2 %v3658_v51, %s6370_s2  ;;  %v9756_v7 = vmul.f32 %v9350_v45, %v12915_v16  ;;  %v12919_v51 = vld [vmem:[#allocation84_spill] sm:$0xff] }
 0x406   :  { %12914 = vst [vmem:[#allocation130_spill] sm:$0xff] %v9732_v59  ;;  %v5575_v39 = vmul.f32 %v9358_v15, %v12915_v16  ;;  %v9762_v8 = vmul.f32 %v9361_v49, %v12919_v51  ;;  %v5655_v42 = vmul.f32 %v9342_v19, %v12919_v51  ;;  %v9772_v57 = vmul.f32 %v9350_v45, %v12919_v51 }
 0x407   :  { %12916 = vst [vmem:[#allocation149_spill] sm:$0xff] %v9741_v23  ;;  %v5581_v29 = vrot.slane %v5573_v2, 1  ;;  %v3697_v2 = vmul.f32 %v12900_v26, %v12722_v35  ;;  %v5657_v32 = vmul.f32 %v9358_v15, %v12919_v51  ;;  %v12923_v23 = vrot.slane %v9745_v3, 1 }
 0x408   :  { %12917 = vst [vmem:[#allocation142_spill] sm:$0xff] %v9745_v3  ;;  %v12208_v59 = vrot.slane %v9756_v7, 1  ;;  %v5584_v46 = vrot.slane %v5575_v39, 1  ;;  %v12207_v53 = vrot.slane %v9762_v8, 2  ;;  %v3706_v16 = vrot.slane %v3698_v38, 2 }
 0x409   :  { %12918 = vst [vmem:[#allocation159_spill] sm:$0xff] %v9756_v7  ;;  %v9783_v30 = vsel %vm220_vm0, %v5581_v29, %v12923_v23  ;;  %v5663_v45 = vrot.slane %v5655_v42, 2  ;;  %v12206_v49 = vrot.slane %v9772_v57, 2  ;;  %v5666_v15 = vrot.slane %v5657_v32, 2  ;;  %3665 = vrot.lane.b32.xlu0 %v3657_v56, %s6370_s2  ;;  %v9819_v42 = vpop.permute.xlu0 %3303 }
 0x40a   :  { %12920 = vst [vmem:[#allocation145_spill] sm:$0xff] %v9762_v8  ;;  %v9790_v51 = vsel %vm220_vm0, %v5584_v46, %v12208_v59  ;;  %v3705_v19 = vrot.slane %v3697_v2, 2  ;;  %v3728_v39 = vmul.f32 %v12902_v62, %v12721_v14  ;;  %v3699_v32 = vmul.f32 %v12900_v26, %v12719_v48  ;;  %v9813_v29 = vpop.permute.xlu2 %3409 }
 0x40b   :  { %12921 = vst [vmem:[#allocation163_spill] sm:$0xff] %v9764_v60  ;;  %v9796_v23 = vsel %vm306_vm1, %v5663_v45, %v12207_v53  ;;  %v9803_v38 = vsel %vm306_vm1, %v5666_v15, %v12206_v49  ;;  %v3727_v45 = vmul.f32 %v12902_v62, %v12722_v35  ;;  %v3700_v15 = vmul.f32 %v12900_v26, %v12726_v22 }
 0x40c   :  { %12922 = vst [vmem:[#allocation150_spill] sm:$0xff] %v9772_v57  ;;  %v3707_v46 = vsel %vm306_vm1, %v3705_v19, %v3706_v16  ;;  %v9817_v2 = vpop.permute.xlu1 %3305  ;;  %v3736_v19 = vrot.slane %v3728_v39, 2  ;;  %v3729_v59 = vmul.f32 %v12902_v62, %v12719_v48  ;;  %v3730_v39 = vmul.f32 %v12902_v62, %v12726_v22  ;;  %v12933_v62 = vld [vmem:[#allocation148_spill] sm:$0xff] }
 0x40d   :  { %12924 = vst [vmem:[#allocation171_spill] sm:$0xff] %v9783_v30  ;;  %3713 = vrot.lane.b32.xlu2 %v3706_v16, %s6371_s28  ;;  %3711 = vrot.lane.b32.xlu1 %v3707_v46, %s6371_s28  ;;  %v3708_v16 = vrot.slane %v3699_v32, 2  ;;  %v3735_v49 = vrot.slane %v3727_v45, 2  ;;  %v3709_v53 = vrot.slane %v3700_v15, 2  ;;  %v3767_v57 = vmul.f32 %v12933_v62, %v8380_v31 }
 0x40e   :  { %12925 = vst [vmem:[#allocation167_spill] sm:$0xff] %v9790_v51  ;;  %v3739_v15 = vrot.slane %v3730_v39, 2  ;;  %v3765_v39 = vmul.f32 %v12933_v62, %v8387_v54 }
 0x40f   :  { %12926 = vst [vmem:[#allocation158_spill] sm:$0xff] %v9796_v23  ;;  %v3737_v46 = vsel %vm306_vm1, %v3735_v49, %v3736_v19  ;;  %v3710_v56 = vsel %vm306_vm1, %v3708_v16, %v3709_v53  ;;  %v3738_v49 = vrot.slane %v3729_v59, 2  ;;  %v3766_v59 = vmul.f32 %v12933_v62, %v8390_v27 }
 0x410   :  { %12927 = vst [vmem:[#allocation138_spill] sm:$0xff] %v9803_v38  ;;  %v3768_v38 = vmul.f32 %v12933_v62, %v8419_v61 }
 0x411   :  { %12928 = vst [vmem:[#allocation165_spill] sm:$0xff] %v9813_v29  ;;  %3715 = vrot.lane.b32.xlu0 %v3710_v56, %s6371_s28  ;;  %v9834_v45 = vpop.permute.xlu0 %3333  ;;  %v3740_v16 = vsel %vm306_vm1, %v3738_v49, %v3739_v15  ;;  %v12950_v29 = vld [vmem:[#allocation37_spill] sm:$0xff] }
 0x412   :  { %v9828_v26 = vpop.permute.xlu2 %3415 }
 0x413   :  { %12929 = vst [vmem:[#allocation153_spill] sm:$0xff] %v9828_v26 }
 0x414   :  { %v9832_v32 = vpop.permute.xlu1 %3335 }
 0x415   :  { %3741 = vrot.lane.b32.xlu2 %v3737_v46, %s6370_s2  ;;  %3717 = vrot.lane.b32.xlu1 %v3709_v53, %s6371_s28  ;;  %12930 = vst [vmem:[#allocation35_spill] sm:$0xff] %v9832_v32 }
 0x419   :  { %3743 = vrot.lane.b32.xlu0 %v3736_v19, %s6370_s2  ;;  %v9844_v56 = vpop.permute.xlu0 %3339 }
 0x41a   :  { %v9840_v53 = vpop.permute.xlu2 %3443  ;;  %12932 = vst [vmem:[#allocation47_spill] sm:$0xff] %v9844_v56 }
 0x41b   :  { %12931 = vst [vmem:[#allocation41_spill] sm:$0xff] %v9840_v53 }
 0x41c   :  { %v9842_v46 = vpop.permute.xlu1 %3357 }
 0x41d   :  { %3747 = vrot.lane.b32.xlu2 %v3739_v15, %s6370_s2  ;;  %3745 = vrot.lane.b32.xlu1 %v3740_v16, %s6370_s2  ;;  %v12937_v16 = vld [vmem:[#allocation152_spill] sm:$0xff] }
 0x41e   :  { %v3790_v23 = vmul.f32 %v12937_v16, %v8390_v27  ;;  %v3789_v8 = vmul.f32 %v12937_v16, %v8387_v54 }
 0x421   :  { %3773 = vrot.lane.b32.xlu0 %v3765_v39, %s6371_s28  ;;  %v9859_v15 = vpop.permute.xlu0 %3361 }
 0x422   :  { %v9855_v19 = vpop.permute.xlu2 %3493  ;;  %12936 = vst [vmem:[#allocation126_spill] sm:$0xff] %v9859_v15 }
 0x423   :  { %12934 = vst [vmem:[#allocation49_spill] sm:$0xff] %v9855_v19 }
 0x424   :  { %v9857_v49 = vpop.permute.xlu1 %3363 }
 0x425   :  { %3777 = vrot.lane.b32.xlu2 %v3767_v57, %s6371_s28  ;;  %3775 = vrot.lane.b32.xlu1 %v3766_v59, %s6371_s28  ;;  %12935 = vst [vmem:[#allocation40_spill] sm:$0xff] %v9857_v49  ;;  %v12938_v57 = vld [vmem:[#allocation154_spill] sm:$0xff] }
 0x426   :  { %v3836_v59 = vmul.f32 %v12938_v57, %v8390_v27  ;;  %v3835_v39 = vmul.f32 %v12938_v57, %v8387_v54 }
 0x428   :  { %v3844_v3 = vrot.slane %v3836_v59, 1  ;;  %v3843_v62 = vrot.slane %v3835_v39, 1 }
 0x429   :  { %3779 = vrot.lane.b32.xlu0 %v3768_v38, %s6371_s28  ;;  %v9878_v30 = vpop.permute.xlu0 %3411  ;;  %v3837_v38 = vmul.f32 %v12938_v57, %v8380_v31 }
 0x42a   :  { %v9874_v51 = vpop.permute.xlu2 %3521  ;;  %12941 = vst [vmem:[#allocation137_spill] sm:$0xff] %v9878_v30  ;;  %v3845_v19 = vsel %vm220_vm0, %v3843_v62, %v3844_v3  ;;  %v3838_v62 = vmul.f32 %v12938_v57, %v8419_v61 }
 0x42b   :  { %12939 = vst [vmem:[#allocation56_spill] sm:$0xff] %v9874_v51  ;;  %v3846_v53 = vrot.slane %v3837_v38, 1 }
 0x42c   :  { %v9876_v7 = vpop.permute.xlu1 %3413 }
 0x42d   :  { %3799 = vrot.lane.b32.xlu2 %v3790_v23, %s6370_s2  ;;  %3797 = vrot.lane.b32.xlu1 %v3789_v8, %s6370_s2  ;;  %12940 = vst [vmem:[#allocation133_spill] sm:$0xff] %v9876_v7  ;;  %v3792_v23 = vmul.f32 %v12937_v16, %v8419_v61  ;;  %v3791_v8 = vmul.f32 %v12937_v16, %v8380_v31  ;;  %v3847_v16 = vrot.slane %v3838_v62, 1 }
 0x431   :  { %3801 = vrot.lane.b32.xlu0 %v3791_v8, %s6370_s2  ;;  %v9896_v39 = vpop.permute.xlu0 %3439 }
 0x432   :  { %v9890_v51 = vpop.permute.xlu2 %3527  ;;  %12944 = vst [vmem:[#allocation185_spill] sm:$0xff] %v9896_v39 }
 0x433   :  { %12942 = vst [vmem:[#allocation141_spill] sm:$0xff] %v9890_v51 }
 0x434   :  { %v9894_v59 = vpop.permute.xlu1 %3441 }
 0x435   :  { %3849 = vrot.lane.b32.xlu2 %v3845_v19, %s6371_s28  ;;  %3803 = vrot.lane.b32.xlu1 %v3792_v23, %s6370_s2  ;;  %12943 = vst [vmem:[#allocation184_spill] sm:$0xff] %v9894_v59  ;;  %v12945_v19 = vld [vmem:[#allocation161_spill] sm:$0xff]  ;;  %v3848_v23 = vsel %vm220_vm0, %v3846_v53, %v3847_v16 }
 0x436   :  { %v3867_v30 = vmul.f32 %v12945_v19, %v8380_v31  ;;  %v3866_v8 = vmul.f32 %v12945_v19, %v8390_v27  ;;  %v3868_v57 = vmul.f32 %v12945_v19, %v8419_v61  ;;  %v3865_v38 = vmul.f32 %v12945_v19, %v8387_v54 }
 0x438   :  { %v3876_v53 = vrot.slane %v3867_v30, 1  ;;  %v3874_v26 = vrot.slane %v3866_v8, 1  ;;  %v3873_v39 = vrot.slane %v3865_v38, 1  ;;  %v2933_v38 = vmul.f32 %v12873_v13, %v12722_v35 }
 0x439   :  { %3851 = vrot.lane.b32.xlu0 %v3844_v3, %s6371_s28  ;;  %v9914_v59 = vpop.permute.xlu0 %3445  ;;  %v9920_v3 = vmul.f32 %v12873_v13, %v12721_v14 }
 0x43a   :  { %v9908_v51 = vpop.permute.xlu2 %3557  ;;  %12948 = vst [vmem:[#allocation188_spill] sm:$0xff] %v9914_v59  ;;  %v3875_v30 = vsel %vm220_vm0, %v3873_v39, %v3874_v26  ;;  %v12951_v59 = vld [vmem:[#allocation170_spill] sm:$0xff]  ;;  %v2941_v56 = vrot.slane %v2933_v38, 1 }
 0x43b   :  { %12946 = vst [vmem:[#allocation186_spill] sm:$0xff] %v9908_v51  ;;  %v3918_v8 = vmul.f32 %v12951_v59, %v8390_v27  ;;  %v3917_v39 = vmul.f32 %v12951_v59, %v8387_v54  ;;  %v2942_v15 = vrot.slane %v9920_v3, 1 }
 0x43c   :  { %v9912_v62 = vpop.permute.xlu1 %3491 }
 0x43d   :  { %3855 = vrot.lane.b32.xlu2 %v3847_v16, %s6371_s28  ;;  %3853 = vrot.lane.b32.xlu1 %v3848_v23, %s6371_s28  ;;  %12947 = vst [vmem:[#allocation187_spill] sm:$0xff] %v9912_v62  ;;  %v12949_v16 = vld [vmem:[#allocation34_spill] sm:$0xff]  ;;  %v3877_v23 = vrot.slane %v3868_v57, 1  ;;  %v3925_v3 = vrot.slane %v3917_v39, 2  ;;  %v3920_v39 = vmul.f32 %v12951_v59, %v8419_v61 }
 0x43e   :  { %v2877_v7 = vmul.f32 %v12949_v16, %v12722_v35  ;;  %v2880_v51 = vmul.f32 %v12949_v16, %v12726_v22  ;;  %v2878_v57 = vmul.f32 %v12949_v16, %v12721_v14 }
 0x43f   :  { %v3878_v19 = vsel %vm220_vm0, %v3876_v53, %v3877_v23 }
 0x440   :  { %v2881_v62 = vadd.f32 %v2877_v7, %v12950_v29  ;;  %v2879_v7 = vmul.f32 %v12949_v16, %v12719_v48  ;;  %v2884_v60 = vadd.f32 %v2880_v51, %v12950_v29  ;;  %v2882_v16 = vadd.f32 %v2878_v57, %v12950_v29 }
 0x441   :  { %3879 = vrot.lane.b32.xlu0 %v3875_v30, %s6370_s2  ;;  %v9947_v32 = vpop.permute.xlu0 %3495  ;;  %v3926_v30 = vrot.slane %v3918_v8, 2  ;;  %v2935_v51 = vmul.f32 %v12873_v13, %v12719_v48  ;;  %v12955_v8 = vld [vmem:[#allocation173_spill] sm:$0xff] }
 0x442   :  { %v9939_v53 = vpop.permute.xlu2 %3579  ;;  %12954 = vst [vmem:[#allocation190_spill] sm:$0xff] %v9947_v32  ;;  %v2943_v32 = vsel %vm220_vm0, %v2941_v56, %v2942_v15  ;;  %v9962_v57 = vmul.f32 %v12955_v8, %v8390_v27 }
 0x443   :  { %12952 = vst [vmem:[#allocation170_spill] sm:$0xff] %v9939_v53  ;;  %v2883_v53 = vadd.f32 %v2879_v7, %v12950_v29  ;;  %v3927_v38 = vsel %vm306_vm1, %v3925_v3, %v3926_v30  ;;  %v3015_v7 = vmul.f32 %v12877_v24, %v12722_v35  ;;  %v3018_v29 = vmul.f32 %v12877_v24, %v12726_v22 }
 0x444   :  { %v9945_v49 = vpop.permute.xlu1 %3497  ;;  %v3956_v3 = vrot.slane %v9962_v57, 2 }
 0x445   :  { %3883 = vrot.lane.b32.xlu2 %v3878_v19, %s6370_s2  ;;  %3881 = vrot.lane.b32.xlu1 %v3874_v26, %s6370_s2  ;;  %v2905_v19 = vadd.f32 %v9102_v52, %v2881_v62  ;;  %12953 = vst [vmem:[#allocation189_spill] sm:$0xff] %v9945_v49  ;;  %v2908_v52 = vadd.f32 %v9120_v58, %v2884_v60 }
 0x446   :  { %v2936_v62 = vmul.f32 %v12873_v13, %v12726_v22  ;;  %v2906_v49 = vadd.f32 %v9100_v18, %v2882_v16  ;;  %v3016_v60 = vmul.f32 %v12877_v24, %v12721_v14  ;;  %v3919_v13 = vmul.f32 %v12951_v59, %v8380_v31  ;;  %v12956_v18 = vld [vmem:[#allocation162_spill] sm:$0xff] }
 0x447   :  { %v2929_v26 = vadd.f32 %v9118_v25, %v2905_v19  ;;  %v2932_v25 = vadd.f32 %v9156_v21, %v2908_v52  ;;  %v2907_v16 = vadd.f32 %v12956_v18, %v2883_v53  ;;  %v3947_v21 = vmul.f32 %v12955_v8, %v8387_v54 }
 0x448   :  { %v2945_v56 = vrot.slane %v2936_v62, 1  ;;  %v3928_v18 = vrot.slane %v3919_v13, 2 }
 0x449   :  { %v2951_v58 = vadd.f32 %v2943_v32, %v2929_v26  ;;  %3885 = vrot.lane.b32.xlu0 %v3877_v23, %s6370_s2  ;;  %v2944_v32 = vrot.slane %v2935_v51, 1  ;;  %v12958_v26 = vld [vmem:[#allocation166_spill] sm:$0xff]  ;;  %v2931_v52 = vadd.f32 %v9158_v4, %v2907_v16  ;;  %v9985_v23 = vpop.permute.xlu0 %3523  ;;  %v3024_v51 = vrot.slane %v3016_v60, 2 }
 0x44a   :  { %v9977_v19 = vpop.permute.xlu2 %3629  ;;  %v2954_v53 = vadd.f32 %v2945_v56, %v2932_v25  ;;  %v3023_v25 = vrot.slane %v3015_v7, 2  ;;  %v3929_v4 = vrot.slane %v3920_v39, 2 }
 0x44b   :  { %12957 = vst [vmem:[#allocation173_spill] sm:$0xff] %v9977_v19  ;;  %v3955_v19 = vrot.slane %v3947_v21, 2  ;;  %v2946_v14 = vsel %vm220_vm0, %v2944_v32, %v2945_v56  ;;  %v3027_v32 = vrot.slane %v3018_v29, 2 }
 0x44c   :  { %v9983_v62 = vpop.permute.xlu1 %3525  ;;  %v2953_v16 = vadd.f32 %v2946_v14, %v2931_v52  ;;  %v2984_v35 = vadd.f32 %v9094_v47, %v2954_v53  ;;  %v3025_v60 = vsel %vm306_vm1, %v3023_v25, %v3024_v51  ;;  %v12961_v25 = vld [vmem:[#allocation157_spill] sm:$0xff] }
 0x44d   :  { %3933 = vrot.lane.b32.xlu2 %v3926_v30, %s6371_s28  ;;  %3931 = vrot.lane.b32.xlu1 %v3927_v38, %s6371_s28  ;;  %v2930_v30 = vadd.f32 %v12958_v26, %v2906_v49  ;;  %v2981_v38 = vadd.f32 %v9063_v37, %v2951_v58  ;;  %v3957_v57 = vsel %vm306_vm1, %v3955_v19, %v3956_v3 }
 0x44e   :  { %v3017_v37 = vmul.f32 %v12877_v24, %v12719_v48  ;;  %v3930_v58 = vsel %vm306_vm1, %v3928_v18, %v3929_v4  ;;  %v2983_v13 = vadd.f32 %v9190_v40, %v2953_v16  ;;  %v3014_v47 = vadd.f32 %v9263_v1, %v2984_v35  ;;  %v12962_v16 = vld [vmem:[#allocation69_spill] sm:$0xff] }
 0x44f   :  { %v3011_v49 = vadd.f32 %v9222_v33, %v2981_v38  ;;  %v2952_v26 = vadd.f32 %v2942_v15, %v2930_v30  ;;  %v3949_v33 = vmul.f32 %v12955_v8, %v8380_v31  ;;  %v3950_v24 = vmul.f32 %v12955_v8, %v8419_v61 }
 0x450   :  { %v3026_v35 = vrot.slane %v3017_v37, 2  ;;  %v3013_v19 = vadd.f32 %v9113_v41, %v2983_v13  ;;  %v3036_v39 = vadd.f32 %v3027_v32, %v3014_v47 }
 0x451   :  { %v2982_v14 = vadd.f32 %v9192_v28, %v2952_v26  ;;  %3935 = vrot.lane.b32.xlu0 %v3930_v58, %s6371_s28  ;;  %v3033_v15 = vadd.f32 %v3025_v60, %v3011_v49  ;;  %v10014_v40 = vpop.permute.xlu0 %3553  ;;  %v3958_v1 = vrot.slane %v3949_v33, 2  ;;  %v3959_v30 = vrot.slane %v3950_v24, 2 }
 0x452   :  { %v10007_v56 = vpop.permute.xlu2 %3635  ;;  %v3066_v52 = vadd.f32 %v9293_v34, %v3036_v39  ;;  %v3154_v26 = vmul.f32 %v8390_v27, %v12962_v16  ;;  %v3153_v33 = vmul.f32 %v8387_v54, %v12962_v16 }
 0x453   :  { %v3012_v21 = vadd.f32 %v9220_v12, %v2982_v14  ;;  %v3063_v28 = vadd.f32 %v9261_v43, %v3033_v15  ;;  %v3028_v12 = vsel %vm306_vm1, %v3026_v35, %v3027_v32  ;;  %v3960_v29 = vsel %vm306_vm1, %v3958_v1, %v3959_v30  ;;  %v12959_v43 = vld [vmem:[#allocation74_spill] sm:$0xff]  ;;  %v12963_v15 = vld [vmem:[#allocation179_spill] sm:$0xff]  ;;  %v12964_v32 = vld [vmem:[#allocation100_spill] sm:$0xff] }
 0x454   :  { %v10012_v7 = vpop.permute.xlu1 %3555  ;;  %v3035_v18 = vadd.f32 %v3028_v12, %v3013_v19  ;;  %v3097_v41 = vmul.f32 %v8387_v54, %v12959_v43  ;;  %v3096_v34 = vadd.f32 %v9215_v6, %v3066_v52  ;;  %v3100_v6 = vmul.f32 %v8419_v61, %v12959_v43 }
 0x455   :  { %3961 = vrot.lane.b32.xlu2 %v3957_v57, %s6370_s2  ;;  %3937 = vrot.lane.b32.xlu1 %v3929_v4, %s6371_s28  ;;  %v3034_v53 = vadd.f32 %v3024_v51, %v3012_v21  ;;  %v3093_v38 = vadd.f32 %v9187_v20, %v3063_v28  ;;  %v12960_v51 = vld [vmem:[#allocation32_spill] sm:$0xff]  ;;  %v3099_v13 = vmul.f32 %v8380_v31, %v12959_v43 }
 0x456   :  { %v3065_v20 = vadd.f32 %v12960_v51, %v3035_v18  ;;  %v3098_v14 = vmul.f32 %v8390_v27, %v12959_v43  ;;  %v3987_v24 = vmul.f32 %v8664_v50, %v12963_v15  ;;  %v3104_v21 = vadd.f32 %v3100_v6, %v3096_v34  ;;  %v12966_v51 = vld [vmem:[#allocation72_spill] sm:$0xff]  ;;  %v13000_v43 = vld [vmem:[#allocation185_spill] sm:$0xff] }
 0x457   :  { %v3064_v4 = vadd.f32 %v12961_v25, %v3034_v53  ;;  %v3101_v37 = vadd.f32 %v3097_v41, %v3093_v38  ;;  %v3985_v28 = vmul.f32 %v12964_v32, %v12963_v15  ;;  %v3156_v1 = vmul.f32 %v8419_v61, %v12962_v16  ;;  %v12967_v25 = vld [vmem:[#allocation175_spill] sm:$0xff] }
 0x458   :  { %v3155_v19 = vmul.f32 %v8380_v31, %v12962_v16  ;;  %v3128_v53 = vadd.f32 %v9401_v5, %v3104_v21  ;;  %v3236_v5 = vmul.f32 %v8390_v27, %v12966_v51  ;;  %v12971_v21 = vld [vmem:[#allocation182_spill] sm:$0xff] }
 0x459   :  { %3963 = vrot.lane.b32.xlu0 %v3956_v3, %s6370_s2  ;;  %v10036_v60 = vpop.permute.xlu0 %3559  ;;  %v3095_v3 = vadd.f32 %v9326_v44, %v3065_v20  ;;  %v3094_v58 = vadd.f32 %v9328_v55, %v3064_v4  ;;  %v3125_v47 = vadd.f32 %v9355_v9, %v3101_v37  ;;  %v3162_v44 = vrot.slane %v3154_v26, 1 }
 0x45a   :  { %v3986_v55 = vmul.f32 %v8671_v36, %v12963_v15  ;;  %v3165_v20 = vrot.slane %v3156_v1, 1  ;;  %v3164_v26 = vrot.slane %v3155_v19, 1  ;;  %v3235_v37 = vmul.f32 %v8387_v54, %v12966_v51 }
 0x45b   :  { %v3149_v35 = vadd.f32 %v9399_v17, %v3125_v47  ;;  %v3103_v9 = vadd.f32 %v3099_v13, %v3095_v3  ;;  %v3102_v39 = vadd.f32 %v3098_v14, %v3094_v58  ;;  %v12965_v17 = vld [vmem:[#allocation160_spill] sm:$0xff]  ;;  %v4055_v19 = vmul.f32 %v12964_v32, %v12971_v21 }
 0x45c   :  { %v10034_v57 = vpop.permute.xlu1 %3577  ;;  %v12968_v3 = vld [vmem:[#allocation180_spill] sm:$0xff] }
 0x45d   :  { %3967 = vrot.lane.b32.xlu2 %v3959_v30, %s6370_s2  ;;  %3965 = vrot.lane.b32.xlu1 %v3960_v29, %s6370_s2  ;;  %v3161_v30 = vrot.slane %v3153_v33, 1  ;;  %v3126_v38 = vadd.f32 %v12965_v17, %v3102_v39  ;;  %v3152_v29 = vadd.f32 %v9477_v11, %v3128_v53  ;;  %v3127_v4 = vadd.f32 %v12967_v25, %v3103_v9  ;;  %v12969_v33 = vld [vmem:[#allocation116_spill] sm:$0xff]  ;;  %v12973_v39 = vld [vmem:[#allocation122_spill] sm:$0xff] }
 0x45e   :  { %v4010_v58 = vmul.f32 %v8671_v36, %v12968_v3  ;;  %v4009_v11 = vmul.f32 %v12964_v32, %v12968_v3  ;;  %v3988_v6 = vmul.f32 %v12969_v33, %v12963_v15  ;;  %v12970_v13 = vld [vmem:[#allocation172_spill] sm:$0xff]  ;;  %v3166_v9 = vsel %vm220_vm0, %v3164_v26, %v3165_v20 }
 0x45f   :  { %v10027_v49 = vpop.permute.xlu2 %3663  ;;  %v3163_v12 = vsel %vm220_vm0, %v3161_v30, %v3162_v44  ;;  %v3150_v14 = vadd.f32 %v12970_v13, %v3126_v38  ;;  %v3174_v47 = vadd.f32 %v3165_v20, %v3152_v29  ;;  %v3243_v30 = vrot.slane %v3235_v37, 2  ;;  %v12974_v29 = vld [vmem:[#allocation46_spill] sm:$0xff]  ;;  %v12977_v13 = vld [vmem:[#allocation140_spill] sm:$0xff] }
 0x460   :  { %v3171_v34 = vadd.f32 %v3163_v12, %v3149_v35  ;;  %v12972_v35 = vld [vmem:[#allocation176_spill] sm:$0xff]  ;;  %v3238_v53 = vmul.f32 %v8419_v61, %v12966_v51  ;;  %v3237_v26 = vmul.f32 %v8380_v31, %v12966_v51  ;;  %v12975_v37 = vld [vmem:[#allocation174_spill] sm:$0xff] }
 0x461   :  { %3993 = vrot.lane.b32.xlu0 %v3985_v28, %s6371_s28  ;;  %v10071_v41 = vpop.permute.xlu0 %3581  ;;  %v3244_v28 = vrot.slane %v3236_v5, 2  ;;  %v3172_v12 = vadd.f32 %v3162_v44, %v3150_v14  ;;  %v4063_v44 = vrot.slane %v4055_v19, 1  ;;  %v4057_v19 = vmul.f32 %v8664_v50, %v12971_v21 }
 0x462   :  { %v3201_v1 = vadd.f32 %v12972_v35, %v3171_v34  ;;  %v3204_v34 = vadd.f32 %v12974_v29, %v3174_v47  ;;  %v3247_v47 = vrot.slane %v3238_v53, 2  ;;  %v12978_v35 = vld [vmem:[#allocation135_spill] sm:$0xff] }
 0x463   :  { %v3245_v20 = vsel %vm306_vm1, %v3243_v30, %v3244_v28  ;;  %v12979_v30 = vld [vmem:[#allocation115_spill] sm:$0xff] }
 0x464   :  { %v10069_v18 = vpop.permute.xlu1 %3583 }
 0x465   :  { %3997 = vrot.lane.b32.xlu2 %v3987_v24, %s6371_s28  ;;  %3995 = vrot.lane.b32.xlu1 %v3986_v55, %s6371_s28  ;;  %v3151_v24 = vadd.f32 %v9479_v0, %v3127_v4  ;;  %v10088_v55 = vmul.f32 %v8671_v36, %v12971_v21  ;;  %v3231_v0 = vadd.f32 %v12973_v39, %v3201_v1 }
 0x466   :  { %v4011_v39 = vmul.f32 %v8664_v50, %v12968_v3 }
 0x467   :  { %v10064_v52 = vpop.permute.xlu2 %3713  ;;  %v3173_v38 = vadd.f32 %v3166_v9, %v3151_v24  ;;  %v4064_v4 = vrot.slane %v10088_v55, 1  ;;  %v3234_v24 = vadd.f32 %v12977_v13, %v3204_v34  ;;  %v3253_v14 = vadd.f32 %v3245_v20, %v3231_v0  ;;  %v12980_v0 = vld [vmem:[#allocation30_spill] sm:$0xff] }
 0x468   :  { %v4012_v55 = vmul.f32 %v12969_v33, %v12968_v3  ;;  %v4058_v20 = vmul.f32 %v12969_v33, %v12971_v21  ;;  %v12982_v13 = vld [vmem:[#allocation66_spill] sm:$0xff] }
 0x469   :  { %3999 = vrot.lane.b32.xlu0 %v3988_v6, %s6371_s28  ;;  %v10105_v25 = vpop.permute.xlu0 %3631  ;;  %v4065_v9 = vsel %vm220_vm0, %v4063_v44, %v4064_v4  ;;  %v3283_v29 = vadd.f32 %v12979_v30, %v3253_v14 }
 0x46b   :  { %v3313_v44 = vadd.f32 %v12982_v13, %v3283_v29  ;;  %v12986_v29 = vld [vmem:[#allocation82_spill] sm:$0xff] }
 0x46c   :  { %v10103_v5 = vpop.permute.xlu1 %3633 }
 0x46d   :  { %4019 = vrot.lane.b32.xlu2 %v4010_v58, %s6370_s2  ;;  %4017 = vrot.lane.b32.xlu1 %v4009_v11, %s6370_s2  ;;  %v3203_v58 = vadd.f32 %v12975_v37, %v3173_v38  ;;  %v12976_v11 = vld [vmem:[#allocation119_spill] sm:$0xff]  ;;  %v3246_v38 = vrot.slane %v3237_v26, 2 }
 0x46e   :  { %v3202_v6 = vadd.f32 %v12976_v11, %v3172_v12  ;;  %v3256_v12 = vadd.f32 %v3247_v47, %v3234_v24  ;;  %v4066_v24 = vrot.slane %v4057_v19, 1 }
 0x46f   :  { %v10100_v17 = vpop.permute.xlu2 %3741  ;;  %v3233_v53 = vadd.f32 %v12980_v0, %v3203_v58  ;;  %v3248_v58 = vsel %vm306_vm1, %v3246_v38, %v3247_v47  ;;  %v12987_v47 = vld [vmem:[#allocation38_spill] sm:$0xff] }
 0x470   :  { %v3232_v1 = vadd.f32 %v12978_v35, %v3202_v6  ;;  %v3286_v26 = vadd.f32 %v9776_v63, %v3256_v12  ;;  %v12983_v35 = vld [vmem:[#allocation103_spill] sm:$0xff]  ;;  %v4067_v63 = vrot.slane %v4058_v20, 1  ;;  %v4087_v38 = vmul.f32 %v8664_v50, %v12987_v47 }
 0x471   :  { %4021 = vrot.lane.b32.xlu0 %v4011_v39, %s6370_s2  ;;  %v3255_v14 = vadd.f32 %v3248_v58, %v3233_v53  ;;  %v3320_v53 = vmul.f32 %v12969_v33, %v12983_v35  ;;  %v4086_v20 = vmul.f32 %v8671_v36, %v12987_v47 }
 0x472   :  { %v3254_v37 = vadd.f32 %v3244_v28, %v3232_v1  ;;  %v12985_v1 = vld [vmem:[#allocation136_spill] sm:$0xff]  ;;  %v4068_v13 = vsel %vm220_vm0, %v4066_v24, %v4067_v63 }
 0x473   :  { %v10134_v6 = vpop.permute.xlu0 %3659  ;;  %v3316_v30 = vadd.f32 %v12985_v1, %v3286_v26  ;;  %v3285_v0 = vadd.f32 %v9778_v10, %v3255_v14  ;;  %v4096_v1 = vrot.slane %v4087_v38, 1  ;;  %v12991_v38 = vld [vmem:[#allocation40_spill] sm:$0xff] }
 0x474   :  { %v10132_v11 = vpop.permute.xlu1 %3661  ;;  %v3284_v12 = vadd.f32 %v12986_v29, %v3254_v37  ;;  %v10163_v37 = vmul.f32 %v12969_v33, %v12987_v47 }
 0x475   :  { %4069 = vrot.lane.b32.xlu2 %v4065_v9, %s6371_s28  ;;  %4023 = vrot.lane.b32.xlu1 %v4012_v55, %s6370_s2  ;;  %v3317_v9 = vmul.f32 %v12964_v32, %v12983_v35  ;;  %v12984_v55 = vld [vmem:[#allocation63_spill] sm:$0xff]  ;;  %v3315_v26 = vadd.f32 %v9817_v2, %v3285_v0  ;;  %v4085_v2 = vmul.f32 %v12964_v32, %v12987_v47 }
 0x476   :  { %v3373_v39 = vmul.f32 %v12964_v32, %v12984_v55  ;;  %v10144_v28 = vmul.f32 %v8671_v36, %v12984_v55  ;;  %v3314_v10 = vadd.f32 %v9819_v42, %v3284_v12  ;;  %v3318_v42 = vmul.f32 %v8671_v36, %v12983_v35  ;;  %v12989_v47 = vld [vmem:[#allocation47_spill] sm:$0xff] }
 0x477   :  { %v10127_v34 = vpop.permute.xlu2 %3747  ;;  %v3321_v19 = vadd.f32 %v3317_v9, %v3313_v44  ;;  %v3319_v44 = vmul.f32 %v8664_v50, %v12983_v35  ;;  %v4094_v12 = vrot.slane %v4086_v20, 1  ;;  %v4097_v3 = vrot.slane %v10163_v37, 1  ;;  %v12992_v20 = vld [vmem:[#allocation67_spill] sm:$0xff] }
 0x478   :  { %12981 = vst [vmem:[#allocation162_spill] sm:$0xff] %v10127_v34  ;;  %v3382_v14 = vrot.slane %v10144_v28, 1  ;;  %v3381_v0 = vrot.slane %v3373_v39, 1  ;;  %v3375_v28 = vmul.f32 %v8664_v50, %v12984_v55 }
 0x479   :  { %4071 = vrot.lane.b32.xlu0 %v4064_v4, %s6371_s28  ;;  %v3345_v58 = vadd.f32 %v9834_v45, %v3321_v19  ;;  %v3324_v4 = vadd.f32 %v3320_v53, %v3316_v30  ;;  %v3376_v45 = vmul.f32 %v12969_v33, %v12984_v55  ;;  %v3323_v19 = vadd.f32 %v3319_v44, %v3315_v26  ;;  %v12990_v53 = vld [vmem:[#allocation35_spill] sm:$0xff] }
 0x47a   :  { %v4093_v30 = vrot.slane %v4085_v2, 1  ;;  %v3383_v39 = vsel %vm220_vm0, %v3381_v0, %v3382_v14  ;;  %v3456_v26 = vmul.f32 %v8671_v36, %v12992_v20  ;;  %v12994_v2 = vld [vmem:[#allocation134_spill] sm:$0xff] }
 0x47b   :  { %v3369_v29 = vadd.f32 %v9842_v46, %v3345_v58  ;;  %v3348_v21 = vadd.f32 %v12989_v47, %v3324_v4  ;;  %v4098_v58 = vsel %vm220_vm0, %v4096_v1, %v4097_v3  ;;  %v3385_v44 = vrot.slane %v3376_v45, 1 }
 0x47c   :  { %v4095_v47 = vsel %vm220_vm0, %v4093_v30, %v4094_v12  ;;  %v3455_v4 = vmul.f32 %v12964_v32, %v12992_v20 }
 0x47d   :  { %4075 = vrot.lane.b32.xlu2 %v4067_v63, %s6371_s28  ;;  %4073 = vrot.lane.b32.xlu1 %v4068_v13, %s6371_s28  ;;  %v10177_v63 = vpop.permute.xlu0 %3665  ;;  %v3322_v13 = vadd.f32 %v3318_v42, %v3314_v10  ;;  %v3372_v46 = vadd.f32 %v12991_v38, %v3348_v21  ;;  %v3391_v35 = vadd.f32 %v3383_v39, %v3369_v29  ;;  %v12993_v10 = vld [vmem:[#allocation45_spill] sm:$0xff]  ;;  %v3384_v21 = vrot.slane %v3375_v28, 1  ;;  %v12996_v29 = vld [vmem:[#allocation163_spill] sm:$0xff] }
 0x47e   :  { %v4138_v37 = vmul.f32 %v8671_v36, %v12993_v10  ;;  %v3347_v42 = vadd.f32 %v12994_v2, %v3323_v19  ;;  %v4137_v0 = vmul.f32 %v12964_v32, %v12993_v10  ;;  %v3464_v38 = vrot.slane %v3456_v26, 2  ;;  %v13002_v26 = vld [vmem:[#allocation50_spill] sm:$0xff] }
 0x47f   :  { %v10168_v24 = vpop.permute.xlu2 %3777  ;;  %v10175_v9 = vpop.permute.xlu1 %3711  ;;  %v3346_v15 = vadd.f32 %v12990_v53, %v3322_v13  ;;  %v3394_v30 = vadd.f32 %v3385_v44, %v3372_v46  ;;  %v12997_v53 = vld [vmem:[#allocation126_spill] sm:$0xff]  ;;  %v3458_v28 = vmul.f32 %v12969_v33, %v12992_v20  ;;  %v3386_v55 = vsel %vm220_vm0, %v3384_v21, %v3385_v44  ;;  %v13003_v21 = vld [vmem:[#allocation133_spill] sm:$0xff] }
 0x480   :  { %12988 = vst [vmem:[#allocation166_spill] sm:$0xff] %v10168_v24  ;;  %v3371_v45 = vadd.f32 %v12997_v53, %v3347_v42  ;;  %v4146_v2 = vrot.slane %v4138_v37, 2  ;;  %v4145_v46 = vrot.slane %v4137_v0, 2  ;;  %v13001_v53 = vld [vmem:[#allocation153_spill] sm:$0xff]  ;;  %v4139_v44 = vmul.f32 %v8664_v50, %v12993_v10 }
 0x481   :  { %4099 = vrot.lane.b32.xlu0 %v4095_v47, %s6370_s2  ;;  %v3370_v13 = vadd.f32 %v12996_v29, %v3346_v15  ;;  %v3463_v47 = vrot.slane %v3455_v4, 2  ;;  %v3457_v15 = vmul.f32 %v8664_v50, %v12992_v20  ;;  %v3424_v24 = vadd.f32 %v13001_v53, %v3394_v30 }
 0x482   :  { %v3393_v42 = vadd.f32 %v3386_v55, %v3371_v45  ;;  %v4147_v4 = vsel %vm306_vm1, %v4145_v46, %v4146_v2  ;;  %v3467_v46 = vrot.slane %v3458_v28, 2  ;;  %v4169_v28 = vmul.f32 %v8664_v50, %v13002_v26 }
 0x483   :  { %v3392_v29 = vadd.f32 %v3382_v14, %v3370_v13  ;;  %v3465_v37 = vsel %vm306_vm1, %v3463_v47, %v3464_v38  ;;  %v13004_v14 = vld [vmem:[#allocation137_spill] sm:$0xff]  ;;  %v13005_v13 = vld [vmem:[#allocation188_spill] sm:$0xff] }
 0x484   :  { %v3423_v55 = vadd.f32 %v13003_v21, %v3393_v42  ;;  %v3454_v30 = vadd.f32 %v13005_v13, %v3424_v24  ;;  %v13008_v21 = vld [vmem:[#allocation187_spill] sm:$0xff]  ;;  %v13009_v13 = vld [vmem:[#allocation41_spill] sm:$0xff] }
 0x485   :  { %4103 = vrot.lane.b32.xlu2 %v4098_v58, %s6370_s2  ;;  %4101 = vrot.lane.b32.xlu1 %v4094_v12, %s6370_s2  ;;  %v10209_v19 = vpop.permute.xlu0 %3715  ;;  %v12999_v58 = vld [vmem:[#allocation165_spill] sm:$0xff]  ;;  %v3422_v0 = vadd.f32 %v13004_v14, %v3392_v29  ;;  %v3466_v14 = vrot.slane %v3457_v15, 2 }
 0x486   :  { %v3421_v12 = vadd.f32 %v12999_v58, %v3391_v35  ;;  %v4168_v35 = vmul.f32 %v8671_v36, %v13002_v26  ;;  %v13010_v36 = vld [vmem:[#allocation189_spill] sm:$0xff] }
 0x487   :  { %v10201_v1 = vpop.permute.xlu2 %3799  ;;  %v10207_v39 = vpop.permute.xlu1 %3717 }
 0x488   :  { %12995 = vst [vmem:[#allocation32_spill] sm:$0xff] %v10201_v1  ;;  %v3451_v1 = vadd.f32 %v13000_v43, %v3421_v12  ;;  %v4167_v43 = vmul.f32 %v12964_v32, %v13002_v26  ;;  %v4140_v12 = vmul.f32 %v12969_v33, %v12993_v10  ;;  %v4176_v29 = vrot.slane %v4168_v35, 2 }
 0x489   :  { %12998 = vst [vmem:[#allocation157_spill] sm:$0xff] %v10207_v39  ;;  %4105 = vrot.lane.b32.xlu0 %v4097_v3, %s6370_s2  ;;  %v3453_v3 = vadd.f32 %v13009_v13, %v3423_v55  ;;  %v3468_v35 = vsel %vm306_vm1, %v3466_v14, %v3467_v46 }
 0x48a   :  { %v3473_v45 = vadd.f32 %v3465_v37, %v3451_v1  ;;  %v3476_v1 = vadd.f32 %v3467_v46, %v3454_v30  ;;  %v4175_v37 = vrot.slane %v4167_v43, 2  ;;  %v4149_v20 = vrot.slane %v4140_v12, 2  ;;  %v13013_v43 = vld [vmem:[#allocation49_spill] sm:$0xff]  ;;  %v13015_v12 = vld [vmem:[#allocation190_spill] sm:$0xff] }
 0x48b   :  { %v13014_v30 = vld [vmem:[#allocation141_spill] sm:$0xff] }
 0x48c   :  { %v3503_v24 = vadd.f32 %v13008_v21, %v3473_v45  ;;  %v3506_v10 = vadd.f32 %v13010_v36, %v3476_v1  ;;  %v4170_v36 = vmul.f32 %v12969_v33, %v13002_v26  ;;  %v13020_v1 = vld [vmem:[#allocation64_spill] sm:$0xff]  ;;  %v13031_v33 = vld [vmem:[#allocation77_spill] sm:$0xff] }
 0x48d   :  { %4153 = vrot.lane.b32.xlu2 %v4146_v2, %s6371_s28  ;;  %4151 = vrot.lane.b32.xlu1 %v4147_v4, %s6371_s28  ;;  %v13007_v2 = vld [vmem:[#allocation184_spill] sm:$0xff]  ;;  %v10240_v42 = vpop.permute.xlu0 %3743  ;;  %v4148_v4 = vrot.slane %v4139_v44, 2  ;;  %v3475_v44 = vadd.f32 %v3468_v35, %v3453_v3  ;;  %v13019_v3 = vld [vmem:[#allocation183_spill] sm:$0xff] }
 0x48e   :  { %v3452_v47 = vadd.f32 %v13007_v2, %v3422_v0  ;;  %v4177_v0 = vsel %vm306_vm1, %v4175_v37, %v4176_v29  ;;  %v13011_v2 = vld [vmem:[#allocation56_spill] sm:$0xff]  ;;  %v10262_v45 = vadd.f32 %v13014_v30, %v3506_v10 }
 0x48f   :  { %v10233_v58 = vpop.permute.xlu2 %3849  ;;  %v10238_v53 = vpop.permute.xlu1 %3745  ;;  %v4150_v15 = vsel %vm306_vm1, %v4148_v4, %v4149_v20 }
 0x490   :  { %13006 = vst [vmem:[#allocation69_spill] sm:$0xff] %v10233_v58  ;;  %v3474_v32 = vadd.f32 %v3464_v38, %v3452_v47  ;;  %v10249_v58 = vadd.f32 %v13011_v2, %v3503_v24  ;;  %v3505_v47 = vadd.f32 %v13015_v12, %v3475_v44  ;;  %v4178_v24 = vrot.slane %v4169_v28, 2  ;;  %v13021_v2 = vld [vmem:[#allocation12_spill] sm:$0xff]  ;;  %v13022_v28 = vld [vmem:[#allocation53_spill] sm:$0xff] }
 0x491   :  { %4155 = vrot.lane.b32.xlu0 %v4150_v15, %s6371_s28  ;;  %v4205_v35 = vmul.f32 %v13022_v28, %v13021_v2  ;;  %v13025_v44 = vld [vmem:[#allocation36_spill] sm:$0xff] }
 0x492   :  { %v3504_v55 = vadd.f32 %v13013_v43, %v3474_v32  ;;  %v10272_v4 = vadd.f32 %v9983_v62, %v3505_v47  ;;  %v4179_v32 = vrot.slane %v4170_v36, 2  ;;  %v4555_v10 = vmul.f32 %v10249_v58, %v13019_v3  ;;  %v13024_v62 = vld [vmem:[#allocation48_spill] sm:$0xff] }
 0x493   :  { %v5155_v37 = vmul.f32 %v10249_v58, %v13020_v1  ;;  %v4206_v36 = vmul.f32 %v13025_v44, %v13021_v2  ;;  %v5237_v50 = vmul.f32 %v10249_v58, %v13031_v33 }
 0x494   :  { %v10275_v13 = vadd.f32 %v9985_v23, %v3504_v55  ;;  %v4207_v23 = vmul.f32 %v13024_v62, %v13021_v2  ;;  %v10295_v55 = vmul.f32 %v10262_v45, %v13019_v3  ;;  %v4563_v47 = vrot.slane %v4555_v10, 2 }
 0x495   :  { %4181 = vrot.lane.b32.xlu2 %v4177_v0, %s6370_s2  ;;  %4157 = vrot.lane.b32.xlu1 %v4149_v20, %s6371_s28  ;;  %v10267_v21 = vpop.permute.xlu0 %3773  ;;  %v13018_v20 = vld [vmem:[#allocation178_spill] sm:$0xff]  ;;  %v4180_v0 = vsel %vm306_vm1, %v4178_v24, %v4179_v32  ;;  %v13028_v24 = vld [vmem:[#allocation71_spill] sm:$0xff] }
 0x496   :  { %13017 = vst [vmem:[#allocation175_spill] sm:$0xff] %v10267_v21  ;;  %v4473_v14 = vmul.f32 %v10249_v58, %v13018_v20  ;;  %v10286_v15 = vmul.f32 %v10262_v45, %v13018_v20  ;;  %v10301_v30 = vmul.f32 %v10275_v13, %v13018_v20  ;;  %v4475_v12 = vmul.f32 %v10272_v4, %v13018_v20 }
 0x497   :  { %v10258_v38 = vpop.permute.xlu2 %3855  ;;  %v10265_v46 = vpop.permute.xlu1 %3775  ;;  %13026 = vst [vmem:[#allocation176_spill] sm:$0xff] %v10295_v55  ;;  %v10311_v26 = vmul.f32 %v10275_v13, %v13019_v3  ;;  %v10325_v21 = vmul.f32 %v10262_v45, %v13020_v1 }
 0x498   :  { %13012 = vst [vmem:[#allocation160_spill] sm:$0xff] %v10258_v38  ;;  %v4481_v43 = vrot.slane %v4473_v14, 1  ;;  %v12242_v10 = vrot.slane %v10301_v30, 1 }
 0x499   :  { %13016 = vst [vmem:[#allocation72_spill] sm:$0xff] %v10265_v46  ;;  %4183 = vrot.lane.b32.xlu0 %v4176_v29, %s6370_s2  ;;  %v4557_v29 = vmul.f32 %v10272_v4, %v13019_v3  ;;  %v10347_v3 = vmul.f32 %v10275_v13, %v13020_v1  ;;  %v13041_v39 = vrot.slane %v10311_v26, 2 }
 0x49a   :  { %13023 = vst [vmem:[#allocation172_spill] sm:$0xff] %v10286_v15  ;;  %v10338_v34 = vsel %vm220_vm0, %v4481_v43, %v12242_v10  ;;  %v5245_v10 = vrot.slane %v5237_v50, 2  ;;  %v10369_v50 = vmul.f32 %v10275_v13, %v13028_v24 }
 0x49b   :  { %13027 = vst [vmem:[#allocation122_spill] sm:$0xff] %v10301_v30  ;;  %v4566_v46 = vrot.slane %v4557_v29, 2  ;;  %v10352_v27 = vsel %vm306_vm1, %v4563_v47, %v13041_v39  ;;  %v5157_v30 = vmul.f32 %v10272_v4, %v13020_v1  ;;  %v12245_v29 = vrot.slane %v10347_v3, 1 }
 0x49c   :  { %13030 = vst [vmem:[#allocation174_spill] sm:$0xff] %v10311_v26  ;;  %v5187_v26 = vmul.f32 %v10272_v4, %v13028_v24 }
 0x49d   :  { %4187 = vrot.lane.b32.xlu2 %v4179_v32, %s6370_s2  ;;  %4185 = vrot.lane.b32.xlu1 %v4180_v0, %s6370_s2  ;;  %v5185_v32 = vmul.f32 %v10249_v58, %v13028_v24  ;;  %v5163_v0 = vrot.slane %v5155_v37, 1  ;;  %v10319_v20 = vpop.permute.xlu0 %3779  ;;  %13034 = vst [vmem:[#allocation135_spill] sm:$0xff] %v10325_v21  ;;  %v10331_v37 = vmul.f32 %v10262_v45, %v13028_v24  ;;  %v5166_v39 = vrot.slane %v5157_v30, 1 }
 0x49e   :  { %13033 = vst [vmem:[#allocation140_spill] sm:$0xff] %v10319_v20  ;;  %v10388_v30 = vmul.f32 %v10262_v45, %v13031_v33 }
 0x49f   :  { %v10307_v14 = vpop.permute.xlu2 %3883  ;;  %v10317_v38 = vpop.permute.xlu1 %3797  ;;  %13035 = vst [vmem:[#allocation115_spill] sm:$0xff] %v10331_v37  ;;  %v5193_v43 = vrot.slane %v5185_v32, 1  ;;  %v12249_v47 = vrot.slane %v10331_v37, 1  ;;  %v10380_v1 = vsel %vm220_vm0, %v5163_v0, %v12245_v29 }
 0x4a0   :  { %13029 = vst [vmem:[#allocation46_spill] sm:$0xff] %v10307_v14  ;;  %v4484_v14 = vrot.slane %v4475_v12, 1  ;;  %v13038_v12 = vrot.slane %v10286_v15, 1  ;;  %v13043_v15 = vrot.slane %v10295_v55, 2 }
 0x4a1   :  { %13032 = vst [vmem:[#allocation119_spill] sm:$0xff] %v10317_v38  ;;  %v13036_v38 = vld [vmem:[#allocation79_spill] sm:$0xff]  ;;  %4213 = vrot.lane.b32.xlu0 %v4205_v35, %s6371_s28 }
 0x4a2   :  { %v5267_v20 = vmul.f32 %v10249_v58, %v13036_v38  ;;  %13037 = vst [vmem:[#allocation30_spill] sm:$0xff] %v10338_v34  ;;  %v10343_v61 = vsel %vm220_vm0, %v4484_v14, %v13038_v12  ;;  %v10359_v14 = vsel %vm306_vm1, %v4566_v46, %v13043_v15  ;;  %v12248_v12 = vrot.slane %v10325_v21, 1 }
 0x4a3   :  { %13039 = vst [vmem:[#allocation66_spill] sm:$0xff] %v10343_v61  ;;  %v10373_v46 = vmul.f32 %v10275_v13, %v13031_v33  ;;  %v5196_v15 = vrot.slane %v5187_v26, 1  ;;  %v5239_v26 = vmul.f32 %v10272_v4, %v13031_v33 }
 0x4a4   :  { %13040 = vst [vmem:[#allocation136_spill] sm:$0xff] %v10347_v3  ;;  %v10395_v35 = vsel %vm220_vm0, %v5166_v39, %v12248_v12  ;;  %v5275_v21 = vrot.slane %v5267_v20, 2  ;;  %v10413_v12 = vmul.f32 %v10262_v45, %v13036_v38 }
 0x4a5   :  { %13042 = vst [vmem:[#allocation82_spill] sm:$0xff] %v10352_v27  ;;  %4217 = vrot.lane.b32.xlu2 %v4207_v23, %s6371_s28  ;;  %4215 = vrot.lane.b32.xlu1 %v4206_v36, %s6371_s28  ;;  %v10384_v23 = vmul.f32 %v10275_v13, %v13036_v38  ;;  %v12251_v36 = vrot.slane %v10369_v50, 1  ;;  %v12253_v32 = vrot.slane %v10373_v46, 2  ;;  %v10403_v29 = vpop.permute.xlu0 %3801  ;;  %v10408_v3 = vsel %vm220_vm0, %v5196_v15, %v12249_v47 }
 0x4a6   :  { %13044 = vst [vmem:[#allocation47_spill] sm:$0xff] %v10359_v14  ;;  %v5133_v15 = vmul.f32 %v10249_v58, %v12962_v16  ;;  %v12257_v47 = vrot.slane %v10388_v30, 2  ;;  %v5248_v37 = vrot.slane %v5239_v26, 2 }
 0x4a7   :  { %13045 = vst [vmem:[#allocation35_spill] sm:$0xff] %v10369_v50  ;;  %v10390_v24 = vpop.permute.xlu2 %3933  ;;  %v10401_v0 = vpop.permute.xlu1 %3803  ;;  %v12255_v39 = vrot.slane %v10384_v23, 2  ;;  %v10418_v33 = vsel %vm220_vm0, %v5193_v43, %v12251_v36  ;;  %v5269_v43 = vmul.f32 %v10272_v4, %v13036_v38  ;;  %v13057_v36 = vld [vmem:[#allocation11_spill] sm:$0xff]  ;;  %v12258_v38 = vrot.slane %v10413_v12, 2 }
 0x4a8   :  { %13046 = vst [vmem:[#allocation40_spill] sm:$0xff] %v10373_v46  ;;  %v4230_v46 = vmul.f32 %v13025_v44, %v13057_v36  ;;  %v10460_v50 = vmul.f32 %v10262_v45, %v12962_v16 }
 0x4a9   :  { %13047 = vst [vmem:[#allocation134_spill] sm:$0xff] %v10380_v1  ;;  %v10430_v20 = vsel %vm306_vm1, %v5275_v21, %v12255_v39  ;;  %v10448_v21 = vsel %vm306_vm1, %v5248_v37, %v12257_v47  ;;  %v5278_v26 = vrot.slane %v5269_v43, 2  ;;  %v10453_v39 = vmul.f32 %v10275_v13, %v12962_v16 }
 0x4aa   :  { %13048 = vst [vmem:[#allocation163_spill] sm:$0xff] %v10384_v23  ;;  %v5135_v37 = vmul.f32 %v10272_v4, %v12962_v16  ;;  %v5215_v47 = vmul.f32 %v10249_v58, %v12966_v51 }
 0x4ab   :  { %13049 = vst [vmem:[#allocation126_spill] sm:$0xff] %v10388_v30  ;;  %v10469_v43 = vsel %vm306_vm1, %v5278_v26, %v12258_v38  ;;  %v5217_v26 = vmul.f32 %v10272_v4, %v12966_v51 }
 0x4ac   :  { %13050 = vst [vmem:[#allocation165_spill] sm:$0xff] %v10390_v24  ;;  %v5223_v16 = vrot.slane %v5215_v47, 2  ;;  %v4231_v47 = vmul.f32 %v13024_v62, %v13057_v36 }
 0x4ad   :  { %13051 = vst [vmem:[#allocation185_spill] sm:$0xff] %v10395_v35  ;;  %v10423_v35 = vsel %vm306_vm1, %v5245_v10, %v12253_v32  ;;  %v4229_v10 = vmul.f32 %v13022_v28, %v13057_v36  ;;  %v13058_v32 = vld [vmem:[#allocation181_spill] sm:$0xff]  ;;  %4239 = vrot.lane.b32.xlu2 %v4230_v46, %s6370_s2  ;;  %v10489_v46 = vpop.permute.xlu0 %3851 }
 0x4ae   :  { %13052 = vst [vmem:[#allocation153_spill] sm:$0xff] %v10408_v3  ;;  %v13069_v3 = vrot.slane %v10460_v50, 1 }
 0x4af   :  { %13053 = vst [vmem:[#allocation133_spill] sm:$0xff] %v10413_v12  ;;  %4237 = vrot.lane.b32.xlu1 %v4229_v10, %s6370_s2  ;;  %v5144_v10 = vrot.slane %v5135_v37, 1  ;;  %v10487_v38 = vpop.permute.xlu1 %3853  ;;  %v13067_v12 = vrot.slane %v10453_v39, 1 }
 0x4b0   :  { %13054 = vst [vmem:[#allocation137_spill] sm:$0xff] %v10418_v33  ;;  %v13059_v33 = vld [vmem:[#allocation13_spill] sm:$0xff] }
 0x4b1   :  { %13055 = vst [vmem:[#allocation188_spill] sm:$0xff] %v10423_v35  ;;  %v4208_v35 = vmul.f32 %v13058_v32, %v13021_v2  ;;  %v10443_v23 = vmul.f32 %v13025_v44, %v13059_v33  ;;  %v4275_v2 = vmul.f32 %v13022_v28, %v13059_v33  ;;  %v10501_v1 = vsel %vm220_vm0, %v5144_v10, %v13069_v3  ;;  %v13072_v3 = vld [vmem:[#allocation14_spill] sm:$0xff] }
 0x4b2   :  { %13056 = vst [vmem:[#allocation184_spill] sm:$0xff] %v10430_v20  ;;  %v5141_v20 = vrot.slane %v5133_v15, 1  ;;  %v10474_v15 = vmul.f32 %v10275_v13, %v12966_v51 }
 0x4b3   :  { %13060 = vst [vmem:[#allocation187_spill] sm:$0xff] %v10448_v21  ;;  %4219 = vrot.lane.b32.xlu0 %v4208_v35, %s6371_s28  ;;  %v10478_v21 = vpop.permute.xlu2 %3961  ;;  %v10483_v35 = vmul.f32 %v10262_v45, %v12966_v51  ;;  %v4283_v51 = vrot.slane %v4275_v2, 1  ;;  %v10517_v2 = vmul.f32 %v13022_v28, %v13072_v3 }
 0x4b4   :  { %13061 = vst [vmem:[#allocation41_spill] sm:$0xff] %v10453_v39  ;;  %v10495_v30 = vsel %vm220_vm0, %v5141_v20, %v13067_v12  ;;  %v12263_v37 = vrot.slane %v10474_v15, 2  ;;  %v5226_v39 = vrot.slane %v5217_v26, 2  ;;  %v4232_v12 = vmul.f32 %v13058_v32, %v13057_v36  ;;  %v13074_v26 = vld [vmem:[#allocation154_spill] sm:$0xff] }
 0x4b5   :  { %13062 = vst [vmem:[#allocation189_spill] sm:$0xff] %v10460_v50  ;;  %v4278_v20 = vmul.f32 %v13058_v32, %v13059_v33  ;;  %v10529_v36 = vmul.f32 %v10275_v13, %v13074_v26 }
 0x4b6   :  { %13063 = vst [vmem:[#allocation56_spill] sm:$0xff] %v10469_v43  ;;  %v4284_v43 = vrot.slane %v10443_v23, 1  ;;  %v10506_v55 = vsel %vm306_vm1, %v5223_v16, %v12263_v37  ;;  %v12264_v23 = vrot.slane %v10483_v35, 2  ;;  %v5815_v37 = vmul.f32 %v10249_v58, %v13074_v26 }
 0x4b7   :  { %13064 = vst [vmem:[#allocation49_spill] sm:$0xff] %v10474_v15  ;;  %4243 = vrot.lane.b32.xlu1 %v4232_v12, %s6370_s2  ;;  %v13077_v15 = vld [vmem:[#allocation161_spill] sm:$0xff]  ;;  %v4287_v61 = vrot.slane %v4278_v20, 1  ;;  %v5927_v20 = vmul.f32 %v10249_v58, %v12955_v8 }
 0x4b8   :  { %13065 = vst [vmem:[#allocation141_spill] sm:$0xff] %v10478_v21  ;;  %v4285_v10 = vsel %vm220_vm0, %v4283_v51, %v4284_v43  ;;  %v10523_v16 = vsel %vm306_vm1, %v5226_v39, %v12264_v23  ;;  %v10536_v51 = vmul.f32 %v13058_v32, %v13072_v3  ;;  %v10540_v39 = vmul.f32 %v10262_v45, %v13074_v26 }
 0x4b9   :  { %13066 = vst [vmem:[#allocation190_spill] sm:$0xff] %v10483_v35  ;;  %4289 = vrot.lane.b32.xlu2 %v4285_v10, %s6371_s28  ;;  %v5817_v23 = vmul.f32 %v10272_v4, %v13074_v26  ;;  %v5823_v35 = vrot.slane %v5815_v37, 1  ;;  %v12268_v10 = vrot.slane %v10529_v36, 1  ;;  %v10558_v12 = vmul.f32 %v10275_v13, %v13077_v15  ;;  %v10564_v26 = vpop.permute.xlu0 %3879 }
 0x4ba   :  { %13068 = vst [vmem:[#allocation178_spill] sm:$0xff] %v10495_v30  ;;  %v5845_v37 = vmul.f32 %v10249_v58, %v13077_v15 }
 0x4bb   :  { %13070 = vst [vmem:[#allocation183_spill] sm:$0xff] %v10501_v1  ;;  %4241 = vrot.lane.b32.xlu0 %v4231_v47, %s6370_s2  ;;  %v10553_v1 = vpop.permute.xlu2 %3967  ;;  %v5826_v30 = vrot.slane %v5817_v23, 1  ;;  %v10562_v47 = vpop.permute.xlu1 %3881  ;;  %v10569_v27 = vsel %vm220_vm0, %v5823_v35, %v12268_v10  ;;  %v10574_v23 = vmul.f32 %v10275_v13, %v12951_v59  ;;  %v12273_v21 = vrot.slane %v10558_v12, 1 }
 0x4bc   :  { %13071 = vst [vmem:[#allocation64_spill] sm:$0xff] %v10506_v55  ;;  %v4277_v55 = vmul.f32 %v13024_v62, %v13059_v33  ;;  %v5847_v33 = vmul.f32 %v10272_v4, %v13077_v15 }
 0x4bd   :  { %13073 = vst [vmem:[#allocation12_spill] sm:$0xff] %v10523_v16  ;;  %v10551_v16 = vmul.f32 %v10262_v45, %v13077_v15  ;;  %v13085_v15 = vrot.slane %v10540_v39, 1 }
 0x4be   :  { %13075 = vst [vmem:[#allocation48_spill] sm:$0xff] %v10529_v36  ;;  %v5856_v14 = vrot.slane %v5847_v33, 1  ;;  %v4286_v34 = vrot.slane %v4277_v55, 1  ;;  %v5853_v33 = vrot.slane %v5845_v37, 1  ;;  %v5897_v36 = vmul.f32 %v10249_v58, %v12951_v59 }
 0x4bf   :  { %13076 = vst [vmem:[#allocation71_spill] sm:$0xff] %v10540_v39  ;;  %v12270_v50 = vrot.slane %v10551_v16, 1  ;;  %v4307_v55 = vmul.f32 %v13024_v62, %v13072_v3 }
 0x4c0   :  { %13078 = vst [vmem:[#allocation77_spill] sm:$0xff] %v10551_v16  ;;  %v5905_v37 = vrot.slane %v5897_v36, 2  ;;  %v4288_v10 = vsel %vm220_vm0, %v4286_v34, %v4287_v61  ;;  %v5935_v16 = vrot.slane %v5927_v20, 2  ;;  %v13092_v36 = vrot.slane %v10574_v23, 2 }
 0x4c1   :  { %13079 = vst [vmem:[#allocation79_spill] sm:$0xff] %v10553_v1  ;;  %v10579_v1 = vsel %vm220_vm0, %v5826_v30, %v13085_v15  ;;  %v10585_v35 = vsel %vm220_vm0, %v5856_v14, %v12270_v50  ;;  %v4306_v30 = vmul.f32 %v13025_v44, %v13072_v3  ;;  %v10598_v15 = vmul.f32 %v10275_v13, %v12955_v8 }
 0x4c2   :  { %13080 = vst [vmem:[#allocation11_spill] sm:$0xff] %v10558_v12  ;;  %v10603_v14 = vsel %vm220_vm0, %v5853_v33, %v12273_v21  ;;  %v10607_v50 = vmul.f32 %v10262_v45, %v12951_v59  ;;  %v5899_v3 = vmul.f32 %v10272_v4, %v12951_v59  ;;  %4295 = vrot.lane.b32.xlu2 %v4287_v61, %s6371_s28  ;;  %v4316_v20 = vrot.slane %v4307_v55, 1 }
 0x4c3   :  { %13081 = vst [vmem:[#allocation181_spill] sm:$0xff] %v10562_v47  ;;  %v10616_v12 = vmul.f32 %v10262_v45, %v12955_v8  ;;  %4293 = vrot.lane.b32.xlu1 %v4288_v10, %s6371_s28  ;;  %4291 = vrot.lane.b32.xlu0 %v4284_v43, %s6371_s28  ;;  %v10623_v33 = vsel %vm306_vm1, %v5905_v37, %v13092_v36  ;;  %v10628_v34 = vpop.permute.xlu2 %3997  ;;  %v10635_v43 = vpop.permute.xlu1 %3931  ;;  %v13099_v36 = vld [vmem:[#allocation111_spill] sm:$0xff] }
 0x4c4   :  { %13082 = vst [vmem:[#allocation13_spill] sm:$0xff] %v10564_v26  ;;  %v12278_v59 = vrot.slane %v10607_v50, 2  ;;  %v5908_v21 = vrot.slane %v5899_v3, 2  ;;  %v5929_v61 = vmul.f32 %v10272_v4, %v12955_v8  ;;  %v5793_v55 = vmul.f32 %v10249_v58, %v13099_v36 }
 0x4c5   :  { %13083 = vst [vmem:[#allocation14_spill] sm:$0xff] %v10569_v27  ;;  %v12280_v3 = vrot.slane %v10616_v12, 2 }
 0x4c6   :  { %13084 = vst [vmem:[#allocation154_spill] sm:$0xff] %v10574_v23  ;;  %v10637_v23 = vpop.permute.xlu0 %3885  ;;  %v10642_v37 = vsel %vm306_vm1, %v5908_v21, %v12278_v59  ;;  %v5938_v8 = vrot.slane %v5929_v61, 2  ;;  %v10662_v61 = vmul.f32 %v10262_v45, %v13099_v36 }
 0x4c7   :  { %13086 = vst [vmem:[#allocation161_spill] sm:$0xff] %v10579_v1 }
 0x4c8   :  { %13087 = vst [vmem:[#allocation191_spill] sm:$0xff] %v10585_v35  ;;  %v12276_v35 = vrot.slane %v10598_v15, 2  ;;  %v10658_v21 = vsel %vm306_vm1, %v5938_v8, %v12280_v3 }
 0x4c9   :  { %13088 = vst [vmem:[#allocation192_spill] sm:$0xff] %v10598_v15  ;;  %v4317_v15 = vrot.slane %v10536_v51, 1  ;;  %v5795_v51 = vmul.f32 %v10272_v4, %v13099_v36 }
 0x4ca   :  { %13089 = vst [vmem:[#allocation193_spill] sm:$0xff] %v10603_v14  ;;  %v10633_v10 = vsel %vm306_vm1, %v5935_v16, %v12276_v35  ;;  %v4313_v16 = vrot.slane %v10517_v2, 1  ;;  %v10651_v35 = vmul.f32 %v10275_v13, %v13099_v36 }
 0x4cb   :  { %13090 = vst [vmem:[#allocation194_spill] sm:$0xff] %v10607_v50  ;;  %v4318_v2 = vsel %vm220_vm0, %v4316_v20, %v4317_v15  ;;  %v5804_v8 = vrot.slane %v5795_v51, 1  ;;  %v10696_v39 = vpop.permute.xlu2 %4019 }
 0x4cc   :  { %13091 = vst [vmem:[#allocation195_spill] sm:$0xff] %v10616_v12  ;;  %v12282_v59 = vrot.slane %v10651_v35, 1  ;;  %v12284_v12 = vrot.slane %v10662_v61, 1  ;;  %4323 = vrot.lane.b32.xlu2 %v4318_v2, %s6370_s2 }
 0x4cd   :  { %13093 = vst [vmem:[#allocation196_spill] sm:$0xff] %v10623_v33  ;;  %v4314_v33 = vrot.slane %v4306_v30, 1  ;;  %v5801_v30 = vrot.slane %v5793_v55, 1 }
 0x4ce   :  { %13094 = vst [vmem:[#allocation197_spill] sm:$0xff] %v10628_v34  ;;  %v10694_v2 = vsel %vm220_vm0, %v5804_v8, %v12284_v12  ;;  %v13115_v12 = vld [vmem:[#allocation65_spill] sm:$0xff]  ;;  %v13118_v34 = vld [vmem:[#allocation16_spill] sm:$0xff] }
 0x4cf   :  { %13095 = vst [vmem:[#allocation198_spill] sm:$0xff] %v10633_v10  ;;  %v13101_v10 = vld [vmem:[#allocation15_spill] sm:$0xff]  ;;  %v4315_v20 = vsel %vm220_vm0, %v4313_v16, %v4314_v33  ;;  %v10684_v55 = vsel %vm220_vm0, %v5801_v30, %v12282_v59  ;;  %4321 = vrot.lane.b32.xlu1 %v4314_v33, %s6370_s2 }
 0x4d0   :  { %13096 = vst [vmem:[#allocation199_spill] sm:$0xff] %v10635_v43  ;;  %v4358_v50 = vmul.f32 %v13025_v44, %v13101_v10  ;;  %4319 = vrot.lane.b32.xlu0 %v4315_v20, %s6370_s2  ;;  %v4357_v30 = vmul.f32 %v13022_v28, %v13101_v10  ;;  %v13124_v43 = vld [vmem:[#allocation186_spill] sm:$0xff] }
 0x4d1   :  { %13097 = vst [vmem:[#allocation200_spill] sm:$0xff] %v10637_v23 }
 0x4d2   :  { %13098 = vst [vmem:[#allocation201_spill] sm:$0xff] %v10642_v37  ;;  %v13104_v37 = vld [vmem:[#allocation93_spill] sm:$0xff]  ;;  %v4366_v8 = vrot.slane %v4358_v50, 2  ;;  %v4365_v27 = vrot.slane %v4357_v30, 2 }
 0x4d3   :  { %13100 = vst [vmem:[#allocation111_spill] sm:$0xff] %v10651_v35  ;;  %v10670_v14 = vmul.f32 %v10275_v13, %v13104_v37  ;;  %v5875_v3 = vmul.f32 %v10249_v58, %v13104_v37  ;;  %v5877_v51 = vmul.f32 %v10272_v4, %v13104_v37  ;;  %v10703_v35 = vpop.permute.xlu0 %3935 }
 0x4d4   :  { %13102 = vst [vmem:[#allocation15_spill] sm:$0xff] %v10658_v21  ;;  %v10677_v21 = vmul.f32 %v10262_v45, %v13104_v37  ;;  %4373 = vrot.lane.b32.xlu2 %v4366_v8, %s6371_s28  ;;  %v4367_v50 = vsel %vm306_vm1, %v4365_v27, %v4366_v8  ;;  %v4360_v27 = vmul.f32 %v13058_v32, %v13101_v10 }
 0x4d5   :  { %13103 = vst [vmem:[#allocation202_spill] sm:$0xff] %v10662_v61  ;;  %v5883_v16 = vrot.slane %v5875_v3, 2  ;;  %v5886_v1 = vrot.slane %v5877_v51, 2  ;;  %v13112_v33 = vrot.slane %v10670_v14, 2  ;;  %v13117_v51 = vld [vmem:[#allocation87_spill] sm:$0xff] }
 0x4d6   :  { %13105 = vst [vmem:[#allocation93_spill] sm:$0xff] %v10670_v14  ;;  %v12286_v59 = vrot.slane %v10677_v21, 2  ;;  %v10736_v14 = vpop.permute.xlu2 %4069 }
 0x4d7   :  { %13106 = vst [vmem:[#allocation203_spill] sm:$0xff] %v10677_v21  ;;  %v10708_v20 = vsel %vm306_vm1, %v5883_v16, %v13112_v33  ;;  %v13119_v33 = vld [vmem:[#allocation99_spill] sm:$0xff]  ;;  %4371 = vrot.lane.b32.xlu1 %v4367_v50, %s6371_s28 }
 0x4d8   :  { %13107 = vst [vmem:[#allocation204_spill] sm:$0xff] %v10684_v55  ;;  %v10701_v55 = vpop.permute.xlu1 %3937  ;;  %v10713_v3 = vsel %vm306_vm1, %v5886_v1, %v12286_v59  ;;  %v4359_v1 = vmul.f32 %v13024_v62, %v13101_v10  ;;  %v3594_v30 = vmul.f32 %v13119_v33, %v13117_v51  ;;  %4325 = vrot.lane.b32.xlu0 %v4317_v15, %s6370_s2  ;;  %v13120_v21 = vld [vmem:[#allocation95_spill] sm:$0xff] }
 0x4d9   :  { %13108 = vst [vmem:[#allocation205_spill] sm:$0xff] %v10694_v2  ;;  %v13116_v2 = vld [vmem:[#allocation75_spill] sm:$0xff]  ;;  %v4387_v59 = vmul.f32 %v13022_v28, %v13118_v34  ;;  %v3595_v50 = vmul.f32 %v13119_v33, %v12719_v48  ;;  %v3596_v23 = vmul.f32 %v13119_v33, %v12726_v22 }
 0x4da   :  { %13109 = vst [vmem:[#allocation206_spill] sm:$0xff] %v10696_v39  ;;  %v3537_v61 = vmul.f32 %v13116_v2, %v13115_v12  ;;  %v3538_v39 = vmul.f32 %v13116_v2, %v13117_v51  ;;  %v3539_v16 = vmul.f32 %v13116_v2, %v12719_v48  ;;  %v4368_v24 = vrot.slane %v4359_v1, 2 }
 0x4db   :  { %13110 = vst [vmem:[#allocation207_spill] sm:$0xff] %v10701_v55  ;;  %v10721_v55 = vmul.f32 %v13025_v44, %v13118_v34  ;;  %v10747_v15 = vpop.permute.xlu0 %3963 }
 0x4dc   :  { %13111 = vst [vmem:[#allocation208_spill] sm:$0xff] %v10703_v35  ;;  %v3542_v8 = vadd.f32 %v3538_v39, %v13120_v21  ;;  %v3602_v39 = vrot.slane %v3594_v30, 1  ;;  %v4395_v35 = vrot.slane %v4387_v59, 2  ;;  %v4389_v59 = vmul.f32 %v13024_v62, %v13118_v34 }
 0x4dd   :  { %13113 = vst [vmem:[#allocation209_spill] sm:$0xff] %v10708_v20  ;;  %v3541_v20 = vadd.f32 %v3537_v61, %v13120_v21  ;;  %v4396_v28 = vrot.slane %v10721_v55, 2  ;;  %v3543_v61 = vadd.f32 %v3539_v16, %v13120_v21  ;;  %v4369_v55 = vrot.slane %v4360_v27, 2 }
 0x4de   :  { %13114 = vst [vmem:[#allocation210_spill] sm:$0xff] %v10713_v3  ;;  %v3593_v3 = vmul.f32 %v13119_v33, %v13115_v12  ;;  %v3566_v10 = vadd.f32 %v10012_v7, %v3542_v8  ;;  %v3604_v16 = vrot.slane %v3595_v50, 1  ;;  %v13126_v33 = vld [vmem:[#allocation84_spill] sm:$0xff] }
 0x4df   :  { %13121 = vst [vmem:[#allocation65_spill] sm:$0xff] %v10736_v14  ;;  %v3565_v14 = vadd.f32 %v10014_v40, %v3541_v20  ;;  %v3567_v26 = vadd.f32 %v13124_v43, %v3543_v61  ;;  %v4397_v40 = vsel %vm306_vm1, %v4395_v35, %v4396_v28  ;;  %v4370_v7 = vsel %vm306_vm1, %v4368_v24, %v4369_v55  ;;  %v13125_v43 = vld [vmem:[#allocation170_spill] sm:$0xff] }
 0x4e0   :  { %v10745_v44 = vpop.permute.xlu1 %3965  ;;  %13123 = vst [vmem:[#allocation87_spill] sm:$0xff] %v10747_v15  ;;  %v3540_v15 = vmul.f32 %v13116_v2, %v12726_v22  ;;  %v3601_v47 = vrot.slane %v3593_v3, 1  ;;  %4401 = vrot.lane.b32.xlu2 %v4397_v40, %s6370_s2  ;;  %v3590_v1 = vadd.f32 %v13125_v43, %v3566_v10  ;;  %4377 = vrot.lane.b32.xlu1 %v4369_v55, %s6371_s28 }
 0x4e1   :  { %13122 = vst [vmem:[#allocation75_spill] sm:$0xff] %v10745_v44  ;;  %v3589_v44 = vadd.f32 %v10034_v57, %v3565_v14  ;;  %v3591_v20 = vadd.f32 %v10071_v41, %v3567_v26  ;;  %v3605_v14 = vrot.slane %v3596_v23, 1  ;;  %4375 = vrot.lane.b32.xlu0 %v4370_v7, %s6371_s28  ;;  %v10770_v41 = vpop.permute.xlu2 %4075  ;;  %v4390_v24 = vmul.f32 %v13058_v32, %v13118_v34 }
 0x4e2   :  { %v3603_v57 = vsel %vm220_vm0, %v3601_v47, %v3602_v39  ;;  %v3544_v35 = vadd.f32 %v3540_v15, %v13120_v21  ;;  %v3676_v30 = vmul.f32 %v13126_v33, %v13117_v51  ;;  %v3612_v50 = vadd.f32 %v3602_v39, %v3590_v1  ;;  %v13127_v51 = vld [vmem:[#allocation173_spill] sm:$0xff] }
 0x4e3   :  { %v3611_v3 = vadd.f32 %v3603_v57, %v3589_v44  ;;  %v3606_v26 = vsel %vm220_vm0, %v3604_v16, %v3605_v14  ;;  %v10779_v47 = vpop.permute.xlu0 %3993  ;;  %v4398_v44 = vrot.slane %v4389_v59, 2  ;;  %v3675_v15 = vmul.f32 %v13126_v33, %v13115_v12 }
 0x4e4   :  { %v3568_v23 = vadd.f32 %v10036_v60, %v3544_v35  ;;  %v3613_v8 = vadd.f32 %v3606_v26, %v3591_v20  ;;  %v3677_v34 = vmul.f32 %v13126_v33, %v12719_v48  ;;  %v4399_v16 = vrot.slane %v4390_v24, 2  ;;  %v13128_v24 = vld [vmem:[#allocation17_spill] sm:$0xff] }
 0x4e5   :  { %v3641_v55 = vadd.f32 %v13127_v51, %v3611_v3  ;;  %v3642_v40 = vadd.f32 %v10105_v25, %v3612_v50  ;;  %v3684_v7 = vrot.slane %v3676_v30, 2  ;;  %v3678_v60 = vmul.f32 %v13126_v33, %v12726_v22  ;;  %v13131_v51 = vld [vmem:[#allocation157_spill] sm:$0xff] }
 0x4e6   :  { %v3592_v61 = vadd.f32 %v10069_v18, %v3568_v23  ;;  %v3643_v10 = vadd.f32 %v10103_v5, %v3613_v8  ;;  %v4400_v12 = vsel %vm306_vm1, %v4398_v44, %v4399_v16  ;;  %v3683_v18 = vrot.slane %v3675_v15, 2 }
 0x4e7   :  { %v3671_v39 = vadd.f32 %v10134_v6, %v3641_v55  ;;  %v3672_v48 = vadd.f32 %v10132_v11, %v3642_v40  ;;  %v3686_v20 = vrot.slane %v3677_v34, 2  ;;  %v3687_v6 = vrot.slane %v3678_v60, 2  ;;  %v13129_v34 = vld [vmem:[#allocation106_spill] sm:$0xff] }
 0x4e8   :  { %v10777_v27 = vpop.permute.xlu1 %3995  ;;  %4407 = vrot.lane.b32.xlu2 %v4399_v16, %s6370_s2  ;;  %4405 = vrot.lane.b32.xlu1 %v4400_v12, %s6370_s2  ;;  %v3614_v5 = vadd.f32 %v3605_v14, %v3592_v61  ;;  %v3673_v25 = vadd.f32 %v10027_v49, %v3643_v10  ;;  %v3685_v22 = vsel %vm306_vm1, %v3683_v18, %v3684_v7  ;;  %v13130_v10 = vld [vmem:[#allocation105_spill] sm:$0xff]  ;;  %v13133_v18 = vld [vmem:[#allocation19_spill] sm:$0xff] }
 0x4e9   :  { %4403 = vrot.lane.b32.xlu0 %v4396_v28, %s6370_s2  ;;  %v10799_v59 = vpop.permute.xlu2 %4103  ;;  %v3693_v57 = vadd.f32 %v3685_v22, %v3671_v39  ;;  %v3694_v11 = vadd.f32 %v3684_v7, %v3672_v48  ;;  %v3688_v3 = vsel %vm306_vm1, %v3686_v20, %v3687_v6  ;;  %v4427_v49 = vmul.f32 %v10272_v4, %v13128_v24  ;;  %v13132_v7 = vld [vmem:[#allocation18_spill] sm:$0xff] }
 0x4ea   :  { %v3644_v28 = vadd.f32 %v10007_v56, %v3614_v5  ;;  %v3695_v14 = vadd.f32 %v3688_v3, %v3673_v25  ;;  %v4426_v26 = vmul.f32 %v10275_v13, %v13128_v24  ;;  %v4425_v33 = vmul.f32 %v10249_v58, %v13128_v24  ;;  %v13134_v25 = vld [vmem:[#allocation70_spill] sm:$0xff] }
 0x4eb   :  { %v10804_v1 = vpop.permute.xlu0 %3999  ;;  %v3723_v35 = vadd.f32 %v10175_v9, %v3693_v57  ;;  %v3724_v9 = vadd.f32 %v10064_v52, %v3694_v11  ;;  %v3759_v52 = vmul.f32 %v13129_v34, %v8380_v31  ;;  %v3757_v61 = vmul.f32 %v13129_v34, %v8387_v54  ;;  %v13136_v11 = vld [vmem:[#allocation175_spill] sm:$0xff] }
 0x4ec   :  { %v3674_v30 = vadd.f32 %v10177_v63, %v3644_v28  ;;  %v3725_v23 = vadd.f32 %v10209_v19, %v3695_v14  ;;  %v4450_v60 = vmul.f32 %v10275_v13, %v13132_v7  ;;  %v4449_v12 = vmul.f32 %v10249_v58, %v13132_v7  ;;  %v13137_v28 = vld [vmem:[#allocation162_spill] sm:$0xff] }
 0x4ed   :  { %v3753_v56 = vadd.f32 %v10100_v17, %v3723_v35  ;;  %v3754_v50 = vadd.f32 %v10240_v42, %v3724_v9  ;;  %v3758_v17 = vmul.f32 %v13129_v34, %v13130_v10  ;;  %v3815_v42 = vmul.f32 %v13099_v36, %v8380_v31 }
 0x4ee   :  { %v3755_v8 = vadd.f32 %v10238_v53, %v3725_v23  ;;  %v3696_v19 = vadd.f32 %v3687_v6, %v3674_v30  ;;  %v3814_v53 = vmul.f32 %v13099_v36, %v13130_v10  ;;  %v4428_v48 = vmul.f32 %v10262_v45, %v13128_v24  ;;  %v13135_v6 = vld [vmem:[#allocation72_spill] sm:$0xff]  ;;  %v13139_v30 = vld [vmem:[#allocation119_spill] sm:$0xff] }
 0x4ef   :  { %v3761_v40 = vadd.f32 %v3757_v61, %v3753_v56  ;;  %v3762_v39 = vadd.f32 %v3758_v17, %v3754_v50  ;;  %v10849_v20 = vmul.f32 %v10275_v13, %v13133_v18  ;;  %v3813_v5 = vmul.f32 %v13099_v36, %v8387_v54  ;;  %v13140_v17 = vld [vmem:[#allocation32_spill] sm:$0xff] }
 0x4f0   :  { %v10802_v43 = vpop.permute.xlu1 %4017  ;;  %4437 = vrot.lane.b32.xlu2 %v4427_v49, %s6371_s28  ;;  %4435 = vrot.lane.b32.xlu1 %v4426_v26, %s6371_s28  ;;  %v3726_v55 = vadd.f32 %v13131_v51, %v3696_v19  ;;  %v3763_v16 = vadd.f32 %v3759_v52, %v3755_v8  ;;  %v3816_v22 = vmul.f32 %v13099_v36, %v13134_v25  ;;  %v3822_v24 = vrot.slane %v3814_v53, 1  ;;  %v13138_v49 = vld [vmem:[#allocation166_spill] sm:$0xff] }
 0x4f1   :  { %4433 = vrot.lane.b32.xlu0 %v4425_v33, %s6371_s28  ;;  %v10823_v44 = vpop.permute.xlu2 %4153  ;;  %v3786_v57 = vadd.f32 %v13135_v6, %v3762_v39  ;;  %v3785_v3 = vadd.f32 %v13136_v11, %v3761_v40  ;;  %v4495_v35 = vmul.f32 %v10249_v58, %v13133_v18  ;;  %v3824_v33 = vrot.slane %v3815_v42, 1 }
 0x4f2   :  { %v3756_v14 = vadd.f32 %v13137_v28, %v3726_v55  ;;  %v3787_v26 = vadd.f32 %v13138_v49, %v3763_v16  ;;  %v4504_v8 = vrot.slane %v10849_v20, 1  ;;  %v3821_v50 = vrot.slane %v3813_v5, 1 }
 0x4f3   :  { %v10828_v63 = vpop.permute.xlu0 %4021  ;;  %v3809_v23 = vadd.f32 %v13139_v30, %v3785_v3  ;;  %v3760_v19 = vmul.f32 %v13129_v34, %v13134_v25  ;;  %v3825_v52 = vrot.slane %v3816_v22, 1  ;;  %v3810_v53 = vadd.f32 %v13140_v17, %v3786_v57  ;;  %v13141_v22 = vld [vmem:[#allocation140_spill] sm:$0xff]  ;;  %v13143_v30 = vld [vmem:[#allocation181_spill] sm:$0xff] }
 0x4f4   :  { %v3811_v61 = vadd.f32 %v10403_v29, %v3787_v26  ;;  %v4503_v42 = vrot.slane %v4495_v35, 1  ;;  %v3823_v51 = vsel %vm220_vm0, %v3821_v50, %v3822_v24  ;;  %v4452_v39 = vmul.f32 %v10262_v45, %v13132_v7  ;;  %v13145_v50 = vld [vmem:[#allocation46_spill] sm:$0xff] }
 0x4f5   :  { %v3764_v55 = vadd.f32 %v3760_v19, %v3756_v14  ;;  %v3826_v16 = vsel %vm220_vm0, %v3824_v33, %v3825_v52  ;;  %v3831_v40 = vadd.f32 %v3823_v51, %v3809_v23  ;;  %v3896_v29 = vmul.f32 %v13104_v37, %v13130_v10  ;;  %v13142_v14 = vld [vmem:[#allocation69_spill] sm:$0xff] }
 0x4f6   :  { %v3897_v20 = vmul.f32 %v13104_v37, %v8380_v31  ;;  %v4497_v5 = vmul.f32 %v10272_v4, %v13133_v18  ;;  %v3832_v57 = vadd.f32 %v3822_v24, %v3810_v53  ;;  %v3895_v10 = vmul.f32 %v13104_v37, %v8387_v54 }
 0x4f7   :  { %v3788_v6 = vadd.f32 %v13141_v22, %v3764_v55  ;;  %v3898_v31 = vmul.f32 %v13104_v37, %v13134_v25  ;;  %v4498_v3 = vmul.f32 %v10262_v45, %v13133_v18  ;;  %v3861_v24 = vadd.f32 %v13142_v14, %v3831_v40  ;;  %v13144_v25 = vld [vmem:[#allocation13_spill] sm:$0xff] }
 0x4f8   :  { %v10826_v15 = vpop.permute.xlu1 %4023  ;;  %4459 = vrot.lane.b32.xlu2 %v4450_v60, %s6370_s2  ;;  %4457 = vrot.lane.b32.xlu1 %v4449_v12, %s6370_s2  ;;  %v4505_v60 = vsel %vm220_vm0, %v4503_v42, %v4504_v8  ;;  %v4451_v12 = vmul.f32 %v10272_v4, %v13132_v7  ;;  %v3862_v28 = vadd.f32 %v10489_v46, %v3832_v57  ;;  %v3904_v26 = vrot.slane %v3896_v29, 2  ;;  %v13146_v46 = vld [vmem:[#allocation20_spill] sm:$0xff]  ;;  %v13147_v29 = vld [vmem:[#allocation199_spill] sm:$0xff] }
 0x4f9   :  { %4439 = vrot.lane.b32.xlu0 %v4428_v48, %s6371_s28  ;;  %v10864_v36 = vpop.permute.xlu2 %4181  ;;  %v3833_v48 = vadd.f32 %v3826_v16, %v3811_v61  ;;  %v3812_v35 = vadd.f32 %v10401_v0, %v3788_v6  ;;  %v3906_v54 = vrot.slane %v3897_v20, 2  ;;  %v4506_v33 = vrot.slane %v4497_v5, 1  ;;  %v13148_v5 = vld [vmem:[#allocation160_spill] sm:$0xff] }
 0x4fa   :  { %v3892_v37 = vadd.f32 %v13143_v30, %v3862_v28  ;;  %v3891_v23 = vadd.f32 %v13144_v25, %v3861_v24  ;;  %v3903_v18 = vrot.slane %v3895_v10, 2  ;;  %v3907_v61 = vrot.slane %v3898_v31, 2  ;;  %v13149_v10 = vld [vmem:[#allocation208_spill] sm:$0xff]  ;;  %v13151_v28 = vld [vmem:[#allocation165_spill] sm:$0xff]  ;;  %v13154_v25 = vld [vmem:[#allocation87_spill] sm:$0xff] }
 0x4fb   :  { %v10869_v56 = vpop.permute.xlu0 %4071  ;;  %v3863_v7 = vadd.f32 %v10487_v38, %v3833_v48  ;;  %v4507_v0 = vrot.slane %v4498_v3, 1  ;;  %v3834_v17 = vadd.f32 %v3825_v52, %v3812_v35  ;;  %v4527_v53 = vmul.f32 %v10272_v4, %v13146_v46  ;;  %v13150_v3 = vld [vmem:[#allocation200_spill] sm:$0xff]  ;;  %v13153_v30 = vld [vmem:[#allocation141_spill] sm:$0xff] }
 0x4fc   :  { %v3905_v42 = vsel %vm306_vm1, %v3903_v18, %v3904_v26  ;;  %v3908_v51 = vsel %vm306_vm1, %v3906_v54, %v3907_v61  ;;  %v4526_v16 = vmul.f32 %v10275_v13, %v13146_v46  ;;  %v3914_v40 = vadd.f32 %v3904_v26, %v3892_v37  ;;  %v13152_v26 = vld [vmem:[#allocation75_spill] sm:$0xff]  ;;  %v13156_v18 = vld [vmem:[#allocation110_spill] sm:$0xff] }
 0x4fd   :  { %v3893_v19 = vadd.f32 %v13145_v50, %v3863_v7  ;;  %v4508_v55 = vsel %vm220_vm0, %v4506_v33, %v4507_v0  ;;  %v4528_v52 = vmul.f32 %v10262_v45, %v13146_v46  ;;  %v4525_v48 = vmul.f32 %v10249_v58, %v13146_v46  ;;  %v13157_v46 = vld [vmem:[#allocation21_spill] sm:$0xff] }
 0x4fe   :  { %v3864_v22 = vadd.f32 %v13148_v5, %v3834_v17  ;;  %v4536_v7 = vrot.slane %v4527_v53, 1  ;;  %v4534_v31 = vrot.slane %v4526_v16, 1  ;;  %v3944_v14 = vadd.f32 %v13151_v28, %v3914_v40  ;;  %v13159_v16 = vld [vmem:[#allocation100_spill] sm:$0xff] }
 0x4ff   :  { %v4537_v24 = vrot.slane %v4528_v52, 1  ;;  %v4533_v33 = vrot.slane %v4525_v48, 1  ;;  %v4578_v53 = vmul.f32 %v10275_v13, %v13157_v46  ;;  %v13160_v52 = vld [vmem:[#allocation113_spill] sm:$0xff] }
 0x500   :  { %v10867_v9 = vpop.permute.xlu1 %4073  ;;  %4509 = vrot.lane.b32.xlu2 %v4505_v60, %s6371_s28  ;;  %4463 = vrot.lane.b32.xlu1 %v4452_v39, %s6370_s2  ;;  %v3913_v60 = vadd.f32 %v3905_v42, %v3891_v23  ;;  %v3915_v39 = vadd.f32 %v3908_v51, %v3893_v19  ;;  %v3894_v35 = vadd.f32 %v13150_v3, %v3864_v22  ;;  %v13155_v19 = vld [vmem:[#allocation97_spill] sm:$0xff] }
 0x501   :  { %4461 = vrot.lane.b32.xlu0 %v4451_v12, %s6370_s2  ;;  %v10898_v11 = vpop.permute.xlu2 %4187  ;;  %v3974_v23 = vadd.f32 %v13154_v25, %v3944_v14  ;;  %v4538_v50 = vsel %vm220_vm0, %v4536_v7, %v4537_v24  ;;  %v4535_v17 = vsel %vm220_vm0, %v4533_v33, %v4534_v31  ;;  %v13158_v51 = vld [vmem:[#allocation117_spill] sm:$0xff]  ;;  %v3977_v40 = vmul.f32 %v13159_v16, %v13155_v19  ;;  %v13162_v14 = vld [vmem:[#allocation116_spill] sm:$0xff]  ;;  %v13164_v25 = vld [vmem:[#allocation79_spill] sm:$0xff] }
 0x502   :  { %v3943_v20 = vadd.f32 %v13147_v29, %v3913_v60  ;;  %v3916_v42 = vadd.f32 %v3907_v61, %v3894_v35  ;;  %v4577_v29 = vmul.f32 %v10249_v58, %v13157_v46  ;;  %v13161_v61 = vld [vmem:[#allocation207_spill] sm:$0xff]  ;;  %v4035_v7 = vmul.f32 %v13156_v18, %v13160_v52  ;;  %v13163_v33 = vld [vmem:[#allocation197_spill] sm:$0xff] }
 0x503   :  { %v10907_v38 = vpop.permute.xlu0 %4099  ;;  %v4586_v3 = vrot.slane %v4578_v53, 2 }
 0x504   :  { %v3973_v37 = vadd.f32 %v13153_v30, %v3943_v20  ;;  %v3946_v20 = vadd.f32 %v13161_v61, %v3916_v42 }
 0x506   :  { %v3981_v22 = vadd.f32 %v3977_v40, %v3973_v37  ;;  %v4585_v37 = vrot.slane %v4577_v29, 2  ;;  %v13166_v40 = vld [vmem:[#allocation206_spill] sm:$0xff] }
 0x508   :  { %v10905_v49 = vpop.permute.xlu1 %4101  ;;  %4515 = vrot.lane.b32.xlu2 %v4507_v0, %s6371_s28  ;;  %4513 = vrot.lane.b32.xlu1 %v4508_v55, %s6371_s28  ;;  %v3979_v0 = vmul.f32 %v13156_v18, %v13155_v19  ;;  %v3978_v55 = vmul.f32 %v13158_v51, %v13155_v19  ;;  %v4005_v28 = vadd.f32 %v10779_v47, %v3981_v22 }
 0x509   :  { %4511 = vrot.lane.b32.xlu0 %v4504_v8, %s6371_s28  ;;  %v10924_v12 = vpop.permute.xlu2 %4217  ;;  %v3945_v8 = vadd.f32 %v13149_v10, %v3915_v39  ;;  %v4034_v39 = vmul.f32 %v13158_v51, %v13160_v52  ;;  %v4587_v47 = vsel %vm306_vm1, %v4585_v37, %v4586_v3 }
 0x50a   :  { %v3982_v5 = vadd.f32 %v3978_v55, %v3974_v23  ;;  %v3976_v23 = vadd.f32 %v13164_v25, %v3946_v20  ;;  %v4579_v55 = vmul.f32 %v10272_v4, %v13157_v46  ;;  %v4580_v20 = vmul.f32 %v10262_v45, %v13157_v46 }
 0x50b   :  { %v10932_v57 = vpop.permute.xlu0 %4105  ;;  %v3975_v54 = vadd.f32 %v13152_v26, %v3945_v8  ;;  %v4036_v26 = vmul.f32 %v13162_v14, %v13160_v52 }
 0x50c   :  { %v4006_v35 = vadd.f32 %v10777_v27, %v3982_v5 }
 0x50d   :  { %v3983_v60 = vadd.f32 %v3979_v0, %v3975_v54  ;;  %v4042_v54 = vrot.slane %v4034_v39, 1  ;;  %v4044_v0 = vrot.slane %v4035_v7, 1  ;;  %v4045_v39 = vrot.slane %v4036_v26, 1 }
 0x50f   :  { %v4007_v30 = vadd.f32 %v13163_v33, %v3983_v60  ;;  %v4030_v60 = vadd.f32 %v13166_v40, %v4006_v35  ;;  %v4046_v7 = vsel %vm220_vm0, %v4044_v0, %v4045_v39  ;;  %v4588_v33 = vrot.slane %v4579_v55, 2 }
 0x510   :  { %v10930_v6 = vpop.permute.xlu1 %4151  ;;  %4543 = vrot.lane.b32.xlu2 %v4538_v50, %s6370_s2  ;;  %4541 = vrot.lane.b32.xlu1 %v4534_v31, %s6370_s2  ;;  %v4033_v31 = vmul.f32 %v13159_v16, %v13160_v52  ;;  %v4029_v50 = vadd.f32 %v10802_v43, %v4005_v28  ;;  %v3980_v43 = vmul.f32 %v13162_v14, %v13155_v19 }
 0x511   :  { %4539 = vrot.lane.b32.xlu0 %v4535_v17, %s6370_s2  ;;  %v10955_v48 = vpop.permute.xlu2 %4239  ;;  %v13165_v17 = vld [vmem:[#allocation22_spill] sm:$0xff]  ;;  %v4031_v27 = vadd.f32 %v10828_v63, %v4007_v30  ;;  %v4052_v37 = vadd.f32 %v4042_v54, %v4030_v60 }
 0x512   :  { %v10977_v42 = vmul.f32 %v10275_v13, %v13165_v17  ;;  %v4041_v53 = vrot.slane %v4033_v31, 1  ;;  %v4607_v63 = vmul.f32 %v10249_v58, %v13165_v17  ;;  %v3984_v22 = vadd.f32 %v3980_v43, %v3976_v23 }
 0x513   :  { %v10964_v8 = vpop.permute.xlu0 %4155  ;;  %v4053_v28 = vadd.f32 %v4046_v7, %v4031_v27  ;;  %v13168_v27 = vld [vmem:[#allocation65_spill] sm:$0xff]  ;;  %v4610_v60 = vmul.f32 %v10262_v45, %v13165_v17 }
 0x514   :  { %v4043_v29 = vsel %vm220_vm0, %v4041_v53, %v4042_v54  ;;  %v4616_v35 = vrot.slane %v10977_v42, 2  ;;  %v4008_v30 = vadd.f32 %v10804_v1, %v3984_v22  ;;  %v4615_v46 = vrot.slane %v4607_v63, 2 }
 0x515   :  { %v4051_v5 = vadd.f32 %v4043_v29, %v4029_v50  ;;  %v4083_v23 = vadd.f32 %v10867_v9, %v4053_v28  ;;  %v4589_v42 = vrot.slane %v4580_v20, 2  ;;  %v13169_v20 = vld [vmem:[#allocation164_spill] sm:$0xff] }
 0x516   :  { %v4032_v53 = vadd.f32 %v10826_v15, %v4008_v30  ;;  %v4617_v54 = vsel %vm306_vm1, %v4615_v46, %v4616_v35  ;;  %v4619_v30 = vrot.slane %v4610_v60, 2  ;;  %v13174_v60 = vld [vmem:[#allocation24_spill] sm:$0xff] }
 0x517   :  { %v4081_v1 = vadd.f32 %v13168_v27, %v4051_v5  ;;  %v4590_v9 = vsel %vm306_vm1, %v4588_v33, %v4589_v42  ;;  %v4113_v15 = vadd.f32 %v10799_v59, %v4083_v23  ;;  %v13170_v5 = vld [vmem:[#allocation53_spill] sm:$0xff] }
 0x518   :  { %v10962_v10 = vpop.permute.xlu1 %4157  ;;  %4593 = vrot.lane.b32.xlu2 %v4586_v3, %s6371_s28  ;;  %4591 = vrot.lane.b32.xlu1 %v4587_v47, %s6371_s28  ;;  %v4054_v43 = vadd.f32 %v4045_v39, %v4032_v53  ;;  %v4197_v22 = vmul.f32 %v13170_v5, %v13169_v20 }
 0x519   :  { %4545 = vrot.lane.b32.xlu0 %v4537_v24, %s6370_s2  ;;  %v10992_v61 = vpop.permute.xlu2 %4289  ;;  %v13167_v24 = vld [vmem:[#allocation114_spill] sm:$0xff] }
 0x51a   :  { %v4116_v26 = vmul.f32 %v13158_v51, %v13167_v24  ;;  %v4117_v25 = vmul.f32 %v13156_v18, %v13167_v24  ;;  %v4115_v50 = vmul.f32 %v13159_v16, %v13167_v24  ;;  %v4118_v0 = vmul.f32 %v13162_v14, %v13167_v24 }
 0x51b   :  { %v4184_v3 = vpop.permute.xlu0 %4183  ;;  %v4082_v51 = vadd.f32 %v10869_v56, %v4052_v37  ;;  %v4609_v18 = vmul.f32 %v10272_v4, %v13165_v17  ;;  %v4111_v14 = vadd.f32 %v10907_v38, %v4081_v1  ;;  %v4084_v17 = vadd.f32 %v10770_v41, %v4054_v43 }
 0x51c   :  { %v4124_v47 = vrot.slane %v4116_v26, 2  ;;  %v4126_v55 = vrot.slane %v4117_v25, 2  ;;  %v4123_v56 = vrot.slane %v4115_v50, 2  ;;  %v4127_v63 = vrot.slane %v4118_v0, 2  ;;  %v13171_v25 = vld [vmem:[#allocation168_spill] sm:$0xff] }
 0x51d   :  { %v4112_v16 = vadd.f32 %v10905_v49, %v4082_v51  ;;  %v4618_v7 = vrot.slane %v4609_v18, 2  ;;  %v4201_v46 = vadd.f32 %v4197_v22, %v13171_v25  ;;  %v4114_v0 = vadd.f32 %v10932_v57, %v4084_v17 }
 0x51e   :  { %v4125_v38 = vsel %vm306_vm1, %v4123_v56, %v4124_v47  ;;  %v4128_v59 = vsel %vm306_vm1, %v4126_v55, %v4127_v63 }
 0x51f   :  { %v4134_v28 = vadd.f32 %v4124_v47, %v4112_v16  ;;  %v4133_v26 = vadd.f32 %v4125_v38, %v4111_v14  ;;  %v4135_v33 = vadd.f32 %v4128_v59, %v4113_v15  ;;  %v4620_v23 = vsel %vm306_vm1, %v4618_v7, %v4619_v30 }
 0x520   :  { %v4186_v31 = vpop.permute.xlu1 %4185  ;;  %4621 = vrot.lane.b32.xlu2 %v4617_v54, %s6370_s2  ;;  %4597 = vrot.lane.b32.xlu1 %v4589_v42, %s6371_s28  ;;  %v4136_v57 = vadd.f32 %v4127_v63, %v4114_v0  ;;  %v13172_v54 = vld [vmem:[#allocation54_spill] sm:$0xff]  ;;  %v13175_v63 = vld [vmem:[#allocation68_spill] sm:$0xff] }
 0x521   :  { %4595 = vrot.lane.b32.xlu0 %v4590_v9, %s6371_s28  ;;  %v11021_v40 = vpop.permute.xlu2 %4295  ;;  %v4163_v37 = vadd.f32 %v10930_v6, %v4133_v26  ;;  %v4165_v39 = vadd.f32 %v10964_v8, %v4135_v33  ;;  %v4164_v50 = vadd.f32 %v10823_v44, %v4134_v28  ;;  %v4199_v44 = vmul.f32 %v13024_v62, %v13169_v20  ;;  %v13173_v9 = vld [vmem:[#allocation23_spill] sm:$0xff]  ;;  %v13177_v0 = vld [vmem:[#allocation36_spill] sm:$0xff] }
 0x523   :  { %v4214_v49 = vpop.permute.xlu0 %4213  ;;  %v11041_v42 = vadd.f32 %v4186_v31, %v4165_v39  ;;  %v11044_v8 = vadd.f32 %v10864_v36, %v4163_v37  ;;  %v11046_v53 = vadd.f32 %v4184_v3, %v4164_v50  ;;  %v4203_v18 = vadd.f32 %v4199_v44, %v13171_v25 }
 0x524   :  { %v4225_v6 = vadd.f32 %v4214_v49, %v4201_v46 }
 0x525   :  { %v4647_v31 = vmul.f32 %v11041_v42, %v13173_v9  ;;  %v4646_v36 = vmul.f32 %v11046_v53, %v13173_v9  ;;  %v4645_v3 = vmul.f32 %v11044_v8, %v13173_v9  ;;  %v4227_v16 = vadd.f32 %v10924_v12, %v4203_v18  ;;  %v13176_v12 = vld [vmem:[#allocation25_spill] sm:$0xff] }
 0x526   :  { %v4670_v43 = vmul.f32 %v11046_v53, %v13174_v60  ;;  %v4669_v38 = vmul.f32 %v11044_v8, %v13174_v60  ;;  %v4716_v7 = vmul.f32 %v11046_v53, %v13176_v12  ;;  %v4671_v50 = vmul.f32 %v11041_v42, %v13174_v60 }
 0x527   :  { %v4717_v44 = vmul.f32 %v11041_v42, %v13176_v12 }
 0x528   :  { %v11025_v29 = vpop.permute.xlu1 %4215  ;;  %4627 = vrot.lane.b32.xlu2 %v4619_v30, %s6370_s2  ;;  %4625 = vrot.lane.b32.xlu1 %v4620_v23, %s6370_s2  ;;  %v4724_v33 = vrot.slane %v4716_v7, 1  ;;  %v4200_v30 = vmul.f32 %v13058_v32, %v13169_v20 }
 0x529   :  { %4623 = vrot.lane.b32.xlu0 %v4616_v35, %s6370_s2  ;;  %v4324_v41 = vpop.permute.xlu2 %4323  ;;  %v4166_v35 = vadd.f32 %v10962_v10, %v4136_v57 }
 0x52b   :  { %v4220_v27 = vpop.permute.xlu0 %4219  ;;  %v11066_v10 = vadd.f32 %v10898_v11, %v4166_v35  ;;  %v4715_v11 = vmul.f32 %v11044_v8, %v13176_v12 }
 0x52d   :  { %v4648_v22 = vmul.f32 %v11066_v10, %v13173_v9  ;;  %v4723_v17 = vrot.slane %v4715_v11, 1  ;;  %v4672_v23 = vmul.f32 %v11066_v10, %v13174_v60  ;;  %v13179_v60 = vld [vmem:[#allocation91_spill] sm:$0xff] }
 0x52f   :  { %v4725_v46 = vsel %vm220_vm0, %v4723_v17, %v4724_v33 }
 0x530   :  { %v4238_v51 = vpop.permute.xlu1 %4237  ;;  %4657 = vrot.lane.b32.xlu2 %v4647_v31, %s6371_s28  ;;  %4655 = vrot.lane.b32.xlu1 %v4646_v36, %s6371_s28 }
 0x531   :  { %v4249_v1 = vadd.f32 %v4238_v51, %v4225_v6  ;;  %4653 = vrot.lane.b32.xlu0 %v4645_v3, %s6371_s28  ;;  %v11063_v14 = vpop.permute.xlu2 %4373  ;;  %v4198_v6 = vmul.f32 %v13177_v0, %v13169_v20  ;;  %v4204_v51 = vadd.f32 %v4200_v30, %v13171_v25  ;;  %v4718_v20 = vmul.f32 %v11066_v10, %v13176_v12 }
 0x533   :  { %v4271_v47 = vadd.f32 %v13172_v54, %v4249_v1  ;;  %v4242_v15 = vpop.permute.xlu0 %4241  ;;  %v13178_v1 = vld [vmem:[#allocation59_spill] sm:$0xff]  ;;  %v4228_v57 = vadd.f32 %v4220_v27, %v4204_v51  ;;  %v4202_v36 = vadd.f32 %v4198_v6, %v13171_v25 }
 0x534   :  { %v4251_v56 = vadd.f32 %v4242_v15, %v4227_v16  ;;  %v4726_v16 = vrot.slane %v4717_v44, 1 }
 0x535   :  { %v4301_v9 = vadd.f32 %v10992_v61, %v4271_v47  ;;  %v4226_v15 = vadd.f32 %v11025_v29, %v4202_v36 }
 0x536   :  { %v4273_v49 = vadd.f32 %v13175_v63, %v4251_v56  ;;  %v4727_v56 = vrot.slane %v4718_v20, 1  ;;  %v13180_v63 = vld [vmem:[#allocation26_spill] sm:$0xff]  ;;  %v13186_v20 = vld [vmem:[#allocation27_spill] sm:$0xff] }
 0x537   :  { %v4747_v27 = vmul.f32 %v11041_v42, %v13180_v63  ;;  %v4746_v25 = vmul.f32 %v11046_v53, %v13180_v63  ;;  %v4748_v29 = vmul.f32 %v11066_v10, %v13180_v63  ;;  %v4745_v12 = vmul.f32 %v11044_v8, %v13180_v63  ;;  %v13189_v63 = vld [vmem:[#allocation29_spill] sm:$0xff] }
 0x538   :  { %v4244_v55 = vpop.permute.xlu1 %4243  ;;  %4679 = vrot.lane.b32.xlu2 %v4670_v43, %s6370_s2  ;;  %4677 = vrot.lane.b32.xlu1 %v4669_v38, %s6370_s2  ;;  %v4728_v38 = vsel %vm220_vm0, %v4726_v16, %v4727_v56 }
 0x539   :  { %4659 = vrot.lane.b32.xlu0 %v4648_v22, %s6371_s28  ;;  %v4252_v3 = vadd.f32 %v4244_v55, %v4228_v57  ;;  %v4250_v55 = vadd.f32 %v10955_v48, %v4226_v15  ;;  %v4754_v17 = vrot.slane %v4746_v25, 1  ;;  %v4753_v44 = vrot.slane %v4745_v12, 1 }
 0x53a   :  { %v4402_v28 = vpop.permute.xlu2 %4401 }
 0x53b   :  { %v4292_v59 = vpop.permute.xlu0 %4291 }
 0x540   :  { %v4294_v26 = vpop.permute.xlu1 %4293  ;;  %4729 = vrot.lane.b32.xlu2 %v4725_v46, %s6371_s28  ;;  %4683 = vrot.lane.b32.xlu1 %v4672_v23, %s6370_s2  ;;  %v13183_v46 = vld [vmem:[#allocation177_spill] sm:$0xff]  ;;  %v13184_v23 = vld [vmem:[#allocation51_spill] sm:$0xff] }
 0x541   :  { %v4303_v37 = vadd.f32 %v4294_v26, %v4273_v49  ;;  %4681 = vrot.lane.b32.xlu0 %v4671_v50, %s6370_s2  ;;  %v13181_v49 = vld [vmem:[#allocation60_spill] sm:$0xff]  ;;  %v4756_v26 = vrot.slane %v4747_v27, 1  ;;  %v13185_v50 = vrot.slane %v13184_v23, 1  ;;  %v13190_v27 = vrot.slane %v13189_v63, 2 }
 0x542   :  { %v4408_v54 = vpop.permute.xlu2 %4407  ;;  %v13182_v61 = vrot.slane %v13181_v49, 1 }
 0x543   :  { %v4333_v39 = vadd.f32 %v4324_v41, %v4303_v37  ;;  %v4320_v35 = vpop.permute.xlu0 %4319  ;;  %v4272_v6 = vadd.f32 %v13185_v50, %v4250_v55  ;;  %v4799_v55 = vmul.f32 %v11041_v42, %v13186_v20 }
 0x544   :  { %v4331_v18 = vadd.f32 %v4320_v35, %v4301_v9  ;;  %v4274_v47 = vadd.f32 %v13182_v61, %v4252_v3  ;;  %v4755_v9 = vsel %vm220_vm0, %v4753_v44, %v4754_v17 }
 0x545   :  { %v11096_v41 = vadd.f32 %v13178_v1, %v4333_v39  ;;  %v4757_v39 = vrot.slane %v4748_v29, 1  ;;  %v4302_v57 = vadd.f32 %v4292_v59, %v4272_v6  ;;  %v4797_v59 = vmul.f32 %v11044_v8, %v13186_v20 }
 0x546   :  { %v4353_v43 = vadd.f32 %v13179_v60, %v4331_v18  ;;  %v4304_v37 = vadd.f32 %v11021_v40, %v4274_v47  ;;  %v4798_v40 = vmul.f32 %v11046_v53, %v13186_v20  ;;  %v4808_v6 = vrot.slane %v4799_v55, 2 }
 0x547   :  { %v4758_v1 = vsel %vm220_vm0, %v4756_v26, %v4757_v39  ;;  %v4805_v47 = vrot.slane %v4797_v59, 2 }
 0x548   :  { %v4322_v31 = vpop.permute.xlu1 %4321  ;;  %4735 = vrot.lane.b32.xlu2 %v4727_v56, %s6371_s28  ;;  %4733 = vrot.lane.b32.xlu1 %v4728_v38, %s6371_s28  ;;  %v4420_v38 = vmul.f32 %v10262_v45, %v13183_v46 }
 0x549   :  { %4731 = vrot.lane.b32.xlu0 %v4724_v33, %s6371_s28  ;;  %v4417_v33 = vmul.f32 %v10249_v58, %v13183_v46  ;;  %v4332_v36 = vadd.f32 %v4322_v31, %v4302_v57  ;;  %v13191_v31 = vld [vmem:[#allocation28_spill] sm:$0xff] }
 0x54a   :  { %v11119_v22 = vpop.permute.xlu2 %4437  ;;  %v4828_v25 = vmul.f32 %v11046_v53, %v13191_v31 }
 0x54b   :  { %v4326_v11 = vpop.permute.xlu0 %4325  ;;  %v4354_v49 = vadd.f32 %v13190_v27, %v4332_v36 }
 0x54c   :  { %v4334_v51 = vadd.f32 %v4326_v11, %v4304_v37  ;;  %v4419_v37 = vmul.f32 %v10272_v4, %v13183_v46  ;;  %v4836_v23 = vrot.slane %v4828_v25, 2 }
 0x54d   :  { %v4384_v26 = vadd.f32 %v11063_v14, %v4354_v49 }
 0x550   :  { %v4372_v7 = vpop.permute.xlu1 %4371  ;;  %4763 = vrot.lane.b32.xlu2 %v4758_v1, %s6370_s2  ;;  %4761 = vrot.lane.b32.xlu1 %v4754_v17, %s6370_s2 }
 0x551   :  { %v4383_v30 = vadd.f32 %v4372_v7, %v4353_v43  ;;  %4759 = vrot.lane.b32.xlu0 %v4755_v9, %s6370_s2  ;;  %v4806_v43 = vrot.slane %v4798_v40, 2  ;;  %v4829_v9 = vmul.f32 %v11041_v42, %v13191_v31 }
 0x552   :  { %v4460_v3 = vpop.permute.xlu2 %4459 }
 0x553   :  { %v4413_v48 = vadd.f32 %v4402_v28, %v4383_v30  ;;  %v13187_v28 = vld [vmem:[#allocation44_spill] sm:$0xff]  ;;  %v4376_v56 = vpop.permute.xlu0 %4375  ;;  %v4807_v29 = vsel %vm306_vm1, %v4805_v47, %v4806_v43  ;;  %v4800_v30 = vmul.f32 %v11066_v10, %v13186_v20 }
 0x554   :  { %v13188_v18 = vrot.slane %v13187_v28, 2  ;;  %v4385_v7 = vadd.f32 %v4376_v56, %v11096_v41  ;;  %v13192_v56 = vld [vmem:[#allocation122_spill] sm:$0xff] }
 0x555   :  { %v4421_v35 = vadd.f32 %v4417_v33, %v4413_v48  ;;  %v4418_v48 = vmul.f32 %v10275_v13, %v13183_v46  ;;  %v4809_v44 = vrot.slane %v4800_v30, 2  ;;  %v4830_v46 = vmul.f32 %v11066_v10, %v13191_v31 }
 0x556   :  { %v4356_v16 = vadd.f32 %v13188_v18, %v4334_v51  ;;  %v4838_v18 = vrot.slane %v4829_v9, 2 }
 0x557   :  { %v4810_v57 = vsel %vm306_vm1, %v4808_v6, %v4809_v44  ;;  %v4839_v59 = vrot.slane %v4830_v46, 2 }
 0x558   :  { %v4378_v15 = vpop.permute.xlu1 %4377  ;;  %4813 = vrot.lane.b32.xlu2 %v4806_v43, %s6371_s28  ;;  %4811 = vrot.lane.b32.xlu1 %v4807_v29, %s6371_s28 }
 0x559   :  { %v4386_v60 = vadd.f32 %v4378_v15, %v4356_v16  ;;  %4765 = vrot.lane.b32.xlu0 %v4757_v39, %s6370_s2  ;;  %v4840_v15 = vsel %vm306_vm1, %v4838_v18, %v4839_v59 }
 0x55a   :  { %v11154_v11 = vpop.permute.xlu2 %4509 }
 0x55b   :  { %v4416_v61 = vadd.f32 %v4408_v54, %v4386_v60  ;;  %v4827_v54 = vmul.f32 %v11044_v8, %v13191_v31  ;;  %v4404_v33 = vpop.permute.xlu0 %4403  ;;  %v13193_v60 = vrot.slane %v13192_v56, 1 }
 0x55c   :  { %v4414_v39 = vadd.f32 %v4404_v33, %v4384_v26  ;;  %v13196_v33 = vld [vmem:[#allocation172_spill] sm:$0xff] }
 0x55d   :  { %v4424_v12 = vadd.f32 %v4420_v38, %v4416_v61  ;;  %v4835_v41 = vrot.slane %v4827_v54, 2  ;;  %v13194_v38 = vld [vmem:[#allocation30_spill] sm:$0xff] }
 0x55e   :  { %v4422_v1 = vadd.f32 %v4418_v48, %v4414_v39  ;;  %v13198_v39 = vld [vmem:[#allocation33_spill] sm:$0xff]  ;;  %v13199_v48 = vld [vmem:[#allocation66_spill] sm:$0xff] }
 0x55f   :  { %v4837_v14 = vsel %vm306_vm1, %v4835_v41, %v4836_v23  ;;  %v4890_v6 = vmul.f32 %v13177_v0, %v13198_v39  ;;  %v4892_v9 = vmul.f32 %v13058_v32, %v13198_v39  ;;  %v4891_v46 = vmul.f32 %v13024_v62, %v13198_v39 }
 0x560   :  { %v4406_v17 = vpop.permute.xlu1 %4405  ;;  %4841 = vrot.lane.b32.xlu2 %v4837_v14, %s6370_s2  ;;  %4817 = vrot.lane.b32.xlu1 %v4809_v44, %s6371_s28  ;;  %v4889_v44 = vmul.f32 %v13170_v5, %v13198_v39 }
 0x561   :  { %v4415_v50 = vadd.f32 %v4406_v17, %v4385_v7  ;;  %4815 = vrot.lane.b32.xlu0 %v4810_v57, %s6371_s28 }
 0x562   :  { %v11170_v20 = vpop.permute.xlu2 %4515 }
 0x563   :  { %v4423_v51 = vadd.f32 %v4419_v37, %v4415_v50  ;;  %v4434_v36 = vpop.permute.xlu0 %4433 }
 0x564   :  { %v4445_v63 = vadd.f32 %v4434_v36, %v4421_v35  ;;  %v13201_v36 = vld [vmem:[#allocation47_spill] sm:$0xff] }
 0x565   :  { %v4447_v7 = vadd.f32 %v11119_v22, %v4423_v51 }
 0x568   :  { %v4436_v40 = vpop.permute.xlu1 %4435  ;;  %4847 = vrot.lane.b32.xlu2 %v4839_v59, %s6370_s2  ;;  %4845 = vrot.lane.b32.xlu1 %v4840_v15, %s6370_s2 }
 0x569   :  { %v4446_v28 = vadd.f32 %v4436_v40, %v4422_v1  ;;  %4843 = vrot.lane.b32.xlu0 %v4836_v23, %s6370_s2  ;;  %v13197_v23 = vrot.slane %v13196_v33, 1  ;;  %v13200_v40 = vld [vmem:[#allocation52_spill] sm:$0xff]  ;;  %v13212_v33 = vld [vmem:[#allocation89_spill] sm:$0xff] }
 0x56a   :  { %v4544_v27 = vpop.permute.xlu2 %4543 }
 0x56b   :  { %v4470_v16 = vadd.f32 %v4460_v3, %v4446_v28  ;;  %v4440_v61 = vpop.permute.xlu0 %4439  ;;  %v13195_v3 = vld [vmem:[#allocation31_spill] sm:$0xff] }
 0x56c   :  { %v4867_v25 = vmul.f32 %v13024_v62, %v13195_v3  ;;  %v4866_v29 = vmul.f32 %v13177_v0, %v13195_v3  ;;  %v4865_v55 = vmul.f32 %v13170_v5, %v13195_v3  ;;  %v4448_v35 = vadd.f32 %v4440_v61, %v4424_v12 }
 0x56d   :  { %v4492_v43 = vadd.f32 %v13193_v60, %v4470_v16  ;;  %v4868_v12 = vmul.f32 %v13058_v32, %v13195_v3  ;;  %v13205_v3 = vld [vmem:[#allocation86_spill] sm:$0xff] }
 0x570   :  { %v4458_v49 = vpop.permute.xlu1 %4457  ;;  %4877 = vrot.lane.b32.xlu2 %v4867_v25, %s6371_s28  ;;  %4875 = vrot.lane.b32.xlu1 %v4866_v29, %s6371_s28  ;;  %v13206_v25 = vrot.slane %v13205_v3, 1  ;;  %v13208_v29 = vld [vmem:[#allocation96_spill] sm:$0xff] }
 0x571   :  { %v4469_v47 = vadd.f32 %v4458_v49, %v4445_v63  ;;  %4873 = vrot.lane.b32.xlu0 %v4865_v55, %s6371_s28 }
 0x572   :  { %v11190_v54 = vpop.permute.xlu2 %4593 }
 0x573   :  { %v4491_v31 = vadd.f32 %v13194_v38, %v4469_v47  ;;  %v4462_v30 = vpop.permute.xlu0 %4461  ;;  %v13204_v47 = vld [vmem:[#allocation82_spill] sm:$0xff] }
 0x574   :  { %v4471_v17 = vadd.f32 %v4462_v30, %v4447_v7  ;;  %v13210_v30 = vld [vmem:[#allocation176_spill] sm:$0xff] }
 0x575   :  { %v4521_v59 = vadd.f32 %v11154_v11, %v4491_v31  ;;  %v13209_v11 = vrot.slane %v13208_v29, 1  ;;  %v13230_v29 = vld [vmem:[#allocation58_spill] sm:$0xff] }
 0x576   :  { %v4493_v41 = vadd.f32 %v13199_v48, %v4471_v17 }
 0x578   :  { %v4464_v26 = vpop.permute.xlu1 %4463  ;;  %4899 = vrot.lane.b32.xlu2 %v4890_v6, %s6370_s2  ;;  %4897 = vrot.lane.b32.xlu1 %v4889_v44, %s6370_s2  ;;  %v13215_v6 = vld [vmem:[#allocation55_spill] sm:$0xff] }
 0x579   :  { %v4472_v37 = vadd.f32 %v4464_v26, %v4448_v35  ;;  %4879 = vrot.lane.b32.xlu0 %v4868_v12, %s6371_s28  ;;  %v13218_v12 = vld [vmem:[#allocation83_spill] sm:$0xff] }
 0x57a   :  { %v11205_v22 = vpop.permute.xlu2 %4621 }
 0x57b   :  { %v4494_v50 = vadd.f32 %v13197_v23, %v4472_v37  ;;  %v4512_v1 = vpop.permute.xlu0 %4511  ;;  %v13211_v37 = vrot.slane %v13210_v30, 2  ;;  %v13213_v23 = vld [vmem:[#allocation57_spill] sm:$0xff] }
 0x57c   :  { %v4522_v18 = vadd.f32 %v4512_v1, %v4492_v43  ;;  %v13207_v43 = vld [vmem:[#allocation61_spill] sm:$0xff]  ;;  %v13214_v39 = vrot.slane %v13213_v23, 1 }
 0x57d   :  { %v4524_v55 = vadd.f32 %v11170_v20, %v4494_v50  ;;  %v13216_v50 = vld [vmem:[#allocation98_spill] sm:$0xff] }
 0x57e   :  { %v13217_v44 = vrot.slane %v13216_v50, 2  ;;  %v13232_v50 = vld [vmem:[#allocation62_spill] sm:$0xff] }
 0x580   :  { %v4514_v51 = vpop.permute.xlu1 %4513  ;;  %4949 = vrot.lane.b32.xlu2 %v13200_v40, %s6371_s28  ;;  %4903 = vrot.lane.b32.xlu1 %v4892_v9, %s6370_s2  ;;  %v13222_v40 = vld [vmem:[#allocation73_spill] sm:$0xff] }
 0x581   :  { %v4523_v14 = vadd.f32 %v4514_v51, %v4493_v41  ;;  %4901 = vrot.lane.b32.xlu0 %v4891_v46, %s6370_s2  ;;  %v13219_v51 = vld [vmem:[#allocation78_spill] sm:$0xff]  ;;  %v13221_v46 = vld [vmem:[#allocation76_spill] sm:$0xff] }
 0x582   :  { %v11218_v16 = vpop.permute.xlu2 %4627  ;;  %v13220_v1 = vrot.slane %v13219_v51, 1  ;;  %v5088_v51 = vmul.f32 %v10262_v45, %v13230_v29 }
 0x583   :  { %v4553_v57 = vadd.f32 %v4544_v27, %v4523_v14  ;;  %v4540_v56 = vpop.permute.xlu0 %4539  ;;  %v13202_v27 = vld [vmem:[#allocation174_spill] sm:$0xff] }
 0x584   :  { %v4551_v63 = vadd.f32 %v4540_v56, %v4521_v59  ;;  %v13203_v49 = vrot.slane %v13202_v27, 2  ;;  %v13227_v27 = vld [vmem:[#allocation90_spill] sm:$0xff] }
 0x585   :  { %v11214_v28 = vadd.f32 %v13201_v36, %v4553_v57  ;;  %v13223_v36 = vrot.slane %v13222_v40, 2 }
 0x586   :  { %v4573_v38 = vadd.f32 %v13204_v47, %v4551_v63 }
 0x588   :  { %v4542_v15 = vpop.permute.xlu1 %4541  ;;  %4955 = vrot.lane.b32.xlu2 %v13206_v25, %s6371_s28  ;;  %4953 = vrot.lane.b32.xlu1 %v13207_v43, %s6371_s28 }
 0x589   :  { %v4552_v60 = vadd.f32 %v4542_v15, %v4522_v18  ;;  %4951 = vrot.lane.b32.xlu0 %v13209_v11, %s6371_s28  ;;  %v13224_v18 = vld [vmem:[#allocation85_spill] sm:$0xff]  ;;  %v5087_v11 = vmul.f32 %v10272_v4, %v13230_v29 }
 0x58a   :  { %v11234_v31 = vpop.permute.xlu2 %4657 }
 0x58b   :  { %v11223_v61 = vadd.f32 %v13203_v49, %v4552_v60  ;;  %v4546_v7 = vpop.permute.xlu0 %4545  ;;  %v13225_v60 = vld [vmem:[#allocation102_spill] sm:$0xff]  ;;  %v13228_v49 = vld [vmem:[#allocation81_spill] sm:$0xff] }
 0x58c   :  { %v4554_v26 = vadd.f32 %v4546_v7, %v4524_v55  ;;  %v13226_v63 = vrot.slane %v13225_v60, 2  ;;  %v13229_v47 = vrot.slane %v13228_v49, 2  ;;  %v5086_v55 = vmul.f32 %v10275_v13, %v13230_v29 }
 0x58d   :  { %v5085_v7 = vmul.f32 %v10249_v58, %v13230_v29 }
 0x58e   :  { %v4576_v17 = vadd.f32 %v13211_v37, %v4554_v26 }
 0x590   :  { %v4592_v35 = vpop.permute.xlu1 %4591  ;;  %4983 = vrot.lane.b32.xlu2 %v13212_v33, %s6370_s2  ;;  %4981 = vrot.lane.b32.xlu1 %v13214_v39, %s6370_s2  ;;  %v13231_v39 = vld [vmem:[#allocation39_spill] sm:$0xff] }
 0x591   :  { %4979 = vrot.lane.b32.xlu0 %v13215_v6, %s6370_s2  ;;  %v4603_v26 = vadd.f32 %v4592_v35, %v4573_v38  ;;  %v4637_v6 = vmul.f32 %v11044_v8, %v13231_v39  ;;  %v13233_v38 = vld [vmem:[#allocation42_spill] sm:$0xff]  ;;  %v4640_v29 = vmul.f32 %v11066_v10, %v13231_v39 }
 0x592   :  { %v11246_v48 = vpop.permute.xlu2 %4679  ;;  %v11299_v35 = vmul.f32 %v11046_v53, %v13233_v38 }
 0x593   :  { %v4596_v20 = vpop.permute.xlu0 %4595  ;;  %v4633_v23 = vadd.f32 %v11205_v22, %v4603_v26  ;;  %v4693_v22 = vmul.f32 %v11044_v8, %v13233_v38 }
 0x594   :  { %v4605_v49 = vadd.f32 %v4596_v20, %v11214_v28  ;;  %v13234_v28 = vld [vmem:[#allocation134_spill] sm:$0xff]  ;;  %v4639_v20 = vmul.f32 %v11041_v42, %v13231_v39 }
 0x598   :  { %v4598_v41 = vpop.permute.xlu1 %4597  ;;  %5033 = vrot.lane.b32.xlu2 %v13217_v44, %s6371_s28  ;;  %5031 = vrot.lane.b32.xlu1 %v13218_v12, %s6371_s28  ;;  %v5110_v44 = vmul.f32 %v10275_v13, %v13232_v50  ;;  %v5109_v12 = vmul.f32 %v10249_v58, %v13232_v50 }
 0x599   :  { %4985 = vrot.lane.b32.xlu0 %v13220_v1, %s6370_s2  ;;  %v4606_v1 = vadd.f32 %v4598_v41, %v4576_v17 }
 0x59a   :  { %v11256_v14 = vpop.permute.xlu2 %4729 }
 0x59b   :  { %v4624_v9 = vpop.permute.xlu0 %4623  ;;  %v4636_v17 = vadd.f32 %v11218_v16, %v4606_v1 }
 0x59d   :  { %v4644_v26 = vadd.f32 %v4640_v29, %v4636_v17 }
 0x5a0   :  { %v4626_v57 = vpop.permute.xlu1 %4625  ;;  %5061 = vrot.lane.b32.xlu2 %v13221_v46, %s6370_s2  ;;  %5037 = vrot.lane.b32.xlu1 %v13223_v36, %s6371_s28  ;;  %v4641_v46 = vadd.f32 %v4637_v6, %v4633_v23  ;;  %v4638_v23 = vmul.f32 %v11046_v53, %v13231_v39  ;;  %v13236_v39 = vld [vmem:[#allocation34_spill] sm:$0xff] }
 0x5a1   :  { %5035 = vrot.lane.b32.xlu0 %v13224_v18, %s6371_s28  ;;  %v4702_v18 = vrot.slane %v11299_v35, 1 }
 0x5a2   :  { %v11265_v59 = vpop.permute.xlu2 %4735 }
 0x5a3   :  { %v4654_v56 = vpop.permute.xlu0 %4653 }
 0x5a4   :  { %v4665_v40 = vadd.f32 %v4654_v56, %v4641_v46 }
 0x5a8   :  { %v11267_v15 = vpop.permute.xlu1 %4655  ;;  %5067 = vrot.lane.b32.xlu2 %v13226_v63, %s6370_s2  ;;  %5065 = vrot.lane.b32.xlu1 %v13227_v27, %s6370_s2  ;;  %v4701_v27 = vrot.slane %v4693_v22, 1  ;;  %v4695_v22 = vmul.f32 %v11041_v42, %v13233_v38 }
 0x5a9   :  { %5063 = vrot.lane.b32.xlu0 %v13229_v47, %s6370_s2  ;;  %v4604_v47 = vadd.f32 %v11190_v54, %v11223_v61  ;;  %v13235_v54 = vld [vmem:[#allocation43_spill] sm:$0xff] }
 0x5aa   :  { %v11277_v3 = vpop.permute.xlu2 %4763  ;;  %v4703_v56 = vsel %vm220_vm0, %v4701_v27, %v4702_v18  ;;  %v4776_v61 = vmul.f32 %v11046_v53, %v13235_v54  ;;  %v4775_v35 = vmul.f32 %v11044_v8, %v13235_v54 }
 0x5ab   :  { %v4660_v43 = vpop.permute.xlu0 %4659  ;;  %v4634_v16 = vadd.f32 %v4624_v9, %v4604_v47  ;;  %v4696_v9 = vmul.f32 %v11066_v10, %v13233_v38  ;;  %v13240_v38 = vld [vmem:[#allocation136_spill] sm:$0xff] }
 0x5b0   :  { %v4678_v25 = vpop.permute.xlu1 %4677  ;;  %5097 = vrot.lane.b32.xlu2 %v5087_v11, %s6371_s28  ;;  %5095 = vrot.lane.b32.xlu1 %v5086_v55, %s6371_s28  ;;  %v5112_v11 = vmul.f32 %v10262_v45, %v13232_v50  ;;  %v5111_v55 = vmul.f32 %v10272_v4, %v13232_v50 }
 0x5b1   :  { %5093 = vrot.lane.b32.xlu0 %v5085_v7, %s6371_s28  ;;  %v4689_v41 = vadd.f32 %v4678_v25, %v4665_v40  ;;  %v4635_v7 = vadd.f32 %v4626_v57, %v4605_v49  ;;  %v4668_v57 = vadd.f32 %v4660_v43, %v4644_v26  ;;  %v4784_v40 = vrot.slane %v4776_v61, 2 }
 0x5b2   :  { %v11288_v30 = vpop.permute.xlu2 %4813  ;;  %v4859_v43 = vmul.f32 %v13024_v62, %v13236_v39  ;;  %v4783_v49 = vrot.slane %v4775_v35, 2 }
 0x5b3   :  { %v11290_v33 = vpop.permute.xlu0 %4681  ;;  %v4711_v25 = vadd.f32 %v4703_v56, %v4689_v41  ;;  %v4705_v41 = vrot.slane %v4696_v9, 1  ;;  %v13237_v56 = vld [vmem:[#allocation135_spill] sm:$0xff] }
 0x5b5   :  { %v4741_v46 = vadd.f32 %v11256_v14, %v4711_v25  ;;  %v4704_v14 = vrot.slane %v4695_v22, 1 }
 0x5b7   :  { %v4706_v35 = vsel %vm220_vm0, %v4704_v14, %v4705_v41 }
 0x5b8   :  { %v4684_v37 = vpop.permute.xlu1 %4683  ;;  %5119 = vrot.lane.b32.xlu2 %v5110_v44, %s6370_s2  ;;  %5117 = vrot.lane.b32.xlu1 %v5109_v12, %s6370_s2  ;;  %v4643_v12 = vadd.f32 %v4639_v20, %v4635_v7  ;;  %v13242_v7 = vld [vmem:[#allocation37_spill] sm:$0xff] }
 0x5b9   :  { %5099 = vrot.lane.b32.xlu0 %v5088_v51, %s6371_s28  ;;  %v4642_v51 = vadd.f32 %v4638_v23, %v4634_v16  ;;  %v4692_v1 = vadd.f32 %v4684_v37, %v4668_v57  ;;  %v13238_v37 = vrot.slane %v13237_v56, 1  ;;  %v4785_v16 = vsel %vm306_vm1, %v4783_v49, %v4784_v40 }
 0x5ba   :  { %v4842_v36 = vpop.permute.xlu2 %4841  ;;  %v4667_v29 = vadd.f32 %v11234_v31, %v4643_v12 }
 0x5bb   :  { %v11313_v63 = vpop.permute.xlu0 %4731  ;;  %v4666_v17 = vadd.f32 %v11267_v15, %v4642_v51  ;;  %v4714_v47 = vadd.f32 %v4705_v41, %v4692_v1  ;;  %v4863_v15 = vadd.f32 %v4859_v43, %v13242_v7 }
 0x5bc   :  { %v4691_v31 = vadd.f32 %v11290_v33, %v4667_v29  ;;  %v4777_v33 = vmul.f32 %v11041_v42, %v13235_v54 }
 0x5bd   :  { %v4690_v25 = vadd.f32 %v11246_v48, %v4666_v17  ;;  %v4744_v9 = vadd.f32 %v11265_v59, %v4714_v47  ;;  %v13243_v59 = vld [vmem:[#allocation153_spill] sm:$0xff] }
 0x5be   :  { %v4713_v12 = vadd.f32 %v4706_v35, %v4691_v31  ;;  %v13246_v17 = vld [vmem:[#allocation137_spill] sm:$0xff] }
 0x5bf   :  { %v4712_v51 = vadd.f32 %v4702_v18, %v4690_v25  ;;  %v13244_v18 = vld [vmem:[#allocation35_spill] sm:$0xff] }
 0x5c0   :  { %v11311_v60 = vpop.permute.xlu1 %4733  ;;  %5169 = vrot.lane.b32.xlu2 %v13234_v28, %s6371_s28  ;;  %5123 = vrot.lane.b32.xlu1 %v5112_v11, %s6370_s2  ;;  %v13239_v11 = vld [vmem:[#allocation185_spill] sm:$0xff] }
 0x5c1   :  { %5121 = vrot.lane.b32.xlu0 %v5111_v55, %s6370_s2  ;;  %v13241_v55 = vrot.slane %v13240_v38, 1  ;;  %v4742_v22 = vadd.f32 %v11313_v63, %v4712_v51 }
 0x5c2   :  { %v4848_v6 = vpop.permute.xlu2 %4847 }
 0x5c3   :  { %v4760_v44 = vpop.permute.xlu0 %4759 }
 0x5c4   :  { %v4771_v27 = vadd.f32 %v4760_v44, %v4741_v46  ;;  %v4778_v44 = vmul.f32 %v11066_v10, %v13235_v54  ;;  %v4743_v46 = vadd.f32 %v11311_v60, %v4713_v12 }
 0x5c6   :  { %v4793_v28 = vadd.f32 %v4785_v16, %v4771_v27  ;;  %v4787_v43 = vrot.slane %v4778_v44, 2  ;;  %v4786_v27 = vrot.slane %v4777_v33, 2  ;;  %v4773_v47 = vadd.f32 %v11277_v3, %v4743_v46  ;;  %v13250_v3 = vld [vmem:[#allocation115_spill] sm:$0xff] }
 0x5c7   :  { %v13255_v44 = vld [vmem:[#allocation187_spill] sm:$0xff] }
 0x5c8   :  { %v4762_v50 = vpop.permute.xlu1 %4761  ;;  %5175 = vrot.lane.b32.xlu2 %v13238_v37, %s6371_s28  ;;  %5173 = vrot.lane.b32.xlu1 %v13239_v11, %s6371_s28  ;;  %v4788_v14 = vsel %vm306_vm1, %v4786_v27, %v4787_v43 }
 0x5c9   :  { %5171 = vrot.lane.b32.xlu0 %v13241_v55, %s6371_s28  ;;  %v4772_v54 = vadd.f32 %v4762_v50, %v4742_v22  ;;  %v4795_v11 = vadd.f32 %v4788_v14, %v4773_v47  ;;  %v13247_v50 = vld [vmem:[#allocation40_spill] sm:$0xff] }
 0x5ca   :  { %v4878_v26 = vpop.permute.xlu2 %4877  ;;  %v13248_v38 = vrot.slane %v13247_v50, 2  ;;  %v13249_v55 = vld [vmem:[#allocation188_spill] sm:$0xff] }
 0x5cb   :  { %v11359_v61 = vadd.f32 %v4878_v26, %v4863_v15  ;;  %v4766_v23 = vpop.permute.xlu0 %4765  ;;  %v4794_v56 = vadd.f32 %v4784_v40, %v4772_v54  ;;  %v13251_v15 = vrot.slane %v13250_v3, 1 }
 0x5cc   :  { %v4774_v1 = vadd.f32 %v4766_v23, %v4744_v9  ;;  %v4857_v23 = vmul.f32 %v13170_v5, %v13236_v39 }
 0x5cd   :  { %v4824_v16 = vadd.f32 %v11288_v30, %v4794_v56  ;;  %v13252_v30 = vld [vmem:[#allocation184_spill] sm:$0xff] }
 0x5ce   :  { %v4796_v41 = vadd.f32 %v4787_v43, %v4774_v1  ;;  %v4861_v51 = vadd.f32 %v4857_v23, %v13242_v7  ;;  %v13256_v43 = vld [vmem:[#allocation133_spill] sm:$0xff] }
 0x5d0   :  { %v4812_v20 = vpop.permute.xlu1 %4811  ;;  %5203 = vrot.lane.b32.xlu2 %v13243_v59, %s6370_s2  ;;  %v4860_v59 = vmul.f32 %v13058_v32, %v13236_v39 }
 0x5d1   :  { %v4823_v57 = vadd.f32 %v4812_v20, %v4793_v28  ;;  %5199 = vrot.lane.b32.xlu0 %v13246_v17, %s6370_s2  ;;  %v4858_v20 = vmul.f32 %v13177_v0, %v13236_v39 }
 0x5d2   :  { %v4900_v60 = vpop.permute.xlu2 %4899 }
 0x5d3   :  { %v4853_v48 = vadd.f32 %v4842_v36, %v4823_v57  ;;  %v13245_v36 = vrot.slane %v13244_v18, 1  ;;  %v4816_v49 = vpop.permute.xlu0 %4815  ;;  %v13253_v57 = vld [vmem:[#allocation126_spill] sm:$0xff]  ;;  %v4862_v12 = vadd.f32 %v4858_v20, %v13242_v7  ;;  %v13257_v18 = vrot.slane %v13256_v43, 2  ;;  %v13267_v20 = vld [vmem:[#allocation92_spill] sm:$0xff] }
 0x5d4   :  { %v13254_v9 = vrot.slane %v13253_v57, 2  ;;  %v5330_v23 = vmul.f32 %v11046_v53, %v13267_v20 }
 0x5d5   :  { %6178 = vst.msk [vmem:[%s11922_s3] sm:$0xff] %vm6177_vm2, %v4853_v48  ;;  %5201 = vrot.lane.b32.xlu1 %v13245_v36, %s6370_s2  ;;  %v13258_v36 = vld [vmem:[#allocation80_spill] sm:$0xff] }
 0x5d6   :  { %v13259_v17 = vrot.slane %v13258_v36, 1 }
 0x5d8   :  { %v4818_v63 = vpop.permute.xlu1 %4817  ;;  %5253 = vrot.lane.b32.xlu2 %v13248_v38, %s6371_s28 }
 0x5d9   :  { %v4826_v29 = vadd.f32 %v4818_v63, %v4796_v41  ;;  %5205 = vrot.lane.b32.xlu0 %v13251_v15, %s6370_s2  ;;  %v13260_v41 = vld [vmem:[#allocation56_spill] sm:$0xff]  ;;  %v13261_v63 = vld [vmem:[#allocation163_spill] sm:$0xff] }
 0x5da   :  { %v4950_v40 = vpop.permute.xlu2 %4949  ;;  %v13262_v27 = vrot.slane %v13261_v63, 2  ;;  %v13270_v63 = vld [vmem:[#allocation131_spill] sm:$0xff] }
 0x5db   :  { %v4856_v37 = vadd.f32 %v4848_v6, %v4826_v29  ;;  %v4825_v6 = vadd.f32 %v4816_v49, %v4795_v11  ;;  %v4844_v31 = vpop.permute.xlu0 %4843  ;;  %v13264_v11 = vld [vmem:[#allocation88_spill] sm:$0xff] }
 0x5dc   :  { %v4854_v28 = vadd.f32 %v4844_v31, %v4824_v16  ;;  %v5307_v50 = vmul.f32 %v11041_v42, %v13264_v11  ;;  %v5306_v38 = vmul.f32 %v11046_v53, %v13264_v11  ;;  %v13265_v31 = vld [vmem:[#allocation169_spill] sm:$0xff] }
 0x5dd   :  { %6186 = vst.msk [vmem:[%s11922_s3 + $0x38] sm:$0x3] %vm6179_vm3, %v4856_v37  ;;  %5251 = vrot.lane.b32.xlu1 %v13249_v55, %s6371_s28  ;;  %v13263_v37 = vld [vmem:[#allocation104_spill] sm:$0xff]  ;;  %v5305_v55 = vmul.f32 %v11044_v8, %v13264_v11 }
 0x5de   :  { %6180 = vst.msk [vmem:[%s11922_s3 + $0x8] sm:$0x3] %vm6179_vm3, %v4854_v28 }
 0x5e0   :  { %v4846_v25 = vpop.permute.xlu1 %4845  ;;  %5281 = vrot.lane.b32.xlu2 %v13252_v30, %s6370_s2  ;;  %v13268_v30 = vld [vmem:[#allocation118_spill] sm:$0xff] }
 0x5e1   :  { %v4855_v26 = vadd.f32 %v4846_v25, %v4825_v6  ;;  %5255 = vrot.lane.b32.xlu0 %v13255_v44, %s6371_s28  ;;  %v13269_v44 = vld [vmem:[#allocation94_spill] sm:$0xff] }
 0x5e2   :  { %v4956_v35 = vpop.permute.xlu2 %4955 }
 0x5e3   :  { %6185 = vst.msk [vmem:[%s11922_s3 + $0x30] sm:$0xff] %vm6177_vm2, %v4855_v26  ;;  %v4874_v1 = vpop.permute.xlu0 %4873  ;;  %v13266_v26 = vrot.slane %v13265_v31, 1 }
 0x5e4   :  { %v4885_v46 = vadd.f32 %v4874_v1, %v4861_v51  ;;  %v5375_v51 = vmul.f32 %v11044_v8, %v13269_v44 }
 0x5e5   :  { %5257 = vrot.lane.b32.xlu1 %v13254_v9, %s6371_s28  ;;  %v5308_v9 = vmul.f32 %v11066_v10, %v13264_v11 }
 0x5e6   :  { %v5383_v43 = vrot.slane %v5375_v51, 1  ;;  %v13275_v51 = vld [vmem:[#allocation124_spill] sm:$0xff] }
 0x5e8   :  { %v4876_v48 = vpop.permute.xlu1 %4875  ;;  %5287 = vrot.lane.b32.xlu2 %v13257_v18, %s6370_s2 }
 0x5e9   :  { %v4886_v33 = vadd.f32 %v4876_v48, %v4862_v12  ;;  %5283 = vrot.lane.b32.xlu0 %v13262_v27, %s6370_s2  ;;  %v5376_v12 = vmul.f32 %v11046_v53, %v13269_v44 }
 0x5ea   :  { %v4984_v49 = vpop.permute.xlu2 %4983 }
 0x5eb   :  { %v4910_v22 = vadd.f32 %v4900_v60, %v4886_v33  ;;  %v4864_v60 = vadd.f32 %v4860_v59, %v13242_v7  ;;  %v4880_v29 = vpop.permute.xlu0 %4879 }
 0x5ed   :  { %v4932_v54 = vadd.f32 %v13259_v17, %v4910_v22  ;;  %5285 = vrot.lane.b32.xlu1 %v13260_v41, %s6370_s2  ;;  %v4888_v56 = vadd.f32 %v4880_v29, %v4864_v60  ;;  %v5331_v17 = vmul.f32 %v11041_v42, %v13267_v20  ;;  %v5377_v41 = vmul.f32 %v11041_v42, %v13269_v44 }
 0x5f0   :  { %v4898_v47 = vpop.permute.xlu1 %4897  ;;  %5317 = vrot.lane.b32.xlu2 %v5307_v50, %s6371_s28 }
 0x5f1   :  { %v4909_v39 = vadd.f32 %v4898_v47, %v4885_v46  ;;  %5313 = vrot.lane.b32.xlu0 %v5305_v55, %s6371_s28  ;;  %v5384_v46 = vrot.slane %v5376_v12, 1 }
 0x5f2   :  { %v5034_v7 = vpop.permute.xlu2 %5033 }
 0x5f3   :  { %v4931_v14 = vadd.f32 %v13263_v37, %v4909_v39  ;;  %v4902_v6 = vpop.permute.xlu0 %4901  ;;  %v5385_v36 = vsel %vm220_vm0, %v5383_v43, %v5384_v46  ;;  %v13271_v37 = vld [vmem:[#allocation123_spill] sm:$0xff] }
 0x5f4   :  { %v4911_v25 = vadd.f32 %v4902_v6, %v11359_v61 }
 0x5f5   :  { %v4961_v3 = vadd.f32 %v4950_v40, %v4931_v14  ;;  %5315 = vrot.lane.b32.xlu1 %v5306_v38, %s6371_s28  ;;  %v5329_v40 = vmul.f32 %v11044_v8, %v13267_v20  ;;  %v13272_v14 = vrot.slane %v13271_v37, 2  ;;  %v13273_v38 = vld [vmem:[#allocation112_spill] sm:$0xff] }
 0x5f6   :  { %v4933_v57 = vadd.f32 %v13268_v30, %v4911_v25 }
 0x5f8   :  { %v4904_v15 = vpop.permute.xlu1 %4903  ;;  %5339 = vrot.lane.b32.xlu2 %v5330_v23, %s6370_s2 }
 0x5f9   :  { %v4912_v16 = vadd.f32 %v4904_v15, %v4888_v56  ;;  %5319 = vrot.lane.b32.xlu0 %v5308_v9, %s6371_s28  ;;  %v5386_v56 = vrot.slane %v5377_v41, 1  ;;  %v13274_v15 = vld [vmem:[#allocation101_spill] sm:$0xff] }
 0x5fa   :  { %v5062_v48 = vpop.permute.xlu2 %5061  ;;  %v5407_v6 = vmul.f32 %v11041_v42, %v13274_v15  ;;  %v5406_v25 = vmul.f32 %v11046_v53, %v13274_v15 }
 0x5fb   :  { %v4934_v28 = vadd.f32 %v13266_v26, %v4912_v16  ;;  %v4952_v33 = vpop.permute.xlu0 %4951 }
 0x5fc   :  { %v4962_v59 = vadd.f32 %v4952_v33, %v4932_v54  ;;  %v5416_v30 = vrot.slane %v5407_v6, 1  ;;  %v5414_v9 = vrot.slane %v5406_v25, 1 }
 0x5fd   :  { %v4964_v61 = vadd.f32 %v4956_v35, %v4934_v28  ;;  %5337 = vrot.lane.b32.xlu1 %v5329_v40, %s6370_s2  ;;  %v5332_v35 = vmul.f32 %v11066_v10, %v13267_v20  ;;  %v5405_v28 = vmul.f32 %v11044_v8, %v13274_v15 }
 0x600   :  { %v4954_v1 = vpop.permute.xlu1 %4953  ;;  %5389 = vrot.lane.b32.xlu2 %v5385_v36, %s6371_s28 }
 0x601   :  { %v4963_v22 = vadd.f32 %v4954_v1, %v4933_v57  ;;  %5341 = vrot.lane.b32.xlu0 %v5331_v17, %s6370_s2  ;;  %v13276_v1 = vrot.slane %v13275_v51, 2 }
 0x602   :  { %v5068_v54 = vpop.permute.xlu2 %5067 }
 0x603   :  { %v4993_v18 = vadd.f32 %v4984_v49, %v4963_v22  ;;  %v5378_v49 = vmul.f32 %v11066_v10, %v13269_v44  ;;  %v4980_v47 = vpop.permute.xlu0 %4979 }
 0x604   :  { %v4991_v39 = vadd.f32 %v4980_v47, %v4961_v3  ;;  %v5408_v3 = vmul.f32 %v11066_v10, %v13274_v15 }
 0x605   :  { %v5015_v27 = vadd.f32 %v13270_v63, %v4993_v18  ;;  %5343 = vrot.lane.b32.xlu1 %v5332_v35, %s6370_s2  ;;  %v5387_v50 = vrot.slane %v5378_v49, 1  ;;  %v13278_v18 = vld [vmem:[#allocation107_spill] sm:$0xff] }
 0x606   :  { %v5013_v55 = vadd.f32 %v13273_v38, %v4991_v39  ;;  %v5417_v44 = vrot.slane %v5408_v3, 1  ;;  %v5458_v36 = vmul.f32 %v11046_v53, %v13278_v18  ;;  %v5457_v35 = vmul.f32 %v11044_v8, %v13278_v18 }
 0x607   :  { %v5388_v16 = vsel %vm220_vm0, %v5386_v56, %v5387_v50  ;;  %v13279_v56 = vld [vmem:[#allocation109_spill] sm:$0xff]  ;;  %v5460_v38 = vmul.f32 %v11066_v10, %v13278_v18 }
 0x608   :  { %v4982_v60 = vpop.permute.xlu1 %4981  ;;  %5395 = vrot.lane.b32.xlu2 %v5387_v50, %s6371_s28  ;;  %v5488_v37 = vmul.f32 %v11046_v53, %v13279_v56  ;;  %v5490_v51 = vmul.f32 %v11066_v10, %v13279_v56 }
 0x609   :  { %v4992_v29 = vadd.f32 %v4982_v60, %v4962_v59  ;;  %5391 = vrot.lane.b32.xlu0 %v5384_v46, %s6371_s28  ;;  %v13277_v46 = vld [vmem:[#allocation74_spill] sm:$0xff]  ;;  %v5418_v59 = vsel %vm220_vm0, %v5416_v30, %v5417_v44  ;;  %v5466_v60 = vrot.slane %v5458_v36, 2 }
 0x60a   :  { %v5098_v26 = vpop.permute.xlu2 %5097  ;;  %v5077_v22 = vmul.f32 %v10249_v58, %v13277_v46  ;;  %v5080_v39 = vmul.f32 %v10262_v45, %v13277_v46 }
 0x60b   :  { %v5014_v11 = vadd.f32 %v13272_v14, %v4992_v29  ;;  %v4986_v23 = vpop.permute.xlu0 %4985  ;;  %v5465_v29 = vrot.slane %v5457_v35, 2 }
 0x60c   :  { %v4994_v40 = vadd.f32 %v4986_v23, %v4964_v61 }
 0x60d   :  { %v5044_v31 = vadd.f32 %v5034_v7, %v5014_v11  ;;  %5393 = vrot.lane.b32.xlu1 %v5388_v16, %s6371_s28  ;;  %v5413_v7 = vrot.slane %v5405_v28, 1  ;;  %v5467_v14 = vsel %vm306_vm1, %v5465_v29, %v5466_v60  ;;  %v5459_v11 = vmul.f32 %v11041_v42, %v13278_v18 }
 0x60e   :  { %v5016_v33 = vadd.f32 %v13276_v1, %v4994_v40  ;;  %v5496_v16 = vrot.slane %v5488_v37, 2  ;;  %v5499_v18 = vrot.slane %v5490_v51, 2 }
 0x60f   :  { %v5415_v43 = vsel %vm220_vm0, %v5413_v7, %v5414_v9  ;;  %v5468_v28 = vrot.slane %v5459_v11, 2 }
 0x610   :  { %v5032_v20 = vpop.permute.xlu1 %5031  ;;  %5423 = vrot.lane.b32.xlu2 %v5418_v59, %s6370_s2 }
 0x611   :  { %v5043_v57 = vadd.f32 %v5032_v20, %v5013_v55  ;;  %5419 = vrot.lane.b32.xlu0 %v5415_v43, %s6370_s2  ;;  %v5079_v55 = vmul.f32 %v10272_v4, %v13277_v46  ;;  %v5078_v20 = vmul.f32 %v10275_v13, %v13277_v46 }
 0x613   :  { %v5073_v12 = vadd.f32 %v5062_v48, %v5043_v57  ;;  %v5120_v48 = vpop.permute.xlu2 %5119  ;;  %v5036_v41 = vpop.permute.xlu0 %5035  ;;  %v5469_v57 = vrot.slane %v5460_v38, 2 }
 0x614   :  { %v5045_v49 = vadd.f32 %v5036_v41, %v5015_v27  ;;  %v5487_v27 = vmul.f32 %v11044_v8, %v13279_v56 }
 0x615   :  { %v5081_v61 = vadd.f32 %v5077_v22, %v5073_v12  ;;  %5421 = vrot.lane.b32.xlu1 %v5414_v9, %s6370_s2  ;;  %v5489_v12 = vmul.f32 %v11041_v42, %v13279_v56 }
 0x616   :  { %v5495_v23 = vrot.slane %v5487_v27, 2 }
 0x617   :  { %v5498_v59 = vrot.slane %v5489_v12, 2 }
 0x618   :  { %v5038_v17 = vpop.permute.xlu1 %5037  ;;  %5473 = vrot.lane.b32.xlu2 %v5466_v60, %s6371_s28  ;;  %v5497_v9 = vsel %vm306_vm1, %v5495_v23, %v5496_v16 }
 0x619   :  { %v5046_v63 = vadd.f32 %v5038_v17, %v5016_v33  ;;  %5425 = vrot.lane.b32.xlu0 %v5417_v44, %s6370_s2  ;;  %v5470_v44 = vsel %vm306_vm1, %v5468_v28, %v5469_v57  ;;  %v5500_v36 = vsel %vm306_vm1, %v5498_v59, %v5499_v18  ;;  %v13287_v28 = vld [vmem:[#allocation183_spill] sm:$0xff] }
 0x61b   :  { %v5076_v47 = vadd.f32 %v5068_v54, %v5046_v63  ;;  %v5170_v54 = vpop.permute.xlu2 %5169  ;;  %v5064_v6 = vpop.permute.xlu0 %5063 }
 0x61c   :  { %v5074_v3 = vadd.f32 %v5064_v6, %v5044_v31 }
 0x61d   :  { %v5084_v50 = vadd.f32 %v5080_v39, %v5076_v47  ;;  %5471 = vrot.lane.b32.xlu1 %v5467_v14, %s6371_s28 }
 0x61e   :  { %v5082_v40 = vadd.f32 %v5078_v20, %v5074_v3 }
 0x620   :  { %v5066_v15 = vpop.permute.xlu1 %5065  ;;  %5501 = vrot.lane.b32.xlu2 %v5497_v9, %s6370_s2 }
 0x621   :  { %v5075_v25 = vadd.f32 %v5066_v15, %v5045_v49  ;;  %5475 = vrot.lane.b32.xlu0 %v5470_v44, %s6371_s28  ;;  %v13284_v15 = vld [vmem:[#allocation189_spill] sm:$0xff] }
 0x622   :  { %v13285_v6 = vrot.slane %v13284_v15, 1 }
 0x623   :  { %v5083_v30 = vadd.f32 %v5079_v55, %v5075_v25  ;;  %v5176_v31 = vpop.permute.xlu2 %5175  ;;  %v5094_v33 = vpop.permute.xlu0 %5093  ;;  %v13286_v25 = vld [vmem:[#allocation125_spill] sm:$0xff] }
 0x624   :  { %v5105_v22 = vadd.f32 %v5094_v33, %v5081_v61  ;;  %v13282_v61 = vld [vmem:[#allocation178_spill] sm:$0xff]  ;;  %v5550_v3 = vmul.f32 %v13177_v0, %v13286_v25  ;;  %v5552_v51 = vmul.f32 %v13058_v32, %v13286_v25  ;;  %v13288_v33 = vld [vmem:[#allocation132_spill] sm:$0xff] }
 0x625   :  { %v5107_v7 = vadd.f32 %v5098_v26, %v5083_v30  ;;  %5477 = vrot.lane.b32.xlu1 %v5469_v57, %s6371_s28  ;;  %v13280_v26 = vld [vmem:[#allocation41_spill] sm:$0xff] }
 0x626   :  { %v13281_v35 = vrot.slane %v13280_v26, 1  ;;  %v13290_v26 = vld [vmem:[#allocation49_spill] sm:$0xff] }
 0x628   :  { %v5096_v1 = vpop.permute.xlu1 %5095  ;;  %5507 = vrot.lane.b32.xlu2 %v5499_v18, %s6370_s2 }
 0x629   :  { %v5106_v46 = vadd.f32 %v5096_v1, %v5082_v40  ;;  %5503 = vrot.lane.b32.xlu0 %v5496_v16, %s6370_s2  ;;  %v5551_v1 = vmul.f32 %v13024_v62, %v13286_v25 }
 0x62b   :  { %v5130_v43 = vadd.f32 %v5120_v48, %v5106_v46  ;;  %v5204_v41 = vpop.permute.xlu2 %5203  ;;  %v5100_v49 = vpop.permute.xlu0 %5099  ;;  %v13283_v48 = vld [vmem:[#allocation121_spill] sm:$0xff] }
 0x62c   :  { %v5108_v47 = vadd.f32 %v5100_v49, %v5084_v50  ;;  %v5527_v39 = vmul.f32 %v13024_v62, %v13283_v48  ;;  %v5526_v56 = vmul.f32 %v13177_v0, %v13283_v48  ;;  %v5525_v37 = vmul.f32 %v13170_v5, %v13283_v48  ;;  %v13293_v49 = vld [vmem:[#allocation108_spill] sm:$0xff] }
 0x62d   :  { %v5152_v17 = vadd.f32 %v13281_v35, %v5130_v43  ;;  %5505 = vrot.lane.b32.xlu1 %v5500_v36, %s6370_s2  ;;  %v5528_v23 = vmul.f32 %v13058_v32, %v13283_v48  ;;  %v13291_v35 = vrot.slane %v13290_v26, 2  ;;  %v13316_v26 = vld [vmem:[#allocation146_spill] sm:$0xff] }
 0x630   :  { %v5118_v63 = vpop.permute.xlu1 %5117  ;;  %5537 = vrot.lane.b32.xlu2 %v5527_v39, %s6371_s28 }
 0x631   :  { %v5129_v60 = vadd.f32 %v5118_v63, %v5105_v22  ;;  %5533 = vrot.lane.b32.xlu0 %v5525_v37, %s6371_s28 }
 0x633   :  { %v5151_v29 = vadd.f32 %v13282_v61, %v5129_v60  ;;  %v5254_v11 = vpop.permute.xlu2 %5253  ;;  %v5122_v27 = vpop.permute.xlu0 %5121  ;;  %v13294_v60 = vrot.slane %v13293_v49, 1  ;;  %v13295_v61 = vld [vmem:[#allocation120_spill] sm:$0xff] }
 0x634   :  { %v5131_v55 = vadd.f32 %v5122_v27, %v5107_v7 }
 0x635   :  { %v5181_v14 = vadd.f32 %v5170_v54, %v5151_v29  ;;  %5535 = vrot.lane.b32.xlu1 %v5526_v56, %s6371_s28  ;;  %v5549_v54 = vmul.f32 %v13170_v5, %v13286_v25  ;;  %v13296_v29 = vld [vmem:[#allocation129_spill] sm:$0xff] }
 0x636   :  { %v5153_v20 = vadd.f32 %v13287_v28, %v5131_v55  ;;  %v13297_v48 = vrot.slane %v13296_v29, 1  ;;  %v13300_v55 = vld [vmem:[#allocation144_spill] sm:$0xff]  ;;  %v13304_v28 = vld [vmem:[#allocation139_spill] sm:$0xff] }
 0x638   :  { %v5124_v50 = vpop.permute.xlu1 %5123  ;;  %5559 = vrot.lane.b32.xlu2 %v5550_v3, %s6370_s2 }
 0x639   :  { %v5132_v38 = vadd.f32 %v5124_v50, %v5108_v47  ;;  %5539 = vrot.lane.b32.xlu0 %v5528_v23, %s6371_s28  ;;  %v13298_v50 = vld [vmem:[#allocation190_spill] sm:$0xff]  ;;  %v13307_v23 = vld [vmem:[#allocation128_spill] sm:$0xff] }
 0x63a   :  { %v13299_v27 = vrot.slane %v13298_v50, 2 }
 0x63b   :  { %v5154_v16 = vadd.f32 %v13285_v6, %v5132_v38  ;;  %v5282_v57 = vpop.permute.xlu2 %5281  ;;  %v5172_v9 = vpop.permute.xlu0 %5171  ;;  %v13303_v6 = vld [vmem:[#allocation147_spill] sm:$0xff] }
 0x63c   :  { %v5182_v12 = vadd.f32 %v5172_v9, %v5152_v17 }
 0x63d   :  { %v5184_v30 = vadd.f32 %v5176_v31, %v5154_v16  ;;  %5557 = vrot.lane.b32.xlu1 %v5549_v54, %s6370_s2  ;;  %v13289_v31 = vld [vmem:[#allocation12_spill] sm:$0xff]  ;;  %v13306_v54 = vld [vmem:[#allocation155_spill] sm:$0xff] }
 0x640   :  { %v5174_v40 = vpop.permute.xlu1 %5173  ;;  %5609 = vrot.lane.b32.xlu2 %v13288_v33, %s6371_s28 }
 0x641   :  { %v5183_v44 = vadd.f32 %v5174_v40, %v5153_v20  ;;  %5561 = vrot.lane.b32.xlu0 %v5551_v1, %s6370_s2  ;;  %v13305_v20 = vrot.slane %v13304_v28, 2  ;;  %v13312_v1 = vld [vmem:[#allocation130_spill] sm:$0xff] }
 0x643   :  { %v5213_v7 = vadd.f32 %v5204_v41, %v5183_v44  ;;  %v11563_v22 = vpop.permute.xlu2 %5287  ;;  %v5200_v43 = vpop.permute.xlu0 %5199  ;;  %v13292_v41 = vld [vmem:[#allocation64_spill] sm:$0xff] }
 0x644   :  { %v5211_v36 = vadd.f32 %v5200_v43, %v5181_v14  ;;  %v13313_v43 = vld [vmem:[#allocation151_spill] sm:$0xff] }
 0x645   :  { %v11559_v46 = vadd.f32 %v13289_v31, %v5213_v7  ;;  %5563 = vrot.lane.b32.xlu1 %v5552_v51, %s6370_s2  ;;  %v13310_v7 = vld [vmem:[#allocation156_spill] sm:$0xff] }
 0x646   :  { %v5233_v63 = vadd.f32 %v13292_v41, %v5211_v36  ;;  %v13311_v51 = vrot.slane %v13310_v7, 2  ;;  %v13315_v36 = vld [vmem:[#allocation149_spill] sm:$0xff] }
 0x648   :  { %v5202_v59 = vpop.permute.xlu1 %5201  ;;  %5615 = vrot.lane.b32.xlu2 %v13294_v60, %s6371_s28  ;;  %v13318_v60 = vld [vmem:[#allocation148_spill] sm:$0xff] }
 0x649   :  { %v5212_v18 = vadd.f32 %v5202_v59, %v5182_v12  ;;  %5611 = vrot.lane.b32.xlu0 %v13297_v48, %s6371_s28  ;;  %v13309_v12 = vld [vmem:[#allocation143_spill] sm:$0xff]  ;;  %v5746_v29 = vmul.f32 %v10275_v13, %v13318_v60  ;;  %v5745_v48 = vmul.f32 %v10249_v58, %v13318_v60 }
 0x64b   :  { %v5234_v17 = vadd.f32 %v13291_v35, %v5212_v18  ;;  %v11578_v39 = vpop.permute.xlu2 %5317  ;;  %v5206_v37 = vpop.permute.xlu0 %5205  ;;  %v13314_v18 = vrot.slane %v13313_v43, 2  ;;  %v13317_v35 = vrot.slane %v13316_v26, 2 }
 0x64c   :  { %v5214_v14 = vadd.f32 %v5206_v37, %v5184_v30  ;;  %v13308_v30 = vrot.slane %v13307_v23, 1 }
 0x64d   :  { %v11571_v47 = vadd.f32 %v5254_v11, %v5234_v17  ;;  %5613 = vrot.lane.b32.xlu1 %v13295_v61, %s6371_s28  ;;  %v13301_v11 = vld [vmem:[#allocation127_spill] sm:$0xff]  ;;  %v5747_v61 = vmul.f32 %v10272_v4, %v13318_v60 }
 0x64e   :  { %v5236_v38 = vadd.f32 %v13299_v27, %v5214_v14  ;;  %v13302_v15 = vrot.slane %v13301_v11, 1  ;;  %v13319_v11 = vld [vmem:[#allocation103_spill] sm:$0xff] }
 0x64f   :  { %v5300_v26 = vmul.f32 %v11066_v10, %v13319_v11 }
 0x650   :  { %v5252_v56 = vpop.permute.xlu1 %5251  ;;  %5643 = vrot.lane.b32.xlu2 %v13300_v55, %s6370_s2 }
 0x651   :  { %5639 = vrot.lane.b32.xlu0 %v13303_v6, %s6370_s2  ;;  %v5263_v37 = vadd.f32 %v5252_v56, %v5233_v63  ;;  %v13320_v6 = vld [vmem:[#allocation152_spill] sm:$0xff] }
 0x652   :  { %v5770_v28 = vmul.f32 %v10275_v13, %v13320_v6  ;;  %v5769_v56 = vmul.f32 %v10249_v58, %v13320_v6 }
 0x653   :  { %v11589_v16 = vpop.permute.xlu2 %5339  ;;  %v5256_v3 = vpop.permute.xlu0 %5255  ;;  %v5293_v55 = vadd.f32 %v5282_v57, %v5263_v37  ;;  %v5299_v37 = vmul.f32 %v11041_v42, %v13319_v11 }
 0x655   :  { %5641 = vrot.lane.b32.xlu1 %v13302_v15, %s6370_s2  ;;  %v5297_v15 = vmul.f32 %v11044_v8, %v13319_v11 }
 0x658   :  { %v5258_v25 = vpop.permute.xlu1 %5257  ;;  %5693 = vrot.lane.b32.xlu2 %v13305_v20, %s6371_s28  ;;  %v13321_v20 = vld [vmem:[#allocation63_spill] sm:$0xff] }
 0x659   :  { %5645 = vrot.lane.b32.xlu0 %v13308_v30, %s6370_s2  ;;  %v11639_v63 = vmul.f32 %v11046_v53, %v13321_v20  ;;  %v5266_v23 = vadd.f32 %v5258_v25, %v5236_v38  ;;  %v5301_v30 = vadd.f32 %v5297_v15, %v5293_v55  ;;  %v5353_v57 = vmul.f32 %v11044_v8, %v13321_v20 }
 0x65a   :  { %v5265_v25 = vadd.f32 %v5256_v3, %v11559_v46  ;;  %v13323_v46 = vld [vmem:[#allocation67_spill] sm:$0xff] }
 0x65b   :  { %v11599_v40 = vpop.permute.xlu2 %5389  ;;  %v5284_v44 = vpop.permute.xlu0 %5283  ;;  %v5361_v38 = vrot.slane %v5353_v57, 1  ;;  %v5436_v3 = vmul.f32 %v11046_v53, %v13323_v46 }
 0x65d   :  { %5691 = vrot.lane.b32.xlu1 %v13306_v54, %s6371_s28  ;;  %v5748_v54 = vmul.f32 %v10262_v45, %v13318_v60  ;;  %v5772_v60 = vmul.f32 %v10262_v45, %v13320_v6  ;;  %v5444_v57 = vrot.slane %v5436_v3, 2 }
 0x660   :  { %v5286_v9 = vpop.permute.xlu1 %5285  ;;  %5721 = vrot.lane.b32.xlu2 %v13309_v12, %s6370_s2 }
 0x661   :  { %5695 = vrot.lane.b32.xlu0 %v13312_v1, %s6371_s28 }
 0x663   :  { %v11608_v33 = vpop.permute.xlu2 %5395  ;;  %v5314_v59 = vpop.permute.xlu0 %5313 }
 0x664   :  { %v5325_v12 = vadd.f32 %v5314_v59, %v5301_v30  ;;  %v5771_v59 = vmul.f32 %v10272_v4, %v13320_v6  ;;  %v5355_v30 = vmul.f32 %v11041_v42, %v13321_v20 }
 0x665   :  { %5697 = vrot.lane.b32.xlu1 %v13311_v51, %s6371_s28  ;;  %v5362_v51 = vrot.slane %v11639_v63, 1 }
 0x668   :  { %v11610_v31 = vpop.permute.xlu1 %5315  ;;  %5727 = vrot.lane.b32.xlu2 %v13314_v18, %s6370_s2  ;;  %v5296_v18 = vadd.f32 %v11563_v22, %v5266_v23 }
 0x669   :  { %5723 = vrot.lane.b32.xlu0 %v13317_v35, %s6370_s2  ;;  %v5363_v35 = vsel %vm220_vm0, %v5361_v38, %v5362_v51 }
 0x66a   :  { %v5304_v22 = vadd.f32 %v5300_v26, %v5296_v18  ;;  %v13324_v26 = vld [vmem:[#allocation71_spill] sm:$0xff] }
 0x66b   :  { %v11620_v17 = vpop.permute.xlu2 %5423  ;;  %v5320_v49 = vpop.permute.xlu0 %5319 }
 0x66c   :  { %v5328_v55 = vadd.f32 %v5320_v49, %v5304_v22  ;;  %v5519_v49 = vmul.f32 %v13024_v62, %v13116_v2 }
 0x66d   :  { %5725 = vrot.lane.b32.xlu1 %v13315_v36, %s6370_s2 }
 0x66e   :  { %v5523_v62 = vadd.f32 %v5519_v49, %v13120_v21 }
 0x670   :  { %v5338_v41 = vpop.permute.xlu1 %5337  ;;  %5757 = vrot.lane.b32.xlu2 %v5747_v61, %s6371_s28  ;;  %v5295_v61 = vadd.f32 %v5286_v9, %v5265_v25  ;;  %v5298_v9 = vmul.f32 %v11046_v53, %v13319_v11 }
 0x671   :  { %5753 = vrot.lane.b32.xlu0 %v5745_v48, %s6371_s28  ;;  %v5349_v36 = vadd.f32 %v5338_v41, %v5325_v12  ;;  %v13322_v41 = vld [vmem:[#allocation14_spill] sm:$0xff] }
 0x672   :  { %v5303_v63 = vadd.f32 %v5299_v37, %v5295_v61 }
 0x673   :  { %v11631_v14 = vpop.permute.xlu2 %5473  ;;  %v5342_v27 = vpop.permute.xlu0 %5341  ;;  %v5371_v48 = vadd.f32 %v5363_v35, %v5349_v36  ;;  %v13326_v35 = vld [vmem:[#allocation161_spill] sm:$0xff] }
 0x674   :  { %v5327_v25 = vadd.f32 %v11578_v39, %v5303_v63 }
 0x675   :  { %5755 = vrot.lane.b32.xlu1 %v5746_v29, %s6371_s28  ;;  %v5294_v29 = vadd.f32 %v5284_v44, %v11571_v47  ;;  %v5356_v47 = vmul.f32 %v11066_v10, %v13321_v20  ;;  %v5401_v23 = vadd.f32 %v11599_v40, %v5371_v48  ;;  %v5364_v40 = vrot.slane %v5355_v30, 1  ;;  %v13327_v20 = vld [vmem:[#allocation48_spill] sm:$0xff] }
 0x676   :  { %v5351_v61 = vadd.f32 %v5342_v27, %v5327_v25 }
 0x677   :  { %v5365_v12 = vrot.slane %v5356_v47, 1 }
 0x678   :  { %v5344_v50 = vpop.permute.xlu1 %5343  ;;  %5779 = vrot.lane.b32.xlu2 %v5770_v28, %s6370_s2  ;;  %v5435_v28 = vmul.f32 %v11044_v8, %v13323_v46 }
 0x679   :  { %5759 = vrot.lane.b32.xlu0 %v5748_v54, %s6371_s28  ;;  %v5352_v54 = vadd.f32 %v5344_v50, %v5328_v55  ;;  %v13325_v50 = vrot.slane %v13324_v26, 1  ;;  %v5366_v55 = vsel %vm220_vm0, %v5364_v40, %v5365_v12  ;;  %v13335_v40 = vld [vmem:[#allocation196_spill] sm:$0xff] }
 0x67a   :  { %v5443_v36 = vrot.slane %v5435_v28, 2  ;;  %v5373_v47 = vadd.f32 %v5366_v55, %v5351_v61  ;;  %v5518_v61 = vmul.f32 %v13177_v0, %v13116_v2 }
 0x67b   :  { %v5502_v7 = vpop.permute.xlu2 %5501  ;;  %v5392_v43 = vpop.permute.xlu0 %5391  ;;  %v5374_v38 = vadd.f32 %v5365_v12, %v5352_v54 }
 0x67c   :  { %v5522_v0 = vadd.f32 %v5518_v61, %v13120_v21 }
 0x67d   :  { %5777 = vrot.lane.b32.xlu1 %v5769_v56, %s6370_s2  ;;  %v5302_v56 = vadd.f32 %v5298_v9, %v5294_v29  ;;  %v5404_v37 = vadd.f32 %v11608_v33, %v5374_v38  ;;  %v5438_v9 = vmul.f32 %v11066_v10, %v13323_v46  ;;  %v13329_v33 = vld [vmem:[#allocation191_spill] sm:$0xff] }
 0x67f   :  { %v5326_v11 = vadd.f32 %v11610_v31, %v5302_v56  ;;  %v5445_v31 = vsel %vm306_vm1, %v5443_v36, %v5444_v57  ;;  %v5447_v54 = vrot.slane %v5438_v9, 2 }
 0x680   :  { %v5394_v1 = vpop.permute.xlu1 %5393  ;;  %5829 = vrot.lane.b32.xlu2 %v13322_v41, %s6371_s28 }
 0x681   :  { %5781 = vrot.lane.b32.xlu0 %v5771_v59, %s6370_s2  ;;  %v5350_v59 = vadd.f32 %v11589_v16, %v5326_v11  ;;  %v5437_v16 = vmul.f32 %v11041_v42, %v13323_v46  ;;  %v5403_v27 = vadd.f32 %v5394_v1, %v5373_v47 }
 0x683   :  { %v5508_v44 = vpop.permute.xlu2 %5507  ;;  %v5420_v6 = vpop.permute.xlu0 %5419  ;;  %v5446_v49 = vrot.slane %v5437_v16, 2  ;;  %v5433_v12 = vadd.f32 %v11620_v17, %v5403_v27  ;;  %v13336_v17 = vld [vmem:[#allocation77_spill] sm:$0xff]  ;;  %v13344_v27 = vld [vmem:[#allocation142_spill] sm:$0xff] }
 0x684   :  { %v5431_v18 = vadd.f32 %v5420_v6, %v5401_v23  ;;  %v5372_v6 = vadd.f32 %v5362_v51, %v5350_v59  ;;  %v13330_v23 = vld [vmem:[#allocation11_spill] sm:$0xff] }
 0x685   :  { %5783 = vrot.lane.b32.xlu1 %v5772_v60, %s6370_s2  ;;  %v13328_v60 = vrot.slane %v13327_v20, 1  ;;  %v13331_v30 = vrot.slane %v13330_v23, 1  ;;  %v5448_v25 = vsel %vm306_vm1, %v5446_v49, %v5447_v54  ;;  %v13347_v23 = vld [vmem:[#allocation192_spill] sm:$0xff] }
 0x686   :  { %v5453_v29 = vadd.f32 %v5445_v31, %v5431_v18  ;;  %v5402_v56 = vadd.f32 %v5392_v43, %v5372_v6  ;;  %v5455_v26 = vadd.f32 %v5448_v25, %v5433_v12 }
 0x688   :  { %v5422_v15 = vpop.permute.xlu1 %5421  ;;  %5835 = vrot.lane.b32.xlu2 %v13325_v50, %s6371_s28 }
 0x689   :  { %5831 = vrot.lane.b32.xlu0 %v13328_v60, %s6371_s28  ;;  %v5432_v51 = vadd.f32 %v5422_v15, %v5402_v56  ;;  %v13333_v15 = vld [vmem:[#allocation154_spill] sm:$0xff]  ;;  %v13345_v56 = vrot.slane %v13344_v27, 1 }
 0x68a   :  { %v13334_v50 = vrot.slane %v13333_v15, 2 }
 0x68b   :  { %v5538_v39 = vpop.permute.xlu2 %5537  ;;  %v5426_v41 = vpop.permute.xlu0 %5425  ;;  %v5454_v36 = vadd.f32 %v5444_v57, %v5432_v51 }
 0x68c   :  { %v11693_v48 = vadd.f32 %v5538_v39, %v5523_v62  ;;  %v5434_v63 = vadd.f32 %v5426_v41, %v5404_v37  ;;  %v5517_v39 = vmul.f32 %v13170_v5, %v13116_v2  ;;  %v13341_v41 = vld [vmem:[#allocation201_spill] sm:$0xff] }
 0x68d   :  { %5833 = vrot.lane.b32.xlu1 %v13326_v35, %s6371_s28  ;;  %v13337_v35 = vrot.slane %v13336_v17, 1  ;;  %v5484_v20 = vadd.f32 %v11631_v14, %v5454_v36  ;;  %v13338_v14 = vld [vmem:[#allocation198_spill] sm:$0xff] }
 0x68e   :  { %v5456_v1 = vadd.f32 %v5447_v54, %v5434_v63  ;;  %v5521_v5 = vadd.f32 %v5517_v39, %v13120_v21  ;;  %v13342_v63 = vld [vmem:[#allocation195_spill] sm:$0xff] }
 0x68f   :  { %v13343_v16 = vrot.slane %v13342_v63, 2  ;;  %v13346_v54 = vld [vmem:[#allocation15_spill] sm:$0xff] }
 0x690   :  { %v5472_v22 = vpop.permute.xlu1 %5471  ;;  %5863 = vrot.lane.b32.xlu2 %v13329_v33, %s6370_s2 }
 0x691   :  { %v5483_v3 = vadd.f32 %v5472_v22, %v5453_v29  ;;  %v13339_v29 = vld [vmem:[#allocation194_spill] sm:$0xff] }
 0x692   :  { %v13340_v22 = vrot.slane %v13339_v29, 2 }
 0x693   :  { %v5513_v28 = vadd.f32 %v5502_v7, %v5483_v3  ;;  %v13332_v7 = vld [vmem:[#allocation193_spill] sm:$0xff]  ;;  %v5560_v46 = vpop.permute.xlu2 %5559  ;;  %v5476_v11 = vpop.permute.xlu0 %5475 }
 0x694   :  { %5859 = vrot.lane.b32.xlu0 %v13332_v7, %s6370_s2 }
 0x695   :  { %6181 = vst.msk [vmem:[%s11922_s3 + $0x10] sm:$0xff] %vm6177_vm2, %v5513_v28  ;;  %5861 = vrot.lane.b32.xlu1 %v13331_v30, %s6370_s2  ;;  %v5520_v28 = vmul.f32 %v13058_v32, %v13116_v2  ;;  %v13348_v30 = vrot.slane %v13347_v23, 2 }
 0x697   :  { %v5524_v51 = vadd.f32 %v5520_v28, %v13120_v21  ;;  %v13356_v28 = vld [vmem:[#allocation138_spill] sm:$0xff] }
 0x698   :  { %v5478_v43 = vpop.permute.xlu1 %5477  ;;  %5913 = vrot.lane.b32.xlu2 %v13334_v50, %s6371_s28 }
 0x699   :  { %v5486_v18 = vadd.f32 %v5478_v43, %v5456_v1  ;;  %v13349_v43 = vld [vmem:[#allocation171_spill] sm:$0xff] }
 0x69b   :  { %v5516_v38 = vadd.f32 %v5508_v44, %v5486_v18  ;;  %v5485_v44 = vadd.f32 %v5476_v11, %v5455_v26  ;;  %v5610_v57 = vpop.permute.xlu2 %5609  ;;  %v5504_v62 = vpop.permute.xlu0 %5503  ;;  %v13350_v11 = vld [vmem:[#allocation179_spill] sm:$0xff] }
 0x69c   :  { %5865 = vrot.lane.b32.xlu0 %v13337_v35, %s6370_s2  ;;  %v5514_v59 = vadd.f32 %v5504_v62, %v5484_v20  ;;  %v5967_v12 = vmul.f32 %v11041_v42, %v13350_v11  ;;  %v5966_v18 = vmul.f32 %v11046_v53, %v13350_v11  ;;  %v5965_v36 = vmul.f32 %v11044_v8, %v13350_v11 }
 0x69d   :  { %6188 = vst.msk [vmem:[%s11922_s3 + $0x48] sm:$0x3] %vm6179_vm3, %v5516_v38  ;;  %5911 = vrot.lane.b32.xlu1 %v13335_v40, %s6371_s28  ;;  %v13351_v40 = vld [vmem:[#allocation159_spill] sm:$0xff] }
 0x69e   :  { %6182 = vst.msk [vmem:[%s11922_s3 + $0x18] sm:$0x3] %vm6179_vm3, %v5514_v59  ;;  %v13352_v17 = vrot.slane %v13351_v40, 1  ;;  %v13355_v59 = vld [vmem:[#allocation182_spill] sm:$0xff] }
 0x69f   :  { %v6036_v61 = vmul.f32 %v11046_v53, %v13355_v59  ;;  %v6035_v39 = vmul.f32 %v11044_v8, %v13355_v59  ;;  %v6038_v27 = vmul.f32 %v11066_v10, %v13355_v59 }
 0x6a0   :  { %v5506_v60 = vpop.permute.xlu1 %5505  ;;  %5941 = vrot.lane.b32.xlu2 %v13338_v14, %s6370_s2 }
 0x6a1   :  { %v5515_v31 = vadd.f32 %v5506_v60, %v5485_v44  ;;  %v13353_v44 = vld [vmem:[#allocation180_spill] sm:$0xff]  ;;  %v13354_v60 = vld [vmem:[#allocation167_spill] sm:$0xff] }
 0x6a2   :  { %v5990_v20 = vmul.f32 %v11046_v53, %v13353_v44 }
 0x6a3   :  { %6187 = vst.msk [vmem:[%s11922_s3 + $0x40] sm:$0xff] %vm6177_vm2, %v5515_v31  ;;  %v5616_v3 = vpop.permute.xlu2 %5615  ;;  %v5534_v9 = vpop.permute.xlu0 %5533  ;;  %v5968_v31 = vmul.f32 %v11066_v10, %v13350_v11 }
 0x6a4   :  { %5915 = vrot.lane.b32.xlu0 %v13341_v41, %s6371_s28  ;;  %v5545_v47 = vadd.f32 %v5534_v9, %v5521_v5  ;;  %v6044_v41 = vrot.slane %v6036_v61, 1 }
 0x6a5   :  { %5917 = vrot.lane.b32.xlu1 %v13340_v22, %s6371_s28 }
 0x6a8   :  { %v5536_v37 = vpop.permute.xlu1 %5535  ;;  %5947 = vrot.lane.b32.xlu2 %v13343_v16, %s6370_s2 }
 0x6a9   :  { %v5546_v55 = vadd.f32 %v5536_v37, %v5522_v0  ;;  %v6043_v37 = vrot.slane %v6035_v39, 1  ;;  %v13363_v39 = vld [vmem:[#allocation45_spill] sm:$0xff] }
 0x6ab   :  { %v5570_v6 = vadd.f32 %v5560_v46, %v5546_v55  ;;  %v5644_v7 = vpop.permute.xlu2 %5643  ;;  %v5540_v1 = vpop.permute.xlu0 %5539  ;;  %v6045_v55 = vsel %vm220_vm0, %v6043_v37, %v6044_v41 }
 0x6ac   :  { %5943 = vrot.lane.b32.xlu0 %v13348_v30, %s6370_s2  ;;  %v5548_v2 = vadd.f32 %v5540_v1, %v5524_v51  ;;  %v6047_v1 = vrot.slane %v6038_v27, 1  ;;  %v6119_v27 = vmul.f32 %v11041_v42, %v13363_v39 }
 0x6ad   :  { %v5592_v33 = vadd.f32 %v13345_v56, %v5570_v6  ;;  %5945 = vrot.lane.b32.xlu1 %v13346_v54, %s6370_s2  ;;  %v6037_v6 = vmul.f32 %v11041_v42, %v13355_v59 }
 0x6af   :  { %v6046_v30 = vrot.slane %v6037_v6, 1 }
 0x6b0   :  { %v5558_v46 = vpop.permute.xlu1 %5557  ;;  %5977 = vrot.lane.b32.xlu2 %v5967_v12, %s6371_s28 }
 0x6b1   :  { %v5569_v32 = vadd.f32 %v5558_v46, %v5545_v47  ;;  %v5991_v47 = vmul.f32 %v11041_v42, %v13353_v44  ;;  %v6048_v11 = vsel %vm220_vm0, %v6046_v30, %v6047_v1 }
 0x6b3   :  { %v5591_v49 = vadd.f32 %v13349_v43, %v5569_v32  ;;  %v5694_v21 = vpop.permute.xlu2 %5693  ;;  %v5562_v26 = vpop.permute.xlu0 %5561  ;;  %v13359_v32 = vld [vmem:[#allocation158_spill] sm:$0xff] }
 0x6b4   :  { %5973 = vrot.lane.b32.xlu0 %v5965_v36, %s6371_s28  ;;  %v5571_v50 = vadd.f32 %v5562_v26, %v11693_v48  ;;  %v13360_v43 = vld [vmem:[#allocation38_spill] sm:$0xff] }
 0x6b5   :  { %v5621_v38 = vadd.f32 %v5610_v57, %v5591_v49  ;;  %5975 = vrot.lane.b32.xlu1 %v5966_v18, %s6371_s28  ;;  %v5989_v57 = vmul.f32 %v11044_v8, %v13353_v44  ;;  %v6067_v49 = vmul.f32 %v11041_v42, %v13360_v43  ;;  %v6066_v12 = vmul.f32 %v11046_v53, %v13360_v43 }
 0x6b6   :  { %v5593_v62 = vadd.f32 %v13354_v60, %v5571_v50  ;;  %v6068_v36 = vmul.f32 %v11066_v10, %v13360_v43  ;;  %v13361_v60 = vld [vmem:[#allocation150_spill] sm:$0xff] }
 0x6b7   :  { %v6076_v50 = vrot.slane %v6067_v49, 1 }
 0x6b8   :  { %v5564_v25 = vpop.permute.xlu1 %5563  ;;  %5999 = vrot.lane.b32.xlu2 %v5990_v20, %s6370_s2 }
 0x6b9   :  { %v5572_v15 = vadd.f32 %v5564_v25, %v5548_v2  ;;  %v6065_v25 = vmul.f32 %v11044_v8, %v13360_v43 }
 0x6bb   :  { %v5594_v35 = vadd.f32 %v13352_v17, %v5572_v15  ;;  %v5722_v14 = vpop.permute.xlu2 %5721  ;;  %v5612_v22 = vpop.permute.xlu0 %5611 }
 0x6bc   :  { %5979 = vrot.lane.b32.xlu0 %v5968_v31, %s6371_s28  ;;  %v5622_v5 = vadd.f32 %v5612_v22, %v5592_v33  ;;  %v5737_v31 = vmul.f32 %v10249_v58, %v13129_v34  ;;  %v6117_v22 = vmul.f32 %v11044_v8, %v13363_v39 }
 0x6bd   :  { %v5624_v48 = vadd.f32 %v5616_v3, %v5594_v35  ;;  %5997 = vrot.lane.b32.xlu1 %v5989_v57, %s6370_s2  ;;  %v5992_v3 = vmul.f32 %v11066_v10, %v13353_v44  ;;  %v6074_v35 = vrot.slane %v6066_v12, 1  ;;  %v6077_v44 = vrot.slane %v6068_v36, 1 }
 0x6bf   :  { %v6078_v59 = vsel %vm220_vm0, %v6076_v50, %v6077_v44 }
 0x6c0   :  { %v5614_v29 = vpop.permute.xlu1 %5613  ;;  %6049 = vrot.lane.b32.xlu2 %v6045_v55, %s6371_s28  ;;  %v6125_v55 = vrot.slane %v6117_v22, 2 }
 0x6c1   :  { %v5623_v0 = vadd.f32 %v5614_v29, %v5593_v62  ;;  %v13362_v62 = vrot.slane %v13361_v60, 2  ;;  %v6118_v29 = vmul.f32 %v11046_v53, %v13363_v39 }
 0x6c3   :  { %v5653_v9 = vadd.f32 %v5644_v7, %v5623_v0  ;;  %v5728_v16 = vpop.permute.xlu2 %5727  ;;  %v5640_v33 = vpop.permute.xlu0 %5639  ;;  %v13357_v7 = vld [vmem:[#allocation145_spill] sm:$0xff]  ;;  %v6126_v37 = vrot.slane %v6118_v29, 2 }
 0x6c4   :  { %6001 = vrot.lane.b32.xlu0 %v5991_v47, %s6370_s2  ;;  %v5651_v23 = vadd.f32 %v5640_v33, %v5621_v38  ;;  %v13358_v51 = vrot.slane %v13357_v7, 2  ;;  %v13364_v47 = vld [vmem:[#allocation50_spill] sm:$0xff]  ;;  %v5739_v33 = vmul.f32 %v10272_v4, %v13129_v34 }
 0x6c5   :  { %v5675_v63 = vadd.f32 %v13356_v28, %v5653_v9  ;;  %6003 = vrot.lane.b32.xlu1 %v5992_v3, %s6370_s2  ;;  %v5740_v3 = vmul.f32 %v10262_v45, %v13129_v34  ;;  %v6148_v6 = vmul.f32 %v11046_v53, %v13364_v47  ;;  %v6127_v28 = vsel %vm306_vm1, %v6125_v55, %v6126_v37 }
 0x6c6   :  { %v5673_v2 = vadd.f32 %v13359_v32, %v5651_v23  ;;  %v6120_v45 = vmul.f32 %v11066_v10, %v13363_v39  ;;  %v6149_v4 = vmul.f32 %v11041_v42, %v13364_v47 }
 0x6c7   :  { %v6156_v30 = vrot.slane %v6148_v6, 2 }
 0x6c8   :  { %v5642_v56 = vpop.permute.xlu1 %5641  ;;  %6055 = vrot.lane.b32.xlu2 %v6047_v1, %s6371_s28  ;;  %v5738_v1 = vmul.f32 %v10275_v13, %v13129_v34  ;;  %v6129_v43 = vrot.slane %v6120_v45, 2  ;;  %v6150_v13 = vmul.f32 %v11066_v10, %v13364_v47  ;;  %v6158_v50 = vrot.slane %v6149_v4, 2  ;;  %v13375_v4 = vld [vmem:[#allocation203_spill] sm:$0xff] }
 0x6c9   :  { %v5652_v54 = vadd.f32 %v5642_v56, %v5622_v5 }
 0x6cb   :  { %v5674_v46 = vadd.f32 %v13358_v51, %v5652_v54  ;;  %v5758_v38 = vpop.permute.xlu2 %5757  ;;  %v5646_v15 = vpop.permute.xlu0 %5645 }
 0x6cc   :  { %6051 = vrot.lane.b32.xlu0 %v6044_v41, %s6371_s28  ;;  %v5654_v17 = vadd.f32 %v5646_v15, %v5624_v48 }
 0x6cd   :  { %v5704_v18 = vadd.f32 %v5694_v21, %v5674_v46  ;;  %6053 = vrot.lane.b32.xlu1 %v6048_v11, %s6371_s28  ;;  %v6073_v21 = vrot.slane %v6065_v25, 1  ;;  %v6128_v46 = vrot.slane %v6119_v27, 2 }
 0x6ce   :  { %v5676_v57 = vadd.f32 %v13362_v62, %v5654_v17  ;;  %v6159_v17 = vrot.slane %v6150_v13, 2 }
 0x6cf   :  { %v6075_v61 = vsel %vm220_vm0, %v6073_v21, %v6074_v35  ;;  %v6130_v12 = vsel %vm306_vm1, %v6128_v46, %v6129_v43 }
 0x6d0   :  { %v5692_v26 = vpop.permute.xlu1 %5691  ;;  %6083 = vrot.lane.b32.xlu2 %v6078_v59, %s6370_s2  ;;  %v13367_v59 = vld [vmem:[#allocation204_spill] sm:$0xff] }
 0x6d1   :  { %v5703_v40 = vadd.f32 %v5692_v26, %v5673_v2 }
 0x6d3   :  { %v5733_v20 = vadd.f32 %v5722_v14, %v5703_v40  ;;  %v5780_v14 = vpop.permute.xlu2 %5779  ;;  %v5696_v58 = vpop.permute.xlu0 %5695 }
 0x6d4   :  { %6079 = vrot.lane.b32.xlu0 %v6075_v61, %s6370_s2  ;;  %v5705_v5 = vadd.f32 %v5696_v58, %v5675_v63  ;;  %v6147_v63 = vmul.f32 %v11044_v8, %v13364_v47  ;;  %v13368_v58 = vld [vmem:[#allocation202_spill] sm:$0xff] }
 0x6d5   :  { %v5741_v48 = vadd.f32 %v5737_v31, %v5733_v20  ;;  %6081 = vrot.lane.b32.xlu1 %v6074_v35, %s6370_s2  ;;  %v6160_v35 = vsel %vm306_vm1, %v6158_v50, %v6159_v17 }
 0x6d6   :  { %v6155_v32 = vrot.slane %v6147_v63, 2  ;;  %v13371_v63 = vld [vmem:[#allocation210_spill] sm:$0xff] }
 0x6d8   :  { %v5698_v41 = vpop.permute.xlu1 %5697  ;;  %6133 = vrot.lane.b32.xlu2 %v6126_v37, %s6371_s28  ;;  %v6157_v11 = vsel %vm306_vm1, %v6155_v32, %v6156_v30  ;;  %v13370_v37 = vld [vmem:[#allocation205_spill] sm:$0xff] }
 0x6d9   :  { %v5706_v0 = vadd.f32 %v5698_v41, %v5676_v57 }
 0x6db   :  { %v5736_v9 = vadd.f32 %v5728_v16, %v5706_v0  ;;  %v5830_v16 = vpop.permute.xlu2 %5829  ;;  %v5724_v23 = vpop.permute.xlu0 %5723  ;;  %v13369_v0 = vrot.slane %v13368_v58, 1 }
 0x6dc   :  { %6085 = vrot.lane.b32.xlu0 %v6077_v44, %s6370_s2  ;;  %v5734_v51 = vadd.f32 %v5724_v23, %v5704_v18 }
 0x6dd   :  { %v5744_v56 = vadd.f32 %v5740_v3, %v5736_v9  ;;  %6131 = vrot.lane.b32.xlu1 %v6127_v28, %s6371_s28 }
 0x6de   :  { %v5742_v49 = vadd.f32 %v5738_v1, %v5734_v51  ;;  %v13374_v1 = vld [vmem:[#allocation209_spill] sm:$0xff] }
 0x6e0   :  { %v5726_v54 = vpop.permute.xlu1 %5725  ;;  %6161 = vrot.lane.b32.xlu2 %v6157_v11, %s6370_s2 }
 0x6e1   :  { %v5735_v7 = vadd.f32 %v5726_v54, %v5705_v5 }
 0x6e3   :  { %v5743_v2 = vadd.f32 %v5739_v33, %v5735_v7  ;;  %v5836_v18 = vpop.permute.xlu2 %5835  ;;  %v5754_v25 = vpop.permute.xlu0 %5753  ;;  %v13372_v7 = vld [vmem:[#allocation93_spill] sm:$0xff] }
 0x6e4   :  { %6135 = vrot.lane.b32.xlu0 %v6130_v12, %s6371_s28  ;;  %v5765_v15 = vadd.f32 %v5754_v25, %v5741_v48  ;;  %v13373_v51 = vrot.slane %v13372_v7, 2 }
 0x6e5   :  { %v5767_v36 = vadd.f32 %v5758_v38, %v5743_v2  ;;  %6137 = vrot.lane.b32.xlu1 %v6129_v43, %s6371_s28  ;;  %v13365_v38 = vld [vmem:[#allocation111_spill] sm:$0xff] }
 0x6e6   :  { %v13366_v44 = vrot.slane %v13365_v38, 1 }
 0x6e8   :  { %v5756_v34 = vpop.permute.xlu1 %5755  ;;  %6167 = vrot.lane.b32.xlu2 %v6159_v17, %s6370_s2 }
 0x6e9   :  { %v5766_v26 = vadd.f32 %v5756_v34, %v5742_v49 }
 0x6eb   :  { %v5790_v40 = vadd.f32 %v5780_v14, %v5766_v26  ;;  %v5864_v21 = vpop.permute.xlu2 %5863  ;;  %v5760_v62 = vpop.permute.xlu0 %5759 }
 0x6ec   :  { %6163 = vrot.lane.b32.xlu0 %v6156_v30, %s6370_s2  ;;  %v5768_v31 = vadd.f32 %v5760_v62, %v5744_v56 }
 0x6ed   :  { %v5812_v20 = vadd.f32 %v13366_v44, %v5790_v40  ;;  %6165 = vrot.lane.b32.xlu1 %v6160_v35, %s6370_s2 }
 0x6f0   :  { %v5778_v60 = vpop.permute.xlu1 %5777 }
 0x6f1   :  { %v5789_v57 = vadd.f32 %v5778_v60, %v5765_v15 }
 0x6f3   :  { %v5811_v61 = vadd.f32 %v13367_v59, %v5789_v57  ;;  %v5914_v29 = vpop.permute.xlu2 %5913  ;;  %v5782_v14 = vpop.permute.xlu0 %5781  ;;  %v5957_v57 = vmul.f32 %v11044_v8, %v13155_v19  ;;  %v6014_v59 = vmul.f32 %v11046_v53, %v13160_v52 }
 0x6f4   :  { %v5791_v41 = vadd.f32 %v5782_v14, %v5767_v36  ;;  %v13376_v36 = vrot.slane %v13375_v4, 2 }
 0x6f5   :  { %v5841_v39 = vadd.f32 %v5830_v16, %v5811_v61  ;;  %v6022_v14 = vrot.slane %v6014_v59, 1 }
 0x6f6   :  { %v5813_v9 = vadd.f32 %v13370_v37, %v5791_v41 }
 0x6f8   :  { %v5784_v48 = vpop.permute.xlu1 %5783 }
 0x6f9   :  { %v5792_v22 = vadd.f32 %v5784_v48, %v5768_v31 }
 0x6fb   :  { %v5814_v5 = vadd.f32 %v13369_v0, %v5792_v22  ;;  %v5942_v3 = vpop.permute.xlu2 %5941  ;;  %v5832_v6 = vpop.permute.xlu0 %5831 }
 0x6fc   :  { %v5842_v27 = vadd.f32 %v5832_v6, %v5812_v20 }
 0x6fd   :  { %v5844_v55 = vadd.f32 %v5836_v18, %v5814_v5 }
 0x700   :  { %v5834_v47 = vpop.permute.xlu1 %5833 }
 0x701   :  { %v5843_v28 = vadd.f32 %v5834_v47, %v5813_v9  ;;  %v5960_v9 = vmul.f32 %v11066_v10, %v13155_v19 }
 0x703   :  { %v5873_v56 = vadd.f32 %v5864_v21, %v5843_v28  ;;  %v5948_v54 = vpop.permute.xlu2 %5947 }
 0x705   :  { %v5895_v45 = vadd.f32 %v13371_v63, %v5873_v56  ;;  %v6096_v56 = vmul.f32 %v11046_v53, %v13167_v24  ;;  %v5959_v63 = vmul.f32 %v11041_v42, %v13155_v19 }
 0x706   :  { %v5860_v33 = vpop.permute.xlu0 %5859 }
 0x707   :  { %v5871_v30 = vadd.f32 %v5860_v33, %v5841_v39  ;;  %v6016_v33 = vmul.f32 %v11066_v10, %v13160_v52 }
 0x708   :  { %v5862_v16 = vpop.permute.xlu1 %5861 }
 0x709   :  { %v5872_v23 = vadd.f32 %v5862_v16, %v5842_v27  ;;  %v5893_v32 = vadd.f32 %v13374_v1, %v5871_v30  ;;  %v5958_v16 = vmul.f32 %v11046_v53, %v13155_v19  ;;  %v6095_v30 = vmul.f32 %v11044_v8, %v13167_v24 }
 0x70b   :  { %v5894_v46 = vadd.f32 %v13373_v51, %v5872_v23  ;;  %v5978_v12 = vpop.permute.xlu2 %5977  ;;  %v6103_v53 = vrot.slane %v6095_v30, 2 }
 0x70d   :  { %v5924_v2 = vadd.f32 %v5914_v29, %v5894_v46  ;;  %v6013_v29 = vmul.f32 %v11044_v8, %v13160_v52 }
 0x70e   :  { %v5866_v49 = vpop.permute.xlu0 %5865 }
 0x70f   :  { %v5874_v11 = vadd.f32 %v5866_v49, %v5844_v55  ;;  %v6021_v5 = vrot.slane %v6013_v29, 1  ;;  %v6025_v49 = vrot.slane %v6016_v33, 1 }
 0x710   :  { %v5912_v43 = vpop.permute.xlu1 %5911 }
 0x711   :  { %v5896_v18 = vadd.f32 %v13376_v36, %v5874_v11  ;;  %v5923_v20 = vadd.f32 %v5912_v43, %v5893_v32  ;;  %v6023_v55 = vsel %vm220_vm0, %v6021_v5, %v6022_v14  ;;  %v6015_v32 = vmul.f32 %v11041_v42, %v13160_v52 }
 0x712   :  { %v6098_v52 = vmul.f32 %v11066_v10, %v13167_v24 }
 0x713   :  { %v6000_v25 = vpop.permute.xlu2 %5999  ;;  %v5953_v62 = vadd.f32 %v5942_v3, %v5923_v20  ;;  %v6024_v36 = vrot.slane %v6015_v32, 1 }
 0x715   :  { %v5961_v39 = vadd.f32 %v5957_v57, %v5953_v62  ;;  %v6097_v62 = vmul.f32 %v11041_v42, %v13167_v24 }
 0x716   :  { %v5916_v34 = vpop.permute.xlu0 %5915 }
 0x717   :  { %v5925_v37 = vadd.f32 %v5916_v34, %v5895_v45 }
 0x718   :  { %v5918_v13 = vpop.permute.xlu1 %5917 }
 0x719   :  { %v5926_v61 = vadd.f32 %v5918_v13, %v5896_v18 }
 0x71b   :  { %v6050_v50 = vpop.permute.xlu2 %6049  ;;  %v5956_v58 = vadd.f32 %v5948_v54, %v5926_v61  ;;  %v6106_v61 = vrot.slane %v6097_v62, 2 }
 0x71d   :  { %v5964_v28 = vadd.f32 %v5960_v9, %v5956_v58 }
 0x71e   :  { %v5944_v15 = vpop.permute.xlu0 %5943 }
 0x71f   :  { %v5954_v47 = vadd.f32 %v5944_v15, %v5924_v2  ;;  %v6104_v2 = vrot.slane %v6096_v56, 2 }
 0x720   :  { %v5946_v26 = vpop.permute.xlu1 %5945 }
 0x721   :  { %v5955_v3 = vadd.f32 %v5946_v26, %v5925_v37  ;;  %v5962_v51 = vadd.f32 %v5958_v16, %v5954_v47  ;;  %v6105_v18 = vsel %vm306_vm1, %v6103_v53, %v6104_v2 }
 0x723   :  { %v6056_v44 = vpop.permute.xlu2 %6055  ;;  %v5963_v7 = vadd.f32 %v5959_v63, %v5955_v3 }
 0x725   :  { %v5987_v4 = vadd.f32 %v5978_v12, %v5963_v7 }
 0x726   :  { %v5974_v17 = vpop.permute.xlu0 %5973 }
 0x727   :  { %v5985_v48 = vadd.f32 %v5974_v17, %v5961_v39 }
 0x728   :  { %v5976_v40 = vpop.permute.xlu1 %5975 }
 0x729   :  { %v5986_v43 = vadd.f32 %v5976_v40, %v5962_v51  ;;  %v6026_v40 = vsel %vm220_vm0, %v6024_v36, %v6025_v49 }
 0x72b   :  { %v11874_v31 = vpop.permute.xlu2 %6083  ;;  %v6010_v13 = vadd.f32 %v6000_v25, %v5986_v43 }
 0x72d   :  { %v6032_v20 = vadd.f32 %v6022_v14, %v6010_v13 }
 0x72e   :  { %v5980_v38 = vpop.permute.xlu0 %5979 }
 0x72f   :  { %v5988_v45 = vadd.f32 %v5980_v38, %v5964_v28 }
 0x730   :  { %v5998_v35 = vpop.permute.xlu1 %5997 }
 0x731   :  { %v6009_v0 = vadd.f32 %v5998_v35, %v5985_v48 }
 0x733   :  { %v6031_v6 = vadd.f32 %v6023_v55, %v6009_v0  ;;  %v6134_v27 = vpop.permute.xlu2 %6133 }
 0x735   :  { %v6061_v1 = vadd.f32 %v6050_v50, %v6031_v6 }
 0x736   :  { %v6002_v60 = vpop.permute.xlu0 %6001 }
 0x737   :  { %v6011_v34 = vadd.f32 %v6002_v60, %v5987_v4 }
 0x738   :  { %v6004_v21 = vpop.permute.xlu1 %6003 }
 0x739   :  { %v6012_v46 = vadd.f32 %v6004_v21, %v5988_v45  ;;  %v6033_v38 = vadd.f32 %v6026_v40, %v6011_v34 }
 0x73b   :  { %v6034_v11 = vadd.f32 %v6025_v49, %v6012_v46  ;;  %v6162_v8 = vpop.permute.xlu2 %6161 }
 0x73d   :  { %v6064_v35 = vadd.f32 %v6056_v44, %v6034_v11  ;;  %v6107_v44 = vrot.slane %v6098_v52, 2 }
 0x73e   :  { %v6052_v41 = vpop.permute.xlu0 %6051 }
 0x73f   :  { %v6062_v60 = vadd.f32 %v6052_v41, %v6032_v20  ;;  %v6108_v24 = vsel %vm306_vm1, %v6106_v61, %v6107_v44 }
 0x740   :  { %v6054_v22 = vpop.permute.xlu1 %6053 }
 0x741   :  { %v6063_v25 = vadd.f32 %v6054_v22, %v6033_v38 }
 0x743   :  { %v6093_v29 = vadd.f32 %v11874_v31, %v6063_v25  ;;  %v6168_v14 = vpop.permute.xlu2 %6167 }
 0x745   :  { %v6115_v42 = vadd.f32 %v6108_v24, %v6093_v29 }
 0x746   :  { %v6080_v23 = vpop.permute.xlu0 %6079 }
 0x747   :  { %v6091_v19 = vadd.f32 %v6080_v23, %v6061_v1 }
 0x748   :  { %v6082_v54 = vpop.permute.xlu1 %6081 }
 0x749   :  { %v6113_v26 = vadd.f32 %v6105_v18, %v6091_v19  ;;  %v6092_v57 = vadd.f32 %v6082_v54, %v6062_v60 }
 0x74b   :  { %v6114_v58 = vadd.f32 %v6104_v2, %v6092_v57 }
 0x74d   :  { %v6144_v41 = vadd.f32 %v6134_v27, %v6114_v58 }
 0x74e   :  { %v6086_v17 = vpop.permute.xlu0 %6085 }
 0x74f   :  { %v6094_v12 = vadd.f32 %v6086_v17, %v6064_v35 }
 0x750   :  { %v6132_v15 = vpop.permute.xlu1 %6131 }
 0x751   :  { %v6143_v50 = vadd.f32 %v6132_v15, %v6113_v26  ;;  %v6116_v59 = vadd.f32 %v6107_v44, %v6094_v12 }
 0x753   :  { %v6173_v21 = vadd.f32 %v6162_v8, %v6143_v50 }
 0x755   :  { %6183 = vst.msk [vmem:[%s11922_s3 + $0x20] sm:$0xff] %vm6177_vm2, %v6173_v21 }
 0x756   :  { %v6136_v39 = vpop.permute.xlu0 %6135 }
 0x757   :  { %v6145_v22 = vadd.f32 %v6136_v39, %v6115_v42 }
 0x758   :  { %v6138_v10 = vpop.permute.xlu1 %6137 }
 0x759   :  { %v6146_v48 = vadd.f32 %v6138_v10, %v6116_v59 }
 0x75b   :  { %v6176_v0 = vadd.f32 %v6168_v14, %v6146_v48 }
 0x75d   :  { %6190 = vst.msk [vmem:[%s11922_s3 + $0x58] sm:$0x3] %vm6179_vm3, %v6176_v0 }
 0x75e   :  { %v6164_v37 = vpop.permute.xlu0 %6163 }
 0x75f   :  { %v6174_v55 = vadd.f32 %v6164_v37, %v6144_v41 }
 0x760   :  { %v6166_v5 = vpop.permute.xlu1 %6165 }
 0x761   :  { %v6175_v9 = vadd.f32 %v6166_v5, %v6145_v22  ;;  %6184 = vst.msk [vmem:[%s11922_s3 + $0x28] sm:$0x3] %vm6179_vm3, %v6174_v55 }
 0x763   :  { %6189 = vst.msk [vmem:[%s11922_s3 + $0x50] sm:$0xff] %vm6177_vm2, %v6175_v9 }
 0x764   :  { %6195 = vsyncpa [#allocation3], 1 }
 0x765   :  { %6196 = vsyncpa [#allocation4], 1 }
 0x766   :  { %6197 = vsyncpa [#allocation6], 1 }

</bundles_post_ra>
